<compile_context>
chip_gen: v5e
topology: v5e:2x2
jax: 0.10.0
libtpu: 0.0.40
codegen_flags: <defaults>
</compile_context>

<pallas_src>
import functools

import jax
import jax.numpy as jnp
from jax import lax
from jax.experimental import pallas as pl
from jax.experimental.pallas import tpu as pltpu


_PROJ_NAMES = ("hw_theta", "hw_phi", "hw_g",
               "c_theta", "c_phi", "c_g",
               "t_theta", "t_phi", "t_g")


def _pick_tile_m(m, target=256):
    """Largest multiple-of-8 divisor of m that is <= target (else m itself)."""
    if m <= target:
        return m
    t = target - (target % 8)
    while t >= 8:
        if m % t == 0:
            return t
        t -= 8
    return m


# ----------------------------------------------------------------------------
# Kernel 1: packed theta/phi/g projections (nine 1x1x1 Conv3d, shared input)
# ----------------------------------------------------------------------------
def _qkv_proj_kernel(x_ref, w_ref, b_ref, *o_refs):
    # activations arrive f32 (no host pad/cast pass); cast once in VMEM
    x = x_ref[...].astype(jnp.bfloat16)
    for i, o_ref in enumerate(o_refs):
        acc = jnp.dot(x, w_ref[i], preferred_element_type=jnp.float32)
        o_ref[...] = (acc + b_ref[i]).astype(o_ref.dtype)


def qkv_projection(x2d, w_stack, b_stack, *, tile_m=256):
    """x2d:(M,C) f32, w_stack:(9,C,ch) bf16, b_stack:(9,1,ch) f32 -> 9x (M,ch) bf16."""
    M, K = x2d.shape
    n_heads, _, ch = w_stack.shape
    tm = _pick_tile_m(M, tile_m)
    head_sds = jax.ShapeDtypeStruct((M, ch), jnp.bfloat16)
    return pl.pallas_call(
        _qkv_proj_kernel,
        out_shape=(head_sds,) * n_heads,
        grid=(M // tm,),
        in_specs=[
            pl.BlockSpec((tm, K), lambda i: (i, 0)),               # activations
            pl.BlockSpec((n_heads, K, ch), lambda i: (0, 0, 0)),   # weights resident
            pl.BlockSpec((n_heads, 1, ch), lambda i: (0, 0, 0)),   # biases resident
        ],
        out_specs=tuple(pl.BlockSpec((tm, ch), lambda i: (i, 0))
                        for _ in range(n_heads)),
        compiler_params=pltpu.CompilerParams(
            dimension_semantics=("parallel",)),
    )(x2d, w_stack, b_stack)


# ----------------------------------------------------------------------------
# Kernel 2: HW non-local attention, query-tiled, exact softmax over all keys
# ----------------------------------------------------------------------------
def _hw_attn_kernel(q_ref, k_ref, v_ref, o_ref):
    q = q_ref[0]                                        # (tq, D) bf16
    k = k_ref[0]                                        # (L,  D) bf16
    v = v_ref[0]
    s = lax.dot_general(q, k, (((1,), (1,)), ((), ())),
                        preferred_element_type=jnp.float32)   # (tq, L)
    s = s - jnp.max(s, axis=-1, keepdims=True)
    p = jnp.exp(s)
    p = p / jnp.sum(p, axis=-1, keepdims=True)
    y = jnp.dot(p.astype(v.dtype), v, preferred_element_type=jnp.float32)
    o_ref[0] = y.astype(o_ref.dtype)


def hw_attention(q, k, v):
    """q/k/v: (B, L, D) bf16 -> (B, L, D) bf16, softmax(QK^T)V over axis 1."""
    B, L, D = q.shape
    # Query tiling keeps the live score block at (tq, L) instead of (L, L);
    # K/V stay VMEM-resident per batch element.
    # TODO(synk): for very large H*W also tile the key axis with an online
    # (flash-style) softmax so K/V themselves need not fit in VMEM.
    tq = 128 if (L % 128 == 0 and L > 128) else L
    nq = L // tq
    return pl.pallas_call(
        _hw_attn_kernel,
        out_shape=jax.ShapeDtypeStruct((B, L, D), jnp.bfloat16),
        grid=(B, nq),
        in_specs=[pl.BlockSpec((1, tq, D), lambda b, qi: (b, qi, 0)),
                  pl.BlockSpec((1, L, D), lambda b, qi: (b, 0, 0)),
                  pl.BlockSpec((1, L, D), lambda b, qi: (b, 0, 0))],
        out_specs=pl.BlockSpec((1, tq, D), lambda b, qi: (b, qi, 0)),
        compiler_params=pltpu.CompilerParams(
            dimension_semantics=("parallel", "parallel")),
    )(q, k, v)


# ----------------------------------------------------------------------------
# Kernel 3: fused C-block (transposed form) + T-block attention, one call
# ----------------------------------------------------------------------------
def _ct_attn_kernel(cq_ref, ck_ref, cv_ref, tq_ref, tk_ref, tv_ref,
                    yc_ref, yt_ref):
    # --- C block: attention over the ch channels, operands channels-last.
    #     S = Q^T K (contract positions), Y^T = V P^T -> output needs no transpose.
    cq = cq_ref[0]                                      # (THW, ch) bf16
    ck = ck_ref[0]
    cv = cv_ref[0]
    s = lax.dot_general(cq, ck, (((0,), (0,)), ((), ())),
                        preferred_element_type=jnp.float32)   # (ch, ch)
    s = s - jnp.max(s, axis=-1, keepdims=True)
    p = jnp.exp(s)
    p = p / jnp.sum(p, axis=-1, keepdims=True)
    yc = lax.dot_general(cv, p.astype(cv.dtype), (((1,), (1,)), ((), ())),
                         preferred_element_type=jnp.float32)  # (THW, ch)
    yc_ref[0] = yc.astype(yc_ref.dtype)

    # --- T block: attention over the T frames.
    tq = tq_ref[0]                                      # (T, HW*ch) bf16
    tk = tk_ref[0]
    tv = tv_ref[0]
    st = lax.dot_general(tq, tk, (((1,), (1,)), ((), ())),
                         preferred_element_type=jnp.float32)  # (T, T)
    st = st - jnp.max(st, axis=-1, keepdims=True)
    pt = jnp.exp(st)
    pt = pt / jnp.sum(pt, axis=-1, keepdims=True)
    yt = jnp.dot(pt.astype(tv.dtype), tv, preferred_element_type=jnp.float32)
    yt_ref[0] = yt.astype(yt_ref.dtype)


def ct_attention(c_q, c_k, c_v, t_q, t_k, t_v):
    B, THW, ch = c_q.shape
    _, T, F = t_q.shape
    c_in = pl.BlockSpec((1, THW, ch), lambda b: (b, 0, 0))
    t_in = pl.BlockSpec((1, T, F), lambda b: (b, 0, 0))
    return pl.pallas_call(
        _ct_attn_kernel,
        out_shape=(jax.ShapeDtypeStruct((B, THW, ch), jnp.bfloat16),
                   jax.ShapeDtypeStruct((B, T, F), jnp.bfloat16)),
        grid=(B,),
        in_specs=[c_in, c_in, c_in, t_in, t_in, t_in],
        out_specs=(pl.BlockSpec((1, THW, ch), lambda b: (b, 0, 0)),
                   pl.BlockSpec((1, T, F), lambda b: (b, 0, 0))),
        compiler_params=pltpu.CompilerParams(
            dimension_semantics=("parallel",)),
    )(c_q, c_k, c_v, t_q, t_k, t_v)


# ----------------------------------------------------------------------------
# Kernel 4: fused hw_z + c_z + t_z 1x1x1 convs + bias + residual
# ----------------------------------------------------------------------------
def _z_residual_kernel(yhw_ref, yc_ref, yt_ref, x_ref,
                       whw_ref, wc_ref, wt_ref, b_ref, o_ref):
    acc = jnp.dot(yhw_ref[...], whw_ref[...], preferred_element_type=jnp.float32)
    acc = acc + jnp.dot(yc_ref[...], wc_ref[...], preferred_element_type=jnp.float32)
    acc = acc + jnp.dot(yt_ref[...], wt_ref[...], preferred_element_type=jnp.float32)
    o_ref[...] = (acc + b_ref[...] + x_ref[...]).astype(o_ref.dtype)


def z_projection(y_hw, y_c, y_t, x2d, w_hw, w_c, w_t, b_sum, *, tile_m=256):
    """z = y_hw@w_hw + y_c@w_c + y_t@w_t + b + x ; all unpadded, f32 output."""
    M, ch = y_hw.shape
    _, C = x2d.shape
    tm = _pick_tile_m(M, tile_m)
    y_spec = pl.BlockSpec((tm, ch), lambda i: (i, 0))
    w_spec = pl.BlockSpec((ch, C), lambda i: (0, 0))
    return pl.pallas_call(
        _z_residual_kernel,
        out_shape=jax.ShapeDtypeStruct((M, C), jnp.float32),
        grid=(M // tm,),
        in_specs=[y_spec, y_spec, y_spec,
                  pl.BlockSpec((tm, C), lambda i: (i, 0)),     # residual (f32)
                  w_spec, w_spec, w_spec,
                  pl.BlockSpec((1, C), lambda i: (0, 0))],
        out_specs=pl.BlockSpec((tm, C), lambda i: (i, 0)),
        compiler_params=pltpu.CompilerParams(
            dimension_semantics=("parallel",)),
    )(y_hw, y_c, y_t, x2d, w_hw, w_c, w_t, b_sum)


# ----------------------------------------------------------------------------
# Separate_Non_Local forward
# ----------------------------------------------------------------------------
def separate_non_local_forward(x, params, *, nf, scale):
    """x: (B, T, C, H, W) f32 -> (B, T, C, H, W) f32; matches the PyTorch module."""
    B, T, C, H, W = x.shape
    ch = nf // scale
    HW, THW = H * W, T * H * W
    M = B * THW
    assert C == nf

    # channels-last working layout, rows ordered (b, t, h, w)
    x2d = jnp.transpose(x, (0, 1, 3, 4, 2)).reshape(M, C)

    # ---- all nine theta/phi/g projections in one Pallas call ----------------
    w_stack = jnp.stack([params[n]["w"] for n in _PROJ_NAMES]).astype(jnp.bfloat16)
    b_stack = jnp.stack([params[n]["b"].reshape(1, -1) for n in _PROJ_NAMES]
                        ).astype(jnp.float32)
    heads = qkv_projection(x2d, w_stack, b_stack)        # 9 x (M, ch) bf16
    hw_q, hw_k, hw_g, c_q, c_k, c_g, t_q, t_k, t_g = heads

    # ---- HW non-local: attention over the H*W positions ---------------------
    def to_hw(a):                       # (M,ch) -> (B, HW, T*ch)  (layout only)
        return jnp.transpose(a.reshape(B, T, HW, ch), (0, 2, 1, 3)
                             ).reshape(B, HW, T * ch)

    y_hw = hw_attention(to_hw(hw_q), to_hw(hw_k), to_hw(hw_g))

    # ---- C (channels) + T (frames) non-local blocks: one fused call ---------
    # their q/k/v are contiguous reshapes of the projection outputs (no copies)
    y_c, y_t = ct_attention(c_q.reshape(B, THW, ch),
                            c_k.reshape(B, THW, ch),
                            c_g.reshape(B, THW, ch),
                            t_q.reshape(B, T, HW * ch),
                            t_k.reshape(B, T, HW * ch),
                            t_g.reshape(B, T, HW * ch))

    # back to (M, ch) rows (b, t, h, w); only the HW path needs a transpose
    y_hw2d = jnp.transpose(y_hw.reshape(B, HW, T, ch), (0, 2, 1, 3)).reshape(M, ch)
    y_c2d = y_c.reshape(M, ch)
    y_t2d = y_t.reshape(M, ch)

    # ---- fused hw_z + c_z + t_z + residual add -------------------------------
    b_sum = (params["hw_z"]["b"] + params["c_z"]["b"] + params["t_z"]["b"]
             ).astype(jnp.float32).reshape(1, -1)
    z2d = z_projection(y_hw2d, y_c2d, y_t2d, x2d,
                       params["hw_z"]["w"].astype(jnp.bfloat16),
                       params["c_z"]["w"].astype(jnp.bfloat16),
                       params["t_z"]["w"].astype(jnp.bfloat16),
                       b_sum)
    return jnp.transpose(z2d.reshape(B, T, H, W, C), (0, 1, 4, 2, 3))


# ----------------------------------------------------------------------------
# Pure-JAX reference (mirrors the PyTorch forward exactly, all f32)
# ----------------------------------------------------------------------------
def reference_forward(x, params, *, nf, scale):
    B, T, C, H, W = x.shape
    ch = nf // scale
    xc = jnp.transpose(x, (0, 2, 1, 3, 4))           # (B, C, T, H, W)

    def conv(a, p):                                  # 1x1x1 Conv3d
        return (jnp.einsum("bcthw,cd->bdthw", a, p["w"])
                + p["b"][None, :, None, None, None])

    def softmax(a):
        a = a - jnp.max(a, axis=-1, keepdims=True)
        e = jnp.exp(a)
        return e / jnp.sum(e, axis=-1, keepdims=True)

    # HW block
    th = conv(xc, params["hw_theta"]).reshape(B, -1, H * W).transpose(0, 2, 1)
    ph = conv(xc, params["hw_phi"]).reshape(B, -1, H * W)
    g = conv(xc, params["hw_g"]).reshape(B, -1, H * W).transpose(0, 2, 1)
    y = softmax(th @ ph) @ g
    hw_z = conv(y.transpose(0, 2, 1).reshape(B, ch, T, H, W), params["hw_z"])

    # C block
    th = conv(xc, params["c_theta"]).reshape(B, ch, T * H * W)
    ph = conv(xc, params["c_phi"]).reshape(B, ch, T * H * W).transpose(0, 2, 1)
    g = conv(xc, params["c_g"]).reshape(B, ch, T * H * W)
    y = softmax(th @ ph) @ g
    c_z = conv(y.reshape(B, ch, T, H, W), params["c_z"])

    # T block
    th = conv(xc, params["t_theta"]).transpose(0, 2, 1, 3, 4).reshape(B, T, -1)
    ph = conv(xc, params["t_phi"]).transpose(0, 2, 1, 3, 4).reshape(B, T, -1)
    g = conv(xc, params["t_g"]).transpose(0, 2, 1, 3, 4).reshape(B, T, -1)
    y = softmax(th @ ph.transpose(0, 2, 1)) @ g
    t_z = conv(y.reshape(B, T, ch, H, W).transpose(0, 2, 1, 3, 4),
               params["t_z"])

    z = hw_z + c_z + t_z + xc
    return jnp.transpose(z, (0, 2, 1, 3, 4))


# ----------------------------------------------------------------------------
# Deterministic synthetic parameters
# ----------------------------------------------------------------------------
def make_params(key, *, nf, scale):
    ch = nf // scale
    keys = iter(jax.random.split(key, 24))

    def conv(cin, cout):
        return {"w": jax.random.normal(next(keys), (cin, cout), jnp.float32) * 0.05,
                "b": jax.random.normal(next(keys), (cout,), jnp.float32) * 0.05}

    p = {n: conv(nf, ch) for n in _PROJ_NAMES}
    for n in ("hw_z", "c_z", "t_z"):
        p[n] = conv(ch, nf)
    return p


if __name__ == "__main__":
    nf, scale = 32, 2
    B, T, H, W = 2, 4, 16, 16

    key = jax.random.PRNGKey(0)
    kx, kp = jax.random.split(key)
    x = jax.random.normal(kx, (B, T, nf, H, W), jnp.float32)
    params = make_params(kp, nf=nf, scale=scale)

    fwd = jax.jit(functools.partial(separate_non_local_forward,
                                    nf=nf, scale=scale))
    out = jax.block_until_ready(fwd(x, params))
    assert out.shape == (B, T, nf, H, W), out.shape
    assert bool(jnp.all(jnp.isfinite(out)))

    # tolerance reflects bf16 MXU operands / bf16 attention outputs vs f32 ref
    ref = reference_forward(x, params, nf=nf, scale=scale)
    err_max = float(jnp.max(jnp.abs(out - ref)))
    err_mean = float(jnp.mean(jnp.abs(out - ref)))
    assert err_max < 1e-1, f"max abs err vs reference: {err_max}"
    assert err_mean < 1e-2, f"mean abs err vs reference: {err_mean}"
    print("KERNEL_OK")
</pallas_src>

<mosaic_0001>
module attributes {stable_mosaic.version = 11 : i64} {
  func.func @_qkv_proj_kernel(%arg0: i32, %arg1: memref<256x32xf32, #tpu.memory_space<vmem>>, %arg2: memref<9x32x16xbf16, #tpu.memory_space<vmem>>, %arg3: memref<9x1x16xf32, #tpu.memory_space<vmem>>, %arg4: memref<256x16xbf16, #tpu.memory_space<vmem>>, %arg5: memref<256x16xbf16, #tpu.memory_space<vmem>>, %arg6: memref<256x16xbf16, #tpu.memory_space<vmem>>, %arg7: memref<256x16xbf16, #tpu.memory_space<vmem>>, %arg8: memref<256x16xbf16, #tpu.memory_space<vmem>>, %arg9: memref<256x16xbf16, #tpu.memory_space<vmem>>, %arg10: memref<256x16xbf16, #tpu.memory_space<vmem>>, %arg11: memref<256x16xbf16, #tpu.memory_space<vmem>>, %arg12: memref<256x16xbf16, #tpu.memory_space<vmem>>) attributes {dimension_semantics = [#tpu.dimension_semantics<parallel>], iteration_bounds = array<i64: 8>, scalar_prefetch = 0 : i64, scratch_operands = 0 : i64, tpu.core_type = #tpu.core_type<tc>, window_params = [{transform_indices = @transform_0, window_bounds = array<i64: 256, 32>}, {pipeline_mode = #tpu.pipeline_mode<synchronous>, transform_indices = @transform_1, window_bounds = array<i64: 9, 32, 16>}, {pipeline_mode = #tpu.pipeline_mode<synchronous>, transform_indices = @transform_2, window_bounds = array<i64: 9, 1, 16>}, {transform_indices = @transform_3, window_bounds = array<i64: 256, 16>}, {transform_indices = @transform_4, window_bounds = array<i64: 256, 16>}, {transform_indices = @transform_5, window_bounds = array<i64: 256, 16>}, {transform_indices = @transform_6, window_bounds = array<i64: 256, 16>}, {transform_indices = @transform_7, window_bounds = array<i64: 256, 16>}, {transform_indices = @transform_8, window_bounds = array<i64: 256, 16>}, {transform_indices = @transform_9, window_bounds = array<i64: 256, 16>}, {transform_indices = @transform_10, window_bounds = array<i64: 256, 16>}, {transform_indices = @transform_11, window_bounds = array<i64: 256, 16>}]} {
    %c0 = arith.constant 0 : index
    %c0_0 = arith.constant 0 : index
    %0 = vector.load %arg1[%c0, %c0_0] : memref<256x32xf32, #tpu.memory_space<vmem>>, vector<256x32xf32>
    %1 = arith.truncf %0 : vector<256x32xf32> to vector<256x32xbf16>
    %c0_1 = arith.constant 0 : index
    %c0_2 = arith.constant 0 : index
    %c0_3 = arith.constant 0 : index
    %2 = vector.load %arg2[%c0_1, %c0_2, %c0_3] : memref<9x32x16xbf16, #tpu.memory_space<vmem>>, vector<1x32x16xbf16>
    %3 = vector.shape_cast %2 : vector<1x32x16xbf16> to vector<32x16xbf16>
    %cst = arith.constant dense<0.000000e+00> : vector<256x16xf32>
    %4 = tpu.matmul %1, %3, %cst {dimension_numbers = #tpu.dot_dimension_numbers<[1], [0], [0], [1], [0, 0, 1, 1], [], []>} : vector<256x32xbf16>, vector<32x16xbf16>, vector<256x16xf32> -> vector<256x16xf32>
    %c0_4 = arith.constant 0 : index
    %c0_5 = arith.constant 0 : index
    %c0_6 = arith.constant 0 : index
    %5 = vector.load %arg3[%c0_4, %c0_5, %c0_6] : memref<9x1x16xf32, #tpu.memory_space<vmem>>, vector<1x1x16xf32>
    %6 = vector.shape_cast %5 : vector<1x1x16xf32> to vector<1x16xf32>
    %7 = vector.broadcast %6 : vector<1x16xf32> to vector<256x16xf32>
    %8 = arith.addf %4, %7 : vector<256x16xf32>
    %9 = arith.truncf %8 : vector<256x16xf32> to vector<256x16xbf16>
    %c0_7 = arith.constant 0 : index
    %c0_8 = arith.constant 0 : index
    %10 = vector.load %arg4[%c0_7, %c0_8] : memref<256x16xbf16, #tpu.memory_space<vmem>>, vector<256x16xbf16>
    tpu.vector_store %arg4[%c0_7, %c0_8], %9 {strides = array<i32>} : memref<256x16xbf16, #tpu.memory_space<vmem>>, vector<256x16xbf16>,
    %c1 = arith.constant 1 : index
    %c0_9 = arith.constant 0 : index
    %c0_10 = arith.constant 0 : index
    %11 = vector.load %arg2[%c1, %c0_9, %c0_10] : memref<9x32x16xbf16, #tpu.memory_space<vmem>>, vector<1x32x16xbf16>
    %12 = vector.shape_cast %11 : vector<1x32x16xbf16> to vector<32x16xbf16>
    %cst_11 = arith.constant dense<0.000000e+00> : vector<256x16xf32>
    %13 = tpu.matmul %1, %12, %cst_11 {dimension_numbers = #tpu.dot_dimension_numbers<[1], [0], [0], [1], [0, 0, 1, 1], [], []>} : vector<256x32xbf16>, vector<32x16xbf16>, vector<256x16xf32> -> vector<256x16xf32>
    %c1_12 = arith.constant 1 : index
    %c0_13 = arith.constant 0 : index
    %c0_14 = arith.constant 0 : index
    %14 = vector.load %arg3[%c1_12, %c0_13, %c0_14] : memref<9x1x16xf32, #tpu.memory_space<vmem>>, vector<1x1x16xf32>
    %15 = vector.shape_cast %14 : vector<1x1x16xf32> to vector<1x16xf32>
    %16 = vector.broadcast %15 : vector<1x16xf32> to vector<256x16xf32>
    %17 = arith.addf %13, %16 : vector<256x16xf32>
    %18 = arith.truncf %17 : vector<256x16xf32> to vector<256x16xbf16>
    %c0_15 = arith.constant 0 : index
    %c0_16 = arith.constant 0 : index
    %19 = vector.load %arg5[%c0_15, %c0_16] : memref<256x16xbf16, #tpu.memory_space<vmem>>, vector<256x16xbf16>
    tpu.vector_store %arg5[%c0_15, %c0_16], %18 {strides = array<i32>} : memref<256x16xbf16, #tpu.memory_space<vmem>>, vector<256x16xbf16>,
    %c2 = arith.constant 2 : index
    %c0_17 = arith.constant 0 : index
    %c0_18 = arith.constant 0 : index
    %20 = vector.load %arg2[%c2, %c0_17, %c0_18] : memref<9x32x16xbf16, #tpu.memory_space<vmem>>, vector<1x32x16xbf16>
    %21 = vector.shape_cast %20 : vector<1x32x16xbf16> to vector<32x16xbf16>
    %cst_19 = arith.constant dense<0.000000e+00> : vector<256x16xf32>
    %22 = tpu.matmul %1, %21, %cst_19 {dimension_numbers = #tpu.dot_dimension_numbers<[1], [0], [0], [1], [0, 0, 1, 1], [], []>} : vector<256x32xbf16>, vector<32x16xbf16>, vector<256x16xf32> -> vector<256x16xf32>
    %c2_20 = arith.constant 2 : index
    %c0_21 = arith.constant 0 : index
    %c0_22 = arith.constant 0 : index
    %23 = vector.load %arg3[%c2_20, %c0_21, %c0_22] : memref<9x1x16xf32, #tpu.memory_space<vmem>>, vector<1x1x16xf32>
    %24 = vector.shape_cast %23 : vector<1x1x16xf32> to vector<1x16xf32>
    %25 = vector.broadcast %24 : vector<1x16xf32> to vector<256x16xf32>
    %26 = arith.addf %22, %25 : vector<256x16xf32>
    %27 = arith.truncf %26 : vector<256x16xf32> to vector<256x16xbf16>
    %c0_23 = arith.constant 0 : index
    %c0_24 = arith.constant 0 : index
    %28 = vector.load %arg6[%c0_23, %c0_24] : memref<256x16xbf16, #tpu.memory_space<vmem>>, vector<256x16xbf16>
    tpu.vector_store %arg6[%c0_23, %c0_24], %27 {strides = array<i32>} : memref<256x16xbf16, #tpu.memory_space<vmem>>, vector<256x16xbf16>,
    %c3 = arith.constant 3 : index
    %c0_25 = arith.constant 0 : index
    %c0_26 = arith.constant 0 : index
    %29 = vector.load %arg2[%c3, %c0_25, %c0_26] : memref<9x32x16xbf16, #tpu.memory_space<vmem>>, vector<1x32x16xbf16>
    %30 = vector.shape_cast %29 : vector<1x32x16xbf16> to vector<32x16xbf16>
    %cst_27 = arith.constant dense<0.000000e+00> : vector<256x16xf32>
    %31 = tpu.matmul %1, %30, %cst_27 {dimension_numbers = #tpu.dot_dimension_numbers<[1], [0], [0], [1], [0, 0, 1, 1], [], []>} : vector<256x32xbf16>, vector<32x16xbf16>, vector<256x16xf32> -> vector<256x16xf32>
    %c3_28 = arith.constant 3 : index
    %c0_29 = arith.constant 0 : index
    %c0_30 = arith.constant 0 : index
    %32 = vector.load %arg3[%c3_28, %c0_29, %c0_30] : memref<9x1x16xf32, #tpu.memory_space<vmem>>, vector<1x1x16xf32>
    %33 = vector.shape_cast %32 : vector<1x1x16xf32> to vector<1x16xf32>
    %34 = vector.broadcast %33 : vector<1x16xf32> to vector<256x16xf32>
    %35 = arith.addf %31, %34 : vector<256x16xf32>
    %36 = arith.truncf %35 : vector<256x16xf32> to vector<256x16xbf16>
    %c0_31 = arith.constant 0 : index
    %c0_32 = arith.constant 0 : index
    %37 = vector.load %arg7[%c0_31, %c0_32] : memref<256x16xbf16, #tpu.memory_space<vmem>>, vector<256x16xbf16>
    tpu.vector_store %arg7[%c0_31, %c0_32], %36 {strides = array<i32>} : memref<256x16xbf16, #tpu.memory_space<vmem>>, vector<256x16xbf16>,
    %c4 = arith.constant 4 : index
    %c0_33 = arith.constant 0 : index
    %c0_34 = arith.constant 0 : index
    %38 = vector.load %arg2[%c4, %c0_33, %c0_34] : memref<9x32x16xbf16, #tpu.memory_space<vmem>>, vector<1x32x16xbf16>
    %39 = vector.shape_cast %38 : vector<1x32x16xbf16> to vector<32x16xbf16>
    %cst_35 = arith.constant dense<0.000000e+00> : vector<256x16xf32>
    %40 = tpu.matmul %1, %39, %cst_35 {dimension_numbers = #tpu.dot_dimension_numbers<[1], [0], [0], [1], [0, 0, 1, 1], [], []>} : vector<256x32xbf16>, vector<32x16xbf16>, vector<256x16xf32> -> vector<256x16xf32>
    %c4_36 = arith.constant 4 : index
    %c0_37 = arith.constant 0 : index
    %c0_38 = arith.constant 0 : index
    %41 = vector.load %arg3[%c4_36, %c0_37, %c0_38] : memref<9x1x16xf32, #tpu.memory_space<vmem>>, vector<1x1x16xf32>
    %42 = vector.shape_cast %41 : vector<1x1x16xf32> to vector<1x16xf32>
    %43 = vector.broadcast %42 : vector<1x16xf32> to vector<256x16xf32>
    %44 = arith.addf %40, %43 : vector<256x16xf32>
    %45 = arith.truncf %44 : vector<256x16xf32> to vector<256x16xbf16>
    %c0_39 = arith.constant 0 : index
    %c0_40 = arith.constant 0 : index
    %46 = vector.load %arg8[%c0_39, %c0_40] : memref<256x16xbf16, #tpu.memory_space<vmem>>, vector<256x16xbf16>
    tpu.vector_store %arg8[%c0_39, %c0_40], %45 {strides = array<i32>} : memref<256x16xbf16, #tpu.memory_space<vmem>>, vector<256x16xbf16>,
    %c5 = arith.constant 5 : index
    %c0_41 = arith.constant 0 : index
    %c0_42 = arith.constant 0 : index
    %47 = vector.load %arg2[%c5, %c0_41, %c0_42] : memref<9x32x16xbf16, #tpu.memory_space<vmem>>, vector<1x32x16xbf16>
    %48 = vector.shape_cast %47 : vector<1x32x16xbf16> to vector<32x16xbf16>
    %cst_43 = arith.constant dense<0.000000e+00> : vector<256x16xf32>
    %49 = tpu.matmul %1, %48, %cst_43 {dimension_numbers = #tpu.dot_dimension_numbers<[1], [0], [0], [1], [0, 0, 1, 1], [], []>} : vector<256x32xbf16>, vector<32x16xbf16>, vector<256x16xf32> -> vector<256x16xf32>
    %c5_44 = arith.constant 5 : index
    %c0_45 = arith.constant 0 : index
    %c0_46 = arith.constant 0 : index
    %50 = vector.load %arg3[%c5_44, %c0_45, %c0_46] : memref<9x1x16xf32, #tpu.memory_space<vmem>>, vector<1x1x16xf32>
    %51 = vector.shape_cast %50 : vector<1x1x16xf32> to vector<1x16xf32>
    %52 = vector.broadcast %51 : vector<1x16xf32> to vector<256x16xf32>
    %53 = arith.addf %49, %52 : vector<256x16xf32>
    %54 = arith.truncf %53 : vector<256x16xf32> to vector<256x16xbf16>
    %c0_47 = arith.constant 0 : index
    %c0_48 = arith.constant 0 : index
    %55 = vector.load %arg9[%c0_47, %c0_48] : memref<256x16xbf16, #tpu.memory_space<vmem>>, vector<256x16xbf16>
    tpu.vector_store %arg9[%c0_47, %c0_48], %54 {strides = array<i32>} : memref<256x16xbf16, #tpu.memory_space<vmem>>, vector<256x16xbf16>,
    %c6 = arith.constant 6 : index
    %c0_49 = arith.constant 0 : index
    %c0_50 = arith.constant 0 : index
    %56 = vector.load %arg2[%c6, %c0_49, %c0_50] : memref<9x32x16xbf16, #tpu.memory_space<vmem>>, vector<1x32x16xbf16>
    %57 = vector.shape_cast %56 : vector<1x32x16xbf16> to vector<32x16xbf16>
    %cst_51 = arith.constant dense<0.000000e+00> : vector<256x16xf32>
    %58 = tpu.matmul %1, %57, %cst_51 {dimension_numbers = #tpu.dot_dimension_numbers<[1], [0], [0], [1], [0, 0, 1, 1], [], []>} : vector<256x32xbf16>, vector<32x16xbf16>, vector<256x16xf32> -> vector<256x16xf32>
    %c6_52 = arith.constant 6 : index
    %c0_53 = arith.constant 0 : index
    %c0_54 = arith.constant 0 : index
    %59 = vector.load %arg3[%c6_52, %c0_53, %c0_54] : memref<9x1x16xf32, #tpu.memory_space<vmem>>, vector<1x1x16xf32>
    %60 = vector.shape_cast %59 : vector<1x1x16xf32> to vector<1x16xf32>
    %61 = vector.broadcast %60 : vector<1x16xf32> to vector<256x16xf32>
    %62 = arith.addf %58, %61 : vector<256x16xf32>
    %63 = arith.truncf %62 : vector<256x16xf32> to vector<256x16xbf16>
    %c0_55 = arith.constant 0 : index
    %c0_56 = arith.constant 0 : index
    %64 = vector.load %arg10[%c0_55, %c0_56] : memref<256x16xbf16, #tpu.memory_space<vmem>>, vector<256x16xbf16>
    tpu.vector_store %arg10[%c0_55, %c0_56], %63 {strides = array<i32>} : memref<256x16xbf16, #tpu.memory_space<vmem>>, vector<256x16xbf16>,
    %c7 = arith.constant 7 : index
    %c0_57 = arith.constant 0 : index
    %c0_58 = arith.constant 0 : index
    %65 = vector.load %arg2[%c7, %c0_57, %c0_58] : memref<9x32x16xbf16, #tpu.memory_space<vmem>>, vector<1x32x16xbf16>
    %66 = vector.shape_cast %65 : vector<1x32x16xbf16> to vector<32x16xbf16>
    %cst_59 = arith.constant dense<0.000000e+00> : vector<256x16xf32>
    %67 = tpu.matmul %1, %66, %cst_59 {dimension_numbers = #tpu.dot_dimension_numbers<[1], [0], [0], [1], [0, 0, 1, 1], [], []>} : vector<256x32xbf16>, vector<32x16xbf16>, vector<256x16xf32> -> vector<256x16xf32>
    %c7_60 = arith.constant 7 : index
    %c0_61 = arith.constant 0 : index
    %c0_62 = arith.constant 0 : index
    %68 = vector.load %arg3[%c7_60, %c0_61, %c0_62] : memref<9x1x16xf32, #tpu.memory_space<vmem>>, vector<1x1x16xf32>
    %69 = vector.shape_cast %68 : vector<1x1x16xf32> to vector<1x16xf32>
    %70 = vector.broadcast %69 : vector<1x16xf32> to vector<256x16xf32>
    %71 = arith.addf %67, %70 : vector<256x16xf32>
    %72 = arith.truncf %71 : vector<256x16xf32> to vector<256x16xbf16>
    %c0_63 = arith.constant 0 : index
    %c0_64 = arith.constant 0 : index
    %73 = vector.load %arg11[%c0_63, %c0_64] : memref<256x16xbf16, #tpu.memory_space<vmem>>, vector<256x16xbf16>
    tpu.vector_store %arg11[%c0_63, %c0_64], %72 {strides = array<i32>} : memref<256x16xbf16, #tpu.memory_space<vmem>>, vector<256x16xbf16>,
    %c8 = arith.constant 8 : index
    %c0_65 = arith.constant 0 : index
    %c0_66 = arith.constant 0 : index
    %74 = vector.load %arg2[%c8, %c0_65, %c0_66] : memref<9x32x16xbf16, #tpu.memory_space<vmem>>, vector<1x32x16xbf16>
    %75 = vector.shape_cast %74 : vector<1x32x16xbf16> to vector<32x16xbf16>
    %cst_67 = arith.constant dense<0.000000e+00> : vector<256x16xf32>
    %76 = tpu.matmul %1, %75, %cst_67 {dimension_numbers = #tpu.dot_dimension_numbers<[1], [0], [0], [1], [0, 0, 1, 1], [], []>} : vector<256x32xbf16>, vector<32x16xbf16>, vector<256x16xf32> -> vector<256x16xf32>
    %c8_68 = arith.constant 8 : index
    %c0_69 = arith.constant 0 : index
    %c0_70 = arith.constant 0 : index
    %77 = vector.load %arg3[%c8_68, %c0_69, %c0_70] : memref<9x1x16xf32, #tpu.memory_space<vmem>>, vector<1x1x16xf32>
    %78 = vector.shape_cast %77 : vector<1x1x16xf32> to vector<1x16xf32>
    %79 = vector.broadcast %78 : vector<1x16xf32> to vector<256x16xf32>
    %80 = arith.addf %76, %79 : vector<256x16xf32>
    %81 = arith.truncf %80 : vector<256x16xf32> to vector<256x16xbf16>
    %c0_71 = arith.constant 0 : index
    %c0_72 = arith.constant 0 : index
    %82 = vector.load %arg12[%c0_71, %c0_72] : memref<256x16xbf16, #tpu.memory_space<vmem>>, vector<256x16xbf16>
    tpu.vector_store %arg12[%c0_71, %c0_72], %81 {strides = array<i32>} : memref<256x16xbf16, #tpu.memory_space<vmem>>, vector<256x16xbf16>,
    return
  }
  func.func @transform_0(%arg0: i32) -> (i32, i32) {
    %c0_i32 = arith.constant 0 : i32
    %c0_i32_0 = arith.constant 0 : i32
    return %arg0, %c0_i32 : i32, i32
  }
  func.func @transform_1(%arg0: i32) -> (i32, i32, i32) {
    %c0_i32 = arith.constant 0 : i32
    %c0_i32_0 = arith.constant 0 : i32
    %c0_i32_1 = arith.constant 0 : i32
    %c0_i32_2 = arith.constant 0 : i32
    return %c0_i32, %c0_i32_0, %c0_i32_1 : i32, i32, i32
  }
  func.func @transform_2(%arg0: i32) -> (i32, i32, i32) {
    %c0_i32 = arith.constant 0 : i32
    %c0_i32_0 = arith.constant 0 : i32
    %c0_i32_1 = arith.constant 0 : i32
    %c0_i32_2 = arith.constant 0 : i32
    return %c0_i32, %c0_i32_0, %c0_i32_1 : i32, i32, i32
  }
  func.func @transform_3(%arg0: i32) -> (i32, i32) {
    %c0_i32 = arith.constant 0 : i32
    %c0_i32_0 = arith.constant 0 : i32
    return %arg0, %c0_i32 : i32, i32
  }
  func.func @transform_4(%arg0: i32) -> (i32, i32) {
    %c0_i32 = arith.constant 0 : i32
    %c0_i32_0 = arith.constant 0 : i32
    return %arg0, %c0_i32 : i32, i32
  }
  func.func @transform_5(%arg0: i32) -> (i32, i32) {
    %c0_i32 = arith.constant 0 : i32
    %c0_i32_0 = arith.constant 0 : i32
    return %arg0, %c0_i32 : i32, i32
  }
  func.func @transform_6(%arg0: i32) -> (i32, i32) {
    %c0_i32 = arith.constant 0 : i32
    %c0_i32_0 = arith.constant 0 : i32
    return %arg0, %c0_i32 : i32, i32
  }
  func.func @transform_7(%arg0: i32) -> (i32, i32) {
    %c0_i32 = arith.constant 0 : i32
    %c0_i32_0 = arith.constant 0 : i32
    return %arg0, %c0_i32 : i32, i32
  }
  func.func @transform_8(%arg0: i32) -> (i32, i32) {
    %c0_i32 = arith.constant 0 : i32
    %c0_i32_0 = arith.constant 0 : i32
    return %arg0, %c0_i32 : i32, i32
  }
  func.func @transform_9(%arg0: i32) -> (i32, i32) {
    %c0_i32 = arith.constant 0 : i32
    %c0_i32_0 = arith.constant 0 : i32
    return %arg0, %c0_i32 : i32, i32
  }
  func.func @transform_10(%arg0: i32) -> (i32, i32) {
    %c0_i32 = arith.constant 0 : i32
    %c0_i32_0 = arith.constant 0 : i32
    return %arg0, %c0_i32 : i32, i32
  }
  func.func @transform_11(%arg0: i32) -> (i32, i32) {
    %c0_i32 = arith.constant 0 : i32
    %c0_i32_0 = arith.constant 0 : i32
    return %arg0, %c0_i32 : i32, i32
  }
}

module attributes {stable_mosaic.version = 11 : i64} {
  func.func @_ct_attn_kernel(%arg0: i32, %arg1: memref<1x1024x16xbf16, #tpu.memory_space<vmem>>, %arg2: memref<1x1024x16xbf16, #tpu.memory_space<vmem>>, %arg3: memref<1x1024x16xbf16, #tpu.memory_space<vmem>>, %arg4: memref<1x4x4096xbf16, #tpu.memory_space<vmem>>, %arg5: memref<1x4x4096xbf16, #tpu.memory_space<vmem>>, %arg6: memref<1x4x4096xbf16, #tpu.memory_space<vmem>>, %arg7: memref<1x1024x16xbf16, #tpu.memory_space<vmem>>, %arg8: memref<1x4x4096xbf16, #tpu.memory_space<vmem>>) attributes {dimension_semantics = [#tpu.dimension_semantics<parallel>], iteration_bounds = array<i64: 2>, scalar_prefetch = 0 : i64, scratch_operands = 0 : i64, tpu.core_type = #tpu.core_type<tc>, window_params = [{transform_indices = @transform_0, window_bounds = array<i64: 1, 1024, 16>}, {transform_indices = @transform_1, window_bounds = array<i64: 1, 1024, 16>}, {transform_indices = @transform_2, window_bounds = array<i64: 1, 1024, 16>}, {transform_indices = @transform_3, window_bounds = array<i64: 1, 4, 4096>}, {transform_indices = @transform_4, window_bounds = array<i64: 1, 4, 4096>}, {transform_indices = @transform_5, window_bounds = array<i64: 1, 4, 4096>}, {transform_indices = @transform_6, window_bounds = array<i64: 1, 1024, 16>}, {transform_indices = @transform_7, window_bounds = array<i64: 1, 4, 4096>}]} {
    %c0 = arith.constant 0 : index
    %c0_0 = arith.constant 0 : index
    %c0_1 = arith.constant 0 : index
    %0 = vector.load %arg1[%c0, %c0_0, %c0_1] : memref<1x1024x16xbf16, #tpu.memory_space<vmem>>, vector<1x1024x16xbf16>
    %1 = vector.shape_cast %0 : vector<1x1024x16xbf16> to vector<1024x16xbf16>
    %c0_2 = arith.constant 0 : index
    %c0_3 = arith.constant 0 : index
    %c0_4 = arith.constant 0 : index
    %2 = vector.load %arg2[%c0_2, %c0_3, %c0_4] : memref<1x1024x16xbf16, #tpu.memory_space<vmem>>, vector<1x1024x16xbf16>
    %3 = vector.shape_cast %2 : vector<1x1024x16xbf16> to vector<1024x16xbf16>
    %c0_5 = arith.constant 0 : index
    %c0_6 = arith.constant 0 : index
    %c0_7 = arith.constant 0 : index
    %4 = vector.load %arg3[%c0_5, %c0_6, %c0_7] : memref<1x1024x16xbf16, #tpu.memory_space<vmem>>, vector<1x1024x16xbf16>
    %5 = vector.shape_cast %4 : vector<1x1024x16xbf16> to vector<1024x16xbf16>
    %cst = arith.constant dense<0.000000e+00> : vector<16x16xf32>
    %6 = tpu.matmul %1, %3, %cst {dimension_numbers = #tpu.dot_dimension_numbers<[0], [0], [1], [1], [0, 1, 1, 1], [], []>} : vector<1024x16xbf16>, vector<1024x16xbf16>, vector<16x16xf32> -> vector<16x16xf32>
    %cst_8 = arith.constant dense<0xFF800000> : vector<16xf32>
    %7 = vector.multi_reduction <maximumf>, %6, %cst_8 [1] : vector<16x16xf32> to vector<16xf32>
    %8 = vector.shape_cast %7 : vector<16xf32> to vector<16x1xf32>
    %9 = vector.broadcast %8 : vector<16x1xf32> to vector<16x16xf32>
    %10 = arith.subf %6, %9 : vector<16x16xf32>
    %11 = math.exp %10 : vector<16x16xf32>
    %cst_9 = arith.constant dense<0.000000e+00> : vector<16xf32>
    %12 = vector.multi_reduction <add>, %11, %cst_9 [1] : vector<16x16xf32> to vector<16xf32>
    %13 = vector.shape_cast %12 : vector<16xf32> to vector<16x1xf32>
    %14 = vector.broadcast %13 : vector<16x1xf32> to vector<16x16xf32>
    %15 = arith.divf %11, %14 : vector<16x16xf32>
    %16 = arith.truncf %15 : vector<16x16xf32> to vector<16x16xbf16>
    %cst_10 = arith.constant dense<0.000000e+00> : vector<1024x16xf32>
    %17 = tpu.matmul %5, %16, %cst_10 {dimension_numbers = #tpu.dot_dimension_numbers<[1], [1], [0], [0], [0, 0, 1, 0], [], []>} : vector<1024x16xbf16>, vector<16x16xbf16>, vector<1024x16xf32> -> vector<1024x16xf32>
    %18 = arith.truncf %17 : vector<1024x16xf32> to vector<1024x16xbf16>
    %c0_11 = arith.constant 0 : index
    %c0_12 = arith.constant 0 : index
    %c0_13 = arith.constant 0 : index
    %19 = vector.load %arg7[%c0_11, %c0_12, %c0_13] : memref<1x1024x16xbf16, #tpu.memory_space<vmem>>, vector<1x1024x16xbf16>
    %20 = vector.shape_cast %19 : vector<1x1024x16xbf16> to vector<1024x16xbf16>
    %21 = vector.shape_cast %18 : vector<1024x16xbf16> to vector<1x1024x16xbf16>
    tpu.vector_store %arg7[%c0_11, %c0_12, %c0_13], %21 {strides = array<i32>} : memref<1x1024x16xbf16, #tpu.memory_space<vmem>>, vector<1x1024x16xbf16>,
    %c0_14 = arith.constant 0 : index
    %c0_15 = arith.constant 0 : index
    %c0_16 = arith.constant 0 : index
    %22 = vector.load %arg4[%c0_14, %c0_15, %c0_16] : memref<1x4x4096xbf16, #tpu.memory_space<vmem>>, vector<1x4x4096xbf16>
    %23 = vector.shape_cast %22 : vector<1x4x4096xbf16> to vector<4x4096xbf16>
    %c0_17 = arith.constant 0 : index
    %c0_18 = arith.constant 0 : index
    %c0_19 = arith.constant 0 : index
    %24 = vector.load %arg5[%c0_17, %c0_18, %c0_19] : memref<1x4x4096xbf16, #tpu.memory_space<vmem>>, vector<1x4x4096xbf16>
    %25 = vector.shape_cast %24 : vector<1x4x4096xbf16> to vector<4x4096xbf16>
    %c0_20 = arith.constant 0 : index
    %c0_21 = arith.constant 0 : index
    %c0_22 = arith.constant 0 : index
    %26 = vector.load %arg6[%c0_20, %c0_21, %c0_22] : memref<1x4x4096xbf16, #tpu.memory_space<vmem>>, vector<1x4x4096xbf16>
    %27 = vector.shape_cast %26 : vector<1x4x4096xbf16> to vector<4x4096xbf16>
    %cst_23 = arith.constant dense<0.000000e+00> : vector<4x4xf32>
    %28 = tpu.matmul %23, %25, %cst_23 {dimension_numbers = #tpu.dot_dimension_numbers<[1], [1], [0], [0], [0, 0, 1, 0], [], []>} : vector<4x4096xbf16>, vector<4x4096xbf16>, vector<4x4xf32> -> vector<4x4xf32>
    %cst_24 = arith.constant dense<0xFF800000> : vector<4xf32>
    %29 = vector.multi_reduction <maximumf>, %28, %cst_24 [1] : vector<4x4xf32> to vector<4xf32>
    %30 = vector.shape_cast %29 : vector<4xf32> to vector<4x1xf32>
    %31 = vector.broadcast %30 : vector<4x1xf32> to vector<4x4xf32>
    %32 = arith.subf %28, %31 : vector<4x4xf32>
    %33 = math.exp %32 : vector<4x4xf32>
    %cst_25 = arith.constant dense<0.000000e+00> : vector<4xf32>
    %34 = vector.multi_reduction <add>, %33, %cst_25 [1] : vector<4x4xf32> to vector<4xf32>
    %35 = vector.shape_cast %34 : vector<4xf32> to vector<4x1xf32>
    %36 = vector.broadcast %35 : vector<4x1xf32> to vector<4x4xf32>
    %37 = arith.divf %33, %36 : vector<4x4xf32>
    %38 = arith.truncf %37 : vector<4x4xf32> to vector<4x4xbf16>
    %cst_26 = arith.constant dense<0.000000e+00> : vector<4x4096xf32>
    %39 = tpu.matmul %38, %27, %cst_26 {dimension_numbers = #tpu.dot_dimension_numbers<[1], [0], [0], [1], [0, 0, 1, 1], [], []>} : vector<4x4xbf16>, vector<4x4096xbf16>, vector<4x4096xf32> -> vector<4x4096xf32>
    %40 = arith.truncf %39 : vector<4x4096xf32> to vector<4x4096xbf16>
    %c0_27 = arith.constant 0 : index
    %c0_28 = arith.constant 0 : index
    %c0_29 = arith.constant 0 : index
    %41 = vector.load %arg8[%c0_27, %c0_28, %c0_29] : memref<1x4x4096xbf16, #tpu.memory_space<vmem>>, vector<1x4x4096xbf16>
    %42 = vector.shape_cast %41 : vector<1x4x4096xbf16> to vector<4x4096xbf16>
    %43 = vector.shape_cast %40 : vector<4x4096xbf16> to vector<1x4x4096xbf16>
    tpu.vector_store %arg8[%c0_27, %c0_28, %c0_29], %43 {strides = array<i32>} : memref<1x4x4096xbf16, #tpu.memory_space<vmem>>, vector<1x4x4096xbf16>,
    return
  }
  func.func @transform_0(%arg0: i32) -> (i32, i32, i32) {
    %c0_i32 = arith.constant 0 : i32
    %c0_i32_0 = arith.constant 0 : i32
    %c0_i32_1 = arith.constant 0 : i32
    return %arg0, %c0_i32, %c0_i32_0 : i32, i32, i32
  }
  func.func @transform_1(%arg0: i32) -> (i32, i32, i32) {
    %c0_i32 = arith.constant 0 : i32
    %c0_i32_0 = arith.constant 0 : i32
    %c0_i32_1 = arith.constant 0 : i32
    return %arg0, %c0_i32, %c0_i32_0 : i32, i32, i32
  }
  func.func @transform_2(%arg0: i32) -> (i32, i32, i32) {
    %c0_i32 = arith.constant 0 : i32
    %c0_i32_0 = arith.constant 0 : i32
    %c0_i32_1 = arith.constant 0 : i32
    return %arg0, %c0_i32, %c0_i32_0 : i32, i32, i32
  }
  func.func @transform_3(%arg0: i32) -> (i32, i32, i32) {
    %c0_i32 = arith.constant 0 : i32
    %c0_i32_0 = arith.constant 0 : i32
    %c0_i32_1 = arith.constant 0 : i32
    return %arg0, %c0_i32, %c0_i32_0 : i32, i32, i32
  }
  func.func @transform_4(%arg0: i32) -> (i32, i32, i32) {
    %c0_i32 = arith.constant 0 : i32
    %c0_i32_0 = arith.constant 0 : i32
    %c0_i32_1 = arith.constant 0 : i32
    return %arg0, %c0_i32, %c0_i32_0 : i32, i32, i32
  }
  func.func @transform_5(%arg0: i32) -> (i32, i32, i32) {
    %c0_i32 = arith.constant 0 : i32
    %c0_i32_0 = arith.constant 0 : i32
    %c0_i32_1 = arith.constant 0 : i32
    return %arg0, %c0_i32, %c0_i32_0 : i32, i32, i32
  }
  func.func @transform_6(%arg0: i32) -> (i32, i32, i32) {
    %c0_i32 = arith.constant 0 : i32
    %c0_i32_0 = arith.constant 0 : i32
    %c0_i32_1 = arith.constant 0 : i32
    return %arg0, %c0_i32, %c0_i32_0 : i32, i32, i32
  }
  func.func @transform_7(%arg0: i32) -> (i32, i32, i32) {
    %c0_i32 = arith.constant 0 : i32
    %c0_i32_0 = arith.constant 0 : i32
    %c0_i32_1 = arith.constant 0 : i32
    return %arg0, %c0_i32, %c0_i32_0 : i32, i32, i32
  }
}

module attributes {stable_mosaic.version = 11 : i64} {
  func.func @_hw_attn_kernel(%arg0: i32, %arg1: i32, %arg2: memref<1x128x64xbf16, #tpu.memory_space<vmem>>, %arg3: memref<1x256x64xbf16, #tpu.memory_space<vmem>>, %arg4: memref<1x256x64xbf16, #tpu.memory_space<vmem>>, %arg5: memref<1x128x64xbf16, #tpu.memory_space<vmem>>) attributes {dimension_semantics = [#tpu.dimension_semantics<parallel>, #tpu.dimension_semantics<parallel>], iteration_bounds = array<i64: 2, 2>, scalar_prefetch = 0 : i64, scratch_operands = 0 : i64, tpu.core_type = #tpu.core_type<tc>, window_params = [{transform_indices = @transform_0, window_bounds = array<i64: 1, 128, 64>}, {transform_indices = @transform_1, window_bounds = array<i64: 1, 256, 64>}, {transform_indices = @transform_2, window_bounds = array<i64: 1, 256, 64>}, {transform_indices = @transform_3, window_bounds = array<i64: 1, 128, 64>}]} {
    %c0 = arith.constant 0 : index
    %c0_0 = arith.constant 0 : index
    %c0_1 = arith.constant 0 : index
    %0 = vector.load %arg2[%c0, %c0_0, %c0_1] : memref<1x128x64xbf16, #tpu.memory_space<vmem>>, vector<1x128x64xbf16>
    %1 = vector.shape_cast %0 : vector<1x128x64xbf16> to vector<128x64xbf16>
    %c0_2 = arith.constant 0 : index
    %c0_3 = arith.constant 0 : index
    %c0_4 = arith.constant 0 : index
    %2 = vector.load %arg3[%c0_2, %c0_3, %c0_4] : memref<1x256x64xbf16, #tpu.memory_space<vmem>>, vector<1x256x64xbf16>
    %3 = vector.shape_cast %2 : vector<1x256x64xbf16> to vector<256x64xbf16>
    %c0_5 = arith.constant 0 : index
    %c0_6 = arith.constant 0 : index
    %c0_7 = arith.constant 0 : index
    %4 = vector.load %arg4[%c0_5, %c0_6, %c0_7] : memref<1x256x64xbf16, #tpu.memory_space<vmem>>, vector<1x256x64xbf16>
    %5 = vector.shape_cast %4 : vector<1x256x64xbf16> to vector<256x64xbf16>
    %cst = arith.constant dense<0.000000e+00> : vector<128x256xf32>
    %6 = tpu.matmul %1, %3, %cst {dimension_numbers = #tpu.dot_dimension_numbers<[1], [1], [0], [0], [0, 0, 1, 0], [], []>} : vector<128x64xbf16>, vector<256x64xbf16>, vector<128x256xf32> -> vector<128x256xf32>
    %cst_8 = arith.constant dense<0xFF800000> : vector<128xf32>
    %7 = vector.multi_reduction <maximumf>, %6, %cst_8 [1] : vector<128x256xf32> to vector<128xf32>
    %8 = vector.shape_cast %7 : vector<128xf32> to vector<128x1xf32>
    %9 = vector.broadcast %8 : vector<128x1xf32> to vector<128x256xf32>
    %10 = arith.subf %6, %9 : vector<128x256xf32>
    %11 = math.exp %10 : vector<128x256xf32>
    %cst_9 = arith.constant dense<0.000000e+00> : vector<128xf32>
    %12 = vector.multi_reduction <add>, %11, %cst_9 [1] : vector<128x256xf32> to vector<128xf32>
    %13 = vector.shape_cast %12 : vector<128xf32> to vector<128x1xf32>
    %14 = vector.broadcast %13 : vector<128x1xf32> to vector<128x256xf32>
    %15 = arith.divf %11, %14 : vector<128x256xf32>
    %16 = arith.truncf %15 : vector<128x256xf32> to vector<128x256xbf16>
    %cst_10 = arith.constant dense<0.000000e+00> : vector<128x64xf32>
    %17 = tpu.matmul %16, %5, %cst_10 {dimension_numbers = #tpu.dot_dimension_numbers<[1], [0], [0], [1], [0, 0, 1, 1], [], []>} : vector<128x256xbf16>, vector<256x64xbf16>, vector<128x64xf32> -> vector<128x64xf32>
    %18 = arith.truncf %17 : vector<128x64xf32> to vector<128x64xbf16>
    %c0_11 = arith.constant 0 : index
    %c0_12 = arith.constant 0 : index
    %c0_13 = arith.constant 0 : index
    %19 = vector.load %arg5[%c0_11, %c0_12, %c0_13] : memref<1x128x64xbf16, #tpu.memory_space<vmem>>, vector<1x128x64xbf16>
    %20 = vector.shape_cast %19 : vector<1x128x64xbf16> to vector<128x64xbf16>
    %21 = vector.shape_cast %18 : vector<128x64xbf16> to vector<1x128x64xbf16>
    tpu.vector_store %arg5[%c0_11, %c0_12, %c0_13], %21 {strides = array<i32>} : memref<1x128x64xbf16, #tpu.memory_space<vmem>>, vector<1x128x64xbf16>,
    return
  }
  func.func @transform_0(%arg0: i32, %arg1: i32) -> (i32, i32, i32) {
    %c0_i32 = arith.constant 0 : i32
    %c0_i32_0 = arith.constant 0 : i32
    return %arg0, %arg1, %c0_i32 : i32, i32, i32
  }
  func.func @transform_1(%arg0: i32, %arg1: i32) -> (i32, i32, i32) {
    %c0_i32 = arith.constant 0 : i32
    %c0_i32_0 = arith.constant 0 : i32
    %c0_i32_1 = arith.constant 0 : i32
    return %arg0, %c0_i32, %c0_i32_0 : i32, i32, i32
  }
  func.func @transform_2(%arg0: i32, %arg1: i32) -> (i32, i32, i32) {
    %c0_i32 = arith.constant 0 : i32
    %c0_i32_0 = arith.constant 0 : i32
    %c0_i32_1 = arith.constant 0 : i32
    return %arg0, %c0_i32, %c0_i32_0 : i32, i32, i32
  }
  func.func @transform_3(%arg0: i32, %arg1: i32) -> (i32, i32, i32) {
    %c0_i32 = arith.constant 0 : i32
    %c0_i32_0 = arith.constant 0 : i32
    return %arg0, %arg1, %c0_i32 : i32, i32, i32
  }
}

module attributes {stable_mosaic.version = 11 : i64} {
  func.func @_z_residual_kernel(%arg0: i32, %arg1: memref<256x16xbf16, #tpu.memory_space<vmem>>, %arg2: memref<256x16xbf16, #tpu.memory_space<vmem>>, %arg3: memref<256x16xbf16, #tpu.memory_space<vmem>>, %arg4: memref<256x32xf32, #tpu.memory_space<vmem>>, %arg5: memref<16x32xbf16, #tpu.memory_space<vmem>>, %arg6: memref<16x32xbf16, #tpu.memory_space<vmem>>, %arg7: memref<16x32xbf16, #tpu.memory_space<vmem>>, %arg8: memref<1x32xf32, #tpu.memory_space<vmem>>, %arg9: memref<256x32xf32, #tpu.memory_space<vmem>>) attributes {dimension_semantics = [#tpu.dimension_semantics<parallel>], iteration_bounds = array<i64: 8>, scalar_prefetch = 0 : i64, scratch_operands = 0 : i64, tpu.core_type = #tpu.core_type<tc>, window_params = [{transform_indices = @transform_0, window_bounds = array<i64: 256, 16>}, {transform_indices = @transform_1, window_bounds = array<i64: 256, 16>}, {transform_indices = @transform_2, window_bounds = array<i64: 256, 16>}, {transform_indices = @transform_3, window_bounds = array<i64: 256, 32>}, {pipeline_mode = #tpu.pipeline_mode<synchronous>, transform_indices = @transform_4, window_bounds = array<i64: 16, 32>}, {pipeline_mode = #tpu.pipeline_mode<synchronous>, transform_indices = @transform_5, window_bounds = array<i64: 16, 32>}, {pipeline_mode = #tpu.pipeline_mode<synchronous>, transform_indices = @transform_6, window_bounds = array<i64: 16, 32>}, {pipeline_mode = #tpu.pipeline_mode<synchronous>, transform_indices = @transform_7, window_bounds = array<i64: 1, 32>}, {transform_indices = @transform_8, window_bounds = array<i64: 256, 32>}]} {
    %c0 = arith.constant 0 : index
    %c0_0 = arith.constant 0 : index
    %0 = vector.load %arg1[%c0, %c0_0] : memref<256x16xbf16, #tpu.memory_space<vmem>>, vector<256x16xbf16>
    %c0_1 = arith.constant 0 : index
    %c0_2 = arith.constant 0 : index
    %1 = vector.load %arg5[%c0_1, %c0_2] : memref<16x32xbf16, #tpu.memory_space<vmem>>, vector<16x32xbf16>
    %cst = arith.constant dense<0.000000e+00> : vector<256x32xf32>
    %2 = tpu.matmul %0, %1, %cst {dimension_numbers = #tpu.dot_dimension_numbers<[1], [0], [0], [1], [0, 0, 1, 1], [], []>} : vector<256x16xbf16>, vector<16x32xbf16>, vector<256x32xf32> -> vector<256x32xf32>
    %c0_3 = arith.constant 0 : index
    %c0_4 = arith.constant 0 : index
    %3 = vector.load %arg2[%c0_3, %c0_4] : memref<256x16xbf16, #tpu.memory_space<vmem>>, vector<256x16xbf16>
    %c0_5 = arith.constant 0 : index
    %c0_6 = arith.constant 0 : index
    %4 = vector.load %arg6[%c0_5, %c0_6] : memref<16x32xbf16, #tpu.memory_space<vmem>>, vector<16x32xbf16>
    %cst_7 = arith.constant dense<0.000000e+00> : vector<256x32xf32>
    %5 = tpu.matmul %3, %4, %cst_7 {dimension_numbers = #tpu.dot_dimension_numbers<[1], [0], [0], [1], [0, 0, 1, 1], [], []>} : vector<256x16xbf16>, vector<16x32xbf16>, vector<256x32xf32> -> vector<256x32xf32>
    %6 = arith.addf %2, %5 : vector<256x32xf32>
    %c0_8 = arith.constant 0 : index
    %c0_9 = arith.constant 0 : index
    %7 = vector.load %arg3[%c0_8, %c0_9] : memref<256x16xbf16, #tpu.memory_space<vmem>>, vector<256x16xbf16>
    %c0_10 = arith.constant 0 : index
    %c0_11 = arith.constant 0 : index
    %8 = vector.load %arg7[%c0_10, %c0_11] : memref<16x32xbf16, #tpu.memory_space<vmem>>, vector<16x32xbf16>
    %cst_12 = arith.constant dense<0.000000e+00> : vector<256x32xf32>
    %9 = tpu.matmul %7, %8, %cst_12 {dimension_numbers = #tpu.dot_dimension_numbers<[1], [0], [0], [1], [0, 0, 1, 1], [], []>} : vector<256x16xbf16>, vector<16x32xbf16>, vector<256x32xf32> -> vector<256x32xf32>
    %10 = arith.addf %6, %9 : vector<256x32xf32>
    %c0_13 = arith.constant 0 : index
    %c0_14 = arith.constant 0 : index
    %11 = vector.load %arg8[%c0_13, %c0_14] : memref<1x32xf32, #tpu.memory_space<vmem>>, vector<1x32xf32>
    %12 = vector.broadcast %11 : vector<1x32xf32> to vector<256x32xf32>
    %13 = arith.addf %10, %12 : vector<256x32xf32>
    %c0_15 = arith.constant 0 : index
    %c0_16 = arith.constant 0 : index
    %14 = vector.load %arg4[%c0_15, %c0_16] : memref<256x32xf32, #tpu.memory_space<vmem>>, vector<256x32xf32>
    %15 = arith.addf %13, %14 : vector<256x32xf32>
    %c0_17 = arith.constant 0 : index
    %c0_18 = arith.constant 0 : index
    %16 = vector.load %arg9[%c0_17, %c0_18] : memref<256x32xf32, #tpu.memory_space<vmem>>, vector<256x32xf32>
    tpu.vector_store %arg9[%c0_17, %c0_18], %15 {strides = array<i32>} : memref<256x32xf32, #tpu.memory_space<vmem>>, vector<256x32xf32>,
    return
  }
  func.func @transform_0(%arg0: i32) -> (i32, i32) {
    %c0_i32 = arith.constant 0 : i32
    %c0_i32_0 = arith.constant 0 : i32
    return %arg0, %c0_i32 : i32, i32
  }
  func.func @transform_1(%arg0: i32) -> (i32, i32) {
    %c0_i32 = arith.constant 0 : i32
    %c0_i32_0 = arith.constant 0 : i32
    return %arg0, %c0_i32 : i32, i32
  }
  func.func @transform_2(%arg0: i32) -> (i32, i32) {
    %c0_i32 = arith.constant 0 : i32
    %c0_i32_0 = arith.constant 0 : i32
    return %arg0, %c0_i32 : i32, i32
  }
  func.func @transform_3(%arg0: i32) -> (i32, i32) {
    %c0_i32 = arith.constant 0 : i32
    %c0_i32_0 = arith.constant 0 : i32
    return %arg0, %c0_i32 : i32, i32
  }
  func.func @transform_4(%arg0: i32) -> (i32, i32) {
    %c0_i32 = arith.constant 0 : i32
    %c0_i32_0 = arith.constant 0 : i32
    %c0_i32_1 = arith.constant 0 : i32
    return %c0_i32, %c0_i32_0 : i32, i32
  }
  func.func @transform_5(%arg0: i32) -> (i32, i32) {
    %c0_i32 = arith.constant 0 : i32
    %c0_i32_0 = arith.constant 0 : i32
    %c0_i32_1 = arith.constant 0 : i32
    return %c0_i32, %c0_i32_0 : i32, i32
  }
  func.func @transform_6(%arg0: i32) -> (i32, i32) {
    %c0_i32 = arith.constant 0 : i32
    %c0_i32_0 = arith.constant 0 : i32
    %c0_i32_1 = arith.constant 0 : i32
    return %c0_i32, %c0_i32_0 : i32, i32
  }
  func.func @transform_7(%arg0: i32) -> (i32, i32) {
    %c0_i32 = arith.constant 0 : i32
    %c0_i32_0 = arith.constant 0 : i32
    %c0_i32_1 = arith.constant 0 : i32
    return %c0_i32, %c0_i32_0 : i32, i32
  }
  func.func @transform_8(%arg0: i32) -> (i32, i32) {
    %c0_i32 = arith.constant 0 : i32
    %c0_i32_0 = arith.constant 0 : i32
    return %arg0, %c0_i32 : i32, i32
  }
}

</mosaic_0001>

<bundles_post_ra>
// kernel: separate_non_local_forward.4
= control target key start
LH: loop header
LB: loop body
LE: loop exit
PB: predicated region body
PF: predicated region fallthrough
CT: control target
= control target key end

     0   :  { %17 = vsyncpa [#allocation3], 0  ;;  %s4482_s0 = inlined_call_operand.hbm [shape: f32[2048,32], index: 0, kind: input, shape index: {}]   ;;  %s4483_s1 = inlined_call_operand.vmem [shape: bf16[9,32,16], index: 1, kind: input, shape index: {}]   ;;  %s4484_s2 = inlined_call_operand.vmem [shape: f32[9,1,16], index: 2, kind: input, shape index: {}]   ;;  %s4485_s3 = inlined_call_operand.vmem [shape: bf16[2048,16], index: 3, kind: output, shape index: {0}]   ;;  %s4486_s4 = inlined_call_operand.vmem [shape: bf16[2048,16], index: 4, kind: output, shape index: {1}]   ;;  %s4487_s5 = inlined_call_operand.vmem [shape: bf16[2048,16], index: 5, kind: output, shape index: {2}]   ;;  %s4488_s6 = inlined_call_operand.vmem [shape: bf16[2048,16], index: 6, kind: output, shape index: {3}]   ;;  %s4489_s7 = inlined_call_operand.vmem [shape: bf16[2048,16], index: 7, kind: output, shape index: {4}]   ;;  %s4490_s8 = inlined_call_operand.vmem [shape: bf16[2048,16], index: 8, kind: output, shape index: {5}]   ;;  %s4491_s9 = inlined_call_operand.vmem [shape: bf16[2048,16], index: 9, kind: output, shape index: {6}]   ;;  %s4492_s10 = inlined_call_operand.vmem [shape: bf16[2048,16], index: 10, kind: output, shape index: {7}]   ;;  %s4493_s11 = inlined_call_operand.vmem [shape: bf16[2048,16], index: 11, kind: output, shape index: {8}]  }
   0x1   :  { %19 = vsyncpa [#allocation3 + $0x1], 0  ;;  %s3023_s17 = smov 0   ;;  %s3025_s18 = smov 0  }
   0x2   :  { %s3027_s19 = smov 0   ;;  %s3029_s20 = smov 0  }
   0x3 LB: > { %s4494_s21 = sadd.s32 4294967295, %s2959_s20   ;;  %s3043_s22 = sadd.s32 1, %s2959_s20   ;;  %s2959_s20 = sphi %s3029_s20, %s4504_s20   ;;  %s2955_s19 = sphi %s3027_s19, %s4503_s19   ;;  %s2951_s18 = sphi %s3025_s18, %s4502_s18   ;;  %s2947_s17 = sphi %s3023_s17, %s4501_s17  }
   0x4   : > { %s29_s23 = ssub.s32 %s2959_s20, %s3043_s22  ;;  %s32_s24 = sadd.s32 1, %s2955_s19 }
   0x5   : > { %p30_p0 = scmp.eq.s32.totalorder %s29_s23, 0  ;;  %p39_p1 = scmp.ne.s32.totalorder %s2955_s19, %s2951_s18 }
   0x6   : > { %p40_p2 = scmp.eq.s32.totalorder %s2959_s20, 0  ;;  %p45_p3 = scmp.ne.s32.totalorder %s2951_s18, %s2947_s17 }
   0x7   : > { %s3053_s25 = scalar_select %p30_p0, %s2955_s19, %s32_s24  }
   0x8   : > { %p3055_p4 = por %p40_p2, %p39_p1  ;;  %p46_p5 = scmp.eq.s32.totalorder %s4494_s21, 0 }
   0x9   : > { %4495 = sst [smem:[#allocation5_spill]] %s3053_s25  ;;  %p2843_p6 = scmp.lt.s32.totalorder %s2959_s20, 8 }
   0xa   : > { %p3062_p7 = por %p46_p5, %p45_p3  ;;  %s351_s28 = sand.u32 1, %s2955_s19  }
   0xb   : > { %s2531_s29 = sshll.u32 %s351_s28, 8  ;;  %s2812_s30 = sshll.u32 %s2959_s20, 8 }
   0xc   : > { %s360_s14 = scalar_lea.hbm %s4482_s0, %s2812_s30  ;;  %s355_s15 = scalar_lea.vmem [#allocation2], %s2531_s29 }
   0xd   : > { %s363_s16 = sshll.u32 %s355_s15, 4  ;;  %s361_s17 = sshll.u32 %s360_s14, 4  ;;  %s364_s16 = int_to_ptr.vmem [resolvable:$true] %s363_s16  ;;  %s362_s17 = int_to_ptr.hbm [resolvable:$true] %s361_s17 }
   0xe   : > { %p3073_p8 = pnand %p2843_p6, %p3055_p4  ;;  %p2534_p9 = scmp.ge.s32.totalorder %s2959_s20, 1 }
   0xf   : > { %s352_s24 = scalar_lea.sflag [#allocation3], %s351_s28  ;;  %s2895_s21 = sshra.s32 %s362_s17, 4  ;;  %s2896_s21 = int_to_ptr.hbm [resolvable:$true] %s2895_s21 }
  0x10   : > { %s2897_s25 = scalar_lea.hbm %s2896_s21, 256  ;;  %p2899_p11 = pneg %p3073_p8 }
  0x11   : > { %p2898_p10 = scmp.ne.s32.totalorder %s2896_s21, %s2897_s25  ;;  %s2902_s12 = scalar_lea.hbm %s4482_s0, 2048 }
  0x12   : > { %p2903_p0 = scmp.lt.s32.totalorder %s2896_s21, %s4482_s0  ;;  %p2904_p1 = scmp.lt.s32.totalorder %s2902_s12, %s2897_s25 }
  0x13   : > { %p2900_p12 = pnand %p2899_p11, %p2898_p10 }
  0x14   : > { %p2905_p2 = por %p2904_p1, %p2903_p0 }
  0x15   : > { %p2901_p13 = pneg %p2900_p12 }
  0x17   : > { %p2906_p3 = pnand %p2905_p2, %p2901_p13 }
  0x19   : > { %2909 = shalt.err (!%p2906_p3)
}
  0x1a   : > { %s2961_s28 = smov 128   ;;  %s2962_s14 = smov 8  }
  0x1b   : > { %2842 = dma.hbm_to_vmem [thread:$0]  (!%p3073_p8), %s362_s17, 4096, %s364_s16, %s352_s24, %s2961_s28, %s2961_s28, %s2962_s14  }
  0x1c   : > { %p371_p4 = scmp.lt.s32.totalorder %s2959_s20, 9 }
  0x1e   : > { %p372_p5 = pnand %p2534_p9, %p371_p4 }
  0x1f   : > { %s377_s15 = sand.u32 (!%p372_p5), 1, %s2951_s18  }
  0x20   : > { %375 = sbr.rel (%p372_p5) target bundleno = 753 (0x2f1), region = 32  ;;  %s2535_s29 = sshll.u32 (!%p372_p5), %s377_s15, 8 }
  0x21   : > { %s378_s21 = scalar_lea.sflag (!%p372_p5), [#allocation3], %s377_s15  ;;  %s3092_s25 = scalar_lea.vmem (!%p372_p5), [#allocation2], %s2535_s29 }
  0x25   : > { %2942 = dma.done.wait (%p3062_p7), %s378_s21, 4096  }
  0x26   : > { %2944 = vsyncadd (%p3062_p7), %s378_s21, 4294963200  ;;  %v2814_v0 = vld [vmem:[%s4483_s1 + $0x8] sm:$0xff]  ;;  %v2813_v1 = vld [vmem:[%s4483_s1] sm:$0xff]  ;;  %vm585_vm0 = vcmask 261120   ;;  %vm755_vm1 = vcmask 125952  }
  0x27   : > { %v517_v2 = vld [vmem:[%s3092_s25] sm:$0xff]  ;;  %v518_v3 = vld [vmem:[%s3092_s25 + $0x8] sm:$0xff]  ;;  %640 = vmatpush.bf16.msra.mxu0 %v2814_v0  ;;  %2831 = vmatpush.bf16.msra.mxu1 %v2814_v0  ;;  %v2820_v11 = vld [vmem:[%s4483_s1 + $0x38] sm:$0xff] }
  0x28   : > { %v525_v4 = vld [vmem:[%s3092_s25 + $0x40] sm:$0xff]  ;;  %v526_v5 = vld [vmem:[%s3092_s25 + $0x48] sm:$0xff]  ;;  %2832 = vmatpush.bf16.msra.mxu2 %v2814_v0  ;;  %2833 = vmatpush.bf16.msra.mxu3 %v2814_v0  ;;  %v3118_v12 = vpack.c.bf16 %v518_v3, %v517_v2  ;;  %v2816_v16 = vld [vmem:[%s4483_s1 + $0x18] sm:$0xff] }
  0x29   : > { %v533_v6 = vld [vmem:[%s3092_s25 + $0x80] sm:$0xff]  ;;  %v534_v7 = vld [vmem:[%s3092_s25 + $0x88] sm:$0xff]  ;;  %v3120_v13 = vpack.c.bf16 %v526_v5, %v525_v4  ;;  %v2819_v19 = vld [vmem:[%s4483_s1 + $0x30] sm:$0xff] }
  0x2a   : > { %v541_v8 = vld [vmem:[%s3092_s25 + $0xc0] sm:$0xff]  ;;  %v542_v9 = vld [vmem:[%s3092_s25 + $0xc8] sm:$0xff]  ;;  %v3122_v14 = vpack.c.bf16 %v534_v7, %v533_v6  ;;  %v2815_v20 = vld [vmem:[%s4483_s1 + $0x10] sm:$0xff] }
  0x2b   : > { %v2818_v10 = vld [vmem:[%s4483_s1 + $0x28] sm:$0xff]  ;;  %641 = vmatpush.bf16.msra.mxu0 %v2813_v1  ;;  %2834 = vmatpush.bf16.msra.mxu1 %v2813_v1  ;;  %v3124_v15 = vpack.c.bf16 %v542_v9, %v541_v8  ;;  %v2817_v18 = vld [vmem:[%s4483_s1 + $0x20] sm:$0xff]  ;;  %v519_v22 = vld [vmem:[%s3092_s25 + $0x10] sm:$0xff] }
  0x2c   : > { %2835 = vmatpush.bf16.msra.mxu2 %v2813_v1  ;;  %2836 = vmatpush.bf16.msra.mxu3 %v2813_v1  ;;  %v2822_v17 = vld [vmem:[%s4483_s1 + $0x48] sm:$0xff]  ;;  %v2821_v21 = vld [vmem:[%s4483_s1 + $0x40] sm:$0xff]  ;;  %v520_v23 = vld [vmem:[%s3092_s25 + $0x18] sm:$0xff] }
  0x2d   : > { %v527_v24 = vld [vmem:[%s3092_s25 + $0x50] sm:$0xff]  ;;  %v528_v25 = vld [vmem:[%s3092_s25 + $0x58] sm:$0xff]  ;;  %v3160_v30 = vpack.c.bf16 %v520_v23, %v519_v22  ;;  %v521_v34 = vld [vmem:[%s3092_s25 + $0x20] sm:$0xff] }
  0x2e   : > { %2562 = vmatmul.msk.bf16.vlgmr.msra.gmra.mxu0 %vm585_vm0, %v3118_v12  ;;  %2566 = vmatmul.msk.bf16.vlgmr.msra.gmra.mxu1 %vm585_vm0, %v3120_v13  ;;  %v535_v26 = vld [vmem:[%s3092_s25 + $0x90] sm:$0xff]  ;;  %v536_v27 = vld [vmem:[%s3092_s25 + $0x98] sm:$0xff]  ;;  %v3162_v31 = vpack.c.bf16 %v528_v25, %v527_v24  ;;  %v522_v35 = vld [vmem:[%s3092_s25 + $0x28] sm:$0xff] }
  0x2f   : > { %2570 = vmatmul.msk.bf16.vlgmr.msra.gmra.mxu2 %vm585_vm0, %v3122_v14  ;;  %2574 = vmatmul.msk.bf16.vlgmr.msra.gmra.mxu3 %vm585_vm0, %v3124_v15  ;;  %v543_v28 = vld [vmem:[%s3092_s25 + $0xd0] sm:$0xff]  ;;  %v544_v29 = vld [vmem:[%s3092_s25 + $0xd8] sm:$0xff]  ;;  %v3164_v32 = vpack.c.bf16 %v536_v27, %v535_v26  ;;  %v529_v36 = vld [vmem:[%s3092_s25 + $0x60] sm:$0xff]  ;;  %v3184_v42 = vpack.c.bf16 %v522_v35, %v521_v34 }
  0x30   : > { %991 = vmatpush.bf16.msrb.mxu2 %v2818_v10  ;;  %1166 = vmatpush.bf16.msrb.mxu3 %v2820_v11  ;;  %v3166_v33 = vpack.c.bf16 %v544_v29, %v543_v28  ;;  %v530_v37 = vld [vmem:[%s3092_s25 + $0x68] sm:$0xff]  ;;  %v537_v38 = vld [vmem:[%s3092_s25 + $0xa0] sm:$0xff]  ;;  %v2828_v47 = vld [vmem:[%s4483_s1 + $0x78] sm:$0xff] }
  0x31   : > { %816 = vmatpush.bf16.msrb.mxu1 %v2816_v16  ;;  %1341 = vmatpush.bf16.msrb.mxu0 %v2822_v17  ;;  %v538_v39 = vld [vmem:[%s3092_s25 + $0xa8] sm:$0xff]  ;;  %v545_v40 = vld [vmem:[%s3092_s25 + $0xe0] sm:$0xff]  ;;  %v3186_v43 = vpack.c.bf16 %v530_v37, %v529_v36  ;;  %v2824_v48 = vld [vmem:[%s4483_s1 + $0x58] sm:$0xff] }
  0x32   : > { %v546_v41 = vld [vmem:[%s3092_s25 + $0xe8] sm:$0xff]  ;;  %v3188_v44 = vpack.c.bf16 %v538_v39, %v537_v38  ;;  %v523_v50 = vld [vmem:[%s3092_s25 + $0x30] sm:$0xff]  ;;  %v524_v51 = vld [vmem:[%s3092_s25 + $0x38] sm:$0xff] }
  0x33   : > { %v3190_v45 = vpack.c.bf16 %v546_v41, %v545_v40  ;;  %v2826_v46 = vld [vmem:[%s4483_s1 + $0x68] sm:$0xff]  ;;  %v531_v52 = vld [vmem:[%s3092_s25 + $0x70] sm:$0xff]  ;;  %v532_v53 = vld [vmem:[%s3092_s25 + $0x78] sm:$0xff]  ;;  %v3220_v58 = vpack.c.bf16 %v524_v51, %v523_v50 }
  0x34   : > { %992 = vmatpush.bf16.msrb.mxu2 %v2817_v18  ;;  %1167 = vmatpush.bf16.msrb.mxu3 %v2819_v19  ;;  %v2830_v49 = vld [vmem:[%s4483_s1 + $0x88] sm:$0xff]  ;;  %v539_v54 = vld [vmem:[%s3092_s25 + $0xb0] sm:$0xff]  ;;  %v540_v55 = vld [vmem:[%s3092_s25 + $0xb8] sm:$0xff]  ;;  %v3222_v59 = vpack.c.bf16 %v532_v53, %v531_v52 }
  0x35   : > { %817 = vmatpush.bf16.msrb.mxu1 %v2815_v20  ;;  %1342 = vmatpush.bf16.msrb.mxu0 %v2821_v21  ;;  %v547_v56 = vld [vmem:[%s3092_s25 + $0xf0] sm:$0xff]  ;;  %v548_v57 = vld [vmem:[%s3092_s25 + $0xf8] sm:$0xff]  ;;  %v3224_v60 = vpack.c.bf16 %v540_v55, %v539_v54  ;;  %s4499_s25 = sadd.s32 4294967295, %s2959_s20   ;;  %v3273_v62 = vld [vmem:[%s4484_s2] ss:$0 sm:$0xff] }
  0x36   : > { %v3226_v61 = vpack.c.bf16 %v548_v57, %v547_v56  ;;  %s2536_s30 = sshll.u32 %s4499_s25, 5 }
  0x37   : > { %p463_p6 = scmp.lt.s32.totalorder %s2536_s30, 255 }
  0x38   : > { %1691 = vmatpush.bf16.msra.mxu2 %v2826_v46  ;;  %1866 = vmatpush.bf16.msra.mxu3 %v2828_v47 }
  0x39   : > { %1516 = vmatpush.bf16.msra.mxu1 %v2824_v48  ;;  %2041 = vmatpush.bf16.msra.mxu0 %v2830_v49  ;;  %s4506_s30 = smov (!%p463_p6, %s2536_s30), 255 }
  0x3a   : > { %s3275_s17 = sshll.u32 %s4506_s30, 2 }
  0x3b   : > { %s3283_s20 = scalar_lea.vmem %s4485_s3, %s3275_s17  ;;  %s3435_s24 = scalar_lea.vmem %s4486_s4, %s3275_s17 }
  0x3c   : > { %s3447_s28 = scalar_lea.vmem %s4489_s7, %s3275_s17  ;;  %s3475_s12 = scalar_lea.vmem %s4487_s5, %s3275_s17 }
  0x3d   : > { %s3483_s27 = scalar_lea.vmem %s4488_s6, %s3275_s17  ;;  %s3999_s15 = scalar_lea.vmem %s4493_s11, %s3275_s17 }
  0x3e   : > { %2563 = vmatmul.msk.bf16.gmra.mxu0 %vm585_vm0, %v3160_v30  ;;  %2567 = vmatmul.msk.bf16.gmra.mxu1 %vm585_vm0, %v3162_v31  ;;  %s4027_s16 = scalar_lea.vmem %s4491_s9, %s3275_s17  ;;  %s4035_s26 = scalar_lea.vmem %s4492_s10, %s3275_s17 }
  0x3f   : > { %2571 = vmatmul.msk.bf16.gmra.mxu2 %vm585_vm0, %v3164_v32  ;;  %2575 = vmatmul.msk.bf16.gmra.mxu3 %vm585_vm0, %v3166_v33 }
  0x4e   : > { %2564 = vmatmul.msk.bf16.gmra.mxu0 %vm585_vm0, %v3184_v42  ;;  %2568 = vmatmul.msk.bf16.gmra.mxu1 %vm585_vm0, %v3186_v43 }
  0x4f   : > { %2572 = vmatmul.msk.bf16.gmra.mxu2 %vm585_vm0, %v3188_v44  ;;  %2576 = vmatmul.msk.bf16.gmra.mxu3 %vm585_vm0, %v3190_v45 }
  0x5e   : > { %2565 = vmatmul.msk.bf16.gmra.mxu0 %vm585_vm0, %v3220_v58  ;;  %2569 = vmatmul.msk.bf16.gmra.mxu1 %vm585_vm0, %v3222_v59 }
  0x5f   : > { %2573 = vmatmul.msk.bf16.gmra.mxu2 %vm585_vm0, %v3224_v60  ;;  %2577 = vmatmul.msk.bf16.gmra.mxu3 %vm585_vm0, %v3226_v61 }
  0x6e   : > { %2591 = vmatmul.msk.bf16.vlgmr.msrb.gmra.mxu1 %vm585_vm0, %v3118_v12  ;;  %2678 = vmatmul.msk.bf16.vlgmr.msrb.gmra.mxu0 %vm585_vm0, %v3118_v12 }
  0x6f   : > { %2620 = vmatmul.msk.bf16.vlgmr.msrb.gmra.mxu2 %vm585_vm0, %v3118_v12  ;;  %2649 = vmatmul.msk.bf16.vlgmr.msrb.gmra.mxu3 %vm585_vm0, %v3118_v12 }
  0x7e   : > { %2592 = vmatmul.msk.bf16.gmra.mxu1 %vm585_vm0, %v3160_v30  ;;  %2679 = vmatmul.msk.bf16.gmra.mxu0 %vm585_vm0, %v3160_v30 }
  0x7f   : > { %2621 = vmatmul.msk.bf16.gmra.mxu2 %vm585_vm0, %v3160_v30  ;;  %2650 = vmatmul.msk.bf16.gmra.mxu3 %vm585_vm0, %v3160_v30 }
  0x8e   : > { %2593 = vmatmul.msk.bf16.gmra.mxu1 %vm585_vm0, %v3184_v42  ;;  %2680 = vmatmul.msk.bf16.gmra.mxu0 %vm585_vm0, %v3184_v42 }
  0x8f   : > { %2622 = vmatmul.msk.bf16.gmra.mxu2 %vm585_vm0, %v3184_v42  ;;  %2651 = vmatmul.msk.bf16.gmra.mxu3 %vm585_vm0, %v3184_v42 }
  0x9e   : > { %2594 = vmatmul.msk.bf16.gmra.mxu1 %vm585_vm0, %v3220_v58  ;;  %2681 = vmatmul.msk.bf16.gmra.mxu0 %vm585_vm0, %v3220_v58 }
  0x9f   : > { %2623 = vmatmul.msk.bf16.gmra.mxu2 %vm585_vm0, %v3220_v58  ;;  %2652 = vmatmul.msk.bf16.gmra.mxu3 %vm585_vm0, %v3220_v58 }
  0xab   : > { %v643_v63 = vpop.f32.mrf.mxu0  ;;  %v663_v0 = vpop.f32.mrf.mxu1 }
  0xac   : > { %v644_v1 = vadd.f32 %v3273_v62, %v643_v63  ;;  %v664_v2 = vadd.f32 %v3273_v62, %v663_v0 }
  0xae   : > { %v723_v3 = vpack.c.bf16 %v644_v1, %v644_v1  ;;  %v731_v4 = vpack.c.bf16 %v664_v2, %v664_v2  ;;  %2595 = vmatmul.msk.bf16.gmra.mxu1 %vm585_vm0, %v3120_v13  ;;  %2682 = vmatmul.msk.bf16.gmra.mxu0 %vm585_vm0, %v3120_v13 }
  0xaf   : > { %2624 = vmatmul.msk.bf16.gmra.mxu2 %vm585_vm0, %v3120_v13  ;;  %2653 = vmatmul.msk.bf16.gmra.mxu3 %vm585_vm0, %v3120_v13 }
  0xb0   : > { %756 = vst.msk [vmem:[%s3283_s20] sm:$0xf] %vm755_vm1, %v723_v3 }
  0xb1   : > { %764 = vst.msk [vmem:[%s3283_s20 + $0x20] sm:$0xf] %vm755_vm1, %v731_v4 }
  0xb2   : > { %v683_v5 = vpop.f32.mrf.mxu2  ;;  %v703_v6 = vpop.f32.mrf.mxu3 }
  0xb3   : > { %v684_v7 = vadd.f32 %v3273_v62, %v683_v5  ;;  %v704_v8 = vadd.f32 %v3273_v62, %v703_v6  ;;  %v645_v9 = vpop.f32.mrf.mxu0  ;;  %v665_v10 = vpop.f32.mrf.mxu1 }
  0xb4   : > { %v646_v11 = vadd.f32 %v3273_v62, %v645_v9  ;;  %v666_v16 = vadd.f32 %v3273_v62, %v665_v10  ;;  %v2827_v9 = vld [vmem:[%s4483_s1 + $0x70] sm:$0xff] }
  0xb5   : > { %v739_v17 = vpack.c.bf16 %v684_v7, %v684_v7  ;;  %v747_v18 = vpack.c.bf16 %v704_v8, %v704_v8  ;;  %v2825_v8 = vld [vmem:[%s4483_s1 + $0x60] sm:$0xff]  ;;  %1867 = vmatpush.bf16.msra.mxu3 %v2827_v9 }
  0xb6   : > { %v724_v19 = vpack.c.bf16 %v646_v11, %v646_v11  ;;  %v732_v20 = vpack.c.bf16 %v666_v16, %v666_v16  ;;  %1692 = vmatpush.bf16.msra.mxu2 %v2825_v8 }
  0xb7   : > { %772 = vst.msk [vmem:[%s3283_s20 + $0x40] sm:$0xf] %vm755_vm1, %v739_v17 }
  0xb8   : > { %780 = vst.msk [vmem:[%s3283_s20 + $0x60] sm:$0xf] %vm755_vm1, %v747_v18 }
  0xb9   : > { %757 = vst.msk [vmem:[%s3283_s20 + $0x4] sm:$0xf] %vm755_vm1, %v724_v19 }
  0xba   : > { %765 = vst.msk [vmem:[%s3283_s20 + $0x24] sm:$0xf] %vm755_vm1, %v732_v20  ;;  %v685_v21 = vpop.f32.mrf.mxu2  ;;  %v705_v22 = vpop.f32.mrf.mxu3 }
  0xbb   : > { %v686_v23 = vadd.f32 %v3273_v62, %v685_v21  ;;  %v706_v24 = vadd.f32 %v3273_v62, %v705_v22  ;;  %v648_v25 = vpop.f32.mrf.mxu0  ;;  %v668_v26 = vpop.f32.mrf.mxu1 }
  0xbc   : > { %v649_v27 = vadd.f32 %v3273_v62, %v648_v25  ;;  %v669_v28 = vadd.f32 %v3273_v62, %v668_v26  ;;  %v2823_v26 = vld [vmem:[%s4483_s1 + $0x50] sm:$0xff] }
  0xbd   : > { %v740_v29 = vpack.c.bf16 %v686_v23, %v686_v23  ;;  %v748_v34 = vpack.c.bf16 %v706_v24, %v706_v24  ;;  %1517 = vmatpush.bf16.msra.mxu1 %v2823_v26 }
  0xbe   : > { %v725_v35 = vpack.c.bf16 %v649_v27, %v649_v27  ;;  %v733_v36 = vpack.c.bf16 %v669_v28, %v669_v28  ;;  %2596 = vmatmul.msk.bf16.gmra.mxu1 %vm585_vm0, %v3162_v31  ;;  %2683 = vmatmul.msk.bf16.gmra.mxu0 %vm585_vm0, %v3162_v31  ;;  %v2829_v27 = vld [vmem:[%s4483_s1 + $0x80] sm:$0xff] }
  0xbf   : > { %773 = vst.msk [vmem:[%s3283_s20 + $0x44] sm:$0xf] %vm755_vm1, %v740_v29  ;;  %2625 = vmatmul.msk.bf16.gmra.mxu2 %vm585_vm0, %v3162_v31  ;;  %2654 = vmatmul.msk.bf16.gmra.mxu3 %vm585_vm0, %v3162_v31 }
  0xc0   : > { %781 = vst.msk [vmem:[%s3283_s20 + $0x64] sm:$0xf] %vm755_vm1, %v748_v34  ;;  %2042 = vmatpush.bf16.msra.mxu0 %v2829_v27 }
  0xc1   : > { %758 = vst.msk [vmem:[%s3283_s20 + $0x8] sm:$0xf] %vm755_vm1, %v725_v35 }
  0xc2   : > { %766 = vst.msk [vmem:[%s3283_s20 + $0x28] sm:$0xf] %vm755_vm1, %v733_v36  ;;  %v688_v37 = vpop.f32.mrf.mxu2  ;;  %v708_v38 = vpop.f32.mrf.mxu3 }
  0xc3   : > { %v689_v39 = vadd.f32 %v3273_v62, %v688_v37  ;;  %v709_v40 = vadd.f32 %v3273_v62, %v708_v38  ;;  %v650_v41 = vpop.f32.mrf.mxu0  ;;  %v670_v46 = vpop.f32.mrf.mxu1 }
  0xc4   : > { %v651_v47 = vadd.f32 %v3273_v62, %v650_v41  ;;  %v671_v48 = vadd.f32 %v3273_v62, %v670_v46 }
  0xc5   : > { %v741_v49 = vpack.c.bf16 %v689_v39, %v689_v39  ;;  %v749_v50 = vpack.c.bf16 %v709_v40, %v709_v40 }
  0xc6   : > { %v726_v51 = vpack.c.bf16 %v651_v47, %v651_v47  ;;  %v734_v52 = vpack.c.bf16 %v671_v48, %v671_v48 }
  0xc7   : > { %774 = vst.msk [vmem:[%s3283_s20 + $0x48] sm:$0xf] %vm755_vm1, %v741_v49 }
  0xc8   : > { %782 = vst.msk [vmem:[%s3283_s20 + $0x68] sm:$0xf] %vm755_vm1, %v749_v50 }
  0xc9   : > { %759 = vst.msk [vmem:[%s3283_s20 + $0xc] sm:$0xf] %vm755_vm1, %v726_v51 }
  0xca   : > { %767 = vst.msk [vmem:[%s3283_s20 + $0x2c] sm:$0xf] %vm755_vm1, %v734_v52  ;;  %v690_v53 = vpop.f32.mrf.mxu2  ;;  %v710_v54 = vpop.f32.mrf.mxu3 }
  0xcb   : > { %v691_v55 = vadd.f32 %v3273_v62, %v690_v53  ;;  %v711_v56 = vadd.f32 %v3273_v62, %v710_v54  ;;  %v653_v57 = vpop.f32.mrf.mxu0  ;;  %v673_v63 = vpop.f32.mrf.mxu1 }
  0xcc   : > { %v654_v0 = vadd.f32 %v3273_v62, %v653_v57  ;;  %v674_v1 = vadd.f32 %v3273_v62, %v673_v63  ;;  %v3416_v63 = vld [vmem:[%s4484_s2 + $0x1] ss:$0 sm:$0xff] }
  0xcd   : > { %v742_v2 = vpack.c.bf16 %v691_v55, %v691_v55  ;;  %v750_v3 = vpack.c.bf16 %v711_v56, %v711_v56 }
  0xce   : > { %v727_v4 = vpack.c.bf16 %v654_v0, %v654_v0  ;;  %v735_v5 = vpack.c.bf16 %v674_v1, %v674_v1  ;;  %2597 = vmatmul.msk.bf16.gmra.mxu1 %vm585_vm0, %v3186_v43  ;;  %2684 = vmatmul.msk.bf16.gmra.mxu0 %vm585_vm0, %v3186_v43  ;;  %v3421_v0 = vld [vmem:[%s4484_s2 + $0x4] ss:$0 sm:$0xff] }
  0xcf   : > { %775 = vst.msk [vmem:[%s3283_s20 + $0x4c] sm:$0xf] %vm755_vm1, %v742_v2  ;;  %2626 = vmatmul.msk.bf16.gmra.mxu2 %vm585_vm0, %v3186_v43  ;;  %2655 = vmatmul.msk.bf16.gmra.mxu3 %vm585_vm0, %v3186_v43 }
  0xd0   : > { %783 = vst.msk [vmem:[%s3283_s20 + $0x6c] sm:$0xf] %vm755_vm1, %v750_v3 }
  0xd1   : > { %760 = vst.msk [vmem:[%s3283_s20 + $0x10] sm:$0xf] %vm755_vm1, %v727_v4 }
  0xd2   : > { %768 = vst.msk [vmem:[%s3283_s20 + $0x30] sm:$0xf] %vm755_vm1, %v735_v5  ;;  %v693_v6 = vpop.f32.mrf.mxu2  ;;  %v713_v7 = vpop.f32.mrf.mxu3 }
  0xd3   : > { %v694_v10 = vadd.f32 %v3273_v62, %v693_v6  ;;  %v714_v11 = vadd.f32 %v3273_v62, %v713_v7  ;;  %v655_v16 = vpop.f32.mrf.mxu0  ;;  %v675_v17 = vpop.f32.mrf.mxu1 }
  0xd4   : > { %v656_v18 = vadd.f32 %v3273_v62, %v655_v16  ;;  %v676_v19 = vadd.f32 %v3273_v62, %v675_v17  ;;  %v3461_v17 = vld [vmem:[%s4484_s2 + $0x3] ss:$0 sm:$0xff] }
  0xd5   : > { %v743_v20 = vpack.c.bf16 %v694_v10, %v694_v10  ;;  %v751_v21 = vpack.c.bf16 %v714_v11, %v714_v11 }
  0xd6   : > { %v728_v22 = vpack.c.bf16 %v656_v18, %v656_v18  ;;  %v736_v23 = vpack.c.bf16 %v676_v19, %v676_v19 }
  0xd7   : > { %776 = vst.msk [vmem:[%s3283_s20 + $0x50] sm:$0xf] %vm755_vm1, %v743_v20 }
  0xd8   : > { %784 = vst.msk [vmem:[%s3283_s20 + $0x70] sm:$0xf] %vm755_vm1, %v751_v21 }
  0xd9   : > { %761 = vst.msk [vmem:[%s3283_s20 + $0x14] sm:$0xf] %vm755_vm1, %v728_v22 }
  0xda   : > { %769 = vst.msk [vmem:[%s3283_s20 + $0x34] sm:$0xf] %vm755_vm1, %v736_v23  ;;  %v695_v24 = vpop.f32.mrf.mxu2  ;;  %v715_v25 = vpop.f32.mrf.mxu3 }
  0xdb   : > { %v696_v28 = vadd.f32 %v3273_v62, %v695_v24  ;;  %v716_v29 = vadd.f32 %v3273_v62, %v715_v25  ;;  %v658_v34 = vpop.f32.mrf.mxu0  ;;  %v678_v35 = vpop.f32.mrf.mxu1 }
  0xdc   : > { %v659_v36 = vadd.f32 %v3273_v62, %v658_v34  ;;  %v679_v37 = vadd.f32 %v3273_v62, %v678_v35 }
  0xdd   : > { %v744_v38 = vpack.c.bf16 %v696_v28, %v696_v28  ;;  %v752_v39 = vpack.c.bf16 %v716_v29, %v716_v29 }
  0xde   : > { %v729_v40 = vpack.c.bf16 %v659_v36, %v659_v36  ;;  %v737_v41 = vpack.c.bf16 %v679_v37, %v679_v37  ;;  %2598 = vmatmul.msk.bf16.gmra.mxu1 %vm585_vm0, %v3222_v59  ;;  %2685 = vmatmul.msk.bf16.gmra.mxu0 %vm585_vm0, %v3222_v59 }
  0xdf   : > { %777 = vst.msk [vmem:[%s3283_s20 + $0x54] sm:$0xf] %vm755_vm1, %v744_v38  ;;  %2627 = vmatmul.msk.bf16.gmra.mxu2 %vm585_vm0, %v3222_v59  ;;  %2656 = vmatmul.msk.bf16.gmra.mxu3 %vm585_vm0, %v3222_v59 }
  0xe0   : > { %785 = vst.msk [vmem:[%s3283_s20 + $0x74] sm:$0xf] %vm755_vm1, %v752_v39 }
  0xe1   : > { %762 = vst.msk [vmem:[%s3283_s20 + $0x18] sm:$0xf] %vm755_vm1, %v729_v40 }
  0xe2   : > { %770 = vst.msk [vmem:[%s3283_s20 + $0x38] sm:$0xf] %vm755_vm1, %v737_v41  ;;  %v698_v46 = vpop.f32.mrf.mxu2  ;;  %v718_v47 = vpop.f32.mrf.mxu3 }
  0xe3   : > { %v699_v48 = vadd.f32 %v3273_v62, %v698_v46  ;;  %v719_v49 = vadd.f32 %v3273_v62, %v718_v47  ;;  %v660_v50 = vpop.f32.mrf.mxu0  ;;  %v680_v51 = vpop.f32.mrf.mxu1 }
  0xe4   : > { %v661_v52 = vadd.f32 %v3273_v62, %v660_v50  ;;  %v681_v53 = vadd.f32 %v3273_v62, %v680_v51 }
  0xe5   : > { %v745_v54 = vpack.c.bf16 %v699_v48, %v699_v48  ;;  %v753_v55 = vpack.c.bf16 %v719_v49, %v719_v49 }
  0xe6   : > { %v730_v56 = vpack.c.bf16 %v661_v52, %v661_v52  ;;  %v738_v57 = vpack.c.bf16 %v681_v53, %v681_v53 }
  0xe7   : > { %778 = vst.msk [vmem:[%s3283_s20 + $0x58] sm:$0xf] %vm755_vm1, %v745_v54 }
  0xe8   : > { %786 = vst.msk [vmem:[%s3283_s20 + $0x78] sm:$0xf] %vm755_vm1, %v753_v55 }
  0xe9   : > { %763 = vst.msk [vmem:[%s3283_s20 + $0x1c] sm:$0xf] %vm755_vm1, %v730_v56 }
  0xea   : > { %771 = vst.msk [vmem:[%s3283_s20 + $0x3c] sm:$0xf] %vm755_vm1, %v738_v57  ;;  %v700_v1 = vpop.f32.mrf.mxu2  ;;  %v720_v2 = vpop.f32.mrf.mxu3 }
  0xeb   : > { %v701_v3 = vadd.f32 %v3273_v62, %v700_v1  ;;  %v721_v4 = vadd.f32 %v3273_v62, %v720_v2  ;;  %v819_v5 = vpop.f32.mrf.mxu1  ;;  %v1344_v6 = vpop.f32.mrf.mxu0  ;;  %v3456_v62 = vld [vmem:[%s4484_s2 + $0x2] ss:$0 sm:$0xff] }
  0xec   : > { %v820_v7 = vadd.f32 %v3416_v63, %v819_v5  ;;  %v1345_v8 = vadd.f32 %v3421_v0, %v1344_v6 }
  0xed   : > { %v746_v9 = vpack.c.bf16 %v701_v3, %v701_v3  ;;  %v754_v10 = vpack.c.bf16 %v721_v4, %v721_v4 }
  0xee   : > { %v899_v11 = vpack.c.bf16 %v820_v7, %v820_v7  ;;  %v1424_v16 = vpack.c.bf16 %v1345_v8, %v1345_v8  ;;  %2599 = vmatmul.msk.bf16.gmra.mxu1 %vm585_vm0, %v3122_v14  ;;  %2686 = vmatmul.msk.bf16.gmra.mxu0 %vm585_vm0, %v3122_v14 }
  0xef   : > { %779 = vst.msk [vmem:[%s3283_s20 + $0x5c] sm:$0xf] %vm755_vm1, %v746_v9  ;;  %2628 = vmatmul.msk.bf16.gmra.mxu2 %vm585_vm0, %v3122_v14  ;;  %2657 = vmatmul.msk.bf16.gmra.mxu3 %vm585_vm0, %v3122_v14 }
  0xf0   : > { %787 = vst.msk [vmem:[%s3283_s20 + $0x7c] sm:$0xf] %vm755_vm1, %v754_v10 }
  0xf1   : > { %931 = vst.msk [vmem:[%s3435_s24] sm:$0xf] %vm755_vm1, %v899_v11 }
  0xf2   : > { %1456 = vst.msk [vmem:[%s3447_s28] sm:$0xf] %vm755_vm1, %v1424_v16  ;;  %v994_v18 = vpop.f32.mrf.mxu2  ;;  %v1169_v19 = vpop.f32.mrf.mxu3 }
  0xf3   : > { %v995_v20 = vadd.f32 %v3456_v62, %v994_v18  ;;  %v1170_v21 = vadd.f32 %v3461_v17, %v1169_v19  ;;  %v821_v22 = vpop.f32.mrf.mxu1  ;;  %v1346_v23 = vpop.f32.mrf.mxu0 }
  0xf4   : > { %v822_v24 = vadd.f32 %v3416_v63, %v821_v22  ;;  %v1347_v25 = vadd.f32 %v3421_v0, %v1346_v23 }
  0xf5   : > { %v1074_v26 = vpack.c.bf16 %v995_v20, %v995_v20  ;;  %v1249_v27 = vpack.c.bf16 %v1170_v21, %v1170_v21 }
  0xf6   : > { %v900_v28 = vpack.c.bf16 %v822_v24, %v822_v24  ;;  %v1425_v29 = vpack.c.bf16 %v1347_v25, %v1347_v25 }
  0xf7   : > { %1106 = vst.msk [vmem:[%s3475_s12] sm:$0xf] %vm755_vm1, %v1074_v26 }
  0xf8   : > { %1281 = vst.msk [vmem:[%s3483_s27] sm:$0xf] %vm755_vm1, %v1249_v27 }
  0xf9   : > { %932 = vst.msk [vmem:[%s3435_s24 + $0x4] sm:$0xf] %vm755_vm1, %v900_v28 }
  0xfa   : > { %1457 = vst.msk [vmem:[%s3447_s28 + $0x4] sm:$0xf] %vm755_vm1, %v1425_v29  ;;  %v996_v34 = vpop.f32.mrf.mxu2  ;;  %v1171_v35 = vpop.f32.mrf.mxu3 }
  0xfb   : > { %v997_v36 = vadd.f32 %v3456_v62, %v996_v34  ;;  %v1172_v37 = vadd.f32 %v3461_v17, %v1171_v35  ;;  %v824_v38 = vpop.f32.mrf.mxu1  ;;  %v1349_v39 = vpop.f32.mrf.mxu0 }
  0xfc   : > { %v825_v40 = vadd.f32 %v3416_v63, %v824_v38  ;;  %v1350_v41 = vadd.f32 %v3421_v0, %v1349_v39 }
  0xfd   : > { %v1075_v46 = vpack.c.bf16 %v997_v36, %v997_v36  ;;  %v1250_v47 = vpack.c.bf16 %v1172_v37, %v1172_v37 }
  0xfe   : > { %v901_v48 = vpack.c.bf16 %v825_v40, %v825_v40  ;;  %v1426_v49 = vpack.c.bf16 %v1350_v41, %v1350_v41  ;;  %2600 = vmatmul.msk.bf16.gmra.mxu1 %vm585_vm0, %v3164_v32  ;;  %2687 = vmatmul.msk.bf16.gmra.mxu0 %vm585_vm0, %v3164_v32 }
  0xff   : > { %1107 = vst.msk [vmem:[%s3475_s12 + $0x4] sm:$0xf] %vm755_vm1, %v1075_v46  ;;  %2629 = vmatmul.msk.bf16.gmra.mxu2 %vm585_vm0, %v3164_v32  ;;  %2658 = vmatmul.msk.bf16.gmra.mxu3 %vm585_vm0, %v3164_v32 }
 0x100   : > { %1282 = vst.msk [vmem:[%s3483_s27 + $0x4] sm:$0xf] %vm755_vm1, %v1250_v47 }
 0x101   : > { %933 = vst.msk [vmem:[%s3435_s24 + $0x8] sm:$0xf] %vm755_vm1, %v901_v48 }
 0x102   : > { %1458 = vst.msk [vmem:[%s3447_s28 + $0x8] sm:$0xf] %vm755_vm1, %v1426_v49  ;;  %v999_v50 = vpop.f32.mrf.mxu2  ;;  %v1174_v51 = vpop.f32.mrf.mxu3 }
 0x103   : > { %v1000_v52 = vadd.f32 %v3456_v62, %v999_v50  ;;  %v1175_v53 = vadd.f32 %v3461_v17, %v1174_v51  ;;  %v826_v54 = vpop.f32.mrf.mxu1  ;;  %v1351_v55 = vpop.f32.mrf.mxu0 }
 0x104   : > { %v827_v56 = vadd.f32 %v3416_v63, %v826_v54  ;;  %v1352_v57 = vadd.f32 %v3421_v0, %v1351_v55 }
 0x105   : > { %v1076_v1 = vpack.c.bf16 %v1000_v52, %v1000_v52  ;;  %v1251_v2 = vpack.c.bf16 %v1175_v53, %v1175_v53 }
 0x106   : > { %v902_v3 = vpack.c.bf16 %v827_v56, %v827_v56  ;;  %v1427_v4 = vpack.c.bf16 %v1352_v57, %v1352_v57 }
 0x107   : > { %1108 = vst.msk [vmem:[%s3475_s12 + $0x8] sm:$0xf] %vm755_vm1, %v1076_v1 }
 0x108   : > { %1283 = vst.msk [vmem:[%s3483_s27 + $0x8] sm:$0xf] %vm755_vm1, %v1251_v2 }
 0x109   : > { %934 = vst.msk [vmem:[%s3435_s24 + $0xc] sm:$0xf] %vm755_vm1, %v902_v3 }
 0x10a   : > { %1459 = vst.msk [vmem:[%s3447_s28 + $0xc] sm:$0xf] %vm755_vm1, %v1427_v4  ;;  %v1001_v5 = vpop.f32.mrf.mxu2  ;;  %v1176_v6 = vpop.f32.mrf.mxu3 }
 0x10b   : > { %v1002_v7 = vadd.f32 %v3456_v62, %v1001_v5  ;;  %v1177_v8 = vadd.f32 %v3461_v17, %v1176_v6  ;;  %v829_v9 = vpop.f32.mrf.mxu1  ;;  %v1354_v10 = vpop.f32.mrf.mxu0 }
 0x10c   : > { %v830_v11 = vadd.f32 %v3416_v63, %v829_v9  ;;  %v1355_v16 = vadd.f32 %v3421_v0, %v1354_v10 }
 0x10d   : > { %v1077_v18 = vpack.c.bf16 %v1002_v7, %v1002_v7  ;;  %v1252_v19 = vpack.c.bf16 %v1177_v8, %v1177_v8 }
 0x10e   : > { %v903_v20 = vpack.c.bf16 %v830_v11, %v830_v11  ;;  %v1428_v21 = vpack.c.bf16 %v1355_v16, %v1355_v16  ;;  %2601 = vmatmul.msk.bf16.gmra.mxu1 %vm585_vm0, %v3188_v44  ;;  %2688 = vmatmul.msk.bf16.gmra.mxu0 %vm585_vm0, %v3188_v44 }
 0x10f   : > { %1109 = vst.msk [vmem:[%s3475_s12 + $0xc] sm:$0xf] %vm755_vm1, %v1077_v18  ;;  %2630 = vmatmul.msk.bf16.gmra.mxu2 %vm585_vm0, %v3188_v44  ;;  %2659 = vmatmul.msk.bf16.gmra.mxu3 %vm585_vm0, %v3188_v44 }
 0x110   : > { %1284 = vst.msk [vmem:[%s3483_s27 + $0xc] sm:$0xf] %vm755_vm1, %v1252_v19 }
 0x111   : > { %935 = vst.msk [vmem:[%s3435_s24 + $0x10] sm:$0xf] %vm755_vm1, %v903_v20 }
 0x112   : > { %1460 = vst.msk [vmem:[%s3447_s28 + $0x10] sm:$0xf] %vm755_vm1, %v1428_v21  ;;  %v1004_v22 = vpop.f32.mrf.mxu2  ;;  %v1179_v23 = vpop.f32.mrf.mxu3 }
 0x113   : > { %v1005_v24 = vadd.f32 %v3456_v62, %v1004_v22  ;;  %v1180_v25 = vadd.f32 %v3461_v17, %v1179_v23  ;;  %v831_v26 = vpop.f32.mrf.mxu1  ;;  %v1356_v27 = vpop.f32.mrf.mxu0 }
 0x114   : > { %v832_v28 = vadd.f32 %v3416_v63, %v831_v26  ;;  %v1357_v29 = vadd.f32 %v3421_v0, %v1356_v27 }
 0x115   : > { %v1078_v34 = vpack.c.bf16 %v1005_v24, %v1005_v24  ;;  %v1253_v35 = vpack.c.bf16 %v1180_v25, %v1180_v25 }
 0x116   : > { %v904_v36 = vpack.c.bf16 %v832_v28, %v832_v28  ;;  %v1429_v37 = vpack.c.bf16 %v1357_v29, %v1357_v29 }
 0x117   : > { %1110 = vst.msk [vmem:[%s3475_s12 + $0x10] sm:$0xf] %vm755_vm1, %v1078_v34 }
 0x118   : > { %1285 = vst.msk [vmem:[%s3483_s27 + $0x10] sm:$0xf] %vm755_vm1, %v1253_v35 }
 0x119   : > { %936 = vst.msk [vmem:[%s3435_s24 + $0x14] sm:$0xf] %vm755_vm1, %v904_v36 }
 0x11a   : > { %1461 = vst.msk [vmem:[%s3447_s28 + $0x14] sm:$0xf] %vm755_vm1, %v1429_v37  ;;  %v1006_v38 = vpop.f32.mrf.mxu2  ;;  %v1181_v39 = vpop.f32.mrf.mxu3 }
 0x11b   : > { %v1007_v40 = vadd.f32 %v3456_v62, %v1006_v38  ;;  %v1182_v41 = vadd.f32 %v3461_v17, %v1181_v39  ;;  %v834_v46 = vpop.f32.mrf.mxu1  ;;  %v1359_v47 = vpop.f32.mrf.mxu0 }
 0x11c   : > { %v835_v48 = vadd.f32 %v3416_v63, %v834_v46  ;;  %v1360_v49 = vadd.f32 %v3421_v0, %v1359_v47 }
 0x11d   : > { %v1079_v50 = vpack.c.bf16 %v1007_v40, %v1007_v40  ;;  %v1254_v51 = vpack.c.bf16 %v1182_v41, %v1182_v41 }
 0x11e   : > { %v905_v52 = vpack.c.bf16 %v835_v48, %v835_v48  ;;  %v1430_v53 = vpack.c.bf16 %v1360_v49, %v1360_v49  ;;  %2602 = vmatmul.msk.bf16.gmra.mxu1 %vm585_vm0, %v3224_v60  ;;  %2689 = vmatmul.msk.bf16.gmra.mxu0 %vm585_vm0, %v3224_v60 }
 0x11f   : > { %1111 = vst.msk [vmem:[%s3475_s12 + $0x14] sm:$0xf] %vm755_vm1, %v1079_v50  ;;  %2631 = vmatmul.msk.bf16.gmra.mxu2 %vm585_vm0, %v3224_v60  ;;  %2660 = vmatmul.msk.bf16.gmra.mxu3 %vm585_vm0, %v3224_v60 }
 0x120   : > { %1286 = vst.msk [vmem:[%s3483_s27 + $0x14] sm:$0xf] %vm755_vm1, %v1254_v51 }
 0x121   : > { %937 = vst.msk [vmem:[%s3435_s24 + $0x18] sm:$0xf] %vm755_vm1, %v905_v52 }
 0x122   : > { %1462 = vst.msk [vmem:[%s3447_s28 + $0x18] sm:$0xf] %vm755_vm1, %v1430_v53  ;;  %v1009_v54 = vpop.f32.mrf.mxu2  ;;  %v1184_v55 = vpop.f32.mrf.mxu3 }
 0x123   : > { %v1010_v56 = vadd.f32 %v3456_v62, %v1009_v54  ;;  %v1185_v57 = vadd.f32 %v3461_v17, %v1184_v55  ;;  %v836_v1 = vpop.f32.mrf.mxu1  ;;  %v1361_v2 = vpop.f32.mrf.mxu0 }
 0x124   : > { %v837_v3 = vadd.f32 %v3416_v63, %v836_v1  ;;  %v1362_v4 = vadd.f32 %v3421_v0, %v1361_v2 }
 0x125   : > { %v1080_v5 = vpack.c.bf16 %v1010_v56, %v1010_v56  ;;  %v1255_v6 = vpack.c.bf16 %v1185_v57, %v1185_v57 }
 0x126   : > { %v906_v7 = vpack.c.bf16 %v837_v3, %v837_v3  ;;  %v1431_v8 = vpack.c.bf16 %v1362_v4, %v1362_v4 }
 0x127   : > { %1112 = vst.msk [vmem:[%s3475_s12 + $0x18] sm:$0xf] %vm755_vm1, %v1080_v5 }
 0x128   : > { %1287 = vst.msk [vmem:[%s3483_s27 + $0x18] sm:$0xf] %vm755_vm1, %v1255_v6 }
 0x129   : > { %938 = vst.msk [vmem:[%s3435_s24 + $0x1c] sm:$0xf] %vm755_vm1, %v906_v7 }
 0x12a   : > { %1463 = vst.msk [vmem:[%s3447_s28 + $0x1c] sm:$0xf] %vm755_vm1, %v1431_v8  ;;  %v1011_v9 = vpop.f32.mrf.mxu2  ;;  %v1186_v10 = vpop.f32.mrf.mxu3 }
 0x12b   : > { %v1012_v11 = vadd.f32 %v3456_v62, %v1011_v9  ;;  %v1187_v16 = vadd.f32 %v3461_v17, %v1186_v10  ;;  %v839_v18 = vpop.f32.mrf.mxu1  ;;  %v1364_v19 = vpop.f32.mrf.mxu0 }
 0x12c   : > { %v840_v20 = vadd.f32 %v3416_v63, %v839_v18  ;;  %v1365_v21 = vadd.f32 %v3421_v0, %v1364_v19 }
 0x12d   : > { %v1081_v22 = vpack.c.bf16 %v1012_v11, %v1012_v11  ;;  %v1256_v23 = vpack.c.bf16 %v1187_v16, %v1187_v16 }
 0x12e   : > { %v907_v24 = vpack.c.bf16 %v840_v20, %v840_v20  ;;  %v1432_v25 = vpack.c.bf16 %v1365_v21, %v1365_v21  ;;  %2603 = vmatmul.msk.bf16.gmra.mxu1 %vm585_vm0, %v3124_v15  ;;  %2690 = vmatmul.msk.bf16.gmra.mxu0 %vm585_vm0, %v3124_v15 }
 0x12f   : > { %1113 = vst.msk [vmem:[%s3475_s12 + $0x1c] sm:$0xf] %vm755_vm1, %v1081_v22  ;;  %2632 = vmatmul.msk.bf16.gmra.mxu2 %vm585_vm0, %v3124_v15  ;;  %2661 = vmatmul.msk.bf16.gmra.mxu3 %vm585_vm0, %v3124_v15 }
 0x130   : > { %1288 = vst.msk [vmem:[%s3483_s27 + $0x1c] sm:$0xf] %vm755_vm1, %v1256_v23 }
 0x131   : > { %939 = vst.msk [vmem:[%s3435_s24 + $0x20] sm:$0xf] %vm755_vm1, %v907_v24 }
 0x132   : > { %1464 = vst.msk [vmem:[%s3447_s28 + $0x20] sm:$0xf] %vm755_vm1, %v1432_v25  ;;  %v1014_v26 = vpop.f32.mrf.mxu2  ;;  %v1189_v27 = vpop.f32.mrf.mxu3 }
 0x133   : > { %v1015_v28 = vadd.f32 %v3456_v62, %v1014_v26  ;;  %v1190_v29 = vadd.f32 %v3461_v17, %v1189_v27  ;;  %v841_v34 = vpop.f32.mrf.mxu1  ;;  %v1366_v35 = vpop.f32.mrf.mxu0 }
 0x134   : > { %v842_v36 = vadd.f32 %v3416_v63, %v841_v34  ;;  %v1367_v37 = vadd.f32 %v3421_v0, %v1366_v35 }
 0x135   : > { %v1082_v38 = vpack.c.bf16 %v1015_v28, %v1015_v28  ;;  %v1257_v39 = vpack.c.bf16 %v1190_v29, %v1190_v29 }
 0x136   : > { %v908_v40 = vpack.c.bf16 %v842_v36, %v842_v36  ;;  %v1433_v41 = vpack.c.bf16 %v1367_v37, %v1367_v37 }
 0x137   : > { %1114 = vst.msk [vmem:[%s3475_s12 + $0x20] sm:$0xf] %vm755_vm1, %v1082_v38 }
 0x138   : > { %1289 = vst.msk [vmem:[%s3483_s27 + $0x20] sm:$0xf] %vm755_vm1, %v1257_v39 }
 0x139   : > { %940 = vst.msk [vmem:[%s3435_s24 + $0x24] sm:$0xf] %vm755_vm1, %v908_v40 }
 0x13a   : > { %1465 = vst.msk [vmem:[%s3447_s28 + $0x24] sm:$0xf] %vm755_vm1, %v1433_v41  ;;  %v1016_v46 = vpop.f32.mrf.mxu2  ;;  %v1191_v47 = vpop.f32.mrf.mxu3 }
 0x13b   : > { %v1017_v48 = vadd.f32 %v3456_v62, %v1016_v46  ;;  %v1192_v49 = vadd.f32 %v3461_v17, %v1191_v47  ;;  %v844_v50 = vpop.f32.mrf.mxu1  ;;  %v1369_v51 = vpop.f32.mrf.mxu0 }
 0x13c   : > { %v845_v52 = vadd.f32 %v3416_v63, %v844_v50  ;;  %v1370_v53 = vadd.f32 %v3421_v0, %v1369_v51 }
 0x13d   : > { %v1083_v54 = vpack.c.bf16 %v1017_v48, %v1017_v48  ;;  %v1258_v55 = vpack.c.bf16 %v1192_v49, %v1192_v49 }
 0x13e   : > { %v909_v56 = vpack.c.bf16 %v845_v52, %v845_v52  ;;  %v1434_v57 = vpack.c.bf16 %v1370_v53, %v1370_v53  ;;  %2604 = vmatmul.msk.bf16.gmra.mxu1 %vm585_vm0, %v3166_v33  ;;  %2691 = vmatmul.msk.bf16.gmra.mxu0 %vm585_vm0, %v3166_v33 }
 0x13f   : > { %1115 = vst.msk [vmem:[%s3475_s12 + $0x24] sm:$0xf] %vm755_vm1, %v1083_v54  ;;  %2633 = vmatmul.msk.bf16.gmra.mxu2 %vm585_vm0, %v3166_v33  ;;  %2662 = vmatmul.msk.bf16.gmra.mxu3 %vm585_vm0, %v3166_v33 }
 0x140   : > { %1290 = vst.msk [vmem:[%s3483_s27 + $0x24] sm:$0xf] %vm755_vm1, %v1258_v55 }
 0x141   : > { %941 = vst.msk [vmem:[%s3435_s24 + $0x28] sm:$0xf] %vm755_vm1, %v909_v56 }
 0x142   : > { %1466 = vst.msk [vmem:[%s3447_s28 + $0x28] sm:$0xf] %vm755_vm1, %v1434_v57  ;;  %v1019_v1 = vpop.f32.mrf.mxu2  ;;  %v1194_v2 = vpop.f32.mrf.mxu3 }
 0x143   : > { %v1020_v3 = vadd.f32 %v3456_v62, %v1019_v1  ;;  %v1195_v4 = vadd.f32 %v3461_v17, %v1194_v2  ;;  %v846_v5 = vpop.f32.mrf.mxu1  ;;  %v1371_v6 = vpop.f32.mrf.mxu0 }
 0x144   : > { %v847_v7 = vadd.f32 %v3416_v63, %v846_v5  ;;  %v1372_v8 = vadd.f32 %v3421_v0, %v1371_v6 }
 0x145   : > { %v1084_v9 = vpack.c.bf16 %v1020_v3, %v1020_v3  ;;  %v1259_v10 = vpack.c.bf16 %v1195_v4, %v1195_v4 }
 0x146   : > { %v910_v11 = vpack.c.bf16 %v847_v7, %v847_v7  ;;  %v1435_v16 = vpack.c.bf16 %v1372_v8, %v1372_v8 }
 0x147   : > { %1116 = vst.msk [vmem:[%s3475_s12 + $0x28] sm:$0xf] %vm755_vm1, %v1084_v9 }
 0x148   : > { %1291 = vst.msk [vmem:[%s3483_s27 + $0x28] sm:$0xf] %vm755_vm1, %v1259_v10 }
 0x149   : > { %942 = vst.msk [vmem:[%s3435_s24 + $0x2c] sm:$0xf] %vm755_vm1, %v910_v11 }
 0x14a   : > { %1467 = vst.msk [vmem:[%s3447_s28 + $0x2c] sm:$0xf] %vm755_vm1, %v1435_v16  ;;  %v1021_v18 = vpop.f32.mrf.mxu2  ;;  %v1196_v19 = vpop.f32.mrf.mxu3 }
 0x14b   : > { %v1022_v20 = vadd.f32 %v3456_v62, %v1021_v18  ;;  %v1197_v21 = vadd.f32 %v3461_v17, %v1196_v19  ;;  %v849_v22 = vpop.f32.mrf.mxu1  ;;  %v1374_v23 = vpop.f32.mrf.mxu0 }
 0x14c   : > { %v850_v24 = vadd.f32 %v3416_v63, %v849_v22  ;;  %v1375_v25 = vadd.f32 %v3421_v0, %v1374_v23 }
 0x14d   : > { %v1085_v26 = vpack.c.bf16 %v1022_v20, %v1022_v20  ;;  %v1260_v27 = vpack.c.bf16 %v1197_v21, %v1197_v21 }
 0x14e   : > { %v911_v28 = vpack.c.bf16 %v850_v24, %v850_v24  ;;  %v1436_v29 = vpack.c.bf16 %v1375_v25, %v1375_v25  ;;  %2605 = vmatmul.msk.bf16.gmra.mxu1 %vm585_vm0, %v3190_v45  ;;  %2692 = vmatmul.msk.bf16.gmra.mxu0 %vm585_vm0, %v3190_v45 }
 0x14f   : > { %1117 = vst.msk [vmem:[%s3475_s12 + $0x2c] sm:$0xf] %vm755_vm1, %v1085_v26  ;;  %2634 = vmatmul.msk.bf16.gmra.mxu2 %vm585_vm0, %v3190_v45  ;;  %2663 = vmatmul.msk.bf16.gmra.mxu3 %vm585_vm0, %v3190_v45 }
 0x150   : > { %1292 = vst.msk [vmem:[%s3483_s27 + $0x2c] sm:$0xf] %vm755_vm1, %v1260_v27 }
 0x151   : > { %943 = vst.msk [vmem:[%s3435_s24 + $0x30] sm:$0xf] %vm755_vm1, %v911_v28 }
 0x152   : > { %1468 = vst.msk [vmem:[%s3447_s28 + $0x30] sm:$0xf] %vm755_vm1, %v1436_v29  ;;  %v1024_v34 = vpop.f32.mrf.mxu2  ;;  %v1199_v35 = vpop.f32.mrf.mxu3 }
 0x153   : > { %v1025_v36 = vadd.f32 %v3456_v62, %v1024_v34  ;;  %v1200_v37 = vadd.f32 %v3461_v17, %v1199_v35  ;;  %v851_v38 = vpop.f32.mrf.mxu1  ;;  %v1376_v39 = vpop.f32.mrf.mxu0 }
 0x154   : > { %v852_v40 = vadd.f32 %v3416_v63, %v851_v38  ;;  %v1377_v41 = vadd.f32 %v3421_v0, %v1376_v39 }
 0x155   : > { %v1086_v46 = vpack.c.bf16 %v1025_v36, %v1025_v36  ;;  %v1261_v47 = vpack.c.bf16 %v1200_v37, %v1200_v37 }
 0x156   : > { %v912_v48 = vpack.c.bf16 %v852_v40, %v852_v40  ;;  %v1437_v49 = vpack.c.bf16 %v1377_v41, %v1377_v41 }
 0x157   : > { %1118 = vst.msk [vmem:[%s3475_s12 + $0x30] sm:$0xf] %vm755_vm1, %v1086_v46 }
 0x158   : > { %1293 = vst.msk [vmem:[%s3483_s27 + $0x30] sm:$0xf] %vm755_vm1, %v1261_v47 }
 0x159   : > { %944 = vst.msk [vmem:[%s3435_s24 + $0x34] sm:$0xf] %vm755_vm1, %v912_v48 }
 0x15a   : > { %1469 = vst.msk [vmem:[%s3447_s28 + $0x34] sm:$0xf] %vm755_vm1, %v1437_v49  ;;  %v1026_v50 = vpop.f32.mrf.mxu2  ;;  %v1201_v51 = vpop.f32.mrf.mxu3 }
 0x15b   : > { %v1027_v52 = vadd.f32 %v3456_v62, %v1026_v50  ;;  %v1202_v53 = vadd.f32 %v3461_v17, %v1201_v51  ;;  %v854_v54 = vpop.f32.mrf.mxu1  ;;  %v1379_v55 = vpop.f32.mrf.mxu0 }
 0x15c   : > { %v855_v56 = vadd.f32 %v3416_v63, %v854_v54  ;;  %v1380_v57 = vadd.f32 %v3421_v0, %v1379_v55 }
 0x15d   : > { %v1087_v1 = vpack.c.bf16 %v1027_v52, %v1027_v52  ;;  %v1262_v2 = vpack.c.bf16 %v1202_v53, %v1202_v53 }
 0x15e   : > { %v913_v3 = vpack.c.bf16 %v855_v56, %v855_v56  ;;  %v1438_v4 = vpack.c.bf16 %v1380_v57, %v1380_v57  ;;  %2606 = vmatmul.msk.bf16.gmra.mxu1 %vm585_vm0, %v3226_v61  ;;  %2693 = vmatmul.msk.bf16.gmra.mxu0 %vm585_vm0, %v3226_v61 }
 0x15f   : > { %1119 = vst.msk [vmem:[%s3475_s12 + $0x34] sm:$0xf] %vm755_vm1, %v1087_v1  ;;  %2635 = vmatmul.msk.bf16.gmra.mxu2 %vm585_vm0, %v3226_v61  ;;  %2664 = vmatmul.msk.bf16.gmra.mxu3 %vm585_vm0, %v3226_v61 }
 0x160   : > { %1294 = vst.msk [vmem:[%s3483_s27 + $0x34] sm:$0xf] %vm755_vm1, %v1262_v2 }
 0x161   : > { %945 = vst.msk [vmem:[%s3435_s24 + $0x38] sm:$0xf] %vm755_vm1, %v913_v3 }
 0x162   : > { %1470 = vst.msk [vmem:[%s3447_s28 + $0x38] sm:$0xf] %vm755_vm1, %v1438_v4  ;;  %v1029_v5 = vpop.f32.mrf.mxu2  ;;  %v1204_v6 = vpop.f32.mrf.mxu3 }
 0x163   : > { %v1030_v7 = vadd.f32 %v3456_v62, %v1029_v5  ;;  %v1205_v8 = vadd.f32 %v3461_v17, %v1204_v6  ;;  %v856_v9 = vpop.f32.mrf.mxu1  ;;  %v1381_v10 = vpop.f32.mrf.mxu0 }
 0x164   : > { %v857_v11 = vadd.f32 %v3416_v63, %v856_v9  ;;  %v1382_v16 = vadd.f32 %v3421_v0, %v1381_v10 }
 0x165   : > { %v1088_v18 = vpack.c.bf16 %v1030_v7, %v1030_v7  ;;  %v1263_v19 = vpack.c.bf16 %v1205_v8, %v1205_v8 }
 0x166   : > { %v914_v20 = vpack.c.bf16 %v857_v11, %v857_v11  ;;  %v1439_v21 = vpack.c.bf16 %v1382_v16, %v1382_v16 }
 0x167   : > { %1120 = vst.msk [vmem:[%s3475_s12 + $0x38] sm:$0xf] %vm755_vm1, %v1088_v18 }
 0x168   : > { %1295 = vst.msk [vmem:[%s3483_s27 + $0x38] sm:$0xf] %vm755_vm1, %v1263_v19 }
 0x169   : > { %946 = vst.msk [vmem:[%s3435_s24 + $0x3c] sm:$0xf] %vm755_vm1, %v914_v20 }
 0x16a   : > { %1471 = vst.msk [vmem:[%s3447_s28 + $0x3c] sm:$0xf] %vm755_vm1, %v1439_v21  ;;  %v1031_v22 = vpop.f32.mrf.mxu2  ;;  %v1206_v23 = vpop.f32.mrf.mxu3 }
 0x16b   : > { %v1032_v24 = vadd.f32 %v3456_v62, %v1031_v22  ;;  %v1207_v25 = vadd.f32 %v3461_v17, %v1206_v23  ;;  %v859_v26 = vpop.f32.mrf.mxu1  ;;  %v1384_v27 = vpop.f32.mrf.mxu0 }
 0x16c   : > { %v860_v28 = vadd.f32 %v3416_v63, %v859_v26  ;;  %v1385_v29 = vadd.f32 %v3421_v0, %v1384_v27 }
 0x16d   : > { %v1089_v34 = vpack.c.bf16 %v1032_v24, %v1032_v24  ;;  %v1264_v35 = vpack.c.bf16 %v1207_v25, %v1207_v25 }
 0x16e   : > { %v915_v36 = vpack.c.bf16 %v860_v28, %v860_v28  ;;  %v1440_v37 = vpack.c.bf16 %v1385_v29, %v1385_v29  ;;  %2707 = vmatmul.msk.bf16.vlgmr.msra.gmra.mxu1 %vm585_vm0, %v3118_v12  ;;  %2794 = vmatmul.msk.bf16.vlgmr.msra.gmra.mxu0 %vm585_vm0, %v3118_v12 }
 0x16f   : > { %1121 = vst.msk [vmem:[%s3475_s12 + $0x3c] sm:$0xf] %vm755_vm1, %v1089_v34  ;;  %2736 = vmatmul.msk.bf16.vlgmr.msra.gmra.mxu2 %vm585_vm0, %v3118_v12  ;;  %2765 = vmatmul.msk.bf16.vlgmr.msra.gmra.mxu3 %vm585_vm0, %v3118_v12 }
 0x170   : > { %1296 = vst.msk [vmem:[%s3483_s27 + $0x3c] sm:$0xf] %vm755_vm1, %v1264_v35 }
 0x171   : > { %947 = vst.msk [vmem:[%s3435_s24 + $0x40] sm:$0xf] %vm755_vm1, %v915_v36 }
 0x172   : > { %1472 = vst.msk [vmem:[%s3447_s28 + $0x40] sm:$0xf] %vm755_vm1, %v1440_v37  ;;  %v1034_v38 = vpop.f32.mrf.mxu2  ;;  %v1209_v39 = vpop.f32.mrf.mxu3 }
 0x173   : > { %v1035_v40 = vadd.f32 %v3456_v62, %v1034_v38  ;;  %v1210_v41 = vadd.f32 %v3461_v17, %v1209_v39  ;;  %v861_v46 = vpop.f32.mrf.mxu1  ;;  %v1386_v47 = vpop.f32.mrf.mxu0 }
 0x174   : > { %v862_v12 = vadd.f32 %v3416_v63, %v861_v46  ;;  %v1387_v48 = vadd.f32 %v3421_v0, %v1386_v47 }
 0x175   : > { %v1090_v49 = vpack.c.bf16 %v1035_v40, %v1035_v40  ;;  %v1265_v50 = vpack.c.bf16 %v1210_v41, %v1210_v41 }
 0x176   : > { %v916_v51 = vpack.c.bf16 %v862_v12, %v862_v12  ;;  %v1441_v52 = vpack.c.bf16 %v1387_v48, %v1387_v48 }
 0x177   : > { %1122 = vst.msk [vmem:[%s3475_s12 + $0x40] sm:$0xf] %vm755_vm1, %v1090_v49 }
 0x178   : > { %1297 = vst.msk [vmem:[%s3483_s27 + $0x40] sm:$0xf] %vm755_vm1, %v1265_v50 }
 0x179   : > { %948 = vst.msk [vmem:[%s3435_s24 + $0x44] sm:$0xf] %vm755_vm1, %v916_v51 }
 0x17a   : > { %1473 = vst.msk [vmem:[%s3447_s28 + $0x44] sm:$0xf] %vm755_vm1, %v1441_v52  ;;  %v1036_v53 = vpop.f32.mrf.mxu2  ;;  %v1211_v54 = vpop.f32.mrf.mxu3 }
 0x17b   : > { %v1037_v55 = vadd.f32 %v3456_v62, %v1036_v53  ;;  %v1212_v56 = vadd.f32 %v3461_v17, %v1211_v54  ;;  %v864_v57 = vpop.f32.mrf.mxu1  ;;  %v1389_v1 = vpop.f32.mrf.mxu0 }
 0x17c   : > { %v865_v2 = vadd.f32 %v3416_v63, %v864_v57  ;;  %v1390_v3 = vadd.f32 %v3421_v0, %v1389_v1 }
 0x17d   : > { %v1091_v4 = vpack.c.bf16 %v1037_v55, %v1037_v55  ;;  %v1266_v5 = vpack.c.bf16 %v1212_v56, %v1212_v56 }
 0x17e   : > { %v917_v6 = vpack.c.bf16 %v865_v2, %v865_v2  ;;  %v1442_v7 = vpack.c.bf16 %v1390_v3, %v1390_v3  ;;  %2708 = vmatmul.msk.bf16.gmra.mxu1 %vm585_vm0, %v3160_v30  ;;  %2795 = vmatmul.msk.bf16.gmra.mxu0 %vm585_vm0, %v3160_v30 }
 0x17f   : > { %1123 = vst.msk [vmem:[%s3475_s12 + $0x44] sm:$0xf] %vm755_vm1, %v1091_v4  ;;  %2737 = vmatmul.msk.bf16.gmra.mxu2 %vm585_vm0, %v3160_v30  ;;  %2766 = vmatmul.msk.bf16.gmra.mxu3 %vm585_vm0, %v3160_v30 }
 0x180   : > { %1298 = vst.msk [vmem:[%s3483_s27 + $0x44] sm:$0xf] %vm755_vm1, %v1266_v5 }
 0x181   : > { %949 = vst.msk [vmem:[%s3435_s24 + $0x48] sm:$0xf] %vm755_vm1, %v917_v6 }
 0x182   : > { %1474 = vst.msk [vmem:[%s3447_s28 + $0x48] sm:$0xf] %vm755_vm1, %v1442_v7  ;;  %v1039_v8 = vpop.f32.mrf.mxu2  ;;  %v1214_v9 = vpop.f32.mrf.mxu3 }
 0x183   : > { %v1040_v10 = vadd.f32 %v3456_v62, %v1039_v8  ;;  %v1215_v11 = vadd.f32 %v3461_v17, %v1214_v9  ;;  %v866_v16 = vpop.f32.mrf.mxu1  ;;  %v1391_v18 = vpop.f32.mrf.mxu0 }
 0x184   : > { %v867_v30 = vadd.f32 %v3416_v63, %v866_v16  ;;  %v1392_v19 = vadd.f32 %v3421_v0, %v1391_v18 }
 0x185   : > { %v1092_v20 = vpack.c.bf16 %v1040_v10, %v1040_v10  ;;  %v1267_v21 = vpack.c.bf16 %v1215_v11, %v1215_v11 }
 0x186   : > { %v918_v22 = vpack.c.bf16 %v867_v30, %v867_v30  ;;  %v1443_v23 = vpack.c.bf16 %v1392_v19, %v1392_v19 }
 0x187   : > { %1124 = vst.msk [vmem:[%s3475_s12 + $0x48] sm:$0xf] %vm755_vm1, %v1092_v20 }
 0x188   : > { %1299 = vst.msk [vmem:[%s3483_s27 + $0x48] sm:$0xf] %vm755_vm1, %v1267_v21 }
 0x189   : > { %950 = vst.msk [vmem:[%s3435_s24 + $0x4c] sm:$0xf] %vm755_vm1, %v918_v22 }
 0x18a   : > { %1475 = vst.msk [vmem:[%s3447_s28 + $0x4c] sm:$0xf] %vm755_vm1, %v1443_v23  ;;  %v1041_v24 = vpop.f32.mrf.mxu2  ;;  %v1216_v25 = vpop.f32.mrf.mxu3 }
 0x18b   : > { %v1042_v26 = vadd.f32 %v3456_v62, %v1041_v24  ;;  %v1217_v27 = vadd.f32 %v3461_v17, %v1216_v25  ;;  %v869_v28 = vpop.f32.mrf.mxu1  ;;  %v1394_v29 = vpop.f32.mrf.mxu0 }
 0x18c   : > { %v870_v34 = vadd.f32 %v3416_v63, %v869_v28  ;;  %v1395_v35 = vadd.f32 %v3421_v0, %v1394_v29 }
 0x18d   : > { %v1093_v36 = vpack.c.bf16 %v1042_v26, %v1042_v26  ;;  %v1268_v37 = vpack.c.bf16 %v1217_v27, %v1217_v27 }
 0x18e   : > { %v919_v38 = vpack.c.bf16 %v870_v34, %v870_v34  ;;  %v1444_v39 = vpack.c.bf16 %v1395_v35, %v1395_v35  ;;  %2709 = vmatmul.msk.bf16.gmra.mxu1 %vm585_vm0, %v3184_v42  ;;  %2796 = vmatmul.msk.bf16.gmra.mxu0 %vm585_vm0, %v3184_v42 }
 0x18f   : > { %1125 = vst.msk [vmem:[%s3475_s12 + $0x4c] sm:$0xf] %vm755_vm1, %v1093_v36  ;;  %2738 = vmatmul.msk.bf16.gmra.mxu2 %vm585_vm0, %v3184_v42  ;;  %2767 = vmatmul.msk.bf16.gmra.mxu3 %vm585_vm0, %v3184_v42 }
 0x190   : > { %1300 = vst.msk [vmem:[%s3483_s27 + $0x4c] sm:$0xf] %vm755_vm1, %v1268_v37 }
 0x191   : > { %951 = vst.msk [vmem:[%s3435_s24 + $0x50] sm:$0xf] %vm755_vm1, %v919_v38 }
 0x192   : > { %1476 = vst.msk [vmem:[%s3447_s28 + $0x50] sm:$0xf] %vm755_vm1, %v1444_v39  ;;  %v1044_v40 = vpop.f32.mrf.mxu2  ;;  %v1219_v41 = vpop.f32.mrf.mxu3 }
 0x193   : > { %v1045_v46 = vadd.f32 %v3456_v62, %v1044_v40  ;;  %v1220_v47 = vadd.f32 %v3461_v17, %v1219_v41  ;;  %v871_v12 = vpop.f32.mrf.mxu1  ;;  %v1396_v48 = vpop.f32.mrf.mxu0 }
 0x194   : > { %v872_v42 = vadd.f32 %v3416_v63, %v871_v12  ;;  %v1397_v49 = vadd.f32 %v3421_v0, %v1396_v48 }
 0x195   : > { %v1094_v50 = vpack.c.bf16 %v1045_v46, %v1045_v46  ;;  %v1269_v51 = vpack.c.bf16 %v1220_v47, %v1220_v47 }
 0x196   : > { %v920_v52 = vpack.c.bf16 %v872_v42, %v872_v42  ;;  %v1445_v53 = vpack.c.bf16 %v1397_v49, %v1397_v49 }
 0x197   : > { %1126 = vst.msk [vmem:[%s3475_s12 + $0x50] sm:$0xf] %vm755_vm1, %v1094_v50 }
 0x198   : > { %1301 = vst.msk [vmem:[%s3483_s27 + $0x50] sm:$0xf] %vm755_vm1, %v1269_v51 }
 0x199   : > { %952 = vst.msk [vmem:[%s3435_s24 + $0x54] sm:$0xf] %vm755_vm1, %v920_v52 }
 0x19a   : > { %1477 = vst.msk [vmem:[%s3447_s28 + $0x54] sm:$0xf] %vm755_vm1, %v1445_v53  ;;  %v1046_v54 = vpop.f32.mrf.mxu2  ;;  %v1221_v55 = vpop.f32.mrf.mxu3 }
 0x19b   : > { %v1047_v56 = vadd.f32 %v3456_v62, %v1046_v54  ;;  %v1222_v57 = vadd.f32 %v3461_v17, %v1221_v55  ;;  %v874_v1 = vpop.f32.mrf.mxu1  ;;  %v1399_v2 = vpop.f32.mrf.mxu0 }
 0x19c   : > { %v875_v3 = vadd.f32 %v3416_v63, %v874_v1  ;;  %v1400_v4 = vadd.f32 %v3421_v0, %v1399_v2 }
 0x19d   : > { %v1095_v5 = vpack.c.bf16 %v1047_v56, %v1047_v56  ;;  %v1270_v6 = vpack.c.bf16 %v1222_v57, %v1222_v57 }
 0x19e   : > { %v921_v7 = vpack.c.bf16 %v875_v3, %v875_v3  ;;  %v1446_v8 = vpack.c.bf16 %v1400_v4, %v1400_v4  ;;  %2710 = vmatmul.msk.bf16.gmra.mxu1 %vm585_vm0, %v3220_v58  ;;  %2797 = vmatmul.msk.bf16.gmra.mxu0 %vm585_vm0, %v3220_v58 }
 0x19f   : > { %1127 = vst.msk [vmem:[%s3475_s12 + $0x54] sm:$0xf] %vm755_vm1, %v1095_v5  ;;  %2739 = vmatmul.msk.bf16.gmra.mxu2 %vm585_vm0, %v3220_v58  ;;  %2768 = vmatmul.msk.bf16.gmra.mxu3 %vm585_vm0, %v3220_v58 }
 0x1a0   : > { %1302 = vst.msk [vmem:[%s3483_s27 + $0x54] sm:$0xf] %vm755_vm1, %v1270_v6 }
 0x1a1   : > { %953 = vst.msk [vmem:[%s3435_s24 + $0x58] sm:$0xf] %vm755_vm1, %v921_v7 }
 0x1a2   : > { %1478 = vst.msk [vmem:[%s3447_s28 + $0x58] sm:$0xf] %vm755_vm1, %v1446_v8  ;;  %v1049_v9 = vpop.f32.mrf.mxu2  ;;  %v1224_v10 = vpop.f32.mrf.mxu3 }
 0x1a3   : > { %v1050_v11 = vadd.f32 %v3456_v62, %v1049_v9  ;;  %v1225_v16 = vadd.f32 %v3461_v17, %v1224_v10  ;;  %v876_v18 = vpop.f32.mrf.mxu1  ;;  %v1401_v30 = vpop.f32.mrf.mxu0 }
 0x1a4   : > { %v877_v58 = vadd.f32 %v3416_v63, %v876_v18  ;;  %v1402_v19 = vadd.f32 %v3421_v0, %v1401_v30 }
 0x1a5   : > { %v1096_v20 = vpack.c.bf16 %v1050_v11, %v1050_v11  ;;  %v1271_v21 = vpack.c.bf16 %v1225_v16, %v1225_v16 }
 0x1a6   : > { %v922_v22 = vpack.c.bf16 %v877_v58, %v877_v58  ;;  %v1447_v23 = vpack.c.bf16 %v1402_v19, %v1402_v19 }
 0x1a7   : > { %1128 = vst.msk [vmem:[%s3475_s12 + $0x58] sm:$0xf] %vm755_vm1, %v1096_v20 }
 0x1a8   : > { %1303 = vst.msk [vmem:[%s3483_s27 + $0x58] sm:$0xf] %vm755_vm1, %v1271_v21 }
 0x1a9   : > { %954 = vst.msk [vmem:[%s3435_s24 + $0x5c] sm:$0xf] %vm755_vm1, %v922_v22 }
 0x1aa   : > { %1479 = vst.msk [vmem:[%s3447_s28 + $0x5c] sm:$0xf] %vm755_vm1, %v1447_v23  ;;  %v1051_v24 = vpop.f32.mrf.mxu2  ;;  %v1226_v25 = vpop.f32.mrf.mxu3 }
 0x1ab   : > { %v1052_v26 = vadd.f32 %v3456_v62, %v1051_v24  ;;  %v1227_v27 = vadd.f32 %v3461_v17, %v1226_v25  ;;  %v879_v28 = vpop.f32.mrf.mxu1  ;;  %v1404_v29 = vpop.f32.mrf.mxu0 }
 0x1ac   : > { %v880_v34 = vadd.f32 %v3416_v63, %v879_v28  ;;  %v1405_v35 = vadd.f32 %v3421_v0, %v1404_v29  ;;  %v2888_v28 = vld [vmem:[%s4484_s2 + $0x4] ss:$0 sm:$0xff] }
 0x1ad   : > { %v1097_v36 = vpack.c.bf16 %v1052_v26, %v1052_v26  ;;  %v1272_v37 = vpack.c.bf16 %v1227_v27, %v1227_v27  ;;  %v2887_v26 = vld [vmem:[%s4484_s2 + $0x1] ss:$0 sm:$0xff] }
 0x1ae   : > { %v923_v38 = vpack.c.bf16 %v880_v34, %v880_v34  ;;  %v1448_v39 = vpack.c.bf16 %v1405_v35, %v1405_v35  ;;  %2711 = vmatmul.msk.bf16.gmra.mxu1 %vm585_vm0, %v3120_v13  ;;  %2798 = vmatmul.msk.bf16.gmra.mxu0 %vm585_vm0, %v3120_v13 }
 0x1af   : > { %1129 = vst.msk [vmem:[%s3475_s12 + $0x5c] sm:$0xf] %vm755_vm1, %v1097_v36  ;;  %2740 = vmatmul.msk.bf16.gmra.mxu2 %vm585_vm0, %v3120_v13  ;;  %2769 = vmatmul.msk.bf16.gmra.mxu3 %vm585_vm0, %v3120_v13 }
 0x1b0   : > { %1304 = vst.msk [vmem:[%s3483_s27 + $0x5c] sm:$0xf] %vm755_vm1, %v1272_v37 }
 0x1b1   : > { %955 = vst.msk [vmem:[%s3435_s24 + $0x60] sm:$0xf] %vm755_vm1, %v923_v38  ;;  %v2889_v38 = vld [vmem:[%s4484_s2 + $0x2] ss:$0 sm:$0xff] }
 0x1b2   : > { %1480 = vst.msk [vmem:[%s3447_s28 + $0x60] sm:$0xf] %vm755_vm1, %v1448_v39  ;;  %v1054_v40 = vpop.f32.mrf.mxu2  ;;  %v1229_v41 = vpop.f32.mrf.mxu3 }
 0x1b3   : > { %v1055_v46 = vadd.f32 %v3456_v62, %v1054_v40  ;;  %v1230_v47 = vadd.f32 %v3461_v17, %v1229_v41  ;;  %v881_v12 = vpop.f32.mrf.mxu1  ;;  %v1406_v48 = vpop.f32.mrf.mxu0 }
 0x1b4   : > { %v882_v13 = vadd.f32 %v3416_v63, %v881_v12  ;;  %v1407_v42 = vadd.f32 %v3421_v0, %v1406_v48 }
 0x1b5   : > { %v1098_v49 = vpack.c.bf16 %v1055_v46, %v1055_v46  ;;  %v1273_v50 = vpack.c.bf16 %v1230_v47, %v1230_v47 }
 0x1b6   : > { %v924_v51 = vpack.c.bf16 %v882_v13, %v882_v13  ;;  %v1449_v52 = vpack.c.bf16 %v1407_v42, %v1407_v42 }
 0x1b7   : > { %1130 = vst.msk [vmem:[%s3475_s12 + $0x60] sm:$0xf] %vm755_vm1, %v1098_v49 }
 0x1b8   : > { %1305 = vst.msk [vmem:[%s3483_s27 + $0x60] sm:$0xf] %vm755_vm1, %v1273_v50 }
 0x1b9   : > { %956 = vst.msk [vmem:[%s3435_s24 + $0x64] sm:$0xf] %vm755_vm1, %v924_v51 }
 0x1ba   : > { %1481 = vst.msk [vmem:[%s3447_s28 + $0x64] sm:$0xf] %vm755_vm1, %v1449_v52  ;;  %v1056_v53 = vpop.f32.mrf.mxu2  ;;  %v1231_v54 = vpop.f32.mrf.mxu3 }
 0x1bb   : > { %v1057_v55 = vadd.f32 %v3456_v62, %v1056_v53  ;;  %v1232_v56 = vadd.f32 %v3461_v17, %v1231_v54  ;;  %v884_v57 = vpop.f32.mrf.mxu1  ;;  %v1409_v1 = vpop.f32.mrf.mxu0 }
 0x1bc   : > { %v885_v2 = vadd.f32 %v3416_v63, %v884_v57  ;;  %v1410_v3 = vadd.f32 %v3421_v0, %v1409_v1 }
 0x1bd   : > { %v1099_v4 = vpack.c.bf16 %v1057_v55, %v1057_v55  ;;  %v1274_v5 = vpack.c.bf16 %v1232_v56, %v1232_v56 }
 0x1be   : > { %v925_v6 = vpack.c.bf16 %v885_v2, %v885_v2  ;;  %v1450_v7 = vpack.c.bf16 %v1410_v3, %v1410_v3  ;;  %2712 = vmatmul.msk.bf16.gmra.mxu1 %vm585_vm0, %v3162_v31  ;;  %2799 = vmatmul.msk.bf16.gmra.mxu0 %vm585_vm0, %v3162_v31 }
 0x1bf   : > { %1131 = vst.msk [vmem:[%s3475_s12 + $0x64] sm:$0xf] %vm755_vm1, %v1099_v4  ;;  %2741 = vmatmul.msk.bf16.gmra.mxu2 %vm585_vm0, %v3162_v31  ;;  %2770 = vmatmul.msk.bf16.gmra.mxu3 %vm585_vm0, %v3162_v31 }
 0x1c0   : > { %1306 = vst.msk [vmem:[%s3483_s27 + $0x64] sm:$0xf] %vm755_vm1, %v1274_v5 }
 0x1c1   : > { %957 = vst.msk [vmem:[%s3435_s24 + $0x68] sm:$0xf] %vm755_vm1, %v925_v6 }
 0x1c2   : > { %1482 = vst.msk [vmem:[%s3447_s28 + $0x68] sm:$0xf] %vm755_vm1, %v1450_v7  ;;  %v1059_v8 = vpop.f32.mrf.mxu2  ;;  %v1234_v9 = vpop.f32.mrf.mxu3 }
 0x1c3   : > { %v1060_v10 = vadd.f32 %v3456_v62, %v1059_v8  ;;  %v1235_v11 = vadd.f32 %v3461_v17, %v1234_v9  ;;  %v886_v16 = vpop.f32.mrf.mxu1  ;;  %v1411_v18 = vpop.f32.mrf.mxu0 }
 0x1c4   : > { %v887_v31 = vadd.f32 %v3416_v63, %v886_v16  ;;  %v1412_v30 = vadd.f32 %v3421_v0, %v1411_v18 }
 0x1c5   : > { %v1100_v58 = vpack.c.bf16 %v1060_v10, %v1060_v10  ;;  %v1275_v19 = vpack.c.bf16 %v1235_v11, %v1235_v11 }
 0x1c6   : > { %v926_v20 = vpack.c.bf16 %v887_v31, %v887_v31  ;;  %v1451_v21 = vpack.c.bf16 %v1412_v30, %v1412_v30 }
 0x1c7   : > { %1132 = vst.msk [vmem:[%s3475_s12 + $0x68] sm:$0xf] %vm755_vm1, %v1100_v58  ;;  %v3970_v58 = vld [vmem:[%s4484_s2 + $0x5] ss:$0 sm:$0xff] }
 0x1c8   : > { %1307 = vst.msk [vmem:[%s3483_s27 + $0x68] sm:$0xf] %vm755_vm1, %v1275_v19  ;;  %v3975_v19 = vld [vmem:[%s4484_s2 + $0x8] ss:$0 sm:$0xff] }
 0x1c9   : > { %958 = vst.msk [vmem:[%s3435_s24 + $0x6c] sm:$0xf] %vm755_vm1, %v926_v20 }
 0x1ca   : > { %1483 = vst.msk [vmem:[%s3447_s28 + $0x6c] sm:$0xf] %vm755_vm1, %v1451_v21  ;;  %v1061_v22 = vpop.f32.mrf.mxu2  ;;  %v1236_v23 = vpop.f32.mrf.mxu3 }
 0x1cb   : > { %v1062_v24 = vadd.f32 %v3456_v62, %v1061_v22  ;;  %v1237_v63 = vadd.f32 %v3461_v17, %v1236_v23  ;;  %v889_v0 = vpop.f32.mrf.mxu1  ;;  %v1414_v25 = vpop.f32.mrf.mxu0 }
 0x1cc   : > { %v890_v27 = vadd.f32 %v2887_v26, %v889_v0  ;;  %v1415_v29 = vadd.f32 %v2888_v28, %v1414_v25 }
 0x1cd   : > { %v1101_v34 = vpack.c.bf16 %v1062_v24, %v1062_v24  ;;  %v1276_v35 = vpack.c.bf16 %v1237_v63, %v1237_v63 }
 0x1ce   : > { %v927_v62 = vpack.c.bf16 %v890_v27, %v890_v27  ;;  %v1452_v36 = vpack.c.bf16 %v1415_v29, %v1415_v29  ;;  %2713 = vmatmul.msk.bf16.gmra.mxu1 %vm585_vm0, %v3186_v43  ;;  %2800 = vmatmul.msk.bf16.gmra.mxu0 %vm585_vm0, %v3186_v43 }
 0x1cf   : > { %1133 = vst.msk [vmem:[%s3475_s12 + $0x6c] sm:$0xf] %vm755_vm1, %v1101_v34  ;;  %2742 = vmatmul.msk.bf16.gmra.mxu2 %vm585_vm0, %v3186_v43  ;;  %2771 = vmatmul.msk.bf16.gmra.mxu3 %vm585_vm0, %v3186_v43  ;;  %v2890_v43 = vld [vmem:[%s4484_s2 + $0x3] ss:$0 sm:$0xff]  ;;  %v4008_v34 = vld [vmem:[%s4484_s2 + $0x6] ss:$0 sm:$0xff] }
 0x1d0   : > { %1308 = vst.msk [vmem:[%s3483_s27 + $0x6c] sm:$0xf] %vm755_vm1, %v1276_v35  ;;  %v4013_v35 = vld [vmem:[%s4484_s2 + $0x7] ss:$0 sm:$0xff] }
 0x1d1   : > { %959 = vst.msk [vmem:[%s3435_s24 + $0x70] sm:$0xf] %vm755_vm1, %v927_v62 }
 0x1d2   : > { %1484 = vst.msk [vmem:[%s3447_s28 + $0x70] sm:$0xf] %vm755_vm1, %v1452_v36  ;;  %v1064_v17 = vpop.f32.mrf.mxu2  ;;  %v1239_v37 = vpop.f32.mrf.mxu3 }
 0x1d3   : > { %v1065_v39 = vadd.f32 %v2889_v38, %v1064_v17  ;;  %v1240_v40 = vadd.f32 %v2890_v43, %v1239_v37  ;;  %v891_v41 = vpop.f32.mrf.mxu1  ;;  %v1416_v46 = vpop.f32.mrf.mxu0 }
 0x1d4   : > { %v892_v47 = vadd.f32 %v2887_v26, %v891_v41  ;;  %v1417_v12 = vadd.f32 %v2888_v28, %v1416_v46 }
 0x1d5   : > { %v1102_v48 = vpack.c.bf16 %v1065_v39, %v1065_v39  ;;  %v1277_v13 = vpack.c.bf16 %v1240_v40, %v1240_v40 }
 0x1d6   : > { %v928_v42 = vpack.c.bf16 %v892_v47, %v892_v47  ;;  %v1453_v49 = vpack.c.bf16 %v1417_v12, %v1417_v12 }
 0x1d7   : > { %1134 = vst.msk [vmem:[%s3475_s12 + $0x70] sm:$0xf] %vm755_vm1, %v1102_v48 }
 0x1d8   : > { %1309 = vst.msk [vmem:[%s3483_s27 + $0x70] sm:$0xf] %vm755_vm1, %v1277_v13 }
 0x1d9   : > { %960 = vst.msk [vmem:[%s3435_s24 + $0x74] sm:$0xf] %vm755_vm1, %v928_v42 }
 0x1da   : > { %1485 = vst.msk [vmem:[%s3447_s28 + $0x74] sm:$0xf] %vm755_vm1, %v1453_v49  ;;  %v1066_v50 = vpop.f32.mrf.mxu2  ;;  %v1241_v51 = vpop.f32.mrf.mxu3 }
 0x1db   : > { %v1067_v52 = vadd.f32 %v2889_v38, %v1066_v50  ;;  %v1242_v53 = vadd.f32 %v2890_v43, %v1241_v51  ;;  %v894_v54 = vpop.f32.mrf.mxu1  ;;  %v1419_v55 = vpop.f32.mrf.mxu0 }
 0x1dc   : > { %v895_v56 = vadd.f32 %v2887_v26, %v894_v54  ;;  %v1420_v57 = vadd.f32 %v2888_v28, %v1419_v55 }
 0x1dd   : > { %v1103_v1 = vpack.c.bf16 %v1067_v52, %v1067_v52  ;;  %v1278_v2 = vpack.c.bf16 %v1242_v53, %v1242_v53 }
 0x1de   : > { %v929_v3 = vpack.c.bf16 %v895_v56, %v895_v56  ;;  %v1454_v4 = vpack.c.bf16 %v1420_v57, %v1420_v57  ;;  %2714 = vmatmul.msk.bf16.gmra.mxu1 %vm585_vm0, %v3222_v59  ;;  %2801 = vmatmul.msk.bf16.gmra.mxu0 %vm585_vm0, %v3222_v59 }
 0x1df   : > { %1135 = vst.msk [vmem:[%s3475_s12 + $0x74] sm:$0xf] %vm755_vm1, %v1103_v1  ;;  %2743 = vmatmul.msk.bf16.gmra.mxu2 %vm585_vm0, %v3222_v59  ;;  %2772 = vmatmul.msk.bf16.gmra.mxu3 %vm585_vm0, %v3222_v59 }
 0x1e0   : > { %1310 = vst.msk [vmem:[%s3483_s27 + $0x74] sm:$0xf] %vm755_vm1, %v1278_v2 }
 0x1e1   : > { %961 = vst.msk [vmem:[%s3435_s24 + $0x78] sm:$0xf] %vm755_vm1, %v929_v3 }
 0x1e2   : > { %1486 = vst.msk [vmem:[%s3447_s28 + $0x78] sm:$0xf] %vm755_vm1, %v1454_v4  ;;  %v1069_v5 = vpop.f32.mrf.mxu2  ;;  %v1244_v6 = vpop.f32.mrf.mxu3 }
 0x1e3   : > { %v1070_v7 = vadd.f32 %v2889_v38, %v1069_v5  ;;  %v1245_v8 = vadd.f32 %v2890_v43, %v1244_v6  ;;  %v896_v9 = vpop.f32.mrf.mxu1  ;;  %v1421_v10 = vpop.f32.mrf.mxu0 }
 0x1e4   : > { %v897_v11 = vadd.f32 %v2887_v26, %v896_v9  ;;  %v1422_v16 = vadd.f32 %v2888_v28, %v1421_v10 }
 0x1e5   : > { %v1104_v18 = vpack.c.bf16 %v1070_v7, %v1070_v7  ;;  %v1279_v59 = vpack.c.bf16 %v1245_v8, %v1245_v8 }
 0x1e6   : > { %v930_v31 = vpack.c.bf16 %v897_v11, %v897_v11  ;;  %v1455_v30 = vpack.c.bf16 %v1422_v16, %v1422_v16 }
 0x1e7   : > { %1136 = vst.msk [vmem:[%s3475_s12 + $0x78] sm:$0xf] %vm755_vm1, %v1104_v18 }
 0x1e8   : > { %1311 = vst.msk [vmem:[%s3483_s27 + $0x78] sm:$0xf] %vm755_vm1, %v1279_v59 }
 0x1e9   : > { %962 = vst.msk [vmem:[%s3435_s24 + $0x7c] sm:$0xf] %vm755_vm1, %v930_v31  ;;  %s3987_s24 = scalar_lea.vmem %s4490_s8, %s3275_s17 }
 0x1ea   : > { %1487 = vst.msk [vmem:[%s3447_s28 + $0x7c] sm:$0xf] %vm755_vm1, %v1455_v30  ;;  %v1071_v20 = vpop.f32.mrf.mxu2  ;;  %v1246_v21 = vpop.f32.mrf.mxu3 }
 0x1eb   : > { %v1072_v22 = vadd.f32 %v2889_v38, %v1071_v20  ;;  %v1247_v23 = vadd.f32 %v2890_v43, %v1246_v21  ;;  %v1519_v24 = vpop.f32.mrf.mxu1  ;;  %v2044_v63 = vpop.f32.mrf.mxu0 }
 0x1ec   : > { %v1520_v0 = vadd.f32 %v3970_v58, %v1519_v24  ;;  %v2045_v25 = vadd.f32 %v3975_v19, %v2044_v63 }
 0x1ed   : > { %v1105_v26 = vpack.c.bf16 %v1072_v22, %v1072_v22  ;;  %v1280_v27 = vpack.c.bf16 %v1247_v23, %v1247_v23 }
 0x1ee   : > { %v1599_v28 = vpack.c.bf16 %v1520_v0, %v1520_v0  ;;  %v2124_v29 = vpack.c.bf16 %v2045_v25, %v2045_v25  ;;  %2715 = vmatmul.msk.bf16.gmra.mxu1 %vm585_vm0, %v3122_v14  ;;  %2802 = vmatmul.msk.bf16.gmra.mxu0 %vm585_vm0, %v3122_v14 }
 0x1ef   : > { %1137 = vst.msk [vmem:[%s3475_s12 + $0x7c] sm:$0xf] %vm755_vm1, %v1105_v26  ;;  %2744 = vmatmul.msk.bf16.gmra.mxu2 %vm585_vm0, %v3122_v14  ;;  %2773 = vmatmul.msk.bf16.gmra.mxu3 %vm585_vm0, %v3122_v14 }
 0x1f0   : > { %1312 = vst.msk [vmem:[%s3483_s27 + $0x7c] sm:$0xf] %vm755_vm1, %v1280_v27 }
 0x1f1   : > { %1631 = vst.msk [vmem:[%s3987_s24] sm:$0xf] %vm755_vm1, %v1599_v28 }
 0x1f2   : > { %2156 = vst.msk [vmem:[%s3999_s15] sm:$0xf] %vm755_vm1, %v2124_v29  ;;  %v1694_v62 = vpop.f32.mrf.mxu2  ;;  %v1869_v14 = vpop.f32.mrf.mxu3 }
 0x1f3   : > { %v1695_v36 = vadd.f32 %v4008_v34, %v1694_v62  ;;  %v1870_v17 = vadd.f32 %v4013_v35, %v1869_v14  ;;  %v1521_v37 = vpop.f32.mrf.mxu1  ;;  %v2046_v38 = vpop.f32.mrf.mxu0 }
 0x1f4   : > { %v1522_v39 = vadd.f32 %v3970_v58, %v1521_v37  ;;  %v2047_v43 = vadd.f32 %v3975_v19, %v2046_v38 }
 0x1f5   : > { %v1774_v40 = vpack.c.bf16 %v1695_v36, %v1695_v36  ;;  %v1949_v41 = vpack.c.bf16 %v1870_v17, %v1870_v17 }
 0x1f6   : > { %v1600_v46 = vpack.c.bf16 %v1522_v39, %v1522_v39  ;;  %v2125_v47 = vpack.c.bf16 %v2047_v43, %v2047_v43 }
 0x1f7   : > { %1806 = vst.msk [vmem:[%s4027_s16] sm:$0xf] %vm755_vm1, %v1774_v40 }
 0x1f8   : > { %1981 = vst.msk [vmem:[%s4035_s26] sm:$0xf] %vm755_vm1, %v1949_v41 }
 0x1f9   : > { %1632 = vst.msk [vmem:[%s3987_s24 + $0x4] sm:$0xf] %vm755_vm1, %v1600_v46 }
 0x1fa   : > { %2157 = vst.msk [vmem:[%s3999_s15 + $0x4] sm:$0xf] %vm755_vm1, %v2125_v47  ;;  %v1696_v12 = vpop.f32.mrf.mxu2  ;;  %v1871_v48 = vpop.f32.mrf.mxu3 }
 0x1fb   : > { %v1697_v13 = vadd.f32 %v4008_v34, %v1696_v12  ;;  %v1872_v42 = vadd.f32 %v4013_v35, %v1871_v48  ;;  %v1524_v49 = vpop.f32.mrf.mxu1  ;;  %v2049_v50 = vpop.f32.mrf.mxu0 }
 0x1fc   : > { %v1525_v51 = vadd.f32 %v3970_v58, %v1524_v49  ;;  %v2050_v52 = vadd.f32 %v3975_v19, %v2049_v50 }
 0x1fd   : > { %v1775_v53 = vpack.c.bf16 %v1697_v13, %v1697_v13  ;;  %v1950_v54 = vpack.c.bf16 %v1872_v42, %v1872_v42 }
 0x1fe   : > { %v1601_v55 = vpack.c.bf16 %v1525_v51, %v1525_v51  ;;  %v2126_v56 = vpack.c.bf16 %v2050_v52, %v2050_v52  ;;  %2716 = vmatmul.msk.bf16.gmra.mxu1 %vm585_vm0, %v3164_v32  ;;  %2803 = vmatmul.msk.bf16.gmra.mxu0 %vm585_vm0, %v3164_v32 }
 0x1ff   : > { %1807 = vst.msk [vmem:[%s4027_s16 + $0x4] sm:$0xf] %vm755_vm1, %v1775_v53  ;;  %2745 = vmatmul.msk.bf16.gmra.mxu2 %vm585_vm0, %v3164_v32  ;;  %2774 = vmatmul.msk.bf16.gmra.mxu3 %vm585_vm0, %v3164_v32 }
 0x200   : > { %1982 = vst.msk [vmem:[%s4035_s26 + $0x4] sm:$0xf] %vm755_vm1, %v1950_v54 }
 0x201   : > { %1633 = vst.msk [vmem:[%s3987_s24 + $0x8] sm:$0xf] %vm755_vm1, %v1601_v55 }
 0x202   : > { %2158 = vst.msk [vmem:[%s3999_s15 + $0x8] sm:$0xf] %vm755_vm1, %v2126_v56  ;;  %v1699_v57 = vpop.f32.mrf.mxu2  ;;  %v1874_v1 = vpop.f32.mrf.mxu3 }
 0x203   : > { %v1700_v2 = vadd.f32 %v4008_v34, %v1699_v57  ;;  %v1875_v3 = vadd.f32 %v4013_v35, %v1874_v1  ;;  %v1526_v4 = vpop.f32.mrf.mxu1  ;;  %v2051_v5 = vpop.f32.mrf.mxu0 }
 0x204   : > { %v1527_v32 = vadd.f32 %v3970_v58, %v1526_v4  ;;  %v2052_v6 = vadd.f32 %v3975_v19, %v2051_v5 }
 0x205   : > { %v1776_v7 = vpack.c.bf16 %v1700_v2, %v1700_v2  ;;  %v1951_v8 = vpack.c.bf16 %v1875_v3, %v1875_v3 }
 0x206   : > { %v1602_v9 = vpack.c.bf16 %v1527_v32, %v1527_v32  ;;  %v2127_v10 = vpack.c.bf16 %v2052_v6, %v2052_v6 }
 0x207   : > { %1808 = vst.msk [vmem:[%s4027_s16 + $0x8] sm:$0xf] %vm755_vm1, %v1776_v7 }
 0x208   : > { %1983 = vst.msk [vmem:[%s4035_s26 + $0x8] sm:$0xf] %vm755_vm1, %v1951_v8 }
 0x209   : > { %1634 = vst.msk [vmem:[%s3987_s24 + $0xc] sm:$0xf] %vm755_vm1, %v1602_v9 }
 0x20a   : > { %2159 = vst.msk [vmem:[%s3999_s15 + $0xc] sm:$0xf] %vm755_vm1, %v2127_v10  ;;  %v1701_v11 = vpop.f32.mrf.mxu2  ;;  %v1876_v16 = vpop.f32.mrf.mxu3 }
 0x20b   : > { %v1702_v18 = vadd.f32 %v4008_v34, %v1701_v11  ;;  %v1877_v59 = vadd.f32 %v4013_v35, %v1876_v16  ;;  %v1529_v31 = vpop.f32.mrf.mxu1  ;;  %v2054_v30 = vpop.f32.mrf.mxu0 }
 0x20c   : > { %v1530_v20 = vadd.f32 %v3970_v58, %v1529_v31  ;;  %v2055_v21 = vadd.f32 %v3975_v19, %v2054_v30 }
 0x20d   : > { %v1777_v22 = vpack.c.bf16 %v1702_v18, %v1702_v18  ;;  %v1952_v23 = vpack.c.bf16 %v1877_v59, %v1877_v59 }
 0x20e   : > { %v1603_v24 = vpack.c.bf16 %v1530_v20, %v1530_v20  ;;  %v2128_v63 = vpack.c.bf16 %v2055_v21, %v2055_v21  ;;  %2717 = vmatmul.msk.bf16.gmra.mxu1 %vm585_vm0, %v3188_v44  ;;  %2804 = vmatmul.msk.bf16.gmra.mxu0 %vm585_vm0, %v3188_v44 }
 0x20f   : > { %1809 = vst.msk [vmem:[%s4027_s16 + $0xc] sm:$0xf] %vm755_vm1, %v1777_v22  ;;  %2746 = vmatmul.msk.bf16.gmra.mxu2 %vm585_vm0, %v3188_v44  ;;  %2775 = vmatmul.msk.bf16.gmra.mxu3 %vm585_vm0, %v3188_v44 }
 0x210   : > { %1984 = vst.msk [vmem:[%s4035_s26 + $0xc] sm:$0xf] %vm755_vm1, %v1952_v23 }
 0x211   : > { %1635 = vst.msk [vmem:[%s3987_s24 + $0x10] sm:$0xf] %vm755_vm1, %v1603_v24 }
 0x212   : > { %2160 = vst.msk [vmem:[%s3999_s15 + $0x10] sm:$0xf] %vm755_vm1, %v2128_v63  ;;  %v1704_v0 = vpop.f32.mrf.mxu2  ;;  %v1879_v25 = vpop.f32.mrf.mxu3 }
 0x213   : > { %v1705_v26 = vadd.f32 %v4008_v34, %v1704_v0  ;;  %v1880_v27 = vadd.f32 %v4013_v35, %v1879_v25  ;;  %v1531_v28 = vpop.f32.mrf.mxu1  ;;  %v2056_v29 = vpop.f32.mrf.mxu0 }
 0x214   : > { %v1532_v44 = vadd.f32 %v3970_v58, %v1531_v28  ;;  %v2057_v62 = vadd.f32 %v3975_v19, %v2056_v29 }
 0x215   : > { %v1778_v14 = vpack.c.bf16 %v1705_v26, %v1705_v26  ;;  %v1953_v36 = vpack.c.bf16 %v1880_v27, %v1880_v27 }
 0x216   : > { %v1604_v17 = vpack.c.bf16 %v1532_v44, %v1532_v44  ;;  %v2129_v37 = vpack.c.bf16 %v2057_v62, %v2057_v62 }
 0x217   : > { %1810 = vst.msk [vmem:[%s4027_s16 + $0x10] sm:$0xf] %vm755_vm1, %v1778_v14 }
 0x218   : > { %1985 = vst.msk [vmem:[%s4035_s26 + $0x10] sm:$0xf] %vm755_vm1, %v1953_v36 }
 0x219   : > { %1636 = vst.msk [vmem:[%s3987_s24 + $0x14] sm:$0xf] %vm755_vm1, %v1604_v17 }
 0x21a   : > { %2161 = vst.msk [vmem:[%s3999_s15 + $0x14] sm:$0xf] %vm755_vm1, %v2129_v37  ;;  %v1706_v38 = vpop.f32.mrf.mxu2  ;;  %v1881_v39 = vpop.f32.mrf.mxu3 }
 0x21b   : > { %v1707_v43 = vadd.f32 %v4008_v34, %v1706_v38  ;;  %v1882_v40 = vadd.f32 %v4013_v35, %v1881_v39  ;;  %v1534_v41 = vpop.f32.mrf.mxu1  ;;  %v2059_v46 = vpop.f32.mrf.mxu0 }
 0x21c   : > { %v1535_v47 = vadd.f32 %v3970_v58, %v1534_v41  ;;  %v2060_v12 = vadd.f32 %v3975_v19, %v2059_v46 }
 0x21d   : > { %v1779_v48 = vpack.c.bf16 %v1707_v43, %v1707_v43  ;;  %v1954_v13 = vpack.c.bf16 %v1882_v40, %v1882_v40 }
 0x21e   : > { %v1605_v42 = vpack.c.bf16 %v1535_v47, %v1535_v47  ;;  %v2130_v49 = vpack.c.bf16 %v2060_v12, %v2060_v12  ;;  %2718 = vmatmul.msk.bf16.gmra.mxu1 %vm585_vm0, %v3224_v60  ;;  %2805 = vmatmul.msk.bf16.gmra.mxu0 %vm585_vm0, %v3224_v60 }
 0x21f   : > { %1811 = vst.msk [vmem:[%s4027_s16 + $0x14] sm:$0xf] %vm755_vm1, %v1779_v48  ;;  %2747 = vmatmul.msk.bf16.gmra.mxu2 %vm585_vm0, %v3224_v60  ;;  %2776 = vmatmul.msk.bf16.gmra.mxu3 %vm585_vm0, %v3224_v60 }
 0x220   : > { %1986 = vst.msk [vmem:[%s4035_s26 + $0x14] sm:$0xf] %vm755_vm1, %v1954_v13 }
 0x221   : > { %1637 = vst.msk [vmem:[%s3987_s24 + $0x18] sm:$0xf] %vm755_vm1, %v1605_v42 }
 0x222   : > { %2162 = vst.msk [vmem:[%s3999_s15 + $0x18] sm:$0xf] %vm755_vm1, %v2130_v49  ;;  %v1709_v50 = vpop.f32.mrf.mxu2  ;;  %v1884_v51 = vpop.f32.mrf.mxu3 }
 0x223   : > { %v1710_v52 = vadd.f32 %v4008_v34, %v1709_v50  ;;  %v1885_v53 = vadd.f32 %v4013_v35, %v1884_v51  ;;  %v1536_v54 = vpop.f32.mrf.mxu1  ;;  %v2061_v55 = vpop.f32.mrf.mxu0 }
 0x224   : > { %v1537_v60 = vadd.f32 %v3970_v58, %v1536_v54  ;;  %v2062_v56 = vadd.f32 %v3975_v19, %v2061_v55 }
 0x225   : > { %v1780_v57 = vpack.c.bf16 %v1710_v52, %v1710_v52  ;;  %v1955_v1 = vpack.c.bf16 %v1885_v53, %v1885_v53 }
 0x226   : > { %v1606_v2 = vpack.c.bf16 %v1537_v60, %v1537_v60  ;;  %v2131_v3 = vpack.c.bf16 %v2062_v56, %v2062_v56 }
 0x227   : > { %1812 = vst.msk [vmem:[%s4027_s16 + $0x18] sm:$0xf] %vm755_vm1, %v1780_v57 }
 0x228   : > { %1987 = vst.msk [vmem:[%s4035_s26 + $0x18] sm:$0xf] %vm755_vm1, %v1955_v1 }
 0x229   : > { %1638 = vst.msk [vmem:[%s3987_s24 + $0x1c] sm:$0xf] %vm755_vm1, %v1606_v2 }
 0x22a   : > { %2163 = vst.msk [vmem:[%s3999_s15 + $0x1c] sm:$0xf] %vm755_vm1, %v2131_v3  ;;  %v1711_v4 = vpop.f32.mrf.mxu2  ;;  %v1886_v5 = vpop.f32.mrf.mxu3 }
 0x22b   : > { %v1712_v32 = vadd.f32 %v4008_v34, %v1711_v4  ;;  %v1887_v6 = vadd.f32 %v4013_v35, %v1886_v5  ;;  %v1539_v7 = vpop.f32.mrf.mxu1  ;;  %v2064_v8 = vpop.f32.mrf.mxu0 }
 0x22c   : > { %v1540_v9 = vadd.f32 %v3970_v58, %v1539_v7  ;;  %v2065_v10 = vadd.f32 %v3975_v19, %v2064_v8 }
 0x22d   : > { %v1781_v11 = vpack.c.bf16 %v1712_v32, %v1712_v32  ;;  %v1956_v16 = vpack.c.bf16 %v1887_v6, %v1887_v6 }
 0x22e   : > { %v1607_v18 = vpack.c.bf16 %v1540_v9, %v1540_v9  ;;  %v2132_v59 = vpack.c.bf16 %v2065_v10, %v2065_v10  ;;  %2719 = vmatmul.msk.bf16.gmra.mxu1 %vm585_vm0, %v3124_v15  ;;  %2806 = vmatmul.msk.bf16.gmra.mxu0 %vm585_vm0, %v3124_v15 }
 0x22f   : > { %1813 = vst.msk [vmem:[%s4027_s16 + $0x1c] sm:$0xf] %vm755_vm1, %v1781_v11  ;;  %2748 = vmatmul.msk.bf16.gmra.mxu2 %vm585_vm0, %v3124_v15  ;;  %2777 = vmatmul.msk.bf16.gmra.mxu3 %vm585_vm0, %v3124_v15 }
 0x230   : > { %1988 = vst.msk [vmem:[%s4035_s26 + $0x1c] sm:$0xf] %vm755_vm1, %v1956_v16 }
 0x231   : > { %1639 = vst.msk [vmem:[%s3987_s24 + $0x20] sm:$0xf] %vm755_vm1, %v1607_v18 }
 0x232   : > { %2164 = vst.msk [vmem:[%s3999_s15 + $0x20] sm:$0xf] %vm755_vm1, %v2132_v59  ;;  %v1714_v31 = vpop.f32.mrf.mxu2  ;;  %v1889_v30 = vpop.f32.mrf.mxu3 }
 0x233   : > { %v1715_v20 = vadd.f32 %v4008_v34, %v1714_v31  ;;  %v1890_v21 = vadd.f32 %v4013_v35, %v1889_v30  ;;  %v1541_v22 = vpop.f32.mrf.mxu1  ;;  %v2066_v23 = vpop.f32.mrf.mxu0 }
 0x234   : > { %v1542_v15 = vadd.f32 %v3970_v58, %v1541_v22  ;;  %v2067_v24 = vadd.f32 %v3975_v19, %v2066_v23 }
 0x235   : > { %v1782_v63 = vpack.c.bf16 %v1715_v20, %v1715_v20  ;;  %v1957_v0 = vpack.c.bf16 %v1890_v21, %v1890_v21 }
 0x236   : > { %v1608_v25 = vpack.c.bf16 %v1542_v15, %v1542_v15  ;;  %v2133_v26 = vpack.c.bf16 %v2067_v24, %v2067_v24 }
 0x237   : > { %1814 = vst.msk [vmem:[%s4027_s16 + $0x20] sm:$0xf] %vm755_vm1, %v1782_v63 }
 0x238   : > { %1989 = vst.msk [vmem:[%s4035_s26 + $0x20] sm:$0xf] %vm755_vm1, %v1957_v0 }
 0x239   : > { %1640 = vst.msk [vmem:[%s3987_s24 + $0x24] sm:$0xf] %vm755_vm1, %v1608_v25 }
 0x23a   : > { %2165 = vst.msk [vmem:[%s3999_s15 + $0x24] sm:$0xf] %vm755_vm1, %v2133_v26  ;;  %v1716_v27 = vpop.f32.mrf.mxu2  ;;  %v1891_v28 = vpop.f32.mrf.mxu3 }
 0x23b   : > { %v1717_v29 = vadd.f32 %v4008_v34, %v1716_v27  ;;  %v1892_v44 = vadd.f32 %v4013_v35, %v1891_v28  ;;  %v1544_v62 = vpop.f32.mrf.mxu1  ;;  %v2069_v14 = vpop.f32.mrf.mxu0 }
 0x23c   : > { %v1545_v36 = vadd.f32 %v3970_v58, %v1544_v62  ;;  %v2070_v17 = vadd.f32 %v3975_v19, %v2069_v14 }
 0x23d   : > { %v1783_v37 = vpack.c.bf16 %v1717_v29, %v1717_v29  ;;  %v1958_v38 = vpack.c.bf16 %v1892_v44, %v1892_v44 }
 0x23e   : > { %v1609_v39 = vpack.c.bf16 %v1545_v36, %v1545_v36  ;;  %v2134_v43 = vpack.c.bf16 %v2070_v17, %v2070_v17  ;;  %2720 = vmatmul.msk.bf16.gmra.mxu1 %vm585_vm0, %v3166_v33  ;;  %2807 = vmatmul.msk.bf16.gmra.mxu0 %vm585_vm0, %v3166_v33 }
 0x23f   : > { %1815 = vst.msk [vmem:[%s4027_s16 + $0x24] sm:$0xf] %vm755_vm1, %v1783_v37  ;;  %2749 = vmatmul.msk.bf16.gmra.mxu2 %vm585_vm0, %v3166_v33  ;;  %2778 = vmatmul.msk.bf16.gmra.mxu3 %vm585_vm0, %v3166_v33 }
 0x240   : > { %1990 = vst.msk [vmem:[%s4035_s26 + $0x24] sm:$0xf] %vm755_vm1, %v1958_v38 }
 0x241   : > { %1641 = vst.msk [vmem:[%s3987_s24 + $0x28] sm:$0xf] %vm755_vm1, %v1609_v39 }
 0x242   : > { %2166 = vst.msk [vmem:[%s3999_s15 + $0x28] sm:$0xf] %vm755_vm1, %v2134_v43  ;;  %v1719_v40 = vpop.f32.mrf.mxu2  ;;  %v1894_v41 = vpop.f32.mrf.mxu3 }
 0x243   : > { %v1720_v46 = vadd.f32 %v4008_v34, %v1719_v40  ;;  %v1895_v47 = vadd.f32 %v4013_v35, %v1894_v41  ;;  %v1546_v12 = vpop.f32.mrf.mxu1  ;;  %v2071_v48 = vpop.f32.mrf.mxu0 }
 0x244   : > { %v1547_v33 = vadd.f32 %v3970_v58, %v1546_v12  ;;  %v2072_v13 = vadd.f32 %v3975_v19, %v2071_v48 }
 0x245   : > { %v1784_v42 = vpack.c.bf16 %v1720_v46, %v1720_v46  ;;  %v1959_v49 = vpack.c.bf16 %v1895_v47, %v1895_v47 }
 0x246   : > { %v1610_v50 = vpack.c.bf16 %v1547_v33, %v1547_v33  ;;  %v2135_v51 = vpack.c.bf16 %v2072_v13, %v2072_v13 }
 0x247   : > { %1816 = vst.msk [vmem:[%s4027_s16 + $0x28] sm:$0xf] %vm755_vm1, %v1784_v42 }
 0x248   : > { %1991 = vst.msk [vmem:[%s4035_s26 + $0x28] sm:$0xf] %vm755_vm1, %v1959_v49 }
 0x249   : > { %1642 = vst.msk [vmem:[%s3987_s24 + $0x2c] sm:$0xf] %vm755_vm1, %v1610_v50 }
 0x24a   : > { %2167 = vst.msk [vmem:[%s3999_s15 + $0x2c] sm:$0xf] %vm755_vm1, %v2135_v51  ;;  %v1721_v52 = vpop.f32.mrf.mxu2  ;;  %v1896_v53 = vpop.f32.mrf.mxu3 }
 0x24b   : > { %v1722_v54 = vadd.f32 %v4008_v34, %v1721_v52  ;;  %v1897_v55 = vadd.f32 %v4013_v35, %v1896_v53  ;;  %v1549_v60 = vpop.f32.mrf.mxu1  ;;  %v2074_v56 = vpop.f32.mrf.mxu0 }
 0x24c   : > { %v1550_v57 = vadd.f32 %v3970_v58, %v1549_v60  ;;  %v2075_v1 = vadd.f32 %v3975_v19, %v2074_v56 }
 0x24d   : > { %v1785_v2 = vpack.c.bf16 %v1722_v54, %v1722_v54  ;;  %v1960_v3 = vpack.c.bf16 %v1897_v55, %v1897_v55 }
 0x24e   : > { %v1611_v4 = vpack.c.bf16 %v1550_v57, %v1550_v57  ;;  %v2136_v5 = vpack.c.bf16 %v2075_v1, %v2075_v1  ;;  %2721 = vmatmul.msk.bf16.gmra.mxu1 %vm585_vm0, %v3190_v45  ;;  %2808 = vmatmul.msk.bf16.gmra.mxu0 %vm585_vm0, %v3190_v45 }
 0x24f   : > { %1817 = vst.msk [vmem:[%s4027_s16 + $0x2c] sm:$0xf] %vm755_vm1, %v1785_v2  ;;  %2750 = vmatmul.msk.bf16.gmra.mxu2 %vm585_vm0, %v3190_v45  ;;  %2779 = vmatmul.msk.bf16.gmra.mxu3 %vm585_vm0, %v3190_v45 }
 0x250   : > { %1992 = vst.msk [vmem:[%s4035_s26 + $0x2c] sm:$0xf] %vm755_vm1, %v1960_v3 }
 0x251   : > { %1643 = vst.msk [vmem:[%s3987_s24 + $0x30] sm:$0xf] %vm755_vm1, %v1611_v4 }
 0x252   : > { %2168 = vst.msk [vmem:[%s3999_s15 + $0x30] sm:$0xf] %vm755_vm1, %v2136_v5  ;;  %v1724_v32 = vpop.f32.mrf.mxu2  ;;  %v1899_v6 = vpop.f32.mrf.mxu3 }
 0x253   : > { %v1725_v7 = vadd.f32 %v4008_v34, %v1724_v32  ;;  %v1900_v8 = vadd.f32 %v4013_v35, %v1899_v6  ;;  %v1551_v9 = vpop.f32.mrf.mxu1  ;;  %v2076_v10 = vpop.f32.mrf.mxu0 }
 0x254   : > { %v1552_v45 = vadd.f32 %v3970_v58, %v1551_v9  ;;  %v2077_v11 = vadd.f32 %v3975_v19, %v2076_v10 }
 0x255   : > { %v1786_v16 = vpack.c.bf16 %v1725_v7, %v1725_v7  ;;  %v1961_v18 = vpack.c.bf16 %v1900_v8, %v1900_v8 }
 0x256   : > { %v1612_v59 = vpack.c.bf16 %v1552_v45, %v1552_v45  ;;  %v2137_v31 = vpack.c.bf16 %v2077_v11, %v2077_v11 }
 0x257   : > { %1818 = vst.msk [vmem:[%s4027_s16 + $0x30] sm:$0xf] %vm755_vm1, %v1786_v16 }
 0x258   : > { %1993 = vst.msk [vmem:[%s4035_s26 + $0x30] sm:$0xf] %vm755_vm1, %v1961_v18 }
 0x259   : > { %1644 = vst.msk [vmem:[%s3987_s24 + $0x34] sm:$0xf] %vm755_vm1, %v1612_v59 }
 0x25a   : > { %2169 = vst.msk [vmem:[%s3999_s15 + $0x34] sm:$0xf] %vm755_vm1, %v2137_v31  ;;  %v1726_v30 = vpop.f32.mrf.mxu2  ;;  %v1901_v20 = vpop.f32.mrf.mxu3 }
 0x25b   : > { %v1727_v21 = vadd.f32 %v4008_v34, %v1726_v30  ;;  %v1902_v22 = vadd.f32 %v4013_v35, %v1901_v20  ;;  %v1554_v23 = vpop.f32.mrf.mxu1  ;;  %v2079_v15 = vpop.f32.mrf.mxu0 }
 0x25c   : > { %v1555_v24 = vadd.f32 %v3970_v58, %v1554_v23  ;;  %v2080_v63 = vadd.f32 %v3975_v19, %v2079_v15 }
 0x25d   : > { %v1787_v0 = vpack.c.bf16 %v1727_v21, %v1727_v21  ;;  %v1962_v25 = vpack.c.bf16 %v1902_v22, %v1902_v22 }
 0x25e   : > { %v1613_v26 = vpack.c.bf16 %v1555_v24, %v1555_v24  ;;  %v2138_v27 = vpack.c.bf16 %v2080_v63, %v2080_v63  ;;  %2722 = vmatmul.msk.bf16.gmra.mxu1 %vm585_vm0, %v3226_v61  ;;  %2809 = vmatmul.msk.bf16.gmra.mxu0 %vm585_vm0, %v3226_v61 }
 0x25f   : > { %1819 = vst.msk [vmem:[%s4027_s16 + $0x34] sm:$0xf] %vm755_vm1, %v1787_v0  ;;  %2751 = vmatmul.msk.bf16.gmra.mxu2 %vm585_vm0, %v3226_v61  ;;  %2780 = vmatmul.msk.bf16.gmra.mxu3 %vm585_vm0, %v3226_v61 }
 0x260   : > { %1994 = vst.msk [vmem:[%s4035_s26 + $0x34] sm:$0xf] %vm755_vm1, %v1962_v25 }
 0x261   : > { %1645 = vst.msk [vmem:[%s3987_s24 + $0x38] sm:$0xf] %vm755_vm1, %v1613_v26 }
 0x262   : > { %2170 = vst.msk [vmem:[%s3999_s15 + $0x38] sm:$0xf] %vm755_vm1, %v2138_v27  ;;  %v1729_v28 = vpop.f32.mrf.mxu2  ;;  %v1904_v29 = vpop.f32.mrf.mxu3 }
 0x263   : > { %v1730_v44 = vadd.f32 %v4008_v34, %v1729_v28  ;;  %v1905_v62 = vadd.f32 %v4013_v35, %v1904_v29  ;;  %v1556_v14 = vpop.f32.mrf.mxu1  ;;  %v2081_v36 = vpop.f32.mrf.mxu0 }
 0x264   : > { %v1557_v61 = vadd.f32 %v3970_v58, %v1556_v14  ;;  %v2082_v17 = vadd.f32 %v3975_v19, %v2081_v36 }
 0x265   : > { %v1788_v37 = vpack.c.bf16 %v1730_v44, %v1730_v44  ;;  %v1963_v38 = vpack.c.bf16 %v1905_v62, %v1905_v62 }
 0x266   : > { %v1614_v39 = vpack.c.bf16 %v1557_v61, %v1557_v61  ;;  %v2139_v43 = vpack.c.bf16 %v2082_v17, %v2082_v17 }
 0x267   : > { %1820 = vst.msk [vmem:[%s4027_s16 + $0x38] sm:$0xf] %vm755_vm1, %v1788_v37 }
 0x268   : > { %1995 = vst.msk [vmem:[%s4035_s26 + $0x38] sm:$0xf] %vm755_vm1, %v1963_v38 }
 0x269   : > { %1646 = vst.msk [vmem:[%s3987_s24 + $0x3c] sm:$0xf] %vm755_vm1, %v1614_v39 }
 0x26a   : > { %2171 = vst.msk [vmem:[%s3999_s15 + $0x3c] sm:$0xf] %vm755_vm1, %v2139_v43  ;;  %v1731_v40 = vpop.f32.mrf.mxu2  ;;  %v1906_v41 = vpop.f32.mrf.mxu3 }
 0x26b   : > { %v1732_v46 = vadd.f32 %v4008_v34, %v1731_v40  ;;  %v1907_v47 = vadd.f32 %v4013_v35, %v1906_v41  ;;  %v1559_v12 = vpop.f32.mrf.mxu1  ;;  %v2084_v48 = vpop.f32.mrf.mxu0 }
 0x26c   : > { %v1560_v33 = vadd.f32 %v3970_v58, %v1559_v12  ;;  %v2085_v13 = vadd.f32 %v3975_v19, %v2084_v48 }
 0x26d   : > { %v1789_v42 = vpack.c.bf16 %v1732_v46, %v1732_v46  ;;  %v1964_v49 = vpack.c.bf16 %v1907_v47, %v1907_v47 }
 0x26e   : > { %v1615_v50 = vpack.c.bf16 %v1560_v33, %v1560_v33  ;;  %v2140_v51 = vpack.c.bf16 %v2085_v13, %v2085_v13 }
 0x26f   : > { %1821 = vst.msk [vmem:[%s4027_s16 + $0x3c] sm:$0xf] %vm755_vm1, %v1789_v42 }
 0x270   : > { %1996 = vst.msk [vmem:[%s4035_s26 + $0x3c] sm:$0xf] %vm755_vm1, %v1964_v49 }
 0x271   : > { %1647 = vst.msk [vmem:[%s3987_s24 + $0x40] sm:$0xf] %vm755_vm1, %v1615_v50 }
 0x272   : > { %2172 = vst.msk [vmem:[%s3999_s15 + $0x40] sm:$0xf] %vm755_vm1, %v2140_v51  ;;  %v1734_v52 = vpop.f32.mrf.mxu2  ;;  %v1909_v53 = vpop.f32.mrf.mxu3 }
 0x273   : > { %v1735_v54 = vadd.f32 %v4008_v34, %v1734_v52  ;;  %v1910_v55 = vadd.f32 %v4013_v35, %v1909_v53  ;;  %v1561_v60 = vpop.f32.mrf.mxu1  ;;  %v2086_v56 = vpop.f32.mrf.mxu0 }
 0x274   : > { %v1562_v57 = vadd.f32 %v3970_v58, %v1561_v60  ;;  %v2087_v1 = vadd.f32 %v3975_v19, %v2086_v56 }
 0x275   : > { %v1790_v2 = vpack.c.bf16 %v1735_v54, %v1735_v54  ;;  %v1965_v3 = vpack.c.bf16 %v1910_v55, %v1910_v55 }
 0x276   : > { %v1616_v4 = vpack.c.bf16 %v1562_v57, %v1562_v57  ;;  %v2141_v5 = vpack.c.bf16 %v2087_v1, %v2087_v1 }
 0x277   : > { %1822 = vst.msk [vmem:[%s4027_s16 + $0x40] sm:$0xf] %vm755_vm1, %v1790_v2 }
 0x278   : > { %1997 = vst.msk [vmem:[%s4035_s26 + $0x40] sm:$0xf] %vm755_vm1, %v1965_v3 }
 0x279   : > { %1648 = vst.msk [vmem:[%s3987_s24 + $0x44] sm:$0xf] %vm755_vm1, %v1616_v4 }
 0x27a   : > { %2173 = vst.msk [vmem:[%s3999_s15 + $0x44] sm:$0xf] %vm755_vm1, %v2141_v5  ;;  %v1736_v32 = vpop.f32.mrf.mxu2  ;;  %v1911_v6 = vpop.f32.mrf.mxu3 }
 0x27b   : > { %v1737_v7 = vadd.f32 %v4008_v34, %v1736_v32  ;;  %v1912_v8 = vadd.f32 %v4013_v35, %v1911_v6  ;;  %v1564_v9 = vpop.f32.mrf.mxu1  ;;  %v2089_v10 = vpop.f32.mrf.mxu0 }
 0x27c   : > { %v1565_v45 = vadd.f32 %v3970_v58, %v1564_v9  ;;  %v2090_v11 = vadd.f32 %v3975_v19, %v2089_v10 }
 0x27d   : > { %v1791_v16 = vpack.c.bf16 %v1737_v7, %v1737_v7  ;;  %v1966_v18 = vpack.c.bf16 %v1912_v8, %v1912_v8 }
 0x27e   : > { %v1617_v59 = vpack.c.bf16 %v1565_v45, %v1565_v45  ;;  %v2142_v31 = vpack.c.bf16 %v2090_v11, %v2090_v11 }
 0x27f   : > { %1823 = vst.msk [vmem:[%s4027_s16 + $0x44] sm:$0xf] %vm755_vm1, %v1791_v16 }
 0x280   : > { %1998 = vst.msk [vmem:[%s4035_s26 + $0x44] sm:$0xf] %vm755_vm1, %v1966_v18 }
 0x281   : > { %1649 = vst.msk [vmem:[%s3987_s24 + $0x48] sm:$0xf] %vm755_vm1, %v1617_v59 }
 0x282   : > { %2174 = vst.msk [vmem:[%s3999_s15 + $0x48] sm:$0xf] %vm755_vm1, %v2142_v31  ;;  %v1739_v30 = vpop.f32.mrf.mxu2  ;;  %v1914_v20 = vpop.f32.mrf.mxu3 }
 0x283   : > { %v1740_v21 = vadd.f32 %v4008_v34, %v1739_v30  ;;  %v1915_v22 = vadd.f32 %v4013_v35, %v1914_v20  ;;  %v1566_v23 = vpop.f32.mrf.mxu1  ;;  %v2091_v15 = vpop.f32.mrf.mxu0 }
 0x284   : > { %v1567_v24 = vadd.f32 %v3970_v58, %v1566_v23  ;;  %v2092_v63 = vadd.f32 %v3975_v19, %v2091_v15 }
 0x285   : > { %v1792_v0 = vpack.c.bf16 %v1740_v21, %v1740_v21  ;;  %v1967_v25 = vpack.c.bf16 %v1915_v22, %v1915_v22 }
 0x286   : > { %v1618_v26 = vpack.c.bf16 %v1567_v24, %v1567_v24  ;;  %v2143_v27 = vpack.c.bf16 %v2092_v63, %v2092_v63 }
 0x287   : > { %1824 = vst.msk [vmem:[%s4027_s16 + $0x48] sm:$0xf] %vm755_vm1, %v1792_v0 }
 0x288   : > { %1999 = vst.msk [vmem:[%s4035_s26 + $0x48] sm:$0xf] %vm755_vm1, %v1967_v25 }
 0x289   : > { %1650 = vst.msk [vmem:[%s3987_s24 + $0x4c] sm:$0xf] %vm755_vm1, %v1618_v26 }
 0x28a   : > { %2175 = vst.msk [vmem:[%s3999_s15 + $0x4c] sm:$0xf] %vm755_vm1, %v2143_v27  ;;  %v1741_v28 = vpop.f32.mrf.mxu2  ;;  %v1916_v29 = vpop.f32.mrf.mxu3 }
 0x28b   : > { %v1742_v44 = vadd.f32 %v4008_v34, %v1741_v28  ;;  %v1917_v62 = vadd.f32 %v4013_v35, %v1916_v29  ;;  %v1569_v14 = vpop.f32.mrf.mxu1  ;;  %v2094_v36 = vpop.f32.mrf.mxu0 }
 0x28c   : > { %v1570_v61 = vadd.f32 %v3970_v58, %v1569_v14  ;;  %v2095_v17 = vadd.f32 %v3975_v19, %v2094_v36 }
 0x28d   : > { %v1793_v37 = vpack.c.bf16 %v1742_v44, %v1742_v44  ;;  %v1968_v38 = vpack.c.bf16 %v1917_v62, %v1917_v62 }
 0x28e   : > { %v1619_v39 = vpack.c.bf16 %v1570_v61, %v1570_v61  ;;  %v2144_v43 = vpack.c.bf16 %v2095_v17, %v2095_v17 }
 0x28f   : > { %1825 = vst.msk [vmem:[%s4027_s16 + $0x4c] sm:$0xf] %vm755_vm1, %v1793_v37 }
 0x290   : > { %2000 = vst.msk [vmem:[%s4035_s26 + $0x4c] sm:$0xf] %vm755_vm1, %v1968_v38 }
 0x291   : > { %1651 = vst.msk [vmem:[%s3987_s24 + $0x50] sm:$0xf] %vm755_vm1, %v1619_v39 }
 0x292   : > { %2176 = vst.msk [vmem:[%s3999_s15 + $0x50] sm:$0xf] %vm755_vm1, %v2144_v43  ;;  %v1744_v40 = vpop.f32.mrf.mxu2  ;;  %v1919_v41 = vpop.f32.mrf.mxu3 }
 0x293   : > { %v1745_v46 = vadd.f32 %v4008_v34, %v1744_v40  ;;  %v1920_v47 = vadd.f32 %v4013_v35, %v1919_v41  ;;  %v1571_v12 = vpop.f32.mrf.mxu1  ;;  %v2096_v48 = vpop.f32.mrf.mxu0 }
 0x294   : > { %v1572_v33 = vadd.f32 %v3970_v58, %v1571_v12  ;;  %v2097_v13 = vadd.f32 %v3975_v19, %v2096_v48 }
 0x295   : > { %v1794_v42 = vpack.c.bf16 %v1745_v46, %v1745_v46  ;;  %v1969_v49 = vpack.c.bf16 %v1920_v47, %v1920_v47 }
 0x296   : > { %v1620_v50 = vpack.c.bf16 %v1572_v33, %v1572_v33  ;;  %v2145_v51 = vpack.c.bf16 %v2097_v13, %v2097_v13 }
 0x297   : > { %1826 = vst.msk [vmem:[%s4027_s16 + $0x50] sm:$0xf] %vm755_vm1, %v1794_v42 }
 0x298   : > { %2001 = vst.msk [vmem:[%s4035_s26 + $0x50] sm:$0xf] %vm755_vm1, %v1969_v49 }
 0x299   : > { %1652 = vst.msk [vmem:[%s3987_s24 + $0x54] sm:$0xf] %vm755_vm1, %v1620_v50 }
 0x29a   : > { %2177 = vst.msk [vmem:[%s3999_s15 + $0x54] sm:$0xf] %vm755_vm1, %v2145_v51  ;;  %v1746_v52 = vpop.f32.mrf.mxu2  ;;  %v1921_v53 = vpop.f32.mrf.mxu3 }
 0x29b   : > { %v1747_v54 = vadd.f32 %v4008_v34, %v1746_v52  ;;  %v1922_v55 = vadd.f32 %v4013_v35, %v1921_v53  ;;  %v1574_v60 = vpop.f32.mrf.mxu1  ;;  %v2099_v56 = vpop.f32.mrf.mxu0 }
 0x29c   : > { %v1575_v57 = vadd.f32 %v3970_v58, %v1574_v60  ;;  %v2100_v1 = vadd.f32 %v3975_v19, %v2099_v56 }
 0x29d   : > { %v1795_v2 = vpack.c.bf16 %v1747_v54, %v1747_v54  ;;  %v1970_v3 = vpack.c.bf16 %v1922_v55, %v1922_v55 }
 0x29e   : > { %v1621_v4 = vpack.c.bf16 %v1575_v57, %v1575_v57  ;;  %v2146_v5 = vpack.c.bf16 %v2100_v1, %v2100_v1 }
 0x29f   : > { %1827 = vst.msk [vmem:[%s4027_s16 + $0x54] sm:$0xf] %vm755_vm1, %v1795_v2 }
 0x2a0   : > { %2002 = vst.msk [vmem:[%s4035_s26 + $0x54] sm:$0xf] %vm755_vm1, %v1970_v3 }
 0x2a1   : > { %1653 = vst.msk [vmem:[%s3987_s24 + $0x58] sm:$0xf] %vm755_vm1, %v1621_v4 }
 0x2a2   : > { %2178 = vst.msk [vmem:[%s3999_s15 + $0x58] sm:$0xf] %vm755_vm1, %v2146_v5  ;;  %v1749_v32 = vpop.f32.mrf.mxu2  ;;  %v1924_v6 = vpop.f32.mrf.mxu3 }
 0x2a3   : > { %v1750_v7 = vadd.f32 %v4008_v34, %v1749_v32  ;;  %v1925_v8 = vadd.f32 %v4013_v35, %v1924_v6  ;;  %v1576_v9 = vpop.f32.mrf.mxu1  ;;  %v2101_v10 = vpop.f32.mrf.mxu0 }
 0x2a4   : > { %v1577_v45 = vadd.f32 %v3970_v58, %v1576_v9  ;;  %v2102_v11 = vadd.f32 %v3975_v19, %v2101_v10 }
 0x2a5   : > { %v1796_v16 = vpack.c.bf16 %v1750_v7, %v1750_v7  ;;  %v1971_v18 = vpack.c.bf16 %v1925_v8, %v1925_v8 }
 0x2a6   : > { %v1622_v59 = vpack.c.bf16 %v1577_v45, %v1577_v45  ;;  %v2147_v31 = vpack.c.bf16 %v2102_v11, %v2102_v11 }
 0x2a7   : > { %1828 = vst.msk [vmem:[%s4027_s16 + $0x58] sm:$0xf] %vm755_vm1, %v1796_v16 }
 0x2a8   : > { %2003 = vst.msk [vmem:[%s4035_s26 + $0x58] sm:$0xf] %vm755_vm1, %v1971_v18 }
 0x2a9   : > { %1654 = vst.msk [vmem:[%s3987_s24 + $0x5c] sm:$0xf] %vm755_vm1, %v1622_v59 }
 0x2aa   : > { %2179 = vst.msk [vmem:[%s3999_s15 + $0x5c] sm:$0xf] %vm755_vm1, %v2147_v31  ;;  %v1751_v30 = vpop.f32.mrf.mxu2  ;;  %v1926_v20 = vpop.f32.mrf.mxu3 }
 0x2ab   : > { %v1752_v21 = vadd.f32 %v4008_v34, %v1751_v30  ;;  %v1927_v22 = vadd.f32 %v4013_v35, %v1926_v20  ;;  %v1579_v23 = vpop.f32.mrf.mxu1  ;;  %v2104_v15 = vpop.f32.mrf.mxu0 }
 0x2ac   : > { %v1580_v24 = vadd.f32 %v3970_v58, %v1579_v23  ;;  %v2105_v63 = vadd.f32 %v3975_v19, %v2104_v15  ;;  %v2891_v23 = vld [vmem:[%s4484_s2 + $0x5] ss:$0 sm:$0xff] }
 0x2ad   : > { %v1797_v0 = vpack.c.bf16 %v1752_v21, %v1752_v21  ;;  %v1972_v25 = vpack.c.bf16 %v1927_v22, %v1927_v22 }
 0x2ae   : > { %v1623_v26 = vpack.c.bf16 %v1580_v24, %v1580_v24  ;;  %v2148_v27 = vpack.c.bf16 %v2105_v63, %v2105_v63  ;;  %v2892_v24 = vld [vmem:[%s4484_s2 + $0x8] ss:$0 sm:$0xff] }
 0x2af   : > { %1829 = vst.msk [vmem:[%s4027_s16 + $0x5c] sm:$0xf] %vm755_vm1, %v1797_v0 }
 0x2b0   : > { %2004 = vst.msk [vmem:[%s4035_s26 + $0x5c] sm:$0xf] %vm755_vm1, %v1972_v25 }
 0x2b1   : > { %1655 = vst.msk [vmem:[%s3987_s24 + $0x60] sm:$0xf] %vm755_vm1, %v1623_v26 }
 0x2b2   : > { %2180 = vst.msk [vmem:[%s3999_s15 + $0x60] sm:$0xf] %vm755_vm1, %v2148_v27  ;;  %v1754_v28 = vpop.f32.mrf.mxu2  ;;  %v1929_v29 = vpop.f32.mrf.mxu3 }
 0x2b3   : > { %v1755_v44 = vadd.f32 %v4008_v34, %v1754_v28  ;;  %v1930_v62 = vadd.f32 %v4013_v35, %v1929_v29  ;;  %v1581_v14 = vpop.f32.mrf.mxu1  ;;  %v2106_v36 = vpop.f32.mrf.mxu0 }
 0x2b4   : > { %v1582_v61 = vadd.f32 %v3970_v58, %v1581_v14  ;;  %v2107_v17 = vadd.f32 %v3975_v19, %v2106_v36 }
 0x2b5   : > { %v1798_v37 = vpack.c.bf16 %v1755_v44, %v1755_v44  ;;  %v1973_v38 = vpack.c.bf16 %v1930_v62, %v1930_v62 }
 0x2b6   : > { %v1624_v39 = vpack.c.bf16 %v1582_v61, %v1582_v61  ;;  %v2149_v43 = vpack.c.bf16 %v2107_v17, %v2107_v17 }
 0x2b7   : > { %1830 = vst.msk [vmem:[%s4027_s16 + $0x60] sm:$0xf] %vm755_vm1, %v1798_v37 }
 0x2b8   : > { %2005 = vst.msk [vmem:[%s4035_s26 + $0x60] sm:$0xf] %vm755_vm1, %v1973_v38 }
 0x2b9   : > { %1656 = vst.msk [vmem:[%s3987_s24 + $0x64] sm:$0xf] %vm755_vm1, %v1624_v39 }
 0x2ba   : > { %2181 = vst.msk [vmem:[%s3999_s15 + $0x64] sm:$0xf] %vm755_vm1, %v2149_v43  ;;  %v1756_v40 = vpop.f32.mrf.mxu2  ;;  %v1931_v41 = vpop.f32.mrf.mxu3 }
 0x2bb   : > { %v1757_v46 = vadd.f32 %v4008_v34, %v1756_v40  ;;  %v1932_v47 = vadd.f32 %v4013_v35, %v1931_v41  ;;  %v1584_v12 = vpop.f32.mrf.mxu1  ;;  %v2109_v48 = vpop.f32.mrf.mxu0  ;;  %v2893_v40 = vld [vmem:[%s4484_s2 + $0x6] ss:$0 sm:$0xff] }
 0x2bc   : > { %v1585_v33 = vadd.f32 %v3970_v58, %v1584_v12  ;;  %v2110_v13 = vadd.f32 %v3975_v19, %v2109_v48 }
 0x2bd   : > { %v1799_v42 = vpack.c.bf16 %v1757_v46, %v1757_v46  ;;  %v1974_v49 = vpack.c.bf16 %v1932_v47, %v1932_v47  ;;  %v2894_v46 = vld [vmem:[%s4484_s2 + $0x7] ss:$0 sm:$0xff] }
 0x2be   : > { %v1625_v50 = vpack.c.bf16 %v1585_v33, %v1585_v33  ;;  %v2150_v51 = vpack.c.bf16 %v2110_v13, %v2110_v13 }
 0x2bf   : > { %1831 = vst.msk [vmem:[%s4027_s16 + $0x64] sm:$0xf] %vm755_vm1, %v1799_v42 }
 0x2c0   : > { %2006 = vst.msk [vmem:[%s4035_s26 + $0x64] sm:$0xf] %vm755_vm1, %v1974_v49 }
 0x2c1   : > { %1657 = vst.msk [vmem:[%s3987_s24 + $0x68] sm:$0xf] %vm755_vm1, %v1625_v50 }
 0x2c2   : > { %2182 = vst.msk [vmem:[%s3999_s15 + $0x68] sm:$0xf] %vm755_vm1, %v2150_v51  ;;  %v1759_v52 = vpop.f32.mrf.mxu2  ;;  %v1934_v53 = vpop.f32.mrf.mxu3 }
 0x2c3   : > { %v1760_v54 = vadd.f32 %v4008_v34, %v1759_v52  ;;  %v1935_v55 = vadd.f32 %v4013_v35, %v1934_v53  ;;  %v1586_v60 = vpop.f32.mrf.mxu1  ;;  %v2111_v56 = vpop.f32.mrf.mxu0 }
 0x2c4   : > { %v1587_v57 = vadd.f32 %v3970_v58, %v1586_v60  ;;  %v2112_v1 = vadd.f32 %v3975_v19, %v2111_v56 }
 0x2c5   : > { %v1800_v2 = vpack.c.bf16 %v1760_v54, %v1760_v54  ;;  %v1975_v3 = vpack.c.bf16 %v1935_v55, %v1935_v55 }
 0x2c6   : > { %v1626_v4 = vpack.c.bf16 %v1587_v57, %v1587_v57  ;;  %v2151_v5 = vpack.c.bf16 %v2112_v1, %v2112_v1 }
 0x2c7   : > { %1832 = vst.msk [vmem:[%s4027_s16 + $0x68] sm:$0xf] %vm755_vm1, %v1800_v2 }
 0x2c8   : > { %2007 = vst.msk [vmem:[%s4035_s26 + $0x68] sm:$0xf] %vm755_vm1, %v1975_v3 }
 0x2c9   : > { %1658 = vst.msk [vmem:[%s3987_s24 + $0x6c] sm:$0xf] %vm755_vm1, %v1626_v4 }
 0x2ca   : > { %2183 = vst.msk [vmem:[%s3999_s15 + $0x6c] sm:$0xf] %vm755_vm1, %v2151_v5  ;;  %v1761_v32 = vpop.f32.mrf.mxu2  ;;  %v1936_v6 = vpop.f32.mrf.mxu3 }
 0x2cb   : > { %v1762_v7 = vadd.f32 %v4008_v34, %v1761_v32  ;;  %v1937_v8 = vadd.f32 %v4013_v35, %v1936_v6  ;;  %v1589_v9 = vpop.f32.mrf.mxu1  ;;  %v2114_v10 = vpop.f32.mrf.mxu0 }
 0x2cc   : > { %v1590_v45 = vadd.f32 %v3970_v58, %v1589_v9  ;;  %v2115_v11 = vadd.f32 %v3975_v19, %v2114_v10 }
 0x2cd   : > { %v1801_v16 = vpack.c.bf16 %v1762_v7, %v1762_v7  ;;  %v1976_v18 = vpack.c.bf16 %v1937_v8, %v1937_v8 }
 0x2ce   : > { %v1627_v59 = vpack.c.bf16 %v1590_v45, %v1590_v45  ;;  %v2152_v31 = vpack.c.bf16 %v2115_v11, %v2115_v11 }
 0x2cf   : > { %1833 = vst.msk [vmem:[%s4027_s16 + $0x6c] sm:$0xf] %vm755_vm1, %v1801_v16 }
 0x2d0   : > { %2008 = vst.msk [vmem:[%s4035_s26 + $0x6c] sm:$0xf] %vm755_vm1, %v1976_v18 }
 0x2d1   : > { %1659 = vst.msk [vmem:[%s3987_s24 + $0x70] sm:$0xf] %vm755_vm1, %v1627_v59 }
 0x2d2   : > { %2184 = vst.msk [vmem:[%s3999_s15 + $0x70] sm:$0xf] %vm755_vm1, %v2152_v31  ;;  %v1764_v30 = vpop.f32.mrf.mxu2  ;;  %v1939_v20 = vpop.f32.mrf.mxu3 }
 0x2d3   : > { %v1765_v58 = vadd.f32 %v4008_v34, %v1764_v30  ;;  %v1940_v19 = vadd.f32 %v4013_v35, %v1939_v20  ;;  %v1591_v21 = vpop.f32.mrf.mxu1  ;;  %v2116_v22 = vpop.f32.mrf.mxu0 }
 0x2d4   : > { %v1592_v15 = vadd.f32 %v2891_v23, %v1591_v21  ;;  %v2117_v63 = vadd.f32 %v2892_v24, %v2116_v22 }
 0x2d5   : > { %v1802_v0 = vpack.c.bf16 %v1765_v58, %v1765_v58  ;;  %v1977_v25 = vpack.c.bf16 %v1940_v19, %v1940_v19 }
 0x2d6   : > { %v1628_v26 = vpack.c.bf16 %v1592_v15, %v1592_v15  ;;  %v2153_v27 = vpack.c.bf16 %v2117_v63, %v2117_v63 }
 0x2d7   : > { %1834 = vst.msk [vmem:[%s4027_s16 + $0x70] sm:$0xf] %vm755_vm1, %v1802_v0 }
 0x2d8   : > { %2009 = vst.msk [vmem:[%s4035_s26 + $0x70] sm:$0xf] %vm755_vm1, %v1977_v25 }
 0x2d9   : > { %1660 = vst.msk [vmem:[%s3987_s24 + $0x74] sm:$0xf] %vm755_vm1, %v1628_v26 }
 0x2da   : > { %2185 = vst.msk [vmem:[%s3999_s15 + $0x74] sm:$0xf] %vm755_vm1, %v2153_v27  ;;  %v1766_v28 = vpop.f32.mrf.mxu2  ;;  %v1941_v29 = vpop.f32.mrf.mxu3 }
 0x2db   : > { %v1767_v44 = vadd.f32 %v4008_v34, %v1766_v28  ;;  %v1942_v62 = vadd.f32 %v4013_v35, %v1941_v29  ;;  %v1594_v14 = vpop.f32.mrf.mxu1  ;;  %v2119_v36 = vpop.f32.mrf.mxu0 }
 0x2dc   : > { %v1595_v61 = vadd.f32 %v2891_v23, %v1594_v14  ;;  %v2120_v17 = vadd.f32 %v2892_v24, %v2119_v36 }
 0x2dd   : > { %v1803_v37 = vpack.c.bf16 %v1767_v44, %v1767_v44  ;;  %v1978_v38 = vpack.c.bf16 %v1942_v62, %v1942_v62 }
 0x2de   : > { %v1629_v39 = vpack.c.bf16 %v1595_v61, %v1595_v61  ;;  %v2154_v43 = vpack.c.bf16 %v2120_v17, %v2120_v17 }
 0x2df   : > { %1835 = vst.msk [vmem:[%s4027_s16 + $0x74] sm:$0xf] %vm755_vm1, %v1803_v37 }
 0x2e0   : > { %2010 = vst.msk [vmem:[%s4035_s26 + $0x74] sm:$0xf] %vm755_vm1, %v1978_v38 }
 0x2e1   : > { %1661 = vst.msk [vmem:[%s3987_s24 + $0x78] sm:$0xf] %vm755_vm1, %v1629_v39 }
 0x2e2   : > { %2186 = vst.msk [vmem:[%s3999_s15 + $0x78] sm:$0xf] %vm755_vm1, %v2154_v43  ;;  %v1769_v34 = vpop.f32.mrf.mxu2  ;;  %v1944_v35 = vpop.f32.mrf.mxu3 }
 0x2e3   : > { %v1770_v41 = vadd.f32 %v2893_v40, %v1769_v34  ;;  %v1945_v47 = vadd.f32 %v2894_v46, %v1944_v35  ;;  %v1596_v12 = vpop.f32.mrf.mxu1  ;;  %v2121_v48 = vpop.f32.mrf.mxu0 }
 0x2e4   : > { %v1597_v33 = vadd.f32 %v2891_v23, %v1596_v12  ;;  %v2122_v13 = vadd.f32 %v2892_v24, %v2121_v48 }
 0x2e5   : > { %v1804_v42 = vpack.c.bf16 %v1770_v41, %v1770_v41  ;;  %v1979_v49 = vpack.c.bf16 %v1945_v47, %v1945_v47 }
 0x2e6   : > { %v1630_v50 = vpack.c.bf16 %v1597_v33, %v1597_v33  ;;  %v2155_v51 = vpack.c.bf16 %v2122_v13, %v2122_v13 }
 0x2e7   : > { %1836 = vst.msk [vmem:[%s4027_s16 + $0x78] sm:$0xf] %vm755_vm1, %v1804_v42 }
 0x2e8   : > { %2011 = vst.msk [vmem:[%s4035_s26 + $0x78] sm:$0xf] %vm755_vm1, %v1979_v49 }
 0x2e9   : > { %1662 = vst.msk [vmem:[%s3987_s24 + $0x7c] sm:$0xf] %vm755_vm1, %v1630_v50 }
 0x2ea   : > { %2187 = vst.msk [vmem:[%s3999_s15 + $0x7c] sm:$0xf] %vm755_vm1, %v2155_v51  ;;  %v1771_v52 = vpop.f32.mrf.mxu2  ;;  %v1946_v53 = vpop.f32.mrf.mxu3 }
 0x2eb   : > { %v1772_v54 = vadd.f32 %v2893_v40, %v1771_v52  ;;  %v1947_v55 = vadd.f32 %v2894_v46, %v1946_v53 }
 0x2ed   : > { %v1805_v60 = vpack.c.bf16 %v1772_v54, %v1772_v54  ;;  %v1980_v56 = vpack.c.bf16 %v1947_v55, %v1947_v55 }
 0x2ef   : > { %1837 = vst.msk [vmem:[%s4027_s16 + $0x7c] sm:$0xf] %vm755_vm1, %v1805_v60 }
 0x2f0   : > { %2012 = vst.msk [vmem:[%s4035_s26 + $0x7c] sm:$0xf] %vm755_vm1, %v1980_v56 }
 0x2f1 PF: > { %s4500_s30 = sld [smem:[#allocation5_spill]]  ;;  %p22_p7 = scmp.ge.s32.totalorder %s3043_s22, 10  }
 0x2f2   : > { %s4501_s17 = smov %s2951_s18  ;;  %s4502_s18 = smov %s2955_s19 }
 0x2f3   : > { %s4504_s20 = smov %s3043_s22  ;;  %24 = sbr.rel (!%p22_p7) target bundleno = 3 (0x3), region = 184 }
 0x2f7   : > { %s4503_s19 = smov %s4500_s30 }
 0x2f8   :  { %2346 = vsyncpa [#allocation3], 1 }
 0x2f9   :  { %2348 = vsyncpa [#allocation3 + $0x1], 1 }

// kernel: separate_non_local_forward.6
= control target key start
LH: loop header
LB: loop body
LE: loop exit
PB: predicated region body
PF: predicated region fallthrough
CT: control target
= control target key end

     0   :  { %s5626_s24 = smov 0   ;;  %s6466_s0 = inlined_call_operand.vmem [shape: bf16[2,1024,16], index: 0, kind: input, shape index: {}]   ;;  %s6467_s1 = inlined_call_operand.vmem [shape: bf16[2,1024,16], index: 1, kind: input, shape index: {}]   ;;  %s6468_s2 = inlined_call_operand.vmem [shape: bf16[2,1024,16], index: 2, kind: input, shape index: {}]   ;;  %s6469_s3 = inlined_call_operand.vmem [shape: bf16[2,4,4096], index: 3, kind: input, shape index: {}]   ;;  %s6470_s4 = inlined_call_operand.vmem [shape: bf16[2,4,4096], index: 4, kind: input, shape index: {}]   ;;  %s6471_s5 = inlined_call_operand.vmem [shape: bf16[2,4,4096], index: 5, kind: input, shape index: {}]   ;;  %s6472_s6 = inlined_call_operand.vmem [shape: bf16[2,1024,16], index: 6, kind: output, shape index: {0}]   ;;  %s6473_s7 = inlined_call_operand.vmem [shape: bf16[2,4,4096], index: 7, kind: output, shape index: {1}]  }
   0x1 LB: > { %s4376_s25 = sadd.s32 4294967295, %s5580_s24   ;;  %p4380_p0 = scmp.ge.s32.totalorder %s5580_s24, 1  ;;  %s5580_s24 = sphi %s5626_s24, %s18_s24  }
   0x2   : > { %p290_p1 = scmp.lt.s32.totalorder %s5580_s24, 3 }
   0x4   : > { %p291_p2 = pnand %p4380_p0, %p290_p1 }
   0x5   : > { %p352_p3 = scmp.lt.s32.totalorder (!%p291_p2), %s4376_s25, 1 }
   0x6   : > { %294 = sbr.rel (%p291_p2) target bundleno = 1684 (0x694), region = 44 }
   0xb   : > { %s6475_s25 = smov (!%p352_p3, %s4376_s25), 1  ;;  %vm1785_vm0 = vcmask 130048   ;;  %vm2807_vm9 = vcmask 125952   ;;  %vm3538_vm10 = vcmask 27648   ;;  %vm3617_vm11 = vcmask 1041408  }
   0xc   : > { %s5637_s26 = sshll.u32 %s6475_s25, 9  ;;  %s5784_s10 = sshll.u32 %s6475_s25, 6 }
   0xd   : > { %s5643_s29 = scalar_lea.vmem %s6466_s0, %s5637_s26  ;;  %s5673_s9 = scalar_lea.vmem %s6467_s1, %s5637_s26 }
   0xe   : > { %v5279_v0 = vld [vmem:[%s5643_s29 + $0x40] sm:$0xff]  ;;  %v5280_v4 = vld [vmem:[%s5643_s29 + $0x48] sm:$0xff]  ;;  %v5281_v8 = vld [vmem:[%s5643_s29 + $0x50] sm:$0xff]  ;;  %s5790_s13 = scalar_lea.vmem %s6469_s3, %s5784_s10  ;;  %s5816_s16 = scalar_lea.vmem %s6468_s2, %s5637_s26 }
   0xf   : > { %v5295_v1 = vld [vmem:[%s5643_s29 + $0xc0] sm:$0xff]  ;;  %v5296_v5 = vld [vmem:[%s5643_s29 + $0xc8] sm:$0xff]  ;;  %v5297_v9 = vld [vmem:[%s5643_s29 + $0xd0] sm:$0xff]  ;;  %s5834_s19 = scalar_lea.vmem %s6470_s4, %s5784_s10  ;;  %s5907_s22 = scalar_lea.vmem %s6472_s6, %s5637_s26 }
  0x10   : > { %v5271_v2 = vld [vmem:[%s5643_s29] sm:$0xff]  ;;  %5552 = vxpose.binary.xlu1.c.b16.start [1/16] (narrow) %v5279_v0, %v5295_v1, 16  ;;  %v5272_v6 = vld [vmem:[%s5643_s29 + $0x8] sm:$0xff]  ;;  %v5273_v10 = vld [vmem:[%s5643_s29 + $0x10] sm:$0xff]  ;;  %s6082_s26 = scalar_lea.vmem %s6471_s5, %s5784_s10 }
  0x11   : > { %v5287_v3 = vld [vmem:[%s5643_s29 + $0x80] sm:$0xff]  ;;  %v5288_v7 = vld [vmem:[%s5643_s29 + $0x88] sm:$0xff]  ;;  %v5289_v11 = vld [vmem:[%s5643_s29 + $0x90] sm:$0xff] }
  0x12   : > { %5542 = vxpose.binary.xlu0.c.b16.start [1/16] (narrow) %v5271_v2, %v5287_v3, 16  ;;  %v5282_v12 = vld [vmem:[%s5643_s29 + $0x58] sm:$0xff]  ;;  %v5283_v16 = vld [vmem:[%s5643_s29 + $0x60] sm:$0xff]  ;;  %v5284_v20 = vld [vmem:[%s5643_s29 + $0x68] sm:$0xff] }
  0x13   : > { %v5298_v13 = vld [vmem:[%s5643_s29 + $0xd8] sm:$0xff]  ;;  %v5299_v17 = vld [vmem:[%s5643_s29 + $0xe0] sm:$0xff]  ;;  %v5300_v21 = vld [vmem:[%s5643_s29 + $0xe8] sm:$0xff] }
  0x14   : > { %v5274_v14 = vld [vmem:[%s5643_s29 + $0x18] sm:$0xff]  ;;  %v5275_v18 = vld [vmem:[%s5643_s29 + $0x20] sm:$0xff]  ;;  %v5276_v22 = vld [vmem:[%s5643_s29 + $0x28] sm:$0xff] }
  0x15   : > { %v5290_v15 = vld [vmem:[%s5643_s29 + $0x98] sm:$0xff]  ;;  %v5291_v19 = vld [vmem:[%s5643_s29 + $0xa0] sm:$0xff]  ;;  %v5292_v23 = vld [vmem:[%s5643_s29 + $0xa8] sm:$0xff] }
  0x16   : > { %v5358_v24 = vld [vmem:[%s5673_s9 + $0xb8] sm:$0xff]  ;;  %v5357_v26 = vld [vmem:[%s5673_s9 + $0xb0] sm:$0xff]  ;;  %v5356_v39 = vld [vmem:[%s5673_s9 + $0xa8] sm:$0xff] }
  0x17   : > { %v5366_v25 = vld [vmem:[%s5673_s9 + $0xf8] sm:$0xff]  ;;  %v5365_v27 = vld [vmem:[%s5673_s9 + $0xf0] sm:$0xff]  ;;  %1701 = vmatpush.bf16.msra.mxu2 %v5358_v24  ;;  %v5364_v40 = vld [vmem:[%s5673_s9 + $0xe8] sm:$0xff] }
  0x18   : > { %v5326_v28 = vld [vmem:[%s5643_s29 + $0x1b8] sm:$0xff]  ;;  %1715 = vmatpush.bf16.msra.mxu3 %v5366_v25  ;;  %v5325_v34 = vld [vmem:[%s5643_s29 + $0x1b0] sm:$0xff]  ;;  %v5324_v42 = vld [vmem:[%s5643_s29 + $0x1a8] sm:$0xff] }
  0x19   : > { %v5342_v29 = vld [vmem:[%s5673_s9 + $0x38] sm:$0xff]  ;;  %v5341_v35 = vld [vmem:[%s5673_s9 + $0x30] sm:$0xff]  ;;  %v5340_v43 = vld [vmem:[%s5673_s9 + $0x28] sm:$0xff] }
  0x1a   : > { %v5310_v30 = vld [vmem:[%s5643_s29 + $0x138] sm:$0xff]  ;;  %1673 = vmatpush.bf16.msra.mxu0 %v5342_v29  ;;  %v5309_v36 = vld [vmem:[%s5643_s29 + $0x130] sm:$0xff]  ;;  %v5332_v44 = vld [vmem:[%s5643_s29 + $0x1e8] sm:$0xff] }
  0x1b   : > { %v5334_v31 = vld [vmem:[%s5643_s29 + $0x1f8] sm:$0xff]  ;;  %5506 = vmatpush.lsf.bf16.msrb.mxu2 %v5326_v28  ;;  %v5333_v37 = vld [vmem:[%s5643_s29 + $0x1f0] sm:$0xff]  ;;  %v5308_v45 = vld [vmem:[%s5643_s29 + $0x128] sm:$0xff] }
  0x1c   : > { %v5350_v32 = vld [vmem:[%s5673_s9 + $0x78] sm:$0xff]  ;;  %5523 = vmatpush.lsf.bf16.msrb.mxu3 %v5334_v31  ;;  %v5349_v38 = vld [vmem:[%s5673_s9 + $0x70] sm:$0xff]  ;;  %v5348_v46 = vld [vmem:[%s5673_s9 + $0x68] sm:$0xff] }
  0x1d   : > { %v5318_v33 = vld [vmem:[%s5643_s29 + $0x178] sm:$0xff]  ;;  %1687 = vmatpush.bf16.msra.mxu1 %v5350_v32  ;;  %v5317_v41 = vld [vmem:[%s5643_s29 + $0x170] sm:$0xff]  ;;  %v5355_v47 = vld [vmem:[%s5673_s9 + $0xa0] sm:$0xff] }
  0x1e   : > { %5472 = vmatpush.lsf.bf16.msrb.mxu0 %v5310_v30  ;;  %v5363_v48 = vld [vmem:[%s5673_s9 + $0xe0] sm:$0xff]  ;;  %v5285_v49 = vld [vmem:[%s5643_s29 + $0x70] sm:$0xff]  ;;  %v5316_v53 = vld [vmem:[%s5643_s29 + $0x168] sm:$0xff] }
  0x1f   : > { %1702 = vmatpush.bf16.msra.mxu2 %v5357_v26  ;;  %v5301_v50 = vld [vmem:[%s5643_s29 + $0xf0] sm:$0xff]  ;;  %v5323_v54 = vld [vmem:[%s5643_s29 + $0x1a0] sm:$0xff]  ;;  %v5354_v55 = vld [vmem:[%s5673_s9 + $0x98] sm:$0xff] }
  0x20   : > { %5553 = vxpose.binary.xlu1.c.b16.cont [2/16] (narrow) %v5280_v4, %v5296_v5, 16  ;;  %v5277_v51 = vld [vmem:[%s5643_s29 + $0x30] sm:$0xff]  ;;  %v5362_v56 = vld [vmem:[%s5673_s9 + $0xd8] sm:$0xff]  ;;  %v5339_v57 = vld [vmem:[%s5673_s9 + $0x20] sm:$0xff] }
  0x21   : > { %1716 = vmatpush.bf16.msra.mxu3 %v5365_v27  ;;  %5489 = vmatpush.lsf.bf16.msrb.mxu1 %v5318_v33  ;;  %v5293_v52 = vld [vmem:[%s5643_s29 + $0xb0] sm:$0xff]  ;;  %v5331_v58 = vld [vmem:[%s5643_s29 + $0x1e0] sm:$0xff]  ;;  %v5322_v62 = vld [vmem:[%s5643_s29 + $0x198] sm:$0xff] }
  0x22   : > { %5543 = vxpose.binary.xlu0.c.b16.cont [2/16] (narrow) %v5272_v6, %v5288_v7, 16  ;;  %v5307_v59 = vld [vmem:[%s5643_s29 + $0x120] sm:$0xff]  ;;  %v5353_v63 = vld [vmem:[%s5673_s9 + $0x90] sm:$0xff]  ;;  %v5338_v1 = vld [vmem:[%s5673_s9 + $0x18] sm:$0xff] }
  0x23   : > { %5507 = vmatpush.lsf.bf16.msrb.mxu2 %v5325_v34  ;;  %1674 = vmatpush.bf16.msra.mxu0 %v5341_v35  ;;  %v5347_v60 = vld [vmem:[%s5673_s9 + $0x60] sm:$0xff]  ;;  %v5361_v0 = vld [vmem:[%s5673_s9 + $0xd0] sm:$0xff]  ;;  %v5330_v2 = vld [vmem:[%s5643_s29 + $0x1d8] sm:$0xff] }
  0x24   : > { %v5315_v61 = vld [vmem:[%s5643_s29 + $0x160] sm:$0xff]  ;;  %v5306_v3 = vld [vmem:[%s5643_s29 + $0x118] sm:$0xff]  ;;  %v5321_v6 = vld [vmem:[%s5643_s29 + $0x190] sm:$0xff] }
  0x25   : > { %5524 = vmatpush.lsf.bf16.msrb.mxu3 %v5333_v37  ;;  %1688 = vmatpush.bf16.msra.mxu1 %v5349_v38  ;;  %v5346_v4 = vld [vmem:[%s5673_s9 + $0x58] sm:$0xff]  ;;  %v5352_v7 = vld [vmem:[%s5673_s9 + $0x88] sm:$0xff]  ;;  %v5319_v26 = vld [vmem:[%s5643_s29 + $0x180] sm:$0xff] }
  0x26   : > { %v5314_v5 = vld [vmem:[%s5643_s29 + $0x158] sm:$0xff]  ;;  %v5344_v24 = vld [vmem:[%s5673_s9 + $0x48] sm:$0xff]  ;;  %v5335_v27 = vld [vmem:[%s5673_s9] sm:$0xff] }
  0x27   : > { %5473 = vmatpush.lsf.bf16.msrb.mxu0 %v5309_v36  ;;  %1703 = vmatpush.bf16.msra.mxu2 %v5356_v39  ;;  %v5312_v25 = vld [vmem:[%s5643_s29 + $0x148] sm:$0xff]  ;;  %v5303_v28 = vld [vmem:[%s5643_s29 + $0x100] sm:$0xff]  ;;  %v5398_v32 = vld [vmem:[%s5673_s9 + $0x1f8] sm:$0xff] }
  0x28   : > { %v5327_v29 = vld [vmem:[%s5643_s29 + $0x1c0] sm:$0xff]  ;;  %v5390_v33 = vld [vmem:[%s5673_s9 + $0x1b8] sm:$0xff]  ;;  %v5397_v36 = vld [vmem:[%s5673_s9 + $0x1f0] sm:$0xff] }
  0x29   : > { %1717 = vmatpush.bf16.msra.mxu3 %v5364_v40  ;;  %5490 = vmatpush.lsf.bf16.msrb.mxu1 %v5317_v41  ;;  %v5343_v30 = vld [vmem:[%s5673_s9 + $0x40] sm:$0xff]  ;;  %v5389_v37 = vld [vmem:[%s5673_s9 + $0x1b0] sm:$0xff]  ;;  %v5382_v38 = vld [vmem:[%s5673_s9 + $0x178] sm:$0xff] }
  0x2a   : > { %v5311_v31 = vld [vmem:[%s5643_s29 + $0x140] sm:$0xff]  ;;  %v5374_v39 = vld [vmem:[%s5673_s9 + $0x138] sm:$0xff]  ;;  %v5388_v40 = vld [vmem:[%s5673_s9 + $0x1a8] sm:$0xff] }
  0x2b   : > { %5508 = vmatpush.lsf.bf16.msrb.mxu2 %v5324_v42  ;;  %1675 = vmatpush.bf16.msra.mxu0 %v5340_v43  ;;  %v5396_v42 = vld [vmem:[%s5673_s9 + $0x1e8] sm:$0xff] }
  0x2d   : > { %5525 = vmatpush.lsf.bf16.msrb.mxu3 %v5332_v44  ;;  %1689 = vmatpush.bf16.msra.mxu1 %v5348_v46  ;;  %v5381_v44 = vld [vmem:[%s5673_s9 + $0x170] sm:$0xff]  ;;  %v5387_v46 = vld [vmem:[%s5673_s9 + $0x1a0] sm:$0xff] }
  0x2f   : > { %5474 = vmatpush.lsf.bf16.msrb.mxu0 %v5308_v45  ;;  %1704 = vmatpush.bf16.msra.mxu2 %v5355_v47  ;;  %v5373_v45 = vld [vmem:[%s5673_s9 + $0x130] sm:$0xff]  ;;  %v5395_v47 = vld [vmem:[%s5673_s9 + $0x1e0] sm:$0xff] }
  0x30   : > { %5554 = vxpose.binary.xlu1.c.b16.cont [3/16] (narrow) %v5281_v8, %v5297_v9, 16  ;;  %v5360_v8 = vld [vmem:[%s5673_s9 + $0xc8] sm:$0xff]  ;;  %v5337_v9 = vld [vmem:[%s5673_s9 + $0x10] sm:$0xff] }
  0x31   : > { %1718 = vmatpush.bf16.msra.mxu3 %v5363_v48  ;;  %5491 = vmatpush.lsf.bf16.msrb.mxu1 %v5316_v53  ;;  %v5380_v48 = vld [vmem:[%s5673_s9 + $0x168] sm:$0xff]  ;;  %v5371_v53 = vld [vmem:[%s5673_s9 + $0x120] sm:$0xff] }
  0x32   : > { %5544 = vxpose.binary.xlu0.c.b16.cont [3/16] (narrow) %v5273_v10, %v5289_v11, 16  ;;  %v5329_v10 = vld [vmem:[%s5643_s29 + $0x1d0] sm:$0xff] }
  0x33   : > { %5509 = vmatpush.lsf.bf16.msrb.mxu2 %v5323_v54  ;;  %1676 = vmatpush.bf16.msra.mxu0 %v5339_v57  ;;  %v5305_v11 = vld [vmem:[%s5643_s29 + $0x110] sm:$0xff]  ;;  %v5370_v57 = vld [vmem:[%s5673_s9 + $0x118] sm:$0xff] }
  0x34   : > { %v5385_v54 = vld [vmem:[%s5673_s9 + $0x190] sm:$0xff] }
  0x35   : > { %1719 = vmatpush.bf16.msra.mxu3 %v5362_v56  ;;  %1690 = vmatpush.bf16.msra.mxu1 %v5347_v60  ;;  %v5378_v56 = vld [vmem:[%s5673_s9 + $0x158] sm:$0xff]  ;;  %v5377_v60 = vld [vmem:[%s5673_s9 + $0x150] sm:$0xff] }
  0x37   : > { %1705 = vmatpush.bf16.msra.mxu2 %v5354_v55  ;;  %5475 = vmatpush.lsf.bf16.msrb.mxu0 %v5307_v59  ;;  %v5393_v55 = vld [vmem:[%s5673_s9 + $0x1d0] sm:$0xff]  ;;  %v5392_v59 = vld [vmem:[%s5673_s9 + $0x1c8] sm:$0xff] }
  0x39   : > { %5526 = vmatpush.lsf.bf16.msrb.mxu3 %v5331_v58  ;;  %5492 = vmatpush.lsf.bf16.msrb.mxu1 %v5315_v61  ;;  %v5384_v58 = vld [vmem:[%s5673_s9 + $0x188] sm:$0xff]  ;;  %v5369_v61 = vld [vmem:[%s5673_s9 + $0x110] sm:$0xff] }
  0x3b   : > { %5510 = vmatpush.lsf.bf16.msrb.mxu2 %v5322_v62  ;;  %1677 = vmatpush.bf16.msra.mxu0 %v5338_v1  ;;  %v5383_v62 = vld [vmem:[%s5673_s9 + $0x180] sm:$0xff]  ;;  %v5368_v1 = vld [vmem:[%s5673_s9 + $0x108] sm:$0xff] }
  0x3d   : > { %1720 = vmatpush.bf16.msra.mxu3 %v5361_v0  ;;  %1691 = vmatpush.bf16.msra.mxu1 %v5346_v4  ;;  %v5376_v0 = vld [vmem:[%s5673_s9 + $0x148] sm:$0xff] }
  0x3f   : > { %1706 = vmatpush.bf16.msra.mxu2 %v5353_v63  ;;  %5476 = vmatpush.lsf.bf16.msrb.mxu0 %v5306_v3  ;;  %v5391_v63 = vld [vmem:[%s5673_s9 + $0x1c0] sm:$0xff] }
  0x40   : > { %5555 = vxpose.binary.xlu1.c.b16.cont [4/16] (narrow) %v5282_v12, %v5298_v13, 16  ;;  %v5345_v12 = vld [vmem:[%s5673_s9 + $0x50] sm:$0xff]  ;;  %v5367_v3 = vld [vmem:[%s5673_s9 + $0x100] sm:$0xff] }
  0x41   : > { %5527 = vmatpush.lsf.bf16.msrb.mxu3 %v5330_v2  ;;  %5493 = vmatpush.lsf.bf16.msrb.mxu1 %v5314_v5  ;;  %v5313_v13 = vld [vmem:[%s5643_s29 + $0x150] sm:$0xff]  ;;  %v5375_v2 = vld [vmem:[%s5673_s9 + $0x140] sm:$0xff] }
  0x42   : > { %5545 = vxpose.binary.xlu0.c.b16.cont [4/16] (narrow) %v5274_v14, %v5290_v15, 16  ;;  %v5320_v14 = vld [vmem:[%s5643_s29 + $0x188] sm:$0xff]  ;;  %v5351_v15 = vld [vmem:[%s5673_s9 + $0x80] sm:$0xff] }
  0x43   : > { %5511 = vmatpush.lsf.bf16.msrb.mxu2 %v5321_v6  ;;  %1678 = vmatpush.bf16.msra.mxu0 %v5337_v9 }
  0x45   : > { %1721 = vmatpush.bf16.msra.mxu3 %v5360_v8  ;;  %1692 = vmatpush.bf16.msra.mxu1 %v5345_v12 }
  0x47   : > { %1707 = vmatpush.bf16.msra.mxu2 %v5352_v7  ;;  %5477 = vmatpush.lsf.bf16.msrb.mxu0 %v5305_v11 }
  0x49   : > { %5528 = vmatpush.lsf.bf16.msrb.mxu3 %v5329_v10  ;;  %5494 = vmatpush.lsf.bf16.msrb.mxu1 %v5313_v13 }
  0x4b   : > { %5512 = vmatpush.lsf.bf16.msrb.mxu2 %v5320_v14 }
  0x4d   : > { %1693 = vmatpush.bf16.msra.mxu1 %v5344_v24 }
  0x4f   : > { %1708 = vmatpush.bf16.msra.mxu2 %v5351_v15 }
  0x50   : > { %5556 = vxpose.binary.xlu1.c.b16.cont [5/16] (narrow) %v5283_v16, %v5299_v17, 16  ;;  %v5359_v16 = vld [vmem:[%s5673_s9 + $0xc0] sm:$0xff]  ;;  %v5286_v17 = vld [vmem:[%s5643_s29 + $0x78] sm:$0xff] }
  0x51   : > { %1722 = vmatpush.bf16.msra.mxu3 %v5359_v16  ;;  %5495 = vmatpush.lsf.bf16.msrb.mxu1 %v5312_v25 }
  0x52   : > { %5546 = vxpose.binary.xlu0.c.b16.cont [5/16] (narrow) %v5275_v18, %v5291_v19, 16  ;;  %v5302_v18 = vld [vmem:[%s5643_s29 + $0xf8] sm:$0xff] }
  0x53   : > { %v5278_v19 = vld [vmem:[%s5643_s29 + $0x38] sm:$0xff]  ;;  %5513 = vmatpush.lsf.bf16.msrb.mxu2 %v5319_v26 }
  0x55   : > { %5514 = vllmr.2.mxu2  ;;  %1694 = vmatpush.bf16.msra.mxu1 %v5343_v30 }
  0x59   : > { %5496 = vmatpush.lsf.bf16.msrb.mxu1 %v5311_v31 }
  0x5b   : > { %5497 = vllmr.2.mxu1 }
  0x60   : > { %5557 = vxpose.binary.xlu1.c.b16.cont [6/16] (narrow) %v5284_v20, %v5300_v21, 16  ;;  %v5294_v20 = vld [vmem:[%s5643_s29 + $0xb8] sm:$0xff]  ;;  %v5336_v21 = vld [vmem:[%s5673_s9 + $0x8] sm:$0xff] }
  0x61   : > { %1679 = vmatpush.bf16.msra.mxu0 %v5336_v21 }
  0x62   : > { %5547 = vxpose.binary.xlu0.c.b16.cont [6/16] (narrow) %v5276_v22, %v5292_v23, 16  ;;  %v5304_v22 = vld [vmem:[%s5643_s29 + $0x108] sm:$0xff] }
  0x63   : > { %v5328_v23 = vld [vmem:[%s5643_s29 + $0x1c8] sm:$0xff]  ;;  %s6397_s29 = scalar_lea.vmem %s6473_s7, %s5784_s10 }
  0x64   : > { %5529 = vmatpush.lsf.bf16.msrb.mxu3 %v5328_v23 }
  0x65   : > { %5478 = vmatpush.lsf.bf16.msrb.mxu0 %v5304_v22 }
  0x68   : > { %5530 = vmatpush.lsf.bf16.msrb.mxu3 %v5327_v29 }
  0x69   : > { %1680 = vmatpush.bf16.msra.mxu0 %v5335_v27 }
  0x6a   : > { %5531 = vllmr.2.mxu3 }
  0x6d   : > { %5479 = vmatpush.lsf.bf16.msrb.mxu0 %v5303_v28 }
  0x6f   : > { %5480 = vllmr.2.mxu0 }
  0x70   : > { %5558 = vxpose.binary.xlu1.c.b16.cont [7/16] (narrow) %v5285_v49, %v5301_v50, 16  ;;  %v5372_v49 = vld [vmem:[%s5673_s9 + $0x128] sm:$0xff]  ;;  %v5386_v50 = vld [vmem:[%s5673_s9 + $0x198] sm:$0xff] }
  0x72   : > { %5548 = vxpose.binary.xlu0.c.b16.cont [7/16] (narrow) %v5277_v51, %v5293_v52, 16  ;;  %v5394_v51 = vld [vmem:[%s5673_s9 + $0x1d8] sm:$0xff]  ;;  %v5379_v52 = vld [vmem:[%s5673_s9 + $0x160] sm:$0xff] }
  0x80   : > { %5559 = vxpose.binary.xlu1.c.b16.end [8/16] (narrow) %v5286_v17, %v5302_v18, 16 }
  0x82   : > { %5549 = vxpose.binary.xlu0.c.b16.end [8/16] (narrow) %v5278_v19, %v5294_v20, 16 }
  0xbc   : > { %v5560_v34 = vpop.trf.xlu1 }
  0xbd   : > { %1723 = vmatmul.bf16.vlgmr.msra.gmra.mxu3 %v5560_v34 }
  0xbe   : > { %v5550_v35 = vpop.trf.xlu0  ;;  %1771 = vmatpush.bf16.msra.mxu3 %v5398_v32 }
  0xbf   : > { %1709 = vmatmul.bf16.vlgmr.msra.gmra.mxu2 %v5550_v35 }
  0xc0   : > { %1757 = vmatpush.bf16.msra.mxu2 %v5390_v33 }
  0xc2   : > { %1772 = vmatpush.bf16.msra.mxu3 %v5397_v36 }
  0xc4   : > { %1758 = vmatpush.bf16.msra.mxu2 %v5389_v37  ;;  %v5561_v41 = vpop.trf.xlu1 }
  0xc5   : > { %1695 = vmatmul.bf16.vlgmr.msra.gmra.mxu1 %v5561_v41 }
  0xc6   : > { %v5551_v43 = vpop.trf.xlu0  ;;  %1743 = vmatpush.bf16.msra.mxu1 %v5382_v38  ;;  %1773 = vmatpush.bf16.msra.mxu3 %v5396_v42 }
  0xc7   : > { %1681 = vmatmul.bf16.vlgmr.msra.gmra.mxu0 %v5551_v43 }
  0xc8   : > { %1729 = vmatpush.bf16.msra.mxu0 %v5374_v39  ;;  %1759 = vmatpush.bf16.msra.mxu2 %v5388_v40 }
  0xca   : > { %1744 = vmatpush.bf16.msra.mxu1 %v5381_v44  ;;  %1774 = vmatpush.bf16.msra.mxu3 %v5395_v47 }
  0xcc   : > { %1730 = vmatpush.bf16.msra.mxu0 %v5373_v45  ;;  %1760 = vmatpush.bf16.msra.mxu2 %v5387_v46 }
  0xce   : > { %1745 = vmatpush.bf16.msra.mxu1 %v5380_v48  ;;  %1775 = vmatpush.bf16.msra.mxu3 %v5394_v51  ;;  %v2936_v48 = vld [vmem:[%s5790_s13] sm:$0xff] }
  0xcf   : > { %2961 = vst [vmem:[#allocation1] ss:$4 sm:$0xff] %v2936_v48  ;;  %v5446_v48 = vld [vmem:[%s5816_s16 + $0x178] sm:$0xff] }
  0xd0   : > { %1731 = vmatpush.bf16.msra.mxu0 %v5372_v49  ;;  %1761 = vmatpush.bf16.msra.mxu2 %v5386_v50 }
  0xd2   : > { %1746 = vmatpush.bf16.msra.mxu1 %v5379_v52  ;;  %1776 = vmatpush.bf16.msra.mxu3 %v5393_v55 }
  0xd4   : > { %1732 = vmatpush.bf16.msra.mxu0 %v5371_v53  ;;  %1762 = vmatpush.bf16.msra.mxu2 %v5385_v54  ;;  %v2938_v53 = vld [vmem:[%s5790_s13 + $0x10] sm:$0xff] }
  0xd6   : > { %1747 = vmatpush.bf16.msra.mxu1 %v5378_v56  ;;  %1777 = vmatpush.bf16.msra.mxu3 %v5392_v59  ;;  %v5794_v55 = vld.sshfl [vmem:[#allocation1] sm:$0xff pattern:$0x73625140]  ;;  %v5796_v56 = vld.sshfl [vmem:[#allocation1 + $0x8] sm:$0xff pattern:$0x73625140] }
  0xd7   : > { %v5798_v59 = vld.sshfl [vmem:[#allocation1 + $0x10] sm:$0xff pattern:$0x73625140] }
  0xd8   : > { %1733 = vmatpush.bf16.msra.mxu0 %v5370_v57  ;;  %1763 = vmatpush.bf16.msra.mxu2 %v5384_v58 }
  0xda   : > { %1748 = vmatpush.bf16.msra.mxu1 %v5377_v60  ;;  %1778 = vmatpush.bf16.msra.mxu3 %v5391_v63  ;;  %v5800_v60 = vld.sshfl [vmem:[#allocation1 + $0x18] sm:$0xff pattern:$0x73625140] }
  0xdb   : > { %2974 = vst [vmem:[#allocation1] ss:$4 sm:$0xff] %v2938_v53  ;;  %v5438_v53 = vld [vmem:[%s5816_s16 + $0x138] sm:$0xff] }
  0xdc   : > { %1734 = vmatpush.bf16.msra.mxu0 %v5369_v61  ;;  %1764 = vmatpush.bf16.msra.mxu2 %v5383_v62 }
  0xdd   : > { %5532 = vmatmul.lmr.bf16.vlgmr.msra.gmra.2.mxu3 }
  0xde   : > { %1749 = vmatpush.bf16.msra.mxu1 %v5376_v0 }
  0xdf   : > { %5515 = vmatmul.lmr.bf16.vlgmr.msra.gmra.2.mxu2 }
  0xe0   : > { %1735 = vmatpush.bf16.msra.mxu0 %v5368_v1 }
  0xe2   : > { %1750 = vmatpush.bf16.msra.mxu1 %v5375_v2 }
  0xe4   : > { %1736 = vmatpush.bf16.msra.mxu0 %v5367_v3 }
  0xe5   : > { %5498 = vmatmul.lmr.bf16.vlgmr.msra.gmra.2.mxu1  ;;  %5533 = vmatmul.lmr.bf16.gmra.2.mxu3 }
  0xe7   : > { %5481 = vmatmul.lmr.bf16.vlgmr.msra.gmra.2.mxu0  ;;  %5516 = vmatmul.lmr.bf16.gmra.2.mxu2 }
  0xed   : > { %5499 = vmatmul.lmr.bf16.gmra.2.mxu1 }
  0xef   : > { %5482 = vmatmul.lmr.bf16.gmra.2.mxu0 }
 0x140   : > { %v1724_v7 = vpop.f32.mrf.mxu3 }
 0x142   : > { %v1696_v4 = vpop.f32.mrf.mxu1  ;;  %v1710_v5 = vpop.f32.mrf.mxu2 }
 0x144   : > { %v1682_v6 = vpop.f32.mrf.mxu0 }
 0x145   : > { %v1697_v8 = vadd.f32 %v1696_v4, %v1682_v6 }
 0x147   : > { %v1711_v13 = vadd.f32 %v1710_v5, %v1697_v8  ;;  %v2940_v8 = vld [vmem:[%s5790_s13 + $0x20] sm:$0xff] }
 0x148   : > { %v1726_v12 = vpop.f32.mrf.mxu3 }
 0x149   : > { %v1725_v15 = vadd.f32 %v1724_v7, %v1711_v13  ;;  %v5807_v13 = vld.sshfl [vmem:[#allocation1 + $0x10] sm:$0xff pattern:$0x73625140] }
 0x14a   : > { %v1698_v9 = vpop.f32.mrf.mxu1  ;;  %v1712_v10 = vpop.f32.mrf.mxu2 }
 0x14c   : > { %v1684_v11 = vpop.f32.mrf.mxu0 }
 0x14d   : > { %v1699_v14 = vadd.f32 %v1698_v9, %v1684_v11  ;;  %v5805_v11 = vld.sshfl [vmem:[#allocation1 + $0x8] sm:$0xff pattern:$0x73625140] }
 0x14f   : > { %v1713_v21 = vadd.f32 %v1712_v10, %v1699_v14  ;;  %v5803_v10 = vld.sshfl [vmem:[#allocation1] sm:$0xff pattern:$0x73625140]  ;;  %v5809_v14 = vld.sshfl [vmem:[#allocation1 + $0x18] sm:$0xff pattern:$0x73625140] }
 0x150   : > { %2986 = vst [vmem:[#allocation1] ss:$4 sm:$0xff] %v2940_v8 }
 0x151   : > { %v1727_v25 = vadd.f32 %v1726_v12, %v1713_v21 }
 0x157   : > { %v5820_v21 = vld.sshfl [vmem:[#allocation1] sm:$0xff pattern:$0x73625140] }
 0x160   : > { %v1780_v20 = vpop.f32.mrf.mxu3 }
 0x162   : > { %v1752_v16 = vpop.f32.mrf.mxu1  ;;  %v1766_v18 = vpop.f32.mrf.mxu2 }
 0x164   : > { %v1738_v17 = vpop.f32.mrf.mxu0 }
 0x165   : > { %v1739_v19 = vadd.f32 %v1738_v17, %v1725_v15 }
 0x167   : > { %v1753_v22 = vadd.f32 %v1752_v16, %v1739_v19  ;;  %v2942_v19 = vld [vmem:[%s5790_s13 + $0x30] sm:$0xff] }
 0x168   : > { %v1782_v32 = vpop.f32.mrf.mxu3 }
 0x169   : > { %v1767_v23 = vadd.f32 %v1766_v18, %v1753_v22  ;;  %v5822_v22 = vld.sshfl [vmem:[#allocation1 + $0x8] sm:$0xff pattern:$0x73625140] }
 0x16a   : > { %v1754_v27 = vpop.f32.mrf.mxu1  ;;  %v1768_v30 = vpop.f32.mrf.mxu2 }
 0x16b   : > { %v1781_v24 = vadd.f32 %v1780_v20, %v1767_v23  ;;  %v5431_v20 = vld [vmem:[%s5816_s16 + $0x100] sm:$0xff]  ;;  %v5824_v23 = vld.sshfl [vmem:[#allocation1 + $0x10] sm:$0xff pattern:$0x73625140] }
 0x16c   : > { %v1740_v26 = vpop.f32.mrf.mxu0 }
 0x16d   : > { %v1741_v28 = vadd.f32 %v1740_v26, %v1727_v25  ;;  %v1786_v29 = vsel %vm1785_vm0, %v1781_v24, -inf  ;;  %v5441_v25 = vld [vmem:[%s5816_s16 + $0x150] sm:$0xff]  ;;  %v5452_v26 = vld [vmem:[%s5816_s16 + $0x1a8] sm:$0xff] }
 0x16e   : > { %1787 = vmax.xlane.f32.xlu2 %v1786_v29 }
 0x16f   : > { %v1755_v31 = vadd.f32 %v1754_v27, %v1741_v28  ;;  %v2944_v27 = vld [vmem:[%s5834_s19] sm:$0xff] }
 0x171   : > { %v1769_v33 = vadd.f32 %v1768_v30, %v1755_v31 }
 0x173   : > { %v1783_v34 = vadd.f32 %v1782_v32, %v1769_v33  ;;  %v5442_v32 = vld [vmem:[%s5816_s16 + $0x158] sm:$0xff]  ;;  %v5453_v33 = vld [vmem:[%s5816_s16 + $0x1b0] sm:$0xff] }
 0x175   : > { %v1789_v35 = vsel %vm1785_vm0, %v1783_v34, -inf }
 0x176   : > { %1790 = vmax.xlane.f32.xlu2 %v1789_v35 }
 0x1e1   : > { %v1788_v36 = vpop.xlane.xlu2 %1787 }
 0x1e2   : > { %v1792_v37 = vsub.f32 %v1781_v24, %v1788_v36  ;;  %v5826_v24 = vld.sshfl [vmem:[#allocation1 + $0x18] sm:$0xff pattern:$0x73625140] }
 0x1e3   : > { %2998 = vst [vmem:[#allocation1] ss:$4 sm:$0xff] %v2942_v19 }
 0x1e4   : > { %v1794_v38 = vmul.f32 1.442695, %v1792_v37 }
 0x1e6   : > { %5562 = vpow2.f32 %v1794_v38  ;;  %v5433_v38 = vld [vmem:[%s5816_s16 + $0x110] sm:$0xff] }
 0x1e9   : > { %v1791_v39 = vpop.xlane.xlu2 %1790 }
 0x1ea   : > { %v1793_v40 = vsub.f32 %v1783_v34, %v1791_v39  ;;  %v5840_v28 = vld.sshfl [vmem:[#allocation1] sm:$0xff pattern:$0x73625140]  ;;  %v5842_v29 = vld.sshfl [vmem:[#allocation1 + $0x8] sm:$0xff pattern:$0x73625140] }
 0x1eb   : > { %v5844_v30 = vld.sshfl [vmem:[#allocation1 + $0x10] sm:$0xff pattern:$0x73625140]  ;;  %v5846_v31 = vld.sshfl [vmem:[#allocation1 + $0x18] sm:$0xff pattern:$0x73625140] }
 0x1ec   : > { %v5563_v41 = vpop.eup %5562  ;;  %v1796_v42 = vmul.f32 1.442695, %v1793_v40  ;;  %3042 = vst [vmem:[#allocation1] ss:$4 sm:$0xff] %v2944_v27  ;;  %v5432_v34 = vld [vmem:[%s5816_s16 + $0x108] sm:$0xff]  ;;  %v5443_v39 = vld [vmem:[%s5816_s16 + $0x160] sm:$0xff] }
 0x1ed   : > { %v1798_v43 = vsel %vm1785_vm0, %v5563_v41, 0.0  ;;  %v5454_v40 = vld [vmem:[%s5816_s16 + $0x1b8] sm:$0xff]  ;;  %v5440_v27 = vld [vmem:[%s5816_s16 + $0x148] sm:$0xff] }
 0x1ee   : > { %5564 = vpow2.f32 %v1796_v42  ;;  %1799 = vadd.xlane.f32.xlu2 %v1798_v43  ;;  %v5444_v42 = vld [vmem:[%s5816_s16 + $0x168] sm:$0xff]  ;;  %v5455_v43 = vld [vmem:[%s5816_s16 + $0x1c0] sm:$0xff] }
 0x1f3   : > { %v3047_v35 = vld.sshfl [vmem:[#allocation1 + $0x8] sm:$0xff pattern:$0x73625140]  ;;  %v3048_v36 = vld.sshfl [vmem:[#allocation1 + $0x10] sm:$0xff pattern:$0x73625140] }
 0x1f4   : > { %v5565_v44 = vpop.eup %5564  ;;  %v3046_v37 = vld.sshfl [vmem:[#allocation1] sm:$0xff pattern:$0x73625140] }
 0x1f5   : > { %v1801_v45 = vsel %vm1785_vm0, %v5565_v44, 0.0 }
 0x1f6   : > { %1802 = vadd.xlane.f32.xlu2 %v1801_v45  ;;  %v5445_v45 = vld [vmem:[%s5816_s16 + $0x170] sm:$0xff] }
 0x261   : > { %v1800_v46 = vpop.xlane.xlu2 %1799 }
 0x262   : > { %5566 = vrcp.f32 %v1800_v46  ;;  %v1815_v61 = vand.u32 2147483648, %v1800_v46  ;;  %vm1809_vm2 = vweird.f32 %v1800_v46  ;;  %v1813_v62 = vand.u32 2147483647, %v1800_v46 }
 0x264   : > { %v1816_v4 = vor.u32 1.1754944e-38, %v1815_v61  ;;  %vm1814_vm5 = vcmp.eq.f32.partialorder %v1813_v62, 8.507059e+37  ;;  %v2939_v61 = vld [vmem:[%s5790_s13 + $0x18] sm:$0xff] }
 0x268   : > { %v5567_v47 = vpop.eup %5566 }
 0x269   : > { %v1805_v49 = vmul.f32 %v5567_v47, %v1800_v46  ;;  %v1803_v50 = vpop.xlane.xlu2 %1802  ;;  %vm1810_vm1 = vweird.f32 %v5567_v47  ;;  %v5456_v46 = vld [vmem:[%s5816_s16 + $0x1c8] sm:$0xff] }
 0x26a   : > { %5568 = vrcp.f32 %v1803_v50  ;;  %vm1811_vm3 = vmor %vm1809_vm2, %vm1810_vm1  ;;  %v1828_v0 = vand.u32 2147483647, %v1803_v50  ;;  %v1830_v1 = vand.u32 2147483648, %v1803_v50  ;;  %vm1824_vm6 = vweird.f32 %v1803_v50 }
 0x26b   : > { %v1806_v51 = vsub.f32 1.0, %v1805_v49  ;;  %v5457_v49 = vld [vmem:[%s5816_s16 + $0x1d0] sm:$0xff]  ;;  %vm3613_vm1 = vcmask 31744   ;;  %vm4161_vm2 = vcmask 1043456  }
 0x26c   : > { %vm1829_vm8 = vcmp.eq.f32.partialorder %v1828_v0, 8.507059e+37  ;;  %v1831_v6 = vor.u32 1.1754944e-38, %v1830_v1 }
 0x26d   : > { %v1807_v52 = vmul.f32 %v5567_v47, %v1806_v51  ;;  %v5447_v51 = vld [vmem:[%s5816_s16 + $0x180] sm:$0xff] }
 0x26f   : > { %v1808_v57 = vadd.f32 %v5567_v47, %v1807_v52  ;;  %v5458_v52 = vld [vmem:[%s5816_s16 + $0x1d8] sm:$0xff] }
 0x270   : > { %v5569_v54 = vpop.eup %5568 }
 0x271   : > { %v1820_v58 = vmul.f32 %v5569_v54, %v1803_v50  ;;  %vm1825_vm4 = vweird.f32 %v5569_v54  ;;  %v1812_v3 = vsel %vm1811_vm3, %v5567_v47, %v1808_v57  ;;  %v5436_v47 = vld [vmem:[%s5816_s16 + $0x128] sm:$0xff]  ;;  %v5437_v50 = vld [vmem:[%s5816_s16 + $0x130] sm:$0xff]  ;;  %v5459_v57 = vld [vmem:[%s5816_s16 + $0x1e0] sm:$0xff] }
 0x272   : > { %vm1826_vm7 = vmor %vm1824_vm6, %vm1825_vm4  ;;  %v1817_v7 = vsel %vm1814_vm5, %v1816_v4, %v1812_v3  ;;  %v5449_v3 = vld [vmem:[%s5816_s16 + $0x190] sm:$0xff]  ;;  %v5460_v4 = vld [vmem:[%s5816_s16 + $0x1e8] sm:$0xff] }
 0x273   : > { %v1821_v63 = vsub.f32 1.0, %v1820_v58  ;;  %v1818_v15 = vmul.f32 %v5563_v41, %v1817_v7  ;;  %v5434_v41 = vld [vmem:[%s5816_s16 + $0x118] sm:$0xff]  ;;  %v2937_v58 = vld [vmem:[%s5790_s13 + $0x8] sm:$0xff] }
 0x274   : > { %2964 = vst [vmem:[#allocation1 + $0x20] ss:$4 sm:$0xff] %v2937_v58  ;;  %v2941_v7 = vld [vmem:[%s5790_s13 + $0x28] sm:$0xff] }
 0x275   : > { %v1822_v2 = vmul.f32 %v5569_v54, %v1821_v63 }
 0x277   : > { %v1823_v5 = vadd.f32 %v5569_v54, %v1822_v2  ;;  %v5439_v2 = vld [vmem:[%s5816_s16 + $0x140] sm:$0xff] }
 0x279   : > { %v1827_v9 = vsel %vm1826_vm7, %v5569_v54, %v1823_v5  ;;  %v5448_v54 = vld [vmem:[%s5816_s16 + $0x188] sm:$0xff] }
 0x27a   : > { %v1832_v12 = vsel %vm1829_vm8, %v1831_v6, %v1827_v9 }
 0x27b   : > { %v1833_v16 = vmul.f32 %v5565_v44, %v1832_v12  ;;  %v5435_v44 = vld [vmem:[%s5816_s16 + $0x120] sm:$0xff]  ;;  %v5894_v63 = vld.sshfl [vmem:[#allocation1 + $0x28] sm:$0xff pattern:$0x73625140] }
 0x27c   : > { %v5892_v62 = vld.sshfl [vmem:[#allocation1 + $0x20] sm:$0xff pattern:$0x73625140]  ;;  %v5896_v0 = vld.sshfl [vmem:[#allocation1 + $0x30] sm:$0xff pattern:$0x73625140] }
 0x27d   : > { %v1834_v17 = vpack.c.bf16 %v1833_v16, %v1818_v15  ;;  %v5898_v1 = vld.sshfl [vmem:[#allocation1 + $0x38] sm:$0xff pattern:$0x73625140] }
 0x27e   : > { %2976 = vst [vmem:[#allocation1 + $0x20] ss:$4 sm:$0xff] %v2939_v61 }
 0x27f   : > { %v2348_v18 = vsel %vm1785_vm0, %v1834_v17, 0 }
 0x280   : > { %2357 = vmatpush.bf16.xpose.msra.mxu0 %v2348_v18  ;;  %5463 = vmatpush.bf16.xpose.msra.mxu1 %v2348_v18 }
 0x281   : > { %5464 = vmatpush.bf16.xpose.msra.mxu2 %v2348_v18  ;;  %5465 = vmatpush.bf16.xpose.msra.mxu3 %v2348_v18 }
 0x285   : > { %v5915_v8 = vld.sshfl [vmem:[#allocation1 + $0x20] sm:$0xff pattern:$0x73625140]  ;;  %v5917_v9 = vld.sshfl [vmem:[#allocation1 + $0x28] sm:$0xff pattern:$0x73625140] }
 0x286   : > { %v5919_v12 = vld.sshfl [vmem:[#allocation1 + $0x30] sm:$0xff pattern:$0x73625140]  ;;  %v5921_v15 = vld.sshfl [vmem:[#allocation1 + $0x38] sm:$0xff pattern:$0x73625140] }
 0x287   : > { %5197 = vmatmul.msk.bf16.vlgmr.msra.gmra.mxu1 %vm1785_vm0, %v5431_v20  ;;  %2988 = vst [vmem:[#allocation1 + $0x20] ss:$4 sm:$0xff] %v2941_v7 }
 0x288   : > { %5207 = vmatmul.msk.bf16.vlgmr.msra.gmra.mxu2 %vm1785_vm0, %v5441_v25  ;;  %5218 = vmatmul.msk.bf16.vlgmr.msra.gmra.mxu3 %vm1785_vm0, %v5452_v26  ;;  %v2943_v26 = vld [vmem:[%s5790_s13 + $0x38] sm:$0xff] }
 0x289   : > { %3142 = vmatpush.bf16.xpose.msra.mxu2 %v3047_v35  ;;  %3155 = vmatpush.bf16.xpose.msra.mxu3 %v3048_v36 }
 0x28a   : > { %3129 = vmatpush.bf16.xpose.msra.mxu1 %v3046_v37 }
 0x28e   : > { %v5935_v36 = vld.sshfl [vmem:[#allocation1 + $0x30] sm:$0xff pattern:$0x73625140]  ;;  %v5937_v37 = vld.sshfl [vmem:[#allocation1 + $0x38] sm:$0xff pattern:$0x73625140] }
 0x297   : > { %5198 = vmatmul.msk.bf16.gmra.mxu1 %vm1785_vm0, %v5432_v34 }
 0x298   : > { %5208 = vmatmul.msk.bf16.gmra.mxu2 %vm1785_vm0, %v5442_v32  ;;  %5219 = vmatmul.msk.bf16.gmra.mxu3 %vm1785_vm0, %v5453_v33  ;;  %v5931_v32 = vld.sshfl [vmem:[#allocation1 + $0x20] sm:$0xff pattern:$0x73625140]  ;;  %v5933_v33 = vld.sshfl [vmem:[#allocation1 + $0x28] sm:$0xff pattern:$0x73625140] }
 0x299   : > { %3000 = vst [vmem:[#allocation1 + $0x20] ss:$4 sm:$0xff] %v2943_v26 }
 0x2a0   : > { %v5960_v58 = vld.sshfl [vmem:[#allocation1 + $0x38] sm:$0xff pattern:$0x73625140] }
 0x2a7   : > { %5199 = vmatmul.msk.bf16.gmra.mxu1 %vm1785_vm0, %v5433_v38 }
 0x2a8   : > { %5209 = vmatmul.msk.bf16.gmra.mxu2 %vm1785_vm0, %v5443_v39  ;;  %5220 = vmatmul.msk.bf16.gmra.mxu3 %vm1785_vm0, %v5454_v40  ;;  %v5450_v40 = vld [vmem:[%s5816_s16 + $0x198] sm:$0xff] }
 0x2b7   : > { %5200 = vmatmul.msk.bf16.gmra.mxu1 %vm1785_vm0, %v5434_v41  ;;  %v5461_v41 = vld [vmem:[%s5816_s16 + $0x1f0] sm:$0xff] }
 0x2b8   : > { %5210 = vmatmul.msk.bf16.gmra.mxu2 %vm1785_vm0, %v5444_v42  ;;  %5221 = vmatmul.msk.bf16.gmra.mxu3 %vm1785_vm0, %v5455_v43 }
 0x2c7   : > { %5201 = vmatmul.msk.bf16.gmra.mxu1 %vm1785_vm0, %v5435_v44  ;;  %v2946_v44 = vld [vmem:[%s5834_s19 + $0x10] sm:$0xff] }
 0x2c8   : > { %5211 = vmatmul.msk.bf16.gmra.mxu2 %vm1785_vm0, %v5445_v45  ;;  %5222 = vmatmul.msk.bf16.gmra.mxu3 %vm1785_vm0, %v5456_v46  ;;  %v3049_v45 = vld.sshfl [vmem:[#allocation1 + $0x18] sm:$0xff pattern:$0x73625140] }
 0x2c9   : > { %3055 = vst [vmem:[#allocation1] ss:$4 sm:$0xff] %v2946_v44 }
 0x2d7   : > { %5202 = vmatmul.msk.bf16.gmra.mxu1 %vm1785_vm0, %v5436_v47 }
 0x2d8   : > { %5212 = vmatmul.msk.bf16.gmra.mxu2 %vm1785_vm0, %v5446_v48  ;;  %5223 = vmatmul.msk.bf16.gmra.mxu3 %vm1785_vm0, %v5457_v49 }
 0x2e7   : > { %5203 = vmatmul.msk.bf16.gmra.mxu1 %vm1785_vm0, %v5437_v50 }
 0x2e8   : > { %5213 = vmatmul.msk.bf16.gmra.mxu2 %vm1785_vm0, %v5447_v51  ;;  %5224 = vmatmul.msk.bf16.gmra.mxu3 %vm1785_vm0, %v5458_v52  ;;  %v5951_v51 = vld.sshfl [vmem:[#allocation1 + $0x20] sm:$0xff pattern:$0x73625140] }
 0x2f7   : > { %5204 = vmatmul.msk.bf16.gmra.mxu1 %vm1785_vm0, %v5438_v53  ;;  %v5953_v53 = vld.sshfl [vmem:[#allocation1 + $0x28] sm:$0xff pattern:$0x73625140] }
 0x2f8   : > { %5214 = vmatmul.msk.bf16.gmra.mxu2 %vm1785_vm0, %v5448_v54  ;;  %5225 = vmatmul.msk.bf16.gmra.mxu3 %vm1785_vm0, %v5459_v57  ;;  %v5955_v54 = vld.sshfl [vmem:[#allocation1 + $0x30] sm:$0xff pattern:$0x73625140]  ;;  %v2945_v57 = vld [vmem:[%s5834_s19 + $0x8] sm:$0xff] }
 0x2f9   : > { %3045 = vst [vmem:[#allocation1 + $0x20] ss:$4 sm:$0xff] %v2945_v57  ;;  %v3061_v57 = vld.sshfl [vmem:[#allocation1 + $0x18] sm:$0xff pattern:$0x73625140] }
 0x304   : > { %v2519_v5 = vpop.f32.mrf.mxu1 }
 0x305   : > { %v2743_v6 = vpack.c.bf16 %v2519_v5, %v2519_v5  ;;  %v5451_v5 = vld [vmem:[%s5816_s16 + $0x1a0] sm:$0xff] }
 0x307   : > { %2872 = vst.msk [vmem:[%s5907_s22 + $0x100] sm:$0xf] %vm2807_vm9, %v2743_v6  ;;  %5205 = vmatmul.msk.bf16.gmra.mxu1 %vm1785_vm0, %v5439_v2  ;;  %v5462_v6 = vld [vmem:[%s5816_s16 + $0x1f8] sm:$0xff] }
 0x308   : > { %5215 = vmatmul.msk.bf16.gmra.mxu2 %vm1785_vm0, %v5449_v3  ;;  %5226 = vmatmul.msk.bf16.gmra.mxu3 %vm1785_vm0, %v5460_v4 }
 0x30b   : > { %v2569_v16 = vpop.f32.mrf.mxu2  ;;  %v2624_v17 = vpop.f32.mrf.mxu3 }
 0x30c   : > { %v2763_v18 = vpack.c.bf16 %v2569_v16, %v2569_v16  ;;  %v2785_v19 = vpack.c.bf16 %v2624_v17, %v2624_v17  ;;  %v2521_v20 = vpop.f32.mrf.mxu1 }
 0x30d   : > { %v2744_v25 = vpack.c.bf16 %v2521_v20, %v2521_v20 }
 0x30e   : > { %2892 = vst.msk [vmem:[%s5907_s22 + $0x150] sm:$0xf] %vm2807_vm9, %v2763_v18 }
 0x30f   : > { %2914 = vst.msk [vmem:[%s5907_s22 + $0x1a8] sm:$0xf] %vm2807_vm9, %v2785_v19 }
 0x310   : > { %2873 = vst.msk [vmem:[%s5907_s22 + $0x104] sm:$0xf] %vm2807_vm9, %v2744_v25 }
 0x313   : > { %v2571_v34 = vpop.f32.mrf.mxu2  ;;  %v2626_v35 = vpop.f32.mrf.mxu3 }
 0x314   : > { %v2764_v38 = vpack.c.bf16 %v2571_v34, %v2571_v34  ;;  %v2786_v39 = vpack.c.bf16 %v2626_v35, %v2626_v35  ;;  %v2524_v42 = vpop.f32.mrf.mxu1  ;;  %v3051_v34 = vld.sshfl [vmem:[#allocation1 + $0x28] sm:$0xff pattern:$0x73625140]  ;;  %v3052_v35 = vld.sshfl [vmem:[#allocation1 + $0x30] sm:$0xff pattern:$0x73625140] }
 0x315   : > { %v2745_v43 = vpack.c.bf16 %v2524_v42, %v2524_v42 }
 0x316   : > { %2893 = vst.msk [vmem:[%s5907_s22 + $0x154] sm:$0xf] %vm2807_vm9, %v2764_v38  ;;  %v3053_v38 = vld.sshfl [vmem:[#allocation1 + $0x38] sm:$0xff pattern:$0x73625140] }
 0x317   : > { %2915 = vst.msk [vmem:[%s5907_s22 + $0x1ac] sm:$0xf] %vm2807_vm9, %v2786_v39  ;;  %5206 = vmatmul.msk.bf16.gmra.mxu1 %vm1785_vm0, %v5440_v27  ;;  %v2947_v27 = vld [vmem:[%s5834_s19 + $0x18] sm:$0xff] }
 0x318   : > { %5216 = vmatmul.msk.bf16.gmra.mxu2 %vm1785_vm0, %v5450_v40  ;;  %5227 = vmatmul.msk.bf16.gmra.mxu3 %vm1785_vm0, %v5461_v41  ;;  %2874 = vst.msk [vmem:[%s5907_s22 + $0x108] sm:$0xf] %vm2807_vm9, %v2745_v43 }
 0x31b   : > { %v2574_v46 = vpop.f32.mrf.mxu2  ;;  %v2629_v47 = vpop.f32.mrf.mxu3 }
 0x31c   : > { %v2765_v48 = vpack.c.bf16 %v2574_v46, %v2574_v46  ;;  %v2787_v49 = vpack.c.bf16 %v2629_v47, %v2629_v47  ;;  %v2526_v50 = vpop.f32.mrf.mxu1 }
 0x31d   : > { %v2746_v52 = vpack.c.bf16 %v2526_v50, %v2526_v50 }
 0x31e   : > { %2894 = vst.msk [vmem:[%s5907_s22 + $0x158] sm:$0xf] %vm2807_vm9, %v2765_v48 }
 0x31f   : > { %2916 = vst.msk [vmem:[%s5907_s22 + $0x1b0] sm:$0xf] %vm2807_vm9, %v2787_v49 }
 0x320   : > { %2875 = vst.msk [vmem:[%s5907_s22 + $0x10c] sm:$0xf] %vm2807_vm9, %v2746_v52  ;;  %v3060_v52 = vld.sshfl [vmem:[#allocation1 + $0x10] sm:$0xff pattern:$0x73625140] }
 0x323   : > { %v2576_v61 = vpop.f32.mrf.mxu2  ;;  %v2631_v2 = vpop.f32.mrf.mxu3 }
 0x324   : > { %v2766_v3 = vpack.c.bf16 %v2576_v61, %v2576_v61  ;;  %v2788_v4 = vpack.c.bf16 %v2631_v2, %v2631_v2  ;;  %v2529_v7 = vpop.f32.mrf.mxu1 }
 0x325   : > { %v2747_v16 = vpack.c.bf16 %v2529_v7, %v2529_v7 }
 0x326   : > { %2895 = vst.msk [vmem:[%s5907_s22 + $0x15c] sm:$0xf] %vm2807_vm9, %v2766_v3 }
 0x327   : > { %2917 = vst.msk [vmem:[%s5907_s22 + $0x1b4] sm:$0xf] %vm2807_vm9, %v2788_v4  ;;  %3130 = vmatmul.bf16.vlgmr.msra.gmra.mxu1 %v5794_v55  ;;  %v3050_v55 = vld.sshfl [vmem:[#allocation1 + $0x20] sm:$0xff pattern:$0x73625140] }
 0x328   : > { %5217 = vmatmul.msk.bf16.gmra.mxu2 %vm1785_vm0, %v5451_v5  ;;  %5228 = vmatmul.msk.bf16.gmra.mxu3 %vm1785_vm0, %v5462_v6  ;;  %2876 = vst.msk [vmem:[%s5907_s22 + $0x110] sm:$0xf] %vm2807_vm9, %v2747_v16 }
 0x329   : > { %3168 = vmatpush.bf16.xpose.msra.mxu1 %v3049_v45  ;;  %3057 = vst [vmem:[#allocation1 + $0x20] ss:$4 sm:$0xff] %v2947_v27 }
 0x32b   : > { %v2579_v17 = vpop.f32.mrf.mxu2  ;;  %v2634_v18 = vpop.f32.mrf.mxu3 }
 0x32c   : > { %v2767_v19 = vpack.c.bf16 %v2579_v17, %v2579_v17  ;;  %v2789_v20 = vpack.c.bf16 %v2634_v18, %v2634_v18  ;;  %v2531_v25 = vpop.f32.mrf.mxu1 }
 0x32d   : > { %v2748_v26 = vpack.c.bf16 %v2531_v25, %v2531_v25 }
 0x32e   : > { %2896 = vst.msk [vmem:[%s5907_s22 + $0x160] sm:$0xf] %vm2807_vm9, %v2767_v19 }
 0x32f   : > { %2918 = vst.msk [vmem:[%s5907_s22 + $0x1b8] sm:$0xf] %vm2807_vm9, %v2789_v20 }
 0x330   : > { %2877 = vst.msk [vmem:[%s5907_s22 + $0x114] sm:$0xf] %vm2807_vm9, %v2748_v26 }
 0x333   : > { %v2581_v39 = vpop.f32.mrf.mxu2  ;;  %v2636_v40 = vpop.f32.mrf.mxu3 }
 0x334   : > { %v2768_v41 = vpack.c.bf16 %v2581_v39, %v2581_v39  ;;  %v2790_v42 = vpack.c.bf16 %v2636_v40, %v2636_v40  ;;  %v2534_v43 = vpop.f32.mrf.mxu1  ;;  %v3065_v39 = vld.sshfl [vmem:[#allocation1 + $0x38] sm:$0xff pattern:$0x73625140] }
 0x335   : > { %v2749_v44 = vpack.c.bf16 %v2534_v43, %v2534_v43 }
 0x336   : > { %2897 = vst.msk [vmem:[%s5907_s22 + $0x164] sm:$0xf] %vm2807_vm9, %v2768_v41 }
 0x337   : > { %2919 = vst.msk [vmem:[%s5907_s22 + $0x1bc] sm:$0xf] %vm2807_vm9, %v2790_v42  ;;  %3169 = vmatmul.bf16.vlgmr.msra.gmra.mxu1 %v5800_v60  ;;  %v3059_v60 = vld.sshfl [vmem:[#allocation1 + $0x8] sm:$0xff pattern:$0x73625140] }
 0x338   : > { %3143 = vmatmul.bf16.vlgmr.msra.gmra.mxu2 %v5796_v56  ;;  %3156 = vmatmul.bf16.vlgmr.msra.gmra.mxu3 %v5798_v59  ;;  %2878 = vst.msk [vmem:[%s5907_s22 + $0x118] sm:$0xf] %vm2807_vm9, %v2749_v44  ;;  %v2948_v56 = vld [vmem:[%s5834_s19 + $0x20] sm:$0xff] }
 0x339   : > { %3181 = vmatpush.bf16.xpose.msra.mxu2 %v3050_v55  ;;  %3194 = vmatpush.bf16.xpose.msra.mxu3 %v3051_v34  ;;  %v3058_v59 = vld.sshfl [vmem:[#allocation1] sm:$0xff pattern:$0x73625140]  ;;  %v2949_v34 = vld [vmem:[%s5834_s19 + $0x28] sm:$0xff] }
 0x33a   : > { %3207 = vmatpush.bf16.xpose.msra.mxu1 %v3052_v35  ;;  %3067 = vst [vmem:[#allocation1] ss:$4 sm:$0xff] %v2948_v56  ;;  %v3062_v55 = vld.sshfl [vmem:[#allocation1 + $0x20] sm:$0xff pattern:$0x73625140] }
 0x33b   : > { %v2584_v45 = vpop.f32.mrf.mxu2  ;;  %v2639_v46 = vpop.f32.mrf.mxu3  ;;  %v3063_v35 = vld.sshfl [vmem:[#allocation1 + $0x28] sm:$0xff pattern:$0x73625140] }
 0x33c   : > { %v2769_v47 = vpack.c.bf16 %v2584_v45, %v2584_v45  ;;  %v2791_v48 = vpack.c.bf16 %v2639_v46, %v2639_v46  ;;  %v2536_v49 = vpop.f32.mrf.mxu1 }
 0x33d   : > { %v2750_v50 = vpack.c.bf16 %v2536_v49, %v2536_v49 }
 0x33e   : > { %2898 = vst.msk [vmem:[%s5907_s22 + $0x168] sm:$0xf] %vm2807_vm9, %v2769_v47 }
 0x33f   : > { %2920 = vst.msk [vmem:[%s5907_s22 + $0x1c0] sm:$0xf] %vm2807_vm9, %v2791_v48 }
 0x340   : > { %2879 = vst.msk [vmem:[%s5907_s22 + $0x11c] sm:$0xf] %vm2807_vm9, %v2750_v50 }
 0x343   : > { %v2586_v61 = vpop.f32.mrf.mxu2  ;;  %v2641_v2 = vpop.f32.mrf.mxu3 }
 0x344   : > { %v2770_v3 = vpack.c.bf16 %v2586_v61, %v2586_v61  ;;  %v2792_v4 = vpack.c.bf16 %v2641_v2, %v2641_v2  ;;  %v2539_v5 = vpop.f32.mrf.mxu1  ;;  %v3073_v61 = vld.sshfl [vmem:[#allocation1 + $0x18] sm:$0xff pattern:$0x73625140] }
 0x345   : > { %v2751_v6 = vpack.c.bf16 %v2539_v5, %v2539_v5 }
 0x346   : > { %2899 = vst.msk [vmem:[%s5907_s22 + $0x16c] sm:$0xf] %vm2807_vm9, %v2770_v3 }
 0x347   : > { %2921 = vst.msk [vmem:[%s5907_s22 + $0x1c4] sm:$0xf] %vm2807_vm9, %v2792_v4  ;;  %3208 = vmatmul.bf16.vlgmr.msra.gmra.mxu1 %v5896_v0 }
 0x348   : > { %3182 = vmatmul.bf16.vlgmr.msra.gmra.mxu2 %v5892_v62  ;;  %3195 = vmatmul.bf16.vlgmr.msra.gmra.mxu3 %v5894_v63  ;;  %2880 = vst.msk [vmem:[%s5907_s22 + $0x120] sm:$0xf] %vm2807_vm9, %v2751_v6 }
 0x349   : > { %3220 = vmatpush.bf16.xpose.msra.mxu2 %v3053_v38  ;;  %3233 = vmatpush.bf16.xpose.msra.mxu3 %v3058_v59  ;;  %v3064_v38 = vld.sshfl [vmem:[#allocation1 + $0x30] sm:$0xff pattern:$0x73625140] }
 0x34a   : > { %3246 = vmatpush.bf16.xpose.msra.mxu1 %v3059_v60  ;;  %3069 = vst [vmem:[#allocation1 + $0x20] ss:$4 sm:$0xff] %v2949_v34 }
 0x34b   : > { %v2589_v7 = vpop.f32.mrf.mxu2  ;;  %v2644_v16 = vpop.f32.mrf.mxu3 }
 0x34c   : > { %v2771_v17 = vpack.c.bf16 %v2589_v7, %v2589_v7  ;;  %v2793_v18 = vpack.c.bf16 %v2644_v16, %v2644_v16  ;;  %v2541_v19 = vpop.f32.mrf.mxu1 }
 0x34d   : > { %v2752_v20 = vpack.c.bf16 %v2541_v19, %v2541_v19 }
 0x34e   : > { %2900 = vst.msk [vmem:[%s5907_s22 + $0x170] sm:$0xf] %vm2807_vm9, %v2771_v17 }
 0x34f   : > { %2922 = vst.msk [vmem:[%s5907_s22 + $0x1c8] sm:$0xf] %vm2807_vm9, %v2793_v18 }
 0x350   : > { %2881 = vst.msk [vmem:[%s5907_s22 + $0x124] sm:$0xf] %vm2807_vm9, %v2752_v20 }
 0x353   : > { %v2591_v62 = vpop.f32.mrf.mxu2  ;;  %v2646_v63 = vpop.f32.mrf.mxu3 }
 0x354   : > { %v2772_v0 = vpack.c.bf16 %v2591_v62, %v2591_v62  ;;  %v2794_v25 = vpack.c.bf16 %v2646_v63, %v2646_v63  ;;  %v2544_v26 = vpop.f32.mrf.mxu1  ;;  %v3076_v63 = vld.sshfl [vmem:[#allocation1 + $0x30] sm:$0xff pattern:$0x73625140] }
 0x355   : > { %v2753_v27 = vpack.c.bf16 %v2544_v26, %v2544_v26 }
 0x356   : > { %2901 = vst.msk [vmem:[%s5907_s22 + $0x174] sm:$0xf] %vm2807_vm9, %v2772_v0  ;;  %v3077_v0 = vld.sshfl [vmem:[#allocation1 + $0x38] sm:$0xff pattern:$0x73625140] }
 0x357   : > { %2923 = vst.msk [vmem:[%s5907_s22 + $0x1cc] sm:$0xf] %vm2807_vm9, %v2794_v25  ;;  %3247 = vmatmul.bf16.vlgmr.msra.gmra.mxu1 %v5805_v11 }
 0x358   : > { %3221 = vmatmul.bf16.vlgmr.msra.gmra.mxu2 %v5898_v1  ;;  %3234 = vmatmul.bf16.vlgmr.msra.gmra.mxu3 %v5803_v10  ;;  %2882 = vst.msk [vmem:[%s5907_s22 + $0x128] sm:$0xf] %vm2807_vm9, %v2753_v27 }
 0x359   : > { %3259 = vmatpush.bf16.xpose.msra.mxu2 %v3060_v52  ;;  %3272 = vmatpush.bf16.xpose.msra.mxu3 %v3061_v57  ;;  %v2950_v57 = vld [vmem:[%s5834_s19 + $0x30] sm:$0xff] }
 0x35a   : > { %3285 = vmatpush.bf16.xpose.msra.mxu1 %v3062_v55 }
 0x35b   : > { %v2594_v40 = vpop.f32.mrf.mxu2  ;;  %v2649_v11 = vpop.f32.mrf.mxu3 }
 0x35c   : > { %v2773_v41 = vpack.c.bf16 %v2594_v40, %v2594_v40  ;;  %v2795_v1 = vpack.c.bf16 %v2649_v11, %v2649_v11  ;;  %v2546_v42 = vpop.f32.mrf.mxu1 }
 0x35d   : > { %v2754_v10 = vpack.c.bf16 %v2546_v42, %v2546_v42 }
 0x35e   : > { %2902 = vst.msk [vmem:[%s5907_s22 + $0x178] sm:$0xf] %vm2807_vm9, %v2773_v41 }
 0x35f   : > { %2924 = vst.msk [vmem:[%s5907_s22 + $0x1d0] sm:$0xf] %vm2807_vm9, %v2795_v1 }
 0x360   : > { %2883 = vst.msk [vmem:[%s5907_s22 + $0x12c] sm:$0xf] %vm2807_vm9, %v2754_v10 }
 0x363   : > { %v2596_v43 = vpop.f32.mrf.mxu2  ;;  %v2651_v44 = vpop.f32.mrf.mxu3 }
 0x364   : > { %v2774_v45 = vpack.c.bf16 %v2596_v43, %v2596_v43  ;;  %v2796_v46 = vpack.c.bf16 %v2651_v44, %v2651_v44  ;;  %v2549_v47 = vpop.f32.mrf.mxu1 }
 0x365   : > { %v2755_v48 = vpack.c.bf16 %v2549_v47, %v2549_v47 }
 0x366   : > { %2903 = vst.msk [vmem:[%s5907_s22 + $0x17c] sm:$0xf] %vm2807_vm9, %v2774_v45  ;;  %v2952_v45 = vld [vmem:[%s6082_s26] sm:$0xff] }
 0x367   : > { %2925 = vst.msk [vmem:[%s5907_s22 + $0x1d4] sm:$0xf] %vm2807_vm9, %v2796_v46  ;;  %3286 = vmatmul.bf16.vlgmr.msra.gmra.mxu1 %v5915_v8  ;;  %v3071_v8 = vld.sshfl [vmem:[#allocation1 + $0x8] sm:$0xff pattern:$0x73625140] }
 0x368   : > { %3260 = vmatmul.bf16.vlgmr.msra.gmra.mxu2 %v5807_v13  ;;  %3273 = vmatmul.bf16.vlgmr.msra.gmra.mxu3 %v5809_v14  ;;  %2884 = vst.msk [vmem:[%s5907_s22 + $0x130] sm:$0xf] %vm2807_vm9, %v2755_v48  ;;  %v3070_v13 = vld.sshfl [vmem:[#allocation1] sm:$0xff pattern:$0x73625140] }
 0x369   : > { %3298 = vmatpush.bf16.xpose.msra.mxu2 %v3063_v35  ;;  %3311 = vmatpush.bf16.xpose.msra.mxu3 %v3064_v38  ;;  %v3072_v14 = vld.sshfl [vmem:[#allocation1 + $0x10] sm:$0xff pattern:$0x73625140] }
 0x36a   : > { %3324 = vmatpush.bf16.xpose.msra.mxu1 %v3065_v39  ;;  %3079 = vst [vmem:[#allocation1] ss:$4 sm:$0xff] %v2950_v57 }
 0x36b   : > { %v2599_v49 = vpop.f32.mrf.mxu2  ;;  %v2654_v50 = vpop.f32.mrf.mxu3 }
 0x36c   : > { %v2775_v56 = vpack.c.bf16 %v2599_v49, %v2599_v49  ;;  %v2797_v59 = vpack.c.bf16 %v2654_v50, %v2654_v50  ;;  %v2551_v60 = vpop.f32.mrf.mxu1 }
 0x36d   : > { %v2756_v52 = vpack.c.bf16 %v2551_v60, %v2551_v60 }
 0x36e   : > { %2904 = vst.msk [vmem:[%s5907_s22 + $0x180] sm:$0xf] %vm2807_vm9, %v2775_v56 }
 0x36f   : > { %2926 = vst.msk [vmem:[%s5907_s22 + $0x1d8] sm:$0xf] %vm2807_vm9, %v2797_v59 }
 0x370   : > { %2885 = vst.msk [vmem:[%s5907_s22 + $0x134] sm:$0xf] %vm2807_vm9, %v2756_v52 }
 0x371   : > { %v3082_v44 = vld.sshfl [vmem:[#allocation1] sm:$0xff pattern:$0x73625140]  ;;  %v3083_v46 = vld.sshfl [vmem:[#allocation1 + $0x8] sm:$0xff pattern:$0x73625140] }
 0x372   : > { %v3084_v47 = vld.sshfl [vmem:[#allocation1 + $0x10] sm:$0xff pattern:$0x73625140]  ;;  %v3085_v48 = vld.sshfl [vmem:[#allocation1 + $0x18] sm:$0xff pattern:$0x73625140] }
 0x373   : > { %v2601_v2 = vpop.f32.mrf.mxu2  ;;  %v2656_v3 = vpop.f32.mrf.mxu3  ;;  %3565 = vst [vmem:[#allocation1] ss:$4 sm:$0xff] %v2952_v45  ;;  %v5399_v45 = vld [vmem:[%s5816_s16] sm:$0xff] }
 0x374   : > { %v2776_v4 = vpack.c.bf16 %v2601_v2, %v2601_v2  ;;  %v2798_v5 = vpack.c.bf16 %v2656_v3, %v2656_v3  ;;  %v2554_v6 = vpop.f32.mrf.mxu1  ;;  %5165 = vmatmul.msk.bf16.vlgmr.msra.gmra.mxu0 %vm1785_vm0, %v5399_v45 }
 0x375   : > { %v2757_v7 = vpack.c.bf16 %v2554_v6, %v2554_v6 }
 0x376   : > { %2905 = vst.msk [vmem:[%s5907_s22 + $0x184] sm:$0xf] %vm2807_vm9, %v2776_v4  ;;  %v2953_v4 = vld [vmem:[%s6082_s26 + $0x8] sm:$0xff] }
 0x377   : > { %2927 = vst.msk [vmem:[%s5907_s22 + $0x1dc] sm:$0xf] %vm2807_vm9, %v2798_v5  ;;  %3325 = vmatmul.bf16.vlgmr.msra.gmra.mxu1 %v5921_v15  ;;  %v3075_v15 = vld.sshfl [vmem:[#allocation1 + $0x28] sm:$0xff pattern:$0x73625140] }
 0x378   : > { %3299 = vmatmul.bf16.vlgmr.msra.gmra.mxu2 %v5917_v9  ;;  %3312 = vmatmul.bf16.vlgmr.msra.gmra.mxu3 %v5919_v12  ;;  %2886 = vst.msk [vmem:[%s5907_s22 + $0x138] sm:$0xf] %vm2807_vm9, %v2757_v7  ;;  %v2951_v9 = vld [vmem:[%s5834_s19 + $0x38] sm:$0xff]  ;;  %v3074_v12 = vld.sshfl [vmem:[#allocation1 + $0x20] sm:$0xff pattern:$0x73625140] }
 0x379   : > { %3337 = vmatpush.bf16.xpose.msra.mxu2 %v3070_v13  ;;  %3350 = vmatpush.bf16.xpose.msra.mxu3 %v3071_v8  ;;  %3081 = vst [vmem:[#allocation1 + $0x20] ss:$4 sm:$0xff] %v2951_v9 }
 0x37a   : > { %3363 = vmatpush.bf16.xpose.msra.mxu1 %v3072_v14 }
 0x37b   : > { %v2604_v16 = vpop.f32.mrf.mxu2  ;;  %v2659_v17 = vpop.f32.mrf.mxu3 }
 0x37c   : > { %v2777_v18 = vpack.c.bf16 %v2604_v16, %v2604_v16  ;;  %v2799_v19 = vpack.c.bf16 %v2659_v17, %v2659_v17  ;;  %v2556_v20 = vpop.f32.mrf.mxu1 }
 0x37d   : > { %v2758_v62 = vpack.c.bf16 %v2556_v20, %v2556_v20 }
 0x37e   : > { %2906 = vst.msk [vmem:[%s5907_s22 + $0x188] sm:$0xf] %vm2807_vm9, %v2777_v18 }
 0x37f   : > { %2928 = vst.msk [vmem:[%s5907_s22 + $0x1e0] sm:$0xf] %vm2807_vm9, %v2799_v19 }
 0x380   : > { %2887 = vst.msk [vmem:[%s5907_s22 + $0x13c] sm:$0xf] %vm2807_vm9, %v2758_v62  ;;  %v3086_v5 = vld.sshfl [vmem:[#allocation1 + $0x20] sm:$0xff pattern:$0x73625140] }
 0x381   : > { %v3089_v6 = vld.sshfl [vmem:[#allocation1 + $0x38] sm:$0xff pattern:$0x73625140] }
 0x383   : > { %v2606_v25 = vpop.f32.mrf.mxu2  ;;  %v2661_v26 = vpop.f32.mrf.mxu3 }
 0x384   : > { %v2778_v27 = vpack.c.bf16 %v2606_v25, %v2606_v25  ;;  %v2800_v55 = vpack.c.bf16 %v2661_v26, %v2661_v26  ;;  %v2559_v34 = vpop.f32.mrf.mxu1 }
 0x385   : > { %v2759_v35 = vpack.c.bf16 %v2559_v34, %v2559_v34 }
 0x386   : > { %2907 = vst.msk [vmem:[%s5907_s22 + $0x18c] sm:$0xf] %vm2807_vm9, %v2778_v27 }
 0x387   : > { %2929 = vst.msk [vmem:[%s5907_s22 + $0x1e4] sm:$0xf] %vm2807_vm9, %v2800_v55  ;;  %3364 = vmatmul.bf16.vlgmr.msra.gmra.mxu1 %v5824_v23 }
 0x388   : > { %3338 = vmatmul.bf16.vlgmr.msra.gmra.mxu2 %v5820_v21  ;;  %3351 = vmatmul.bf16.vlgmr.msra.gmra.mxu3 %v5822_v22  ;;  %2888 = vst.msk [vmem:[%s5907_s22 + $0x140] sm:$0xf] %vm2807_vm9, %v2759_v35 }
 0x389   : > { %3376 = vmatpush.bf16.xpose.msra.mxu2 %v3073_v61  ;;  %3389 = vmatpush.bf16.xpose.msra.mxu3 %v3074_v12 }
 0x38a   : > { %3402 = vmatpush.bf16.xpose.msra.mxu1 %v3075_v15 }
 0x38b   : > { %v2609_v38 = vpop.f32.mrf.mxu2  ;;  %v2664_v39 = vpop.f32.mrf.mxu3 }
 0x38c   : > { %v2779_v40 = vpack.c.bf16 %v2609_v38, %v2609_v38  ;;  %v2801_v11 = vpack.c.bf16 %v2664_v39, %v2664_v39  ;;  %v2561_v41 = vpop.f32.mrf.mxu1 }
 0x38d   : > { %v2760_v1 = vpack.c.bf16 %v2561_v41, %v2561_v41 }
 0x38e   : > { %2908 = vst.msk [vmem:[%s5907_s22 + $0x190] sm:$0xf] %vm2807_vm9, %v2779_v40 }
 0x38f   : > { %2930 = vst.msk [vmem:[%s5907_s22 + $0x1e8] sm:$0xf] %vm2807_vm9, %v2801_v11 }
 0x390   : > { %2889 = vst.msk [vmem:[%s5907_s22 + $0x144] sm:$0xf] %vm2807_vm9, %v2760_v1 }
 0x393   : > { %v2611_v21 = vpop.f32.mrf.mxu2  ;;  %v2666_v22 = vpop.f32.mrf.mxu3 }
 0x394   : > { %v2780_v23 = vpack.c.bf16 %v2611_v21, %v2611_v21  ;;  %v2802_v42 = vpack.c.bf16 %v2666_v22, %v2666_v22  ;;  %v2564_v10 = vpop.f32.mrf.mxu1 }
 0x395   : > { %v2761_v43 = vpack.c.bf16 %v2564_v10, %v2564_v10 }
 0x396   : > { %2909 = vst.msk [vmem:[%s5907_s22 + $0x194] sm:$0xf] %vm2807_vm9, %v2780_v23 }
 0x397   : > { %2931 = vst.msk [vmem:[%s5907_s22 + $0x1ec] sm:$0xf] %vm2807_vm9, %v2802_v42  ;;  %3403 = vmatmul.bf16.vlgmr.msra.gmra.mxu1 %v5933_v33 }
 0x398   : > { %3377 = vmatmul.bf16.vlgmr.msra.gmra.mxu2 %v5826_v24  ;;  %3390 = vmatmul.bf16.vlgmr.msra.gmra.mxu3 %v5931_v32  ;;  %2890 = vst.msk [vmem:[%s5907_s22 + $0x148] sm:$0xf] %vm2807_vm9, %v2761_v43 }
 0x399   : > { %3415 = vmatpush.bf16.xpose.msra.mxu2 %v3076_v63  ;;  %3428 = vmatpush.bf16.xpose.msra.mxu3 %v3077_v0 }
 0x39a   : > { %3441 = vmatpush.bf16.xpose.msra.mxu1 %v3082_v44 }
 0x39b   : > { %v2614_v49 = vpop.f32.mrf.mxu2  ;;  %v2669_v33 = vpop.f32.mrf.mxu3 }
 0x39c   : > { %v2781_v50 = vpack.c.bf16 %v2614_v49, %v2614_v49  ;;  %v2803_v24 = vpack.c.bf16 %v2669_v33, %v2669_v33  ;;  %v2566_v56 = vpop.f32.mrf.mxu1 }
 0x39d   : > { %v2762_v59 = vpack.c.bf16 %v2566_v56, %v2566_v56 }
 0x39e   : > { %2910 = vst.msk [vmem:[%s5907_s22 + $0x198] sm:$0xf] %vm2807_vm9, %v2781_v50 }
 0x39f   : > { %2932 = vst.msk [vmem:[%s5907_s22 + $0x1f0] sm:$0xf] %vm2807_vm9, %v2803_v24 }
 0x3a0   : > { %2891 = vst.msk [vmem:[%s5907_s22 + $0x14c] sm:$0xf] %vm2807_vm9, %v2762_v59  ;;  %v5400_v59 = vld [vmem:[%s5816_s16 + $0x8] sm:$0xff] }
 0x3a1   : > { %5166 = vmatmul.msk.bf16.gmra.mxu0 %vm1785_vm0, %v5400_v59 }
 0x3a3   : > { %v2616_v32 = vpop.f32.mrf.mxu2  ;;  %v2671_v60 = vpop.f32.mrf.mxu3 }
 0x3a4   : > { %v2782_v52 = vpack.c.bf16 %v2616_v32, %v2616_v32  ;;  %v2804_v57 = vpack.c.bf16 %v2671_v60, %v2671_v60  ;;  %v3131_v13 = vpop.f32.mrf.mxu1 }
 0x3a6   : > { %2911 = vst.msk [vmem:[%s5907_s22 + $0x19c] sm:$0xf] %vm2807_vm9, %v2782_v52 }
 0x3a7   : > { %2933 = vst.msk [vmem:[%s5907_s22 + $0x1f4] sm:$0xf] %vm2807_vm9, %v2804_v57  ;;  %3442 = vmatmul.bf16.vlgmr.msra.gmra.mxu1 %v5840_v28  ;;  %v3087_v28 = vld.sshfl [vmem:[#allocation1 + $0x28] sm:$0xff pattern:$0x73625140] }
 0x3a8   : > { %3416 = vmatmul.bf16.vlgmr.msra.gmra.mxu2 %v5935_v36  ;;  %3429 = vmatmul.bf16.vlgmr.msra.gmra.mxu3 %v5937_v37  ;;  %v3088_v36 = vld.sshfl [vmem:[#allocation1 + $0x30] sm:$0xff pattern:$0x73625140] }
 0x3a9   : > { %3454 = vmatpush.bf16.xpose.msra.mxu2 %v3083_v46  ;;  %3467 = vmatpush.bf16.xpose.msra.mxu3 %v3084_v47  ;;  %3568 = vst [vmem:[#allocation1 + $0x20] ss:$4 sm:$0xff] %v2953_v4 }
 0x3aa   : > { %3480 = vmatpush.bf16.xpose.msra.mxu1 %v3085_v48 }
 0x3ab   : > { %v2619_v8 = vpop.f32.mrf.mxu2  ;;  %v2674_v14 = vpop.f32.mrf.mxu3 }
 0x3ac   : > { %v2783_v61 = vpack.c.bf16 %v2619_v8, %v2619_v8  ;;  %v2805_v2 = vpack.c.bf16 %v2674_v14, %v2674_v14  ;;  %v3133_v3 = vpop.f32.mrf.mxu1  ;;  %v5401_v14 = vld [vmem:[%s5816_s16 + $0x10] sm:$0xff] }
 0x3ae   : > { %2912 = vst.msk [vmem:[%s5907_s22 + $0x1a0] sm:$0xf] %vm2807_vm9, %v2783_v61 }
 0x3af   : > { %2934 = vst.msk [vmem:[%s5907_s22 + $0x1f8] sm:$0xf] %vm2807_vm9, %v2805_v2 }
 0x3b1   : > { %5167 = vmatmul.msk.bf16.gmra.mxu0 %vm1785_vm0, %v5401_v14 }
 0x3b3   : > { %v2621_v37 = vpop.f32.mrf.mxu2  ;;  %v2676_v7 = vpop.f32.mrf.mxu3 }
 0x3b4   : > { %v2784_v16 = vpack.c.bf16 %v2621_v37, %v2621_v37  ;;  %v2806_v17 = vpack.c.bf16 %v2676_v7, %v2676_v7  ;;  %v3170_v18 = vpop.f32.mrf.mxu1 }
 0x3b6   : > { %2913 = vst.msk [vmem:[%s5907_s22 + $0x1a4] sm:$0xf] %vm2807_vm9, %v2784_v16 }
 0x3b7   : > { %2935 = vst.msk [vmem:[%s5907_s22 + $0x1fc] sm:$0xf] %vm2807_vm9, %v2806_v17  ;;  %3481 = vmatmul.bf16.vlgmr.msra.gmra.mxu1 %v5846_v31 }
 0x3b8   : > { %3455 = vmatmul.bf16.vlgmr.msra.gmra.mxu2 %v5842_v29  ;;  %3468 = vmatmul.bf16.vlgmr.msra.gmra.mxu3 %v5844_v30 }
 0x3b9   : > { %3493 = vmatpush.bf16.xpose.msra.mxu2 %v3086_v5  ;;  %3506 = vmatpush.bf16.xpose.msra.mxu3 %v3087_v28 }
 0x3ba   : > { %3519 = vmatpush.bf16.xpose.msra.mxu1 %v3088_v36  ;;  %v5402_v36 = vld [vmem:[%s5816_s16 + $0x18] sm:$0xff] }
 0x3bb   : > { %v3144_v19 = vpop.f32.mrf.mxu2  ;;  %v3157_v20 = vpop.f32.mrf.mxu3 }
 0x3bc   : > { %v3145_v62 = vadd.f32 %v3144_v19, %v3131_v13  ;;  %v3172_v9 = vpop.f32.mrf.mxu1 }
 0x3be   : > { %v3158_v12 = vadd.f32 %v3157_v20, %v3145_v62  ;;  %v5403_v62 = vld [vmem:[%s5816_s16 + $0x20] sm:$0xff] }
 0x3c0   : > { %v3171_v15 = vadd.f32 %v3170_v18, %v3158_v12 }
 0x3c1   : > { %5168 = vmatmul.msk.bf16.gmra.mxu0 %vm1785_vm0, %v5402_v36 }
 0x3c3   : > { %v3146_v63 = vpop.f32.mrf.mxu2  ;;  %v3159_v0 = vpop.f32.mrf.mxu3 }
 0x3c4   : > { %v3209_v25 = vpop.f32.mrf.mxu1 }
 0x3c7   : > { %3520 = vmatmul.bf16.vlgmr.msra.gmra.mxu1 %v5955_v54 }
 0x3c8   : > { %3494 = vmatmul.bf16.vlgmr.msra.gmra.mxu2 %v5951_v51  ;;  %3507 = vmatmul.bf16.vlgmr.msra.gmra.mxu3 %v5953_v53 }
 0x3c9   : > { %3532 = vmatpush.bf16.xpose.msra.mxu2 %v3089_v6 }
 0x3cb   : > { %v3183_v29 = vpop.f32.mrf.mxu2  ;;  %v3196_v30 = vpop.f32.mrf.mxu3 }
 0x3cc   : > { %v3184_v31 = vadd.f32 %v3183_v29, %v3171_v15  ;;  %v3211_v26 = vpop.f32.mrf.mxu1 }
 0x3ce   : > { %v3197_v27 = vadd.f32 %v3196_v30, %v3184_v31 }
 0x3d0   : > { %v3210_v55 = vadd.f32 %v3209_v25, %v3197_v27 }
 0x3d1   : > { %5169 = vmatmul.msk.bf16.gmra.mxu0 %vm1785_vm0, %v5403_v62 }
 0x3d3   : > { %v3185_v34 = vpop.f32.mrf.mxu2  ;;  %v3198_v35 = vpop.f32.mrf.mxu3 }
 0x3d4   : > { %v3248_v38 = vpop.f32.mrf.mxu1 }
 0x3d8   : > { %3533 = vmatmul.bf16.vlgmr.msra.gmra.mxu2 %v5960_v58 }
 0x3db   : > { %v3222_v39 = vpop.f32.mrf.mxu2  ;;  %v3235_v40 = vpop.f32.mrf.mxu3 }
 0x3dc   : > { %v3223_v54 = vadd.f32 %v3222_v39, %v3210_v55  ;;  %v3250_v11 = vpop.f32.mrf.mxu1  ;;  %v5404_v55 = vld [vmem:[%s5816_s16 + $0x28] sm:$0xff] }
 0x3de   : > { %v3236_v51 = vadd.f32 %v3235_v40, %v3223_v54 }
 0x3e0   : > { %v3249_v41 = vadd.f32 %v3248_v38, %v3236_v51 }
 0x3e1   : > { %5170 = vmatmul.msk.bf16.gmra.mxu0 %vm1785_vm0, %v5404_v55 }
 0x3e3   : > { %v3224_v53 = vpop.f32.mrf.mxu2  ;;  %v3237_v1 = vpop.f32.mrf.mxu3 }
 0x3e4   : > { %v3287_v21 = vpop.f32.mrf.mxu1  ;;  %v5405_v1 = vld [vmem:[%s5816_s16 + $0x30] sm:$0xff] }
 0x3eb   : > { %v3261_v22 = vpop.f32.mrf.mxu2  ;;  %v3274_v23 = vpop.f32.mrf.mxu3 }
 0x3ec   : > { %v3262_v42 = vadd.f32 %v3261_v22, %v3249_v41  ;;  %v3289_v10 = vpop.f32.mrf.mxu1 }
 0x3ee   : > { %v3275_v43 = vadd.f32 %v3274_v23, %v3262_v42 }
 0x3f0   : > { %v3288_v44 = vadd.f32 %v3287_v21, %v3275_v43 }
 0x3f1   : > { %5171 = vmatmul.msk.bf16.gmra.mxu0 %vm1785_vm0, %v5405_v1 }
 0x3f3   : > { %v3263_v46 = vpop.f32.mrf.mxu2  ;;  %v3276_v58 = vpop.f32.mrf.mxu3 }
 0x3f4   : > { %v3326_v47 = vpop.f32.mrf.mxu1  ;;  %v5406_v58 = vld [vmem:[%s5816_s16 + $0x38] sm:$0xff] }
 0x3fb   : > { %v3300_v48 = vpop.f32.mrf.mxu2  ;;  %v3313_v49 = vpop.f32.mrf.mxu3 }
 0x3fc   : > { %v3301_v33 = vadd.f32 %v3300_v48, %v3288_v44  ;;  %v3328_v50 = vpop.f32.mrf.mxu1  ;;  %v5407_v48 = vld [vmem:[%s5816_s16 + $0x40] sm:$0xff] }
 0x3fe   : > { %v3314_v24 = vadd.f32 %v3313_v49, %v3301_v33  ;;  %v2359_v49 = vpop.f32.mrf.mxu0 }
 0x3ff   : > { %v2679_v33 = vpack.c.bf16 %v2359_v49, %v2359_v49 }
 0x400   : > { %v3327_v56 = vadd.f32 %v3326_v47, %v3314_v24 }
 0x401   : > { %5172 = vmatmul.msk.bf16.gmra.mxu0 %vm1785_vm0, %v5406_v58  ;;  %2808 = vst.msk [vmem:[%s5907_s22] sm:$0xf] %vm2807_vm9, %v2679_v33  ;;  %v5419_v33 = vld [vmem:[%s5816_s16 + $0xa0] sm:$0xff] }
 0x403   : > { %v3302_v32 = vpop.f32.mrf.mxu2  ;;  %v3315_v60 = vpop.f32.mrf.mxu3 }
 0x404   : > { %v3365_v52 = vpop.f32.mrf.mxu1 }
 0x406   : > { %v2361_v50 = vpop.f32.mrf.mxu0 }
 0x407   : > { %v2680_v24 = vpack.c.bf16 %v2361_v50, %v2361_v50 }
 0x409   : > { %2809 = vst.msk [vmem:[%s5907_s22 + $0x4] sm:$0xf] %vm2807_vm9, %v2680_v24 }
 0x40b   : > { %v3339_v57 = vpop.f32.mrf.mxu2  ;;  %v3352_v13 = vpop.f32.mrf.mxu3 }
 0x40c   : > { %v3367_v8 = vpop.f32.mrf.mxu1  ;;  %v3340_v16 = vadd.f32 %v3339_v57, %v3327_v56  ;;  %v5408_v56 = vld [vmem:[%s5816_s16 + $0x48] sm:$0xff]  ;;  %v5409_v57 = vld [vmem:[%s5816_s16 + $0x50] sm:$0xff] }
 0x40e   : > { %v3353_v20 = vadd.f32 %v3352_v13, %v3340_v16 }
 0x410   : > { %v3366_v9 = vadd.f32 %v3365_v52, %v3353_v20 }
 0x411   : > { %5173 = vmatmul.msk.bf16.gmra.mxu0 %vm1785_vm0, %v5407_v48 }
 0x413   : > { %v3341_v61 = vpop.f32.mrf.mxu2  ;;  %v3354_v2 = vpop.f32.mrf.mxu3 }
 0x414   : > { %v3404_v3 = vpop.f32.mrf.mxu1  ;;  %v5410_v2 = vld [vmem:[%s5816_s16 + $0x58] sm:$0xff] }
 0x41b   : > { %v3378_v4 = vpop.f32.mrf.mxu2  ;;  %v3391_v5 = vpop.f32.mrf.mxu3 }
 0x41c   : > { %v3406_v28 = vpop.f32.mrf.mxu1  ;;  %v3379_v63 = vadd.f32 %v3378_v4, %v3366_v9  ;;  %v5413_v9 = vld [vmem:[%s5816_s16 + $0x70] sm:$0xff] }
 0x41e   : > { %v3392_v25 = vadd.f32 %v3391_v5, %v3379_v63  ;;  %v2364_v59 = vpop.f32.mrf.mxu0 }
 0x41f   : > { %v2681_v32 = vpack.c.bf16 %v2364_v59, %v2364_v59 }
 0x420   : > { %v3405_v31 = vadd.f32 %v3404_v3, %v3392_v25 }
 0x421   : > { %2810 = vst.msk [vmem:[%s5907_s22 + $0x8] sm:$0xf] %vm2807_vm9, %v2681_v32  ;;  %5174 = vmatmul.msk.bf16.gmra.mxu0 %vm1785_vm0, %v5408_v56  ;;  %v5420_v32 = vld [vmem:[%s5816_s16 + $0xa8] sm:$0xff] }
 0x423   : > { %v3380_v6 = vpop.f32.mrf.mxu2  ;;  %v3393_v37 = vpop.f32.mrf.mxu3 }
 0x424   : > { %v3443_v7 = vpop.f32.mrf.mxu1  ;;  %v5411_v6 = vld [vmem:[%s5816_s16 + $0x60] sm:$0xff] }
 0x426   : > { %v2366_v60 = vpop.f32.mrf.mxu0 }
 0x427   : > { %v2682_v52 = vpack.c.bf16 %v2366_v60, %v2366_v60  ;;  %v3569_v60 = vld.sshfl [vmem:[#allocation1] sm:$0xff pattern:$0x73625140] }
 0x429   : > { %2811 = vst.msk [vmem:[%s5907_s22 + $0xc] sm:$0xf] %vm2807_vm9, %v2682_v52  ;;  %v3618_v52 = vsel %vm3617_vm11, %v3569_v60, 0 }
 0x42a   : > { %3689 = vmatpush.bf16.msra.mxu3 %v3618_v52 }
 0x42b   : > { %v3417_v17 = vpop.f32.mrf.mxu2  ;;  %v3430_v18 = vpop.f32.mrf.mxu3 }
 0x42c   : > { %v3445_v19 = vpop.f32.mrf.mxu1  ;;  %v3418_v27 = vadd.f32 %v3417_v17, %v3405_v31  ;;  %v5412_v17 = vld [vmem:[%s5816_s16 + $0x68] sm:$0xff] }
 0x42e   : > { %v3431_v34 = vadd.f32 %v3430_v18, %v3418_v27  ;;  %v2369_v13 = vpop.f32.mrf.mxu0  ;;  %v5414_v27 = vld [vmem:[%s5816_s16 + $0x78] sm:$0xff] }
 0x42f   : > { %v2683_v8 = vpack.c.bf16 %v2369_v13, %v2369_v13 }
 0x430   : > { %v3444_v40 = vadd.f32 %v3443_v7, %v3431_v34 }
 0x431   : > { %2812 = vst.msk [vmem:[%s5907_s22 + $0x10] sm:$0xf] %vm2807_vm9, %v2683_v8  ;;  %5175 = vmatmul.msk.bf16.gmra.mxu0 %vm1785_vm0, %v5409_v57  ;;  %v3570_v57 = vld.sshfl [vmem:[#allocation1 + $0x8] sm:$0xff pattern:$0x73625140] }
 0x432   : > { %v3620_v13 = vsel %vm3617_vm11, %v3570_v57, 0  ;;  %v3571_v8 = vld.sshfl [vmem:[#allocation1 + $0x10] sm:$0xff pattern:$0x73625140] }
 0x433   : > { %v3419_v12 = vpop.f32.mrf.mxu2  ;;  %v3432_v15 = vpop.f32.mrf.mxu3  ;;  %3702 = vmatpush.bf16.msra.mxu1 %v3620_v13 }
 0x434   : > { %v3482_v0 = vpop.f32.mrf.mxu1 }
 0x436   : > { %v2371_v14 = vpop.f32.mrf.mxu0 }
 0x437   : > { %v2684_v61 = vpack.c.bf16 %v2371_v14, %v2371_v14  ;;  %v3622_v14 = vsel %vm3617_vm11, %v3571_v8, 0 }
 0x438   : > { %3715 = vmatpush.bf16.msra.mxu2 %v3622_v14  ;;  %v5425_v14 = vld [vmem:[%s5816_s16 + $0xd0] sm:$0xff] }
 0x439   : > { %2813 = vst.msk [vmem:[%s5907_s22 + $0x14] sm:$0xf] %vm2807_vm9, %v2684_v61  ;;  %v2954_v61 = vld [vmem:[%s6082_s26 + $0x10] sm:$0xff] }
 0x43b   : > { %v3456_v29 = vpop.f32.mrf.mxu2  ;;  %v3469_v30 = vpop.f32.mrf.mxu3 }
 0x43c   : > { %v3484_v26 = vpop.f32.mrf.mxu1  ;;  %v3457_v54 = vadd.f32 %v3456_v29, %v3444_v40 }
 0x43e   : > { %v3470_v41 = vadd.f32 %v3469_v30, %v3457_v54  ;;  %v2374_v3 = vpop.f32.mrf.mxu0 }
 0x43f   : > { %v2685_v4 = vpack.c.bf16 %v2374_v3, %v2374_v3 }
 0x440   : > { %v3483_v21 = vadd.f32 %v3482_v0, %v3470_v41  ;;  %v5416_v41 = vld [vmem:[%s5816_s16 + $0x88] sm:$0xff] }
 0x441   : > { %2814 = vst.msk [vmem:[%s5907_s22 + $0x18] sm:$0xf] %vm2807_vm9, %v2685_v4  ;;  %5176 = vmatmul.msk.bf16.gmra.mxu0 %vm1785_vm0, %v5410_v2  ;;  %v3572_v4 = vld.sshfl [vmem:[#allocation1 + $0x18] sm:$0xff pattern:$0x73625140] }
 0x442   : > { %3578 = vst [vmem:[#allocation1] ss:$4 sm:$0xff] %v2954_v61 }
 0x443   : > { %v3458_v35 = vpop.f32.mrf.mxu2  ;;  %v3471_v38 = vpop.f32.mrf.mxu3 }
 0x444   : > { %v3521_v39 = vpop.f32.mrf.mxu1 }
 0x446   : > { %v2376_v5 = vpop.f32.mrf.mxu0 }
 0x447   : > { %v2686_v28 = vpack.c.bf16 %v2376_v5, %v2376_v5 }
 0x449   : > { %2815 = vst.msk [vmem:[%s5907_s22 + $0x1c] sm:$0xf] %vm2807_vm9, %v2686_v28 }
 0x44b   : > { %v3495_v11 = vpop.f32.mrf.mxu2  ;;  %v3508_v51 = vpop.f32.mrf.mxu3 }
 0x44c   : > { %v3523_v53 = vpop.f32.mrf.mxu1  ;;  %v3496_v22 = vadd.f32 %v3495_v11, %v3483_v21 }
 0x44e   : > { %v3509_v10 = vadd.f32 %v3508_v51, %v3496_v22  ;;  %v2379_v36 = vpop.f32.mrf.mxu0 }
 0x44f   : > { %v2687_v37 = vpack.c.bf16 %v2379_v36, %v2379_v36 }
 0x450   : > { %v3522_v43 = vadd.f32 %v3521_v39, %v3509_v10  ;;  %v5415_v39 = vld [vmem:[%s5816_s16 + $0x80] sm:$0xff] }
 0x451   : > { %5177 = vmatmul.msk.bf16.gmra.mxu0 %vm1785_vm0, %v5411_v6  ;;  %2816 = vst.msk [vmem:[%s5907_s22 + $0x20] sm:$0xf] %vm2807_vm9, %v2687_v37  ;;  %v5421_v6 = vld [vmem:[%s5816_s16 + $0xb0] sm:$0xff]  ;;  %v2955_v37 = vld [vmem:[%s6082_s26 + $0x18] sm:$0xff] }
 0x453   : > { %v3497_v23 = vpop.f32.mrf.mxu2  ;;  %v3510_v42 = vpop.f32.mrf.mxu3 }
 0x454   : > { %v5417_v23 = vld [vmem:[%s5816_s16 + $0x90] sm:$0xff] }
 0x456   : > { %v2381_v7 = vpop.f32.mrf.mxu0 }
 0x457   : > { %v2688_v16 = vpack.c.bf16 %v2381_v7, %v2381_v7  ;;  %v3573_v7 = vld.sshfl [vmem:[#allocation1 + $0x20] sm:$0xff pattern:$0x73625140] }
 0x459   : > { %2817 = vst.msk [vmem:[%s5907_s22 + $0x24] sm:$0xf] %vm2807_vm9, %v2688_v16  ;;  %v3574_v16 = vld.sshfl [vmem:[#allocation1 + $0x28] sm:$0xff pattern:$0x73625140] }
 0x45b   : > { %v3534_v44 = vpop.f32.mrf.mxu2 }
 0x45c   : > { %v3535_v45 = vadd.f32 %v3534_v44, %v3522_v43 }
 0x45e   : > { %v3539_v46 = vsel %vm3538_vm10, %v3535_v45, -inf  ;;  %v2384_v18 = vpop.f32.mrf.mxu0 }
 0x45f   : > { %3540 = vmax.xlane.f32.xlu2 %v3539_v46  ;;  %v2689_v19 = vpack.c.bf16 %v2384_v18, %v2384_v18 }
 0x461   : > { %2818 = vst.msk [vmem:[%s5907_s22 + $0x28] sm:$0xf] %vm2807_vm9, %v2689_v19  ;;  %5178 = vmatmul.msk.bf16.gmra.mxu0 %vm1785_vm0, %v5412_v17 }
 0x463   : > { %v3536_v47 = vpop.f32.mrf.mxu2 }
 0x466   : > { %v2386_v20 = vpop.f32.mrf.mxu0 }
 0x467   : > { %v2690_v62 = vpack.c.bf16 %v2386_v20, %v2386_v20  ;;  %v3575_v20 = vld.sshfl [vmem:[#allocation1 + $0x30] sm:$0xff pattern:$0x73625140] }
 0x469   : > { %2819 = vst.msk [vmem:[%s5907_s22 + $0x2c] sm:$0xf] %vm2807_vm9, %v2690_v62  ;;  %v3576_v62 = vld.sshfl [vmem:[#allocation1 + $0x38] sm:$0xff pattern:$0x73625140] }
 0x46a   : > { %3580 = vst [vmem:[#allocation1 + $0x20] ss:$4 sm:$0xff] %v2955_v37 }
 0x46e   : > { %v2389_v12 = vpop.f32.mrf.mxu0 }
 0x46f   : > { %v2691_v15 = vpack.c.bf16 %v2389_v12, %v2389_v12 }
 0x471   : > { %2820 = vst.msk [vmem:[%s5907_s22 + $0x30] sm:$0xf] %vm2807_vm9, %v2691_v15  ;;  %5179 = vmatmul.msk.bf16.gmra.mxu0 %vm1785_vm0, %v5413_v9  ;;  %v3588_v57 = vld.sshfl [vmem:[#allocation1 + $0x38] sm:$0xff pattern:$0x73625140] }
 0x476   : > { %v2391_v29 = vpop.f32.mrf.mxu0 }
 0x477   : > { %v2692_v30 = vpack.c.bf16 %v2391_v29, %v2391_v29 }
 0x479   : > { %2821 = vst.msk [vmem:[%s5907_s22 + $0x34] sm:$0xf] %vm2807_vm9, %v2692_v30 }
 0x47e   : > { %v2394_v55 = vpop.f32.mrf.mxu0 }
 0x47f   : > { %v2693_v34 = vpack.c.bf16 %v2394_v55, %v2394_v55  ;;  %v5422_v55 = vld [vmem:[%s5816_s16 + $0xb8] sm:$0xff] }
 0x481   : > { %2822 = vst.msk [vmem:[%s5907_s22 + $0x38] sm:$0xf] %vm2807_vm9, %v2693_v34  ;;  %5180 = vmatmul.msk.bf16.gmra.mxu0 %vm1785_vm0, %v5414_v27 }
 0x486   : > { %v2396_v35 = vpop.f32.mrf.mxu0 }
 0x487   : > { %v2694_v38 = vpack.c.bf16 %v2396_v35, %v2396_v35 }
 0x489   : > { %2823 = vst.msk [vmem:[%s5907_s22 + $0x3c] sm:$0xf] %vm2807_vm9, %v2694_v38 }
 0x48e   : > { %v2399_v40 = vpop.f32.mrf.mxu0 }
 0x48f   : > { %v2695_v54 = vpack.c.bf16 %v2399_v40, %v2399_v40  ;;  %v3626_v40 = vsel %vm3617_vm11, %v3573_v7, 0 }
 0x491   : > { %2824 = vst.msk [vmem:[%s5907_s22 + $0x40] sm:$0xf] %vm2807_vm9, %v2695_v54  ;;  %5181 = vmatmul.msk.bf16.gmra.mxu0 %vm1785_vm0, %v5415_v39  ;;  %v3624_v39 = vsel %vm3617_vm11, %v3572_v4, 0  ;;  %v3628_v54 = vsel %vm3617_vm11, %v3574_v16, 0 }
 0x496   : > { %v2401_v11 = vpop.f32.mrf.mxu0 }
 0x497   : > { %v2696_v51 = vpack.c.bf16 %v2401_v11, %v2401_v11 }
 0x499   : > { %2825 = vst.msk [vmem:[%s5907_s22 + $0x44] sm:$0xf] %vm2807_vm9, %v2696_v51 }
 0x49e   : > { %v2404_v53 = vpop.f32.mrf.mxu0 }
 0x49f   : > { %v2697_v1 = vpack.c.bf16 %v2404_v53, %v2404_v53 }
 0x4a1   : > { %2826 = vst.msk [vmem:[%s5907_s22 + $0x48] sm:$0xf] %vm2807_vm9, %v2697_v1  ;;  %5182 = vmatmul.msk.bf16.gmra.mxu0 %vm1785_vm0, %v5416_v41  ;;  %v3581_v41 = vld.sshfl [vmem:[#allocation1] sm:$0xff pattern:$0x73625140] }
 0x4a2   : > { %v3582_v1 = vld.sshfl [vmem:[#allocation1 + $0x8] sm:$0xff pattern:$0x73625140] }
 0x4a6   : > { %v2406_v21 = vpop.f32.mrf.mxu0 }
 0x4a7   : > { %v2698_v22 = vpack.c.bf16 %v2406_v21, %v2406_v21  ;;  %v3583_v21 = vld.sshfl [vmem:[#allocation1 + $0x10] sm:$0xff pattern:$0x73625140] }
 0x4a9   : > { %2827 = vst.msk [vmem:[%s5907_s22 + $0x4c] sm:$0xf] %vm2807_vm9, %v2698_v22  ;;  %v3584_v22 = vld.sshfl [vmem:[#allocation1 + $0x18] sm:$0xff pattern:$0x73625140] }
 0x4ae   : > { %v2409_v42 = vpop.f32.mrf.mxu0 }
 0x4af   : > { %v2699_v10 = vpack.c.bf16 %v2409_v42, %v2409_v42  ;;  %v5423_v42 = vld [vmem:[%s5816_s16 + $0xc0] sm:$0xff] }
 0x4b1   : > { %2828 = vst.msk [vmem:[%s5907_s22 + $0x50] sm:$0xf] %vm2807_vm9, %v2699_v10  ;;  %5183 = vmatmul.msk.bf16.gmra.mxu0 %vm1785_vm0, %v5417_v23  ;;  %v3630_v10 = vsel %vm3617_vm11, %v3575_v20, 0 }
 0x4b6   : > { %v2411_v43 = vpop.f32.mrf.mxu0 }
 0x4b7   : > { %v2700_v44 = vpack.c.bf16 %v2411_v43, %v2411_v43  ;;  %v3632_v43 = vsel %vm3617_vm11, %v3576_v62, 0 }
 0x4b9   : > { %2829 = vst.msk [vmem:[%s5907_s22 + $0x54] sm:$0xf] %vm2807_vm9, %v2700_v44  ;;  %v3634_v44 = vsel %vm3617_vm11, %v3581_v41, 0 }
 0x4be   : > { %v2414_v46 = vpop.f32.mrf.mxu0 }
 0x4bf   : > { %v2701_v58 = vpack.c.bf16 %v2414_v46, %v2414_v46 }
 0x4c1   : > { %2830 = vst.msk [vmem:[%s5907_s22 + $0x58] sm:$0xf] %vm2807_vm9, %v2701_v58 }
 0x4c6   : > { %v2416_v47 = vpop.f32.mrf.mxu0 }
 0x4c7   : > { %v2702_v48 = vpack.c.bf16 %v2416_v47, %v2416_v47 }
 0x4c9   : > { %2831 = vst.msk [vmem:[%s5907_s22 + $0x5c] sm:$0xf] %vm2807_vm9, %v2702_v48  ;;  %v5424_v48 = vld [vmem:[%s5816_s16 + $0xc8] sm:$0xff] }
 0x4ce   : > { %v2419_v49 = vpop.f32.mrf.mxu0 }
 0x4cf   : > { %v2703_v24 = vpack.c.bf16 %v2419_v49, %v2419_v49  ;;  %v3636_v49 = vsel %vm3617_vm11, %v3582_v1, 0 }
 0x4d1   : > { %2832 = vst.msk [vmem:[%s5907_s22 + $0x60] sm:$0xf] %vm2807_vm9, %v2703_v24  ;;  %v3640_v24 = vsel %vm3617_vm11, %v3584_v22, 0 }
 0x4d2   : > { %v3541_v63 = vpop.xlane.xlu2 %3540 }
 0x4d3   : > { %v3542_v0 = vsub.f32 %v3535_v45, %v3541_v63  ;;  %v5418_v45 = vld [vmem:[%s5816_s16 + $0x98] sm:$0xff] }
 0x4d4   : > { %5184 = vmatmul.msk.bf16.gmra.mxu0 %vm1785_vm0, %v5418_v45 }
 0x4d5   : > { %v3543_v25 = vmul.f32 1.442695, %v3542_v0 }
 0x4d6   : > { %v2421_v50 = vpop.f32.mrf.mxu0 }
 0x4d7   : > { %5570 = vpow2.f32 %v3543_v25  ;;  %v2704_v56 = vpack.c.bf16 %v2421_v50, %v2421_v50  ;;  %v3638_v50 = vsel %vm3617_vm11, %v3583_v21, 0 }
 0x4d9   : > { %2833 = vst.msk [vmem:[%s5907_s22 + $0x64] sm:$0xf] %vm2807_vm9, %v2704_v56  ;;  %v3585_v56 = vld.sshfl [vmem:[#allocation1 + $0x20] sm:$0xff pattern:$0x73625140] }
 0x4da   : > { %v3642_v61 = vsel %vm3617_vm11, %v3585_v56, 0 }
 0x4dd   : > { %v6182_v31 = vpop.eup %5570 }
 0x4de   : > { %v3545_v26 = vsel %vm3538_vm10, %v6182_v31, 0.0  ;;  %v2424_v59 = vpop.f32.mrf.mxu0 }
 0x4df   : > { %3546 = vadd.xlane.f32.xlu2 %v3545_v26  ;;  %v2705_v2 = vpack.c.bf16 %v2424_v59, %v2424_v59  ;;  %v3586_v59 = vld.sshfl [vmem:[#allocation1 + $0x28] sm:$0xff pattern:$0x73625140] }
 0x4e1   : > { %2834 = vst.msk [vmem:[%s5907_s22 + $0x68] sm:$0xf] %vm2807_vm9, %v2705_v2  ;;  %v2958_v2 = vld [vmem:[%s6082_s26 + $0x30] sm:$0xff] }
 0x4e4   : > { %5185 = vmatmul.msk.bf16.gmra.mxu0 %vm1785_vm0, %v5419_v33  ;;  %v2957_v33 = vld [vmem:[%s6082_s26 + $0x28] sm:$0xff] }
 0x4e6   : > { %v2426_v3 = vpop.f32.mrf.mxu0 }
 0x4e7   : > { %v2706_v5 = vpack.c.bf16 %v2426_v3, %v2426_v3  ;;  %v3644_v3 = vsel %vm3617_vm11, %v3586_v59, 0 }
 0x4e9   : > { %2835 = vst.msk [vmem:[%s5907_s22 + $0x6c] sm:$0xf] %vm2807_vm9, %v2706_v5 }
 0x4ee   : > { %v2429_v28 = vpop.f32.mrf.mxu0 }
 0x4ef   : > { %v2707_v18 = vpack.c.bf16 %v2429_v28, %v2429_v28 }
 0x4f1   : > { %2836 = vst.msk [vmem:[%s5907_s22 + $0x70] sm:$0xf] %vm2807_vm9, %v2707_v18  ;;  %v5426_v18 = vld [vmem:[%s5816_s16 + $0xd8] sm:$0xff] }
 0x4f4   : > { %5186 = vmatmul.msk.bf16.gmra.mxu0 %vm1785_vm0, %v5420_v32  ;;  %v3587_v32 = vld.sshfl [vmem:[#allocation1 + $0x30] sm:$0xff pattern:$0x73625140] }
 0x4f5   : > { %3592 = vst [vmem:[#allocation1 + $0x20] ss:$4 sm:$0xff] %v2957_v33  ;;  %v3646_v4 = vsel %vm3617_vm11, %v3587_v32, 0 }
 0x4f6   : > { %v2431_v19 = vpop.f32.mrf.mxu0 }
 0x4f7   : > { %v2708_v12 = vpack.c.bf16 %v2431_v19, %v2431_v19  ;;  %v3648_v19 = vsel %vm3617_vm11, %v3588_v57, 0 }
 0x4f9   : > { %2837 = vst.msk [vmem:[%s5907_s22 + $0x74] sm:$0xf] %vm2807_vm9, %v2708_v12 }
 0x4fe   : > { %v2434_v26 = vpop.f32.mrf.mxu0 }
 0x4ff   : > { %v2709_v11 = vpack.c.bf16 %v2434_v26, %v2434_v26 }
 0x501   : > { %2838 = vst.msk [vmem:[%s5907_s22 + $0x78] sm:$0xf] %vm2807_vm9, %v2709_v11  ;;  %v5428_v11 = vld [vmem:[%s5816_s16 + $0xe8] sm:$0xff] }
 0x504   : > { %5187 = vmatmul.msk.bf16.gmra.mxu0 %vm1785_vm0, %v5421_v6 }
 0x506   : > { %v2436_v51 = vpop.f32.mrf.mxu0 }
 0x507   : > { %v2710_v53 = vpack.c.bf16 %v2436_v51, %v2436_v51 }
 0x509   : > { %2839 = vst.msk [vmem:[%s5907_s22 + $0x7c] sm:$0xf] %vm2807_vm9, %v2710_v53 }
 0x50e   : > { %v2439_v23 = vpop.f32.mrf.mxu0 }
 0x50f   : > { %v2711_v45 = vpack.c.bf16 %v2439_v23, %v2439_v23 }
 0x511   : > { %2840 = vst.msk [vmem:[%s5907_s22 + $0x80] sm:$0xf] %vm2807_vm9, %v2711_v45 }
 0x514   : > { %5188 = vmatmul.msk.bf16.gmra.mxu0 %vm1785_vm0, %v5422_v55 }
 0x516   : > { %v2441_v46 = vpop.f32.mrf.mxu0 }
 0x517   : > { %v2712_v58 = vpack.c.bf16 %v2441_v46, %v2441_v46 }
 0x519   : > { %2841 = vst.msk [vmem:[%s5907_s22 + $0x84] sm:$0xf] %vm2807_vm9, %v2712_v58 }
 0x51e   : > { %v2444_v47 = vpop.f32.mrf.mxu0 }
 0x51f   : > { %v2713_v60 = vpack.c.bf16 %v2444_v47, %v2444_v47 }
 0x521   : > { %2842 = vst.msk [vmem:[%s5907_s22 + $0x88] sm:$0xf] %vm2807_vm9, %v2713_v60 }
 0x524   : > { %5189 = vmatmul.msk.bf16.gmra.mxu0 %vm1785_vm0, %v5423_v42  ;;  %v5429_v42 = vld [vmem:[%s5816_s16 + $0xf0] sm:$0xff] }
 0x526   : > { %v2446_v52 = vpop.f32.mrf.mxu0 }
 0x527   : > { %v2714_v13 = vpack.c.bf16 %v2446_v52, %v2446_v52 }
 0x529   : > { %2843 = vst.msk [vmem:[%s5907_s22 + $0x8c] sm:$0xf] %vm2807_vm9, %v2714_v13 }
 0x52e   : > { %v2449_v8 = vpop.f32.mrf.mxu0 }
 0x534   : > { %5190 = vmatmul.msk.bf16.gmra.mxu0 %vm1785_vm0, %v5424_v48 }
 0x536   : > { %v2451_v6 = vpop.f32.mrf.mxu0 }
 0x537   : > { %v2716_v16 = vpack.c.bf16 %v2451_v6, %v2451_v6 }
 0x539   : > { %2845 = vst.msk [vmem:[%s5907_s22 + $0x94] sm:$0xf] %vm2807_vm9, %v2716_v16 }
 0x544   : > { %5191 = vmatmul.msk.bf16.gmra.mxu0 %vm1785_vm0, %v5425_v14 }
 0x552   : > { %v3547_v36 = vpop.xlane.xlu2 %3546 }
 0x553   : > { %5572 = vrcp.f32 %v3547_v36  ;;  %v3559_v63 = vand.u32 2147483648, %v3547_v36  ;;  %v3557_v25 = vand.u32 2147483647, %v3547_v36  ;;  %vm3553_vm13 = vweird.f32 %v3547_v36 }
 0x554   : > { %5192 = vmatmul.msk.bf16.gmra.mxu0 %vm1785_vm0, %v5426_v18 }
 0x555   : > { %v3560_v30 = vor.u32 1.1754944e-38, %v3559_v63  ;;  %vm3558_vm15 = vcmp.eq.f32.partialorder %v3557_v25, 8.507059e+37  ;;  %v3597_v63 = vld.sshfl [vmem:[#allocation1 + $0x20] sm:$0xff pattern:$0x73625140] }
 0x556   : > { %v3598_v25 = vld.sshfl [vmem:[#allocation1 + $0x28] sm:$0xff pattern:$0x73625140] }
 0x557   : > { %v3660_v51 = vsel %vm3617_vm11, %v3598_v25, 0 }
 0x559   : > { %v5573_v17 = vpop.eup %5572 }
 0x55a   : > { %v3549_v9 = vmul.f32 %v5573_v17, %v3547_v36  ;;  %vm3554_vm12 = vweird.f32 %v5573_v17  ;;  %v2715_v36 = vpack.c.bf16 %v2449_v8, %v2449_v8 }
 0x55b   : > { %vm3555_vm14 = vmor %vm3553_vm13, %vm3554_vm12 }
 0x55c   : > { %v3550_v15 = vsub.f32 1.0, %v3549_v9  ;;  %2844 = vst.msk [vmem:[%s5907_s22 + $0x90] sm:$0xf] %vm2807_vm9, %v2715_v36  ;;  %v2959_v9 = vld [vmem:[%s6082_s26 + $0x38] sm:$0xff] }
 0x55e   : > { %v3551_v0 = vmul.f32 %v5573_v17, %v3550_v15 }
 0x560   : > { %v3552_v29 = vadd.f32 %v5573_v17, %v3551_v0 }
 0x562   : > { %v3556_v27 = vsel %vm3555_vm14, %v5573_v17, %v3552_v29  ;;  %v2454_v17 = vpop.f32.mrf.mxu0  ;;  %v3599_v29 = vld.sshfl [vmem:[#allocation1 + $0x30] sm:$0xff pattern:$0x73625140] }
 0x563   : > { %v3561_v34 = vsel %vm3558_vm15, %v3560_v30, %v3556_v27  ;;  %v2717_v12 = vpack.c.bf16 %v2454_v17, %v2454_v17  ;;  %v3600_v30 = vld.sshfl [vmem:[#allocation1 + $0x38] sm:$0xff pattern:$0x73625140]  ;;  %v5427_v27 = vld [vmem:[%s5816_s16 + $0xe0] sm:$0xff]  ;;  %v3662_v41 = vsel %vm3617_vm11, %v3599_v29, 0 }
 0x564   : > { %v3562_v35 = vmul.f32 %v6182_v31, %v3561_v34  ;;  %v2956_v31 = vld [vmem:[%s6082_s26 + $0x20] sm:$0xff]  ;;  %3604 = vst [vmem:[#allocation1 + $0x20] ss:$4 sm:$0xff] %v2959_v9  ;;  %5193 = vmatmul.msk.bf16.gmra.mxu0 %vm1785_vm0, %v5427_v27  ;;  %v3664_v53 = vsel %vm3617_vm11, %v3600_v30, 0 }
 0x565   : > { %3590 = vst [vmem:[#allocation1] ss:$4 sm:$0xff] %v2956_v31 }
 0x566   : > { %v6242_v38 = vpack.c.bf16 %v3562_v35, %v3562_v35  ;;  %2846 = vst.msk [vmem:[%s5907_s22 + $0x98] sm:$0xf] %vm2807_vm9, %v2717_v12  ;;  %v3658_v35 = vsel %vm3617_vm11, %v3597_v63, 0 }
 0x568   : > { %5229 = vmatmul.msk.bf16.vlgmr.msra.gmra.mxu3 %vm3613_vm1, %v6242_v38  ;;  %5230 = vmatmul.msk.bf16.vlgmr.msra.gmra.mxu1 %vm3613_vm1, %v6242_v38 }
 0x569   : > { %5231 = vmatmul.msk.bf16.vlgmr.msra.gmra.mxu2 %vm3613_vm1, %v6242_v38  ;;  %3728 = vmatpush.bf16.msra.mxu3 %v3624_v39 }
 0x56a   : > { %3741 = vmatpush.bf16.msra.mxu1 %v3626_v40  ;;  %3754 = vmatpush.bf16.msra.mxu2 %v3628_v54  ;;  %v2456_v15 = vpop.f32.mrf.mxu0 }
 0x56b   : > { %v2718_v0 = vpack.c.bf16 %v2456_v15, %v2456_v15  ;;  %v3609_v56 = vld.sshfl [vmem:[#allocation1 + $0x20] sm:$0xff pattern:$0x73625140]  ;;  %v3610_v59 = vld.sshfl [vmem:[#allocation1 + $0x28] sm:$0xff pattern:$0x73625140] }
 0x56c   : > { %v3593_v5 = vld.sshfl [vmem:[#allocation1] sm:$0xff pattern:$0x73625140]  ;;  %v3594_v28 = vld.sshfl [vmem:[#allocation1 + $0x8] sm:$0xff pattern:$0x73625140] }
 0x56d   : > { %v3595_v37 = vld.sshfl [vmem:[#allocation1 + $0x10] sm:$0xff pattern:$0x73625140]  ;;  %v3596_v7 = vld.sshfl [vmem:[#allocation1 + $0x18] sm:$0xff pattern:$0x73625140] }
 0x56e   : > { %3602 = vst [vmem:[#allocation1] ss:$4 sm:$0xff] %v2958_v2  ;;  %v3650_v20 = vsel %vm3617_vm11, %v3593_v5, 0  ;;  %v3652_v62 = vsel %vm3617_vm11, %v3594_v28, 0  ;;  %v3654_v55 = vsel %vm3617_vm11, %v3595_v37, 0  ;;  %v3656_v34 = vsel %vm3617_vm11, %v3596_v7, 0 }
 0x56f   : > { %2847 = vst.msk [vmem:[%s5907_s22 + $0x9c] sm:$0xf] %vm2807_vm9, %v2718_v0  ;;  %v3674_v52 = vsel %vm3617_vm11, %v3609_v56, 0  ;;  %v3676_v57 = vsel %vm3617_vm11, %v3610_v59, 0 }
 0x570   : > { %v3611_v28 = vld.sshfl [vmem:[#allocation1 + $0x30] sm:$0xff pattern:$0x73625140]  ;;  %v3612_v6 = vld.sshfl [vmem:[#allocation1 + $0x38] sm:$0xff pattern:$0x73625140] }
 0x571   : > { %v3678_v16 = vsel %vm3617_vm11, %v3611_v28, 0  ;;  %v3680_v17 = vsel %vm3617_vm11, %v3612_v6, 0 }
 0x572   : > { %v2459_v26 = vpop.f32.mrf.mxu0 }
 0x573   : > { %v2719_v39 = vpack.c.bf16 %v2459_v26, %v2459_v26 }
 0x574   : > { %5194 = vmatmul.msk.bf16.gmra.mxu0 %vm1785_vm0, %v5428_v11 }
 0x575   : > { %2848 = vst.msk [vmem:[%s5907_s22 + $0xa0] sm:$0xf] %vm2807_vm9, %v2719_v39 }
 0x578   : > { %5232 = vmatmul.msk.bf16.vlgmr.msra.gmra.mxu3 %vm3613_vm1, %v6242_v38  ;;  %5233 = vmatmul.msk.bf16.vlgmr.msra.gmra.mxu1 %vm3613_vm1, %v6242_v38 }
 0x579   : > { %5234 = vmatmul.msk.bf16.vlgmr.msra.gmra.mxu2 %vm3613_vm1, %v6242_v38  ;;  %3767 = vmatpush.bf16.msra.mxu3 %v3630_v10  ;;  %v3605_v10 = vld.sshfl [vmem:[#allocation1] sm:$0xff pattern:$0x73625140] }
 0x57a   : > { %3780 = vmatpush.bf16.msra.mxu1 %v3632_v43  ;;  %3793 = vmatpush.bf16.msra.mxu2 %v3634_v44  ;;  %v2461_v40 = vpop.f32.mrf.mxu0  ;;  %v3606_v43 = vld.sshfl [vmem:[#allocation1 + $0x8] sm:$0xff pattern:$0x73625140]  ;;  %v3607_v44 = vld.sshfl [vmem:[#allocation1 + $0x10] sm:$0xff pattern:$0x73625140] }
 0x57b   : > { %v2720_v54 = vpack.c.bf16 %v2461_v40, %v2461_v40  ;;  %v3666_v45 = vsel %vm3617_vm11, %v3605_v10, 0  ;;  %v3668_v46 = vsel %vm3617_vm11, %v3606_v43, 0  ;;  %v3670_v58 = vsel %vm3617_vm11, %v3607_v44, 0 }
 0x57d   : > { %2849 = vst.msk [vmem:[%s5907_s22 + $0xa4] sm:$0xf] %vm2807_vm9, %v2720_v54 }
 0x582   : > { %v2464_v31 = vpop.f32.mrf.mxu0 }
 0x583   : > { %v2721_v1 = vpack.c.bf16 %v2464_v31, %v2464_v31 }
 0x584   : > { %5195 = vmatmul.msk.bf16.gmra.mxu0 %vm1785_vm0, %v5429_v42 }
 0x585   : > { %2850 = vst.msk [vmem:[%s5907_s22 + $0xa8] sm:$0xf] %vm2807_vm9, %v2721_v1 }
 0x588   : > { %5235 = vmatmul.msk.bf16.vlgmr.msra.gmra.mxu3 %vm3613_vm1, %v6242_v38  ;;  %5236 = vmatmul.msk.bf16.vlgmr.msra.gmra.mxu1 %vm3613_vm1, %v6242_v38 }
 0x589   : > { %5237 = vmatmul.msk.bf16.vlgmr.msra.gmra.mxu2 %vm3613_vm1, %v6242_v38  ;;  %3806 = vmatpush.bf16.msra.mxu3 %v3636_v49 }
 0x58a   : > { %3819 = vmatpush.bf16.msra.mxu1 %v3638_v50  ;;  %3832 = vmatpush.bf16.msra.mxu2 %v3640_v24  ;;  %v2466_v21 = vpop.f32.mrf.mxu0  ;;  %v5430_v50 = vld [vmem:[%s5816_s16 + $0xf8] sm:$0xff] }
 0x58b   : > { %v2722_v22 = vpack.c.bf16 %v2466_v21, %v2466_v21  ;;  %v3608_v24 = vld.sshfl [vmem:[#allocation1 + $0x18] sm:$0xff pattern:$0x73625140] }
 0x58c   : > { %v3672_v60 = vsel %vm3617_vm11, %v3608_v24, 0 }
 0x58d   : > { %2851 = vst.msk [vmem:[%s5907_s22 + $0xac] sm:$0xf] %vm2807_vm9, %v2722_v22 }
 0x592   : > { %v2469_v23 = vpop.f32.mrf.mxu0 }
 0x593   : > { %v2723_v47 = vpack.c.bf16 %v2469_v23, %v2469_v23 }
 0x594   : > { %5196 = vmatmul.msk.bf16.gmra.mxu0 %vm1785_vm0, %v5430_v50  ;;  %vm4157_vm0 = vcmask 1045508  }
 0x595   : > { %2852 = vst.msk [vmem:[%s5907_s22 + $0xb0] sm:$0xf] %vm2807_vm9, %v2723_v47 }
 0x598   : > { %5238 = vmatmul.msk.bf16.vlgmr.msra.gmra.mxu3 %vm3613_vm1, %v6242_v38  ;;  %5239 = vmatmul.msk.bf16.vlgmr.msra.gmra.mxu1 %vm3613_vm1, %v6242_v38 }
 0x599   : > { %5240 = vmatmul.msk.bf16.vlgmr.msra.gmra.mxu2 %vm3613_vm1, %v6242_v38  ;;  %3845 = vmatpush.bf16.msra.mxu3 %v3642_v61 }
 0x59a   : > { %3858 = vmatpush.bf16.msra.mxu1 %v3644_v3  ;;  %3871 = vmatpush.bf16.msra.mxu2 %v3646_v4  ;;  %v2471_v48 = vpop.f32.mrf.mxu0 }
 0x59b   : > { %v2724_v49 = vpack.c.bf16 %v2471_v48, %v2471_v48 }
 0x59d   : > { %2853 = vst.msk [vmem:[%s5907_s22 + $0xb4] sm:$0xf] %vm2807_vm9, %v2724_v49 }
 0x5a2   : > { %v2474_v33 = vpop.f32.mrf.mxu0 }
 0x5a3   : > { %v2725_v13 = vpack.c.bf16 %v2474_v33, %v2474_v33 }
 0x5a5   : > { %2854 = vst.msk [vmem:[%s5907_s22 + $0xb8] sm:$0xf] %vm2807_vm9, %v2725_v13 }
 0x5a8   : > { %5241 = vmatmul.msk.bf16.vlgmr.msra.gmra.mxu3 %vm3613_vm1, %v6242_v38  ;;  %5242 = vmatmul.msk.bf16.vlgmr.msra.gmra.mxu1 %vm3613_vm1, %v6242_v38 }
 0x5a9   : > { %5243 = vmatmul.msk.bf16.vlgmr.msra.gmra.mxu2 %vm3613_vm1, %v6242_v38  ;;  %3884 = vmatpush.bf16.msra.mxu3 %v3648_v19 }
 0x5aa   : > { %3897 = vmatpush.bf16.msra.mxu1 %v3650_v20  ;;  %3910 = vmatpush.bf16.msra.mxu2 %v3652_v62  ;;  %v2476_v8 = vpop.f32.mrf.mxu0 }
 0x5ab   : > { %v2726_v14 = vpack.c.bf16 %v2476_v8, %v2476_v8 }
 0x5ad   : > { %2855 = vst.msk [vmem:[%s5907_s22 + $0xbc] sm:$0xf] %vm2807_vm9, %v2726_v14 }
 0x5b2   : > { %v2479_v4 = vpop.f32.mrf.mxu0 }
 0x5b3   : > { %v2727_v7 = vpack.c.bf16 %v2479_v4, %v2479_v4 }
 0x5b5   : > { %2856 = vst.msk [vmem:[%s5907_s22 + $0xc0] sm:$0xf] %vm2807_vm9, %v2727_v7 }
 0x5b8   : > { %5244 = vmatmul.msk.bf16.vlgmr.msra.gmra.mxu3 %vm3613_vm1, %v6242_v38  ;;  %5245 = vmatmul.msk.bf16.vlgmr.msra.gmra.mxu1 %vm3613_vm1, %v6242_v38 }
 0x5b9   : > { %5246 = vmatmul.msk.bf16.vlgmr.msra.gmra.mxu2 %vm3613_vm1, %v6242_v38  ;;  %3923 = vmatpush.bf16.msra.mxu3 %v3654_v55 }
 0x5ba   : > { %3936 = vmatpush.bf16.msra.mxu1 %v3656_v34  ;;  %3949 = vmatpush.bf16.msra.mxu2 %v3658_v35  ;;  %v2481_v19 = vpop.f32.mrf.mxu0 }
 0x5bb   : > { %v2728_v20 = vpack.c.bf16 %v2481_v19, %v2481_v19 }
 0x5bd   : > { %2857 = vst.msk [vmem:[%s5907_s22 + $0xc4] sm:$0xf] %vm2807_vm9, %v2728_v20 }
 0x5c2   : > { %v2484_v27 = vpop.f32.mrf.mxu0 }
 0x5c3   : > { %v2729_v39 = vpack.c.bf16 %v2484_v27, %v2484_v27 }
 0x5c5   : > { %2858 = vst.msk [vmem:[%s5907_s22 + $0xc8] sm:$0xf] %vm2807_vm9, %v2729_v39 }
 0x5c8   : > { %5247 = vmatmul.msk.bf16.vlgmr.msra.gmra.mxu3 %vm3613_vm1, %v6242_v38  ;;  %5248 = vmatmul.msk.bf16.vlgmr.msra.gmra.mxu1 %vm3613_vm1, %v6242_v38 }
 0x5c9   : > { %5249 = vmatmul.msk.bf16.vlgmr.msra.gmra.mxu2 %vm3613_vm1, %v6242_v38  ;;  %3962 = vmatpush.bf16.msra.mxu3 %v3660_v51 }
 0x5ca   : > { %3975 = vmatpush.bf16.msra.mxu1 %v3662_v41  ;;  %3988 = vmatpush.bf16.msra.mxu2 %v3664_v53  ;;  %v2486_v54 = vpop.f32.mrf.mxu0 }
 0x5cb   : > { %v2730_v31 = vpack.c.bf16 %v2486_v54, %v2486_v54 }
 0x5cd   : > { %2859 = vst.msk [vmem:[%s5907_s22 + $0xcc] sm:$0xf] %vm2807_vm9, %v2730_v31 }
 0x5d8   : > { %5250 = vmatmul.msk.bf16.vlgmr.msra.gmra.mxu3 %vm3613_vm1, %v6242_v38  ;;  %5251 = vmatmul.msk.bf16.vlgmr.msra.gmra.mxu1 %vm3613_vm1, %v6242_v38 }
 0x5d9   : > { %5252 = vmatmul.msk.bf16.vlgmr.msra.gmra.mxu2 %vm3613_vm1, %v6242_v38  ;;  %4001 = vmatpush.bf16.msra.mxu3 %v3666_v45 }
 0x5da   : > { %4014 = vmatpush.bf16.msra.mxu1 %v3668_v46  ;;  %4027 = vmatpush.bf16.msra.mxu2 %v3670_v58 }
 0x5e5   : > { %v3704_v32 = vpop.f32.mrf.mxu1 }
 0x5e8   : > { %5253 = vmatmul.msk.bf16.vlgmr.msra.gmra.mxu3 %vm3613_vm1, %v6242_v38  ;;  %5254 = vmatmul.msk.bf16.vlgmr.msra.gmra.mxu1 %vm3613_vm1, %v6242_v38 }
 0x5e9   : > { %5255 = vmatmul.msk.bf16.vlgmr.msra.gmra.mxu2 %vm3613_vm1, %v6242_v38  ;;  %4040 = vmatpush.bf16.msra.mxu3 %v3672_v60 }
 0x5ea   : > { %4053 = vmatpush.bf16.msra.mxu1 %v3674_v52  ;;  %4066 = vmatpush.bf16.msra.mxu2 %v3676_v57 }
 0x5eb   : > { %v3691_v61 = vpop.f32.mrf.mxu3 }
 0x5ec   : > { %v3717_v2 = vpop.f32.mrf.mxu2  ;;  %v4098_v18 = vpack.c.bf16 %v3704_v32, %v3691_v61 }
 0x5ed   : > { %v3706_v3 = vpop.f32.mrf.mxu1 }
 0x5ee   : > { %v4130_v9 = vrot.slane %v4098_v18, 2 }
 0x5f0   : > { %v4156_v29 = vsel %vm3617_vm11, %v4098_v18, %v4130_v9 }
 0x5f3   : > { %v3693_v5 = vpop.f32.mrf.mxu3 }
 0x5f4   : > { %v3719_v36 = vpop.f32.mrf.mxu2 }
 0x5f5   : > { %v3743_v37 = vpop.f32.mrf.mxu1 }
 0x5f8   : > { %5256 = vmatmul.msk.bf16.vlgmr.msra.gmra.mxu3 %vm3613_vm1, %v6242_v38  ;;  %5257 = vmatmul.msk.bf16.vlgmr.msra.gmra.mxu1 %vm3613_vm1, %v6242_v38 }
 0x5f9   : > { %5258 = vmatmul.msk.bf16.vlgmr.msra.gmra.mxu2 %vm3613_vm1, %v6242_v38  ;;  %4079 = vmatpush.bf16.msra.mxu3 %v3678_v16 }
 0x5fa   : > { %4092 = vmatpush.bf16.msra.mxu1 %v3680_v17 }
 0x5fb   : > { %v3730_v62 = vpop.f32.mrf.mxu3 }
 0x5fc   : > { %v4099_v12 = vpack.c.bf16 %v3730_v62, %v3717_v2  ;;  %v3756_v15 = vpop.f32.mrf.mxu2 }
 0x5fd   : > { %v3745_v63 = vpop.f32.mrf.mxu1  ;;  %v4100_v40 = vpack.c.bf16 %v3756_v15, %v3743_v37 }
 0x5fe   : > { %v4131_v0 = vrot.slane %v4099_v12, 4  ;;  %v4132_v25 = vrot.slane %v4099_v12, 6 }
 0x5ff   : > { %v4133_v51 = vrot.slane %v4100_v40, 2 }
 0x600   : > { %v4160_v30 = vsel %vm4157_vm0, %v4131_v0, %v4132_v25 }
 0x601   : > { %v4162_v26 = vsel %vm4161_vm2, %v4156_v29, %v4160_v30  ;;  %v4165_v23 = vsel %vm3617_vm11, %v4100_v40, %v4133_v51 }
 0x602   : > { %4220 = vst [vmem:[%s6397_s29] sm:$0xff] %v4162_v26 }
 0x603   : > { %v3732_v55 = vpop.f32.mrf.mxu3 }
 0x604   : > { %v3758_v34 = vpop.f32.mrf.mxu2 }
 0x605   : > { %v3782_v35 = vpop.f32.mrf.mxu1 }
 0x608   : > { %5259 = vmatmul.msk.bf16.vlgmr.msra.gmra.mxu3 %vm3613_vm1, %v6242_v38  ;;  %5260 = vmatmul.msk.bf16.vlgmr.msra.gmra.mxu1 %vm3613_vm1, %v6242_v38  ;;  %v2489_v38 = vpop.f32.mrf.mxu0 }
 0x609   : > { %v2731_v46 = vpack.c.bf16 %v2489_v38, %v2489_v38 }
 0x60b   : > { %v3769_v11 = vpop.f32.mrf.mxu3  ;;  %2860 = vst.msk [vmem:[%s5907_s22 + $0xd0] sm:$0xf] %vm2807_vm9, %v2731_v46 }
 0x60c   : > { %v4101_v41 = vpack.c.bf16 %v3782_v35, %v3769_v11  ;;  %v3795_v53 = vpop.f32.mrf.mxu2 }
 0x60d   : > { %v3784_v1 = vpop.f32.mrf.mxu1 }
 0x60e   : > { %v4134_v21 = vrot.slane %v4101_v41, 4  ;;  %v4135_v22 = vrot.slane %v4101_v41, 6 }
 0x610   : > { %v4168_v42 = vsel %vm4157_vm0, %v4134_v21, %v4135_v22  ;;  %v2491_v58 = vpop.f32.mrf.mxu0 }
 0x611   : > { %v4169_v10 = vsel %vm4161_vm2, %v4165_v23, %v4168_v42  ;;  %v2732_v47 = vpack.c.bf16 %v2491_v58, %v2491_v58 }
 0x612   : > { %4221 = vst [vmem:[%s6397_s29 + $0x8] sm:$0xff] %v4169_v10 }
 0x613   : > { %v3771_v43 = vpop.f32.mrf.mxu3  ;;  %2861 = vst.msk [vmem:[%s5907_s22 + $0xd4] sm:$0xf] %vm2807_vm9, %v2732_v47 }
 0x614   : > { %v3797_v44 = vpop.f32.mrf.mxu2 }
 0x615   : > { %v3821_v45 = vpop.f32.mrf.mxu1 }
 0x618   : > { %v2494_v57 = vpop.f32.mrf.mxu0 }
 0x619   : > { %v2733_v2 = vpack.c.bf16 %v2494_v57, %v2494_v57 }
 0x61b   : > { %v3808_v48 = vpop.f32.mrf.mxu3  ;;  %2862 = vst.msk [vmem:[%s5907_s22 + $0xd8] sm:$0xf] %vm2807_vm9, %v2733_v2 }
 0x61c   : > { %v4102_v49 = vpack.c.bf16 %v3808_v48, %v3795_v53  ;;  %v3834_v33 = vpop.f32.mrf.mxu2 }
 0x61d   : > { %v4103_v50 = vpack.c.bf16 %v3834_v33, %v3821_v45  ;;  %v3823_v24 = vpop.f32.mrf.mxu1 }
 0x61e   : > { %v4136_v56 = vrot.slane %v4102_v49, 2 }
 0x61f   : > { %v4137_v59 = vrot.slane %v4103_v50, 4  ;;  %v4138_v32 = vrot.slane %v4103_v50, 6 }
 0x620   : > { %v4172_v60 = vsel %vm3617_vm11, %v4102_v49, %v4136_v56  ;;  %v2496_v3 = vpop.f32.mrf.mxu0 }
 0x621   : > { %v4175_v52 = vsel %vm4157_vm0, %v4137_v59, %v4138_v32  ;;  %v2734_v4 = vpack.c.bf16 %v2496_v3, %v2496_v3 }
 0x622   : > { %v4176_v13 = vsel %vm4161_vm2, %v4172_v60, %v4175_v52 }
 0x623   : > { %4222 = vst [vmem:[%s6397_s29 + $0x10] sm:$0xff] %v4176_v13  ;;  %v3810_v8 = vpop.f32.mrf.mxu3 }
 0x624   : > { %v3836_v14 = vpop.f32.mrf.mxu2  ;;  %2863 = vst.msk [vmem:[%s5907_s22 + $0xdc] sm:$0xf] %vm2807_vm9, %v2734_v4 }
 0x625   : > { %v3860_v61 = vpop.f32.mrf.mxu1 }
 0x628   : > { %v2499_v6 = vpop.f32.mrf.mxu0 }
 0x629   : > { %v2735_v17 = vpack.c.bf16 %v2499_v6, %v2499_v6 }
 0x62b   : > { %v3847_v5 = vpop.f32.mrf.mxu3  ;;  %2864 = vst.msk [vmem:[%s5907_s22 + $0xe0] sm:$0xf] %vm2807_vm9, %v2735_v17 }
 0x62c   : > { %v3873_v28 = vpop.f32.mrf.mxu2  ;;  %v4104_v18 = vpack.c.bf16 %v3860_v61, %v3847_v5 }
 0x62d   : > { %v3862_v36 = vpop.f32.mrf.mxu1 }
 0x62e   : > { %v4139_v9 = vrot.slane %v4104_v18, 2 }
 0x630   : > { %v2501_v19 = vpop.f32.mrf.mxu0  ;;  %v4179_v29 = vsel %vm3617_vm11, %v4104_v18, %v4139_v9 }
 0x631   : > { %v2736_v20 = vpack.c.bf16 %v2501_v19, %v2501_v19 }
 0x633   : > { %v3849_v37 = vpop.f32.mrf.mxu3  ;;  %2865 = vst.msk [vmem:[%s5907_s22 + $0xe4] sm:$0xf] %vm2807_vm9, %v2736_v20 }
 0x634   : > { %v3875_v7 = vpop.f32.mrf.mxu2 }
 0x635   : > { %v3899_v16 = vpop.f32.mrf.mxu1 }
 0x638   : > { %v2504_v27 = vpop.f32.mrf.mxu0 }
 0x639   : > { %v2737_v39 = vpack.c.bf16 %v2504_v27, %v2504_v27 }
 0x63b   : > { %v3886_v62 = vpop.f32.mrf.mxu3  ;;  %2866 = vst.msk [vmem:[%s5907_s22 + $0xe8] sm:$0xf] %vm2807_vm9, %v2737_v39 }
 0x63c   : > { %v4105_v12 = vpack.c.bf16 %v3886_v62, %v3873_v28  ;;  %v3912_v15 = vpop.f32.mrf.mxu2 }
 0x63d   : > { %v3901_v63 = vpop.f32.mrf.mxu1  ;;  %v4106_v40 = vpack.c.bf16 %v3912_v15, %v3899_v16 }
 0x63e   : > { %v4140_v0 = vrot.slane %v4105_v12, 4  ;;  %v4141_v25 = vrot.slane %v4105_v12, 6 }
 0x63f   : > { %v4142_v51 = vrot.slane %v4106_v40, 2 }
 0x640   : > { %v4182_v30 = vsel %vm4157_vm0, %v4140_v0, %v4141_v25  ;;  %v2506_v54 = vpop.f32.mrf.mxu0 }
 0x641   : > { %v4183_v26 = vsel %vm4161_vm2, %v4179_v29, %v4182_v30  ;;  %v2738_v31 = vpack.c.bf16 %v2506_v54, %v2506_v54  ;;  %v4186_v23 = vsel %vm3617_vm11, %v4106_v40, %v4142_v51 }
 0x642   : > { %4223 = vst [vmem:[%s6397_s29 + $0x18] sm:$0xff] %v4183_v26 }
 0x643   : > { %v3888_v55 = vpop.f32.mrf.mxu3  ;;  %2867 = vst.msk [vmem:[%s5907_s22 + $0xec] sm:$0xf] %vm2807_vm9, %v2738_v31 }
 0x644   : > { %v3914_v34 = vpop.f32.mrf.mxu2 }
 0x645   : > { %v3938_v35 = vpop.f32.mrf.mxu1 }
 0x648   : > { %v2509_v38 = vpop.f32.mrf.mxu0 }
 0x649   : > { %v2739_v46 = vpack.c.bf16 %v2509_v38, %v2509_v38 }
 0x64b   : > { %v3925_v11 = vpop.f32.mrf.mxu3  ;;  %2868 = vst.msk [vmem:[%s5907_s22 + $0xf0] sm:$0xf] %vm2807_vm9, %v2739_v46 }
 0x64c   : > { %v4107_v41 = vpack.c.bf16 %v3938_v35, %v3925_v11  ;;  %v3951_v53 = vpop.f32.mrf.mxu2 }
 0x64d   : > { %v3940_v1 = vpop.f32.mrf.mxu1 }
 0x64e   : > { %v4143_v21 = vrot.slane %v4107_v41, 4  ;;  %v4144_v22 = vrot.slane %v4107_v41, 6 }
 0x650   : > { %v4189_v42 = vsel %vm4157_vm0, %v4143_v21, %v4144_v22  ;;  %v2511_v58 = vpop.f32.mrf.mxu0 }
 0x651   : > { %v4190_v10 = vsel %vm4161_vm2, %v4186_v23, %v4189_v42  ;;  %v2740_v47 = vpack.c.bf16 %v2511_v58, %v2511_v58 }
 0x652   : > { %4224 = vst [vmem:[%s6397_s29 + $0x20] sm:$0xff] %v4190_v10 }
 0x653   : > { %v3927_v43 = vpop.f32.mrf.mxu3  ;;  %2869 = vst.msk [vmem:[%s5907_s22 + $0xf4] sm:$0xf] %vm2807_vm9, %v2740_v47 }
 0x654   : > { %v3953_v44 = vpop.f32.mrf.mxu2 }
 0x655   : > { %v3977_v45 = vpop.f32.mrf.mxu1 }
 0x658   : > { %v2514_v57 = vpop.f32.mrf.mxu0 }
 0x659   : > { %v2741_v2 = vpack.c.bf16 %v2514_v57, %v2514_v57 }
 0x65b   : > { %v3964_v48 = vpop.f32.mrf.mxu3  ;;  %2870 = vst.msk [vmem:[%s5907_s22 + $0xf8] sm:$0xf] %vm2807_vm9, %v2741_v2 }
 0x65c   : > { %v4108_v49 = vpack.c.bf16 %v3964_v48, %v3951_v53  ;;  %v3990_v33 = vpop.f32.mrf.mxu2 }
 0x65d   : > { %v4109_v50 = vpack.c.bf16 %v3990_v33, %v3977_v45  ;;  %v3979_v24 = vpop.f32.mrf.mxu1 }
 0x65e   : > { %v4145_v56 = vrot.slane %v4108_v49, 2 }
 0x65f   : > { %v4146_v59 = vrot.slane %v4109_v50, 4  ;;  %v4147_v32 = vrot.slane %v4109_v50, 6 }
 0x660   : > { %v4193_v60 = vsel %vm3617_vm11, %v4108_v49, %v4145_v56  ;;  %v2516_v3 = vpop.f32.mrf.mxu0 }
 0x661   : > { %v4196_v52 = vsel %vm4157_vm0, %v4146_v59, %v4147_v32  ;;  %v2742_v4 = vpack.c.bf16 %v2516_v3, %v2516_v3 }
 0x662   : > { %v4197_v13 = vsel %vm4161_vm2, %v4193_v60, %v4196_v52 }
 0x663   : > { %4225 = vst [vmem:[%s6397_s29 + $0x28] sm:$0xff] %v4197_v13  ;;  %v3966_v8 = vpop.f32.mrf.mxu3 }
 0x664   : > { %v3992_v14 = vpop.f32.mrf.mxu2  ;;  %2871 = vst.msk [vmem:[%s5907_s22 + $0xfc] sm:$0xf] %vm2807_vm9, %v2742_v4 }
 0x665   : > { %v4016_v61 = vpop.f32.mrf.mxu1 }
 0x66b   : > { %v4003_v5 = vpop.f32.mrf.mxu3 }
 0x66c   : > { %v4029_v28 = vpop.f32.mrf.mxu2  ;;  %v4110_v16 = vpack.c.bf16 %v4016_v61, %v4003_v5 }
 0x66d   : > { %v4018_v36 = vpop.f32.mrf.mxu1 }
 0x66e   : > { %v4148_v18 = vrot.slane %v4110_v16, 2 }
 0x670   : > { %v4200_v15 = vsel %vm3617_vm11, %v4110_v16, %v4148_v18 }
 0x673   : > { %v4005_v6 = vpop.f32.mrf.mxu3 }
 0x674   : > { %v4031_v37 = vpop.f32.mrf.mxu2 }
 0x675   : > { %v4055_v7 = vpop.f32.mrf.mxu1 }
 0x67b   : > { %v4042_v17 = vpop.f32.mrf.mxu3 }
 0x67c   : > { %v4111_v19 = vpack.c.bf16 %v4042_v17, %v4029_v28  ;;  %v4068_v20 = vpop.f32.mrf.mxu2 }
 0x67d   : > { %v4057_v62 = vpop.f32.mrf.mxu1  ;;  %v4112_v26 = vpack.c.bf16 %v4068_v20, %v4055_v7 }
 0x67e   : > { %v4149_v9 = vrot.slane %v4111_v19, 4  ;;  %v4150_v12 = vrot.slane %v4111_v19, 6 }
 0x67f   : > { %v4151_v55 = vrot.slane %v4112_v26, 2 }
 0x680   : > { %v4203_v63 = vsel %vm4157_vm0, %v4149_v9, %v4150_v12 }
 0x681   : > { %v4204_v0 = vsel %vm4161_vm2, %v4200_v15, %v4203_v63  ;;  %v4207_v54 = vsel %vm3617_vm11, %v4112_v26, %v4151_v55 }
 0x682   : > { %4226 = vst [vmem:[%s6397_s29 + $0x30] sm:$0xff] %v4204_v0 }
 0x683   : > { %v4044_v25 = vpop.f32.mrf.mxu3 }
 0x684   : > { %v4070_v29 = vpop.f32.mrf.mxu2 }
 0x685   : > { %v4094_v30 = vpop.f32.mrf.mxu1 }
 0x68b   : > { %v4081_v27 = vpop.f32.mrf.mxu3 }
 0x68c   : > { %v4113_v34 = vpack.c.bf16 %v4094_v30, %v4081_v27 }
 0x68d   : > { %v4096_v35 = vpop.f32.mrf.mxu1 }
 0x68e   : > { %v4152_v39 = vrot.slane %v4113_v34, 4  ;;  %v4153_v40 = vrot.slane %v4113_v34, 6 }
 0x690   : > { %v4210_v31 = vsel %vm4157_vm0, %v4152_v39, %v4153_v40 }
 0x691   : > { %v4211_v11 = vsel %vm4161_vm2, %v4207_v54, %v4210_v31 }
 0x692   : > { %4227 = vst [vmem:[%s6397_s29 + $0x38] sm:$0xff] %v4211_v11 }
 0x693   : > { %v4083_v51 = vpop.f32.mrf.mxu3 }
 0x694 PF: > { %s18_s24 = sadd.s32 1, %s5580_s24  }
 0x695   : > { %p15_p4 = scmp.ge.s32.totalorder %s18_s24, 4  }
 0x697   :  { %17 = sbr.rel (!%p15_p4) target bundleno = 1 (0x1), region = 104 }

// kernel: separate_non_local_forward.5
= control target key start
LH: loop header
LB: loop body
LE: loop exit
PB: predicated region body
PF: predicated region fallthrough
CT: control target
= control target key end

     0   :  { %s1857_s12 = smov 0   ;;  %s1859_s13 = smov 0   ;;  %s2353_s0 = inlined_call_operand.vmem [shape: bf16[2,256,64], index: 0, kind: input, shape index: {}]   ;;  %s2354_s1 = inlined_call_operand.vmem [shape: bf16[2,256,64], index: 1, kind: input, shape index: {}]   ;;  %s2355_s2 = inlined_call_operand.vmem [shape: bf16[2,256,64], index: 2, kind: input, shape index: {}]   ;;  %s2356_s3 = inlined_call_operand.vmem [shape: bf16[2,256,64], index: 3, kind: output, shape index: {}]  }
   0x1   :  { %s1861_s14 = smov 0   ;;  %s1863_s15 = smov 0  }
   0x2   :  { %s1865_s16 = smov 0  }
   0x3 LB: > { %s22_s17 = sadd.s32 1, %s1827_s14  ;;  %s25_s18 = sadd.s32 1, %s1831_s15  ;;  %s1835_s16 = sphi %s1865_s16, %s13_s16   ;;  %s1831_s15 = sphi %s1863_s15, %s2368_s15   ;;  %s1827_s14 = sphi %s1861_s14, %s2367_s14   ;;  %s1823_s13 = sphi %s1859_s13, %s2366_s13   ;;  %s1819_s12 = sphi %s1857_s12, %s2365_s12  }
   0x4   : > { %p23_p0 = scmp.ge.s32.totalorder %s22_s17, 2  ;;  %p1430_p1 = scmp.ge.s32.totalorder %s1835_s16, 1 }
   0x5   : > { %p178_p2 = scmp.lt.s32.totalorder %s1835_s16, 5 }
   0x6   : > { %s2370_s17 = smov (%p23_p0, %s22_s17), 0  ;;  %s2372_s18 = smov (!%p23_p0, %s25_s18), %s1831_s15 }
   0x7   : > { %p179_p3 = pnand %p1430_p1, %p178_p2  ;;  %p27_p4 = scmp.ge.s32.totalorder %s2372_s18, 2 }
   0x8   : > { %p221_p5 = scmp.lt.s32.totalorder (!%p179_p3), %s1823_s13, 1  ;;  %s1431_s23 = sshll.u32 (!%p179_p3), %s1819_s12, 4 }
   0x9   : > { %s2374_s18 = smov (%p27_p4, %s2372_s18), 0  ;;  %182 = sbr.rel (%p179_p3) target bundleno = 809 (0x329), region = 32 }
   0xa   : > { %p223_p6 = scmp.lt.s32.totalorder (!%p179_p3), %s1431_s23, 31 }
   0xe   : > { %s2376_s13 = smov (!%p221_p5, %s1823_s13), 1  ;;  %vm450_vm0 = vcmask 523264   ;;  %s2378_s23 = smov (!%p223_p6, %s1431_s23), 31 }
   0xf   : > { %s1619_s19 = sshll.u32 %s2376_s13, 7  ;;  %s1432_s24 = sshll.u32 %s2376_s13, 5 }
  0x10   : > { %s1897_s22 = scalar_lea.vmem %s2354_s1, %s1619_s19  ;;  %s1931_s25 = sadd.s32 %s1432_s24, %s2378_s23 }
  0x11   : > { %v1636_v0 = vld [vmem:[%s1897_s22 + $0x38] sm:$0xff]  ;;  %v1635_v4 = vld [vmem:[%s1897_s22 + $0x30] sm:$0xff]  ;;  %v1634_v8 = vld [vmem:[%s1897_s22 + $0x28] sm:$0xff]  ;;  %s1433_s26 = sshll.u32 %s1931_s25, 2  ;;  %s2056_s5 = scalar_lea.vmem %s2355_s2, %s1619_s19 }
  0x12   : > { %v1644_v1 = vld [vmem:[%s1897_s22 + $0x78] sm:$0xff]  ;;  %v497_v2 = vsel %vm450_vm0, %v1636_v0, 0  ;;  %v1643_v5 = vld [vmem:[%s1897_s22 + $0x70] sm:$0xff]  ;;  %v494_v6 = vsel %vm450_vm0, %v1635_v4, 0  ;;  %v1642_v9 = vld [vmem:[%s1897_s22 + $0x68] sm:$0xff]  ;;  %v491_v10 = vsel %vm450_vm0, %v1634_v8, 0  ;;  %s228_s29 = scalar_lea.vmem %s2353_s0, %s1433_s26  ;;  %s2274_s8 = scalar_lea.vmem %s2356_s3, %s1433_s26 }
  0x13   : > { %v521_v3 = vsel %vm450_vm0, %v1644_v1, 0  ;;  %523 = vmatpush.bf16.xpose.msra.mxu0 %v497_v2  ;;  %v518_v7 = vsel %vm450_vm0, %v1643_v5, 0  ;;  %v515_v11 = vsel %vm450_vm0, %v1642_v9, 0  ;;  %v1633_v12 = vld [vmem:[%s1897_s22 + $0x20] sm:$0xff]  ;;  %v1632_v16 = vld [vmem:[%s1897_s22 + $0x18] sm:$0xff]  ;;  %v1631_v20 = vld [vmem:[%s1897_s22 + $0x10] sm:$0xff] }
  0x14   : > { %572 = vmatpush.bf16.xpose.msra.mxu1 %v521_v3  ;;  %v1641_v13 = vld [vmem:[%s1897_s22 + $0x60] sm:$0xff]  ;;  %v488_v14 = vsel %vm450_vm0, %v1633_v12, 0  ;;  %v1640_v17 = vld [vmem:[%s1897_s22 + $0x58] sm:$0xff]  ;;  %v485_v18 = vsel %vm450_vm0, %v1632_v16, 0  ;;  %v1639_v21 = vld [vmem:[%s1897_s22 + $0x50] sm:$0xff]  ;;  %v482_v22 = vsel %vm450_vm0, %v1631_v20, 0 }
  0x15   : > { %v512_v15 = vsel %vm450_vm0, %v1641_v13, 0  ;;  %v509_v19 = vsel %vm450_vm0, %v1640_v17, 0  ;;  %v506_v23 = vsel %vm450_vm0, %v1639_v21, 0  ;;  %v1630_v24 = vld [vmem:[%s1897_s22 + $0x8] sm:$0xff]  ;;  %v1629_v28 = vld [vmem:[%s1897_s22] sm:$0xff]  ;;  %v1623_v34 = vld [vmem:[%s228_s29 + $0x10] sm:$0xff] }
  0x16   : > { %v1638_v25 = vld [vmem:[%s1897_s22 + $0x48] sm:$0xff]  ;;  %v479_v26 = vsel %vm450_vm0, %v1630_v24, 0  ;;  %v1637_v29 = vld [vmem:[%s1897_s22 + $0x40] sm:$0xff]  ;;  %v476_v30 = vsel %vm450_vm0, %v1629_v28, 0  ;;  %v1624_v35 = vld [vmem:[%s228_s29 + $0x18] sm:$0xff] }
  0x17   : > { %v503_v27 = vsel %vm450_vm0, %v1638_v25, 0  ;;  %v500_v31 = vsel %vm450_vm0, %v1637_v29, 0  ;;  %v1621_v32 = vld [vmem:[%s228_s29] sm:$0xff]  ;;  %v1622_v33 = vld [vmem:[%s228_s29 + $0x8] sm:$0xff]  ;;  %v1627_v38 = vld [vmem:[%s228_s29 + $0x30] sm:$0xff] }
  0x18   : > { %v1625_v36 = vld [vmem:[%s228_s29 + $0x20] sm:$0xff]  ;;  %v1626_v37 = vld [vmem:[%s228_s29 + $0x28] sm:$0xff]  ;;  %v1628_v45 = vld [vmem:[%s228_s29 + $0x38] sm:$0xff] }
  0x1b   : > { %524 = vmatpush.bf16.xpose.msra.mxu0 %v494_v6 }
  0x1c   : > { %573 = vmatpush.bf16.xpose.msra.mxu1 %v518_v7 }
  0x23   : > { %525 = vmatpush.bf16.xpose.msra.mxu0 %v491_v10 }
  0x24   : > { %574 = vmatpush.bf16.xpose.msra.mxu1 %v515_v11 }
  0x2b   : > { %526 = vmatpush.bf16.xpose.msra.mxu0 %v488_v14 }
  0x2c   : > { %575 = vmatpush.bf16.xpose.msra.mxu1 %v512_v15 }
  0x33   : > { %527 = vmatpush.bf16.xpose.msra.mxu0 %v485_v18 }
  0x34   : > { %576 = vmatpush.bf16.xpose.msra.mxu1 %v509_v19 }
  0x3b   : > { %528 = vmatpush.bf16.xpose.msra.mxu0 %v482_v22 }
  0x3c   : > { %577 = vmatpush.bf16.xpose.msra.mxu1 %v506_v23 }
  0x43   : > { %529 = vmatpush.bf16.xpose.msra.mxu0 %v479_v26 }
  0x44   : > { %578 = vmatpush.bf16.xpose.msra.mxu1 %v503_v27 }
  0x4b   : > { %530 = vmatpush.bf16.xpose.msra.mxu0 %v476_v30 }
  0x4c   : > { %579 = vmatpush.bf16.xpose.msra.mxu1 %v500_v31 }
  0x52   : > { %1537 = vmatmul.msk.bf16.vlgmr.msra.gmra.mxu0 %vm450_vm0, %v1621_v32 }
  0x53   : > { %1545 = vmatmul.msk.bf16.vlgmr.msra.gmra.mxu1 %vm450_vm0, %v1621_v32 }
  0x62   : > { %1538 = vmatmul.msk.bf16.gmra.mxu0 %vm450_vm0, %v1622_v33 }
  0x63   : > { %1546 = vmatmul.msk.bf16.gmra.mxu1 %vm450_vm0, %v1622_v33 }
  0x72   : > { %1539 = vmatmul.msk.bf16.gmra.mxu0 %vm450_vm0, %v1623_v34 }
  0x73   : > { %1547 = vmatmul.msk.bf16.gmra.mxu1 %vm450_vm0, %v1623_v34 }
  0x82   : > { %1540 = vmatmul.msk.bf16.gmra.mxu0 %vm450_vm0, %v1624_v35 }
  0x83   : > { %1548 = vmatmul.msk.bf16.gmra.mxu1 %vm450_vm0, %v1624_v35 }
  0x92   : > { %1541 = vmatmul.msk.bf16.gmra.mxu0 %vm450_vm0, %v1625_v36 }
  0x93   : > { %1549 = vmatmul.msk.bf16.gmra.mxu1 %vm450_vm0, %v1625_v36 }
  0xa2   : > { %1542 = vmatmul.msk.bf16.gmra.mxu0 %vm450_vm0, %v1626_v37 }
  0xa3   : > { %1550 = vmatmul.msk.bf16.gmra.mxu1 %vm450_vm0, %v1626_v37 }
  0xb2   : > { %1543 = vmatmul.msk.bf16.gmra.mxu0 %vm450_vm0, %v1627_v38 }
  0xb3   : > { %1551 = vmatmul.msk.bf16.gmra.mxu1 %vm450_vm0, %v1627_v38 }
  0xc2   : > { %1544 = vmatmul.msk.bf16.gmra.mxu0 %vm450_vm0, %v1628_v45 }
  0xc3   : > { %1552 = vmatmul.msk.bf16.gmra.mxu1 %vm450_vm0, %v1628_v45 }
  0xcf   : > { %v532_v39 = vpop.f32.mrf.mxu0 }
  0xd0   : > { %v581_v40 = vpop.f32.mrf.mxu1 }
  0xd1   : > { %v621_v41 = vmax.f32 %v532_v39, %v581_v40 }
  0xd3   : > { %622 = vmax.xlane.f32.xlu0 %v621_v41 }
  0xd7   : > { %v534_v42 = vpop.f32.mrf.mxu0 }
  0xd8   : > { %v583_v43 = vpop.f32.mrf.mxu1 }
  0xd9   : > { %v624_v44 = vmax.f32 %v534_v42, %v583_v43 }
  0xdb   : > { %625 = vmax.xlane.f32.xlu0 %v624_v44 }
  0xdf   : > { %v537_v46 = vpop.f32.mrf.mxu0 }
  0xe0   : > { %v586_v47 = vpop.f32.mrf.mxu1 }
  0xe1   : > { %v627_v48 = vmax.f32 %v537_v46, %v586_v47 }
  0xe3   : > { %628 = vmax.xlane.f32.xlu1 %v627_v48 }
  0xe7   : > { %v1957_v49 = vpop.f32.mrf.mxu0 }
  0xe8   : > { %v1959_v50 = vpop.f32.mrf.mxu1 }
  0xe9   : > { %v630_v51 = vmax.f32 %v1957_v49, %v1959_v50 }
  0xeb   : > { %631 = vmax.xlane.f32.xlu1 %v630_v51 }
  0xef   : > { %v1963_v52 = vpop.f32.mrf.mxu0 }
  0xf0   : > { %v1965_v53 = vpop.f32.mrf.mxu1 }
  0xf1   : > { %v633_v54 = vmax.f32 %v1963_v52, %v1965_v53 }
  0xf3   : > { %634 = vmax.xlane.f32.xlu2 %v633_v54 }
  0xf7   : > { %v1969_v55 = vpop.f32.mrf.mxu0 }
  0xf8   : > { %v1971_v56 = vpop.f32.mrf.mxu1 }
  0xf9   : > { %v636_v57 = vmax.f32 %v1969_v55, %v1971_v56 }
  0xfb   : > { %637 = vmax.xlane.f32.xlu2 %v636_v57 }
  0xff   : > { %v1975_v58 = vpop.f32.mrf.mxu0 }
 0x100   : > { %v1977_v59 = vpop.f32.mrf.mxu1 }
 0x101   : > { %v639_v60 = vmax.f32 %v1975_v58, %v1977_v59 }
 0x103   : > { %640 = vmax.xlane.f32.xlu0 %v639_v60 }
 0x107   : > { %v1981_v61 = vpop.f32.mrf.mxu0 }
 0x108   : > { %v1983_v62 = vpop.f32.mrf.mxu1 }
 0x109   : > { %v642_v63 = vmax.f32 %v1981_v61, %v1983_v62 }
 0x10b   : > { %643 = vmax.xlane.f32.xlu1 %v642_v63 }
 0x10f   : > { %v1987_v0 = vpop.f32.mrf.mxu0 }
 0x110   : > { %v1989_v1 = vpop.f32.mrf.mxu1 }
 0x111   : > { %v645_v2 = vmax.f32 %v1987_v0, %v1989_v1 }
 0x113   : > { %646 = vmax.xlane.f32.xlu1 %v645_v2 }
 0x117   : > { %v1993_v8 = vpop.f32.mrf.mxu0 }
 0x118   : > { %v1995_v9 = vpop.f32.mrf.mxu1 }
 0x119   : > { %v648_v28 = vmax.f32 %v1993_v8, %v1995_v9 }
 0x11f   : > { %v2003_v18 = vpop.f32.mrf.mxu0 }
 0x120   : > { %v2005_v20 = vpop.f32.mrf.mxu1 }
 0x121   : > { %v651_v37 = vmax.f32 %v2003_v18, %v2005_v20 }
 0x127   : > { %v2017_v32 = vpop.f32.mrf.mxu0 }
 0x128   : > { %v2019_v33 = vpop.f32.mrf.mxu1 }
 0x130   : > { %v2037_v48 = vpop.f32.mrf.mxu1 }
 0x146   : > { %v623_v3 = vpop.xlane.xlu0 %622 }
 0x147   : > { %v669_v4 = vsub.f32 %v532_v39, %v623_v3  ;;  %v670_v5 = vsub.f32 %v581_v40, %v623_v3  ;;  %v2062_v3 = vpop.f32.mrf.mxu1 }
 0x149   : > { %v701_v6 = vmul.f32 1.442695, %v669_v4  ;;  %v703_v7 = vmul.f32 1.442695, %v670_v5  ;;  %v1652_v4 = vld [vmem:[%s2056_s5 + $0x38] sm:$0xff] }
 0x14a   : > { %v1660_v5 = vld [vmem:[%s2056_s5 + $0x78] sm:$0xff]  ;;  %1181 = vmatpush.bf16.msra.mxu2 %v1652_v4  ;;  %v1647_v4 = vld [vmem:[%s2056_s5 + $0x10] sm:$0xff] }
 0x14b   : > { %1701 = vpow2.f32 %v701_v6  ;;  %1230 = vmatpush.bf16.msra.mxu3 %v1660_v5  ;;  %v1655_v5 = vld [vmem:[%s2056_s5 + $0x50] sm:$0xff] }
 0x14c   : > { %1703 = vpow2.f32 %v703_v7 }
 0x14e   : > { %v626_v10 = vpop.xlane.xlu0 %625 }
 0x14f   : > { %v671_v11 = vsub.f32 %v534_v42, %v626_v10  ;;  %v672_v12 = vsub.f32 %v583_v43, %v626_v10 }
 0x151   : > { %v1997_v13 = vpop.eup %1701  ;;  %v705_v14 = vmul.f32 1.442695, %v671_v11  ;;  %v707_v15 = vmul.f32 1.442695, %v672_v12 }
 0x152   : > { %v1999_v16 = vpop.eup %1703 }
 0x153   : > { %1705 = vpow2.f32 %v705_v14  ;;  %v765_v17 = vadd.f32 %v1999_v16, %v1997_v13 }
 0x154   : > { %1707 = vpow2.f32 %v707_v15 }
 0x155   : > { %766 = vadd.xlane.f32.xlu2 %v765_v17 }
 0x156   : > { %v629_v19 = vpop.xlane.xlu1 %628 }
 0x157   : > { %v673_v21 = vsub.f32 %v537_v46, %v629_v19  ;;  %v674_v22 = vsub.f32 %v586_v47, %v629_v19  ;;  %v2033_v46 = vpop.f32.mrf.mxu0 }
 0x158   : > { %v657_v63 = vmax.f32 %v2033_v46, %v2037_v48 }
 0x159   : > { %v2007_v23 = vpop.eup %1705  ;;  %v709_v24 = vmul.f32 1.442695, %v673_v21  ;;  %v711_v25 = vmul.f32 1.442695, %v674_v22 }
 0x15a   : > { %v2009_v26 = vpop.eup %1707 }
 0x15b   : > { %1709 = vpow2.f32 %v709_v24  ;;  %v768_v27 = vadd.f32 %v2009_v26, %v2007_v23 }
 0x15c   : > { %1711 = vpow2.f32 %v711_v25 }
 0x15d   : > { %769 = vadd.xlane.f32.xlu0 %v768_v27  ;;  %649 = vmax.xlane.f32.xlu2 %v648_v28 }
 0x15e   : > { %v632_v29 = vpop.xlane.xlu1 %631 }
 0x15f   : > { %v675_v30 = vsub.f32 %v1957_v49, %v632_v29  ;;  %v676_v31 = vsub.f32 %v1959_v50, %v632_v29  ;;  %v654_v50 = vmax.f32 %v2017_v32, %v2019_v33 }
 0x161   : > { %v2021_v34 = vpop.eup %1709  ;;  %v713_v35 = vmul.f32 1.442695, %v675_v30  ;;  %v715_v36 = vmul.f32 1.442695, %v676_v31 }
 0x162   : > { %v2025_v38 = vpop.eup %1711 }
 0x163   : > { %1713 = vpow2.f32 %v713_v35  ;;  %v771_v39 = vadd.f32 %v2025_v38, %v2021_v34 }
 0x164   : > { %1715 = vpow2.f32 %v715_v36 }
 0x165   : > { %772 = vadd.xlane.f32.xlu0 %v771_v39  ;;  %652 = vmax.xlane.f32.xlu2 %v651_v37 }
 0x166   : > { %v635_v40 = vpop.xlane.xlu2 %634 }
 0x167   : > { %v677_v41 = vsub.f32 %v1963_v52, %v635_v40  ;;  %v678_v42 = vsub.f32 %v1965_v53, %v635_v40 }
 0x169   : > { %v2031_v43 = vpop.eup %1713  ;;  %v717_v44 = vmul.f32 1.442695, %v677_v41  ;;  %v719_v45 = vmul.f32 1.442695, %v678_v42 }
 0x16a   : > { %v2035_v47 = vpop.eup %1715 }
 0x16b   : > { %1717 = vpow2.f32 %v717_v44  ;;  %v774_v49 = vadd.f32 %v2035_v47, %v2031_v43 }
 0x16c   : > { %1719 = vpow2.f32 %v719_v45 }
 0x16d   : > { %775 = vadd.xlane.f32.xlu1 %v774_v49  ;;  %655 = vmax.xlane.f32.xlu0 %v654_v50  ;;  %v1651_v50 = vld [vmem:[%s2056_s5 + $0x30] sm:$0xff] }
 0x16e   : > { %v638_v51 = vpop.xlane.xlu2 %637  ;;  %1182 = vmatpush.bf16.msra.mxu2 %v1651_v50 }
 0x16f   : > { %v679_v52 = vsub.f32 %v1969_v55, %v638_v51  ;;  %v680_v53 = vsub.f32 %v1971_v56, %v638_v51  ;;  %v2058_v55 = vpop.f32.mrf.mxu0  ;;  %v1659_v51 = vld [vmem:[%s2056_s5 + $0x70] sm:$0xff] }
 0x170   : > { %v660_v19 = vmax.f32 %v2058_v55, %v2062_v3  ;;  %1231 = vmatpush.bf16.msra.mxu3 %v1659_v51 }
 0x171   : > { %v2045_v54 = vpop.eup %1717  ;;  %v721_v57 = vmul.f32 1.442695, %v679_v52  ;;  %v723_v60 = vmul.f32 1.442695, %v680_v53  ;;  %v1650_v52 = vld [vmem:[%s2056_s5 + $0x28] sm:$0xff] }
 0x172   : > { %v2049_v2 = vpop.eup %1719  ;;  %v1658_v53 = vld [vmem:[%s2056_s5 + $0x68] sm:$0xff]  ;;  %1183 = vmatpush.bf16.msra.mxu2 %v1650_v52 }
 0x173   : > { %1721 = vpow2.f32 %v721_v57  ;;  %v777_v56 = vadd.f32 %v2049_v2, %v2045_v54  ;;  %v1649_v57 = vld [vmem:[%s2056_s5 + $0x20] sm:$0xff] }
 0x174   : > { %1723 = vpow2.f32 %v723_v60  ;;  %1232 = vmatpush.bf16.msra.mxu3 %v1658_v53  ;;  %v1657_v60 = vld [vmem:[%s2056_s5 + $0x60] sm:$0xff] }
 0x175   : > { %778 = vadd.xlane.f32.xlu1 %v777_v56  ;;  %658 = vmax.xlane.f32.xlu0 %v657_v63  ;;  %v1648_v63 = vld [vmem:[%s2056_s5 + $0x18] sm:$0xff] }
 0x176   : > { %v641_v6 = vpop.xlane.xlu0 %640  ;;  %1184 = vmatpush.bf16.msra.mxu2 %v1649_v57  ;;  %v1656_v56 = vld [vmem:[%s2056_s5 + $0x58] sm:$0xff] }
 0x177   : > { %v681_v7 = vsub.f32 %v1975_v58, %v641_v6  ;;  %v682_v10 = vsub.f32 %v1977_v59, %v641_v6  ;;  %v2076_v21 = vpop.f32.mrf.mxu0  ;;  %v2078_v58 = vpop.f32.mrf.mxu1  ;;  %v1646_v6 = vld [vmem:[%s2056_s5 + $0x8] sm:$0xff] }
 0x178   : > { %v663_v29 = vmax.f32 %v2076_v21, %v2078_v58  ;;  %1233 = vmatpush.bf16.msra.mxu3 %v1657_v60 }
 0x179   : > { %v2068_v11 = vpop.eup %1721  ;;  %v725_v12 = vmul.f32 1.442695, %v681_v7  ;;  %v727_v14 = vmul.f32 1.442695, %v682_v10  ;;  %v1654_v7 = vld [vmem:[%s2056_s5 + $0x48] sm:$0xff]  ;;  %v1645_v10 = vld [vmem:[%s2056_s5] sm:$0xff] }
 0x17a   : > { %v2070_v15 = vpop.eup %1723  ;;  %1185 = vmatpush.bf16.msra.mxu2 %v1648_v63 }
 0x17b   : > { %1725 = vpow2.f32 %v725_v12  ;;  %v780_v17 = vadd.f32 %v2070_v15, %v2068_v11  ;;  %v1653_v12 = vld [vmem:[%s2056_s5 + $0x40] sm:$0xff] }
 0x17c   : > { %1727 = vpow2.f32 %v727_v14  ;;  %1234 = vmatpush.bf16.msra.mxu3 %v1656_v56 }
 0x17d   : > { %781 = vadd.xlane.f32.xlu2 %v780_v17  ;;  %661 = vmax.xlane.f32.xlu1 %v660_v19 }
 0x17e   : > { %v644_v59 = vpop.xlane.xlu1 %643  ;;  %1186 = vmatpush.bf16.msra.mxu2 %v1647_v4 }
 0x17f   : > { %v683_v22 = vsub.f32 %v1981_v61, %v644_v59  ;;  %v684_v24 = vsub.f32 %v1983_v62, %v644_v59  ;;  %v2092_v36 = vpop.f32.mrf.mxu0  ;;  %v2094_v37 = vpop.f32.mrf.mxu1 }
 0x180   : > { %v666_v44 = vmax.f32 %v2092_v36, %v2094_v37  ;;  %1235 = vmatpush.bf16.msra.mxu3 %v1655_v5 }
 0x181   : > { %v2082_v25 = vpop.eup %1725  ;;  %v729_v27 = vmul.f32 1.442695, %v683_v22  ;;  %v731_v28 = vmul.f32 1.442695, %v684_v24 }
 0x182   : > { %v2086_v30 = vpop.eup %1727  ;;  %1187 = vmatpush.bf16.msra.mxu2 %v1646_v6 }
 0x183   : > { %1729 = vpow2.f32 %v729_v27  ;;  %v783_v31 = vadd.f32 %v2086_v30, %v2082_v25 }
 0x184   : > { %1731 = vpow2.f32 %v731_v28  ;;  %1236 = vmatpush.bf16.msra.mxu3 %v1654_v7 }
 0x185   : > { %784 = vadd.xlane.f32.xlu2 %v783_v31  ;;  %664 = vmax.xlane.f32.xlu1 %v663_v29 }
 0x186   : > { %v647_v35 = vpop.xlane.xlu1 %646  ;;  %1188 = vmatpush.bf16.msra.mxu2 %v1645_v10 }
 0x187   : > { %v685_v61 = vsub.f32 %v1987_v0, %v647_v35  ;;  %v686_v62 = vsub.f32 %v1989_v1, %v647_v35 }
 0x188   : > { %1237 = vmatpush.bf16.msra.mxu3 %v1653_v12 }
 0x189   : > { %v2096_v39 = vpop.eup %1729  ;;  %v733_v40 = vmul.f32 1.442695, %v685_v61  ;;  %v735_v41 = vmul.f32 1.442695, %v686_v62 }
 0x18a   : > { %v2098_v42 = vpop.eup %1731 }
 0x18b   : > { %1733 = vpow2.f32 %v733_v40  ;;  %v786_v0 = vadd.f32 %v2098_v42, %v2096_v39 }
 0x18c   : > { %1735 = vpow2.f32 %v735_v41 }
 0x18d   : > { %787 = vadd.xlane.f32.xlu0 %v786_v0  ;;  %667 = vmax.xlane.f32.xlu2 %v666_v44 }
 0x191   : > { %v2104_v1 = vpop.eup %1733 }
 0x192   : > { %v2106_v45 = vpop.eup %1735 }
 0x193   : > { %v789_v49 = vadd.f32 %v2106_v45, %v2104_v1 }
 0x195   : > { %790 = vadd.xlane.f32.xlu0 %v789_v49 }
 0x1c8   : > { %v767_v14 = vpop.xlane.xlu2 %766 }
 0x1c9   : > { %1737 = vrcp.f32 %v767_v14  ;;  %v824_v0 = vand.u32 2147483648, %v767_v14  ;;  %vm818_vm2 = vweird.f32 %v767_v14  ;;  %v822_v50 = vand.u32 2147483647, %v767_v14 }
 0x1cb   : > { %v825_v4 = vor.u32 1.1754944e-38, %v824_v0  ;;  %vm823_vm6 = vcmp.eq.f32.partialorder %v822_v50, 8.507059e+37 }
 0x1cf   : > { %v1738_v17 = vpop.eup %1737 }
 0x1d0   : > { %v814_v19 = vmul.f32 %v1738_v17, %v767_v14  ;;  %v770_v59 = vpop.xlane.xlu0 %769  ;;  %v650_v22 = vpop.xlane.xlu2 %649  ;;  %vm819_vm1 = vweird.f32 %v1738_v17 }
 0x1d1   : > { %1739 = vrcp.f32 %v770_v59  ;;  %v687_v24 = vsub.f32 %v1993_v8, %v650_v22  ;;  %v688_v28 = vsub.f32 %v1995_v9, %v650_v22  ;;  %v840_v52 = vand.u32 2147483648, %v770_v59  ;;  %vm2133_vm3 = vmor %vm818_vm2, %vm819_vm1 }
 0x1d2   : > { %v815_v27 = vsub.f32 1.0, %v814_v19  ;;  %v838_v5 = vand.u32 2147483647, %v770_v59  ;;  %vm834_vm5 = vweird.f32 %v770_v59 }
 0x1d3   : > { %v737_v29 = vmul.f32 1.442695, %v687_v24  ;;  %v739_v35 = vmul.f32 1.442695, %v688_v28  ;;  %v841_v22 = vor.u32 1.1754944e-38, %v840_v52 }
 0x1d4   : > { %v816_v31 = vmul.f32 %v1738_v17, %v815_v27  ;;  %vm839_vm8 = vcmp.eq.f32.partialorder %v838_v5, 8.507059e+37 }
 0x1d5   : > { %1741 = vpow2.f32 %v737_v29 }
 0x1d6   : > { %1743 = vpow2.f32 %v739_v35  ;;  %v817_v44 = vadd.f32 %v1738_v17, %v816_v31 }
 0x1d7   : > { %v1740_v61 = vpop.eup %1739 }
 0x1d8   : > { %v830_v62 = vmul.f32 %v1740_v61, %v770_v59  ;;  %v2126_v40 = vpop.xlane.xlu0 %772  ;;  %v653_v41 = vpop.xlane.xlu2 %652  ;;  %vm835_vm4 = vweird.f32 %v1740_v61 }
 0x1d9   : > { %1745 = vrcp.f32 %v2126_v40  ;;  %v689_v8 = vsub.f32 %v2003_v18, %v653_v41  ;;  %v690_v9 = vsub.f32 %v2005_v20, %v653_v41  ;;  %v821_v18 = vsel %vm2133_vm3, %v1738_v17, %v817_v44  ;;  %vm836_vm7 = vmor %vm834_vm5, %vm835_vm4 }
 0x1da   : > { %v831_v49 = vsub.f32 1.0, %v830_v62  ;;  %v826_v10 = vsel %vm823_vm6, %v825_v4, %v821_v18  ;;  %v856_v50 = vand.u32 2147483648, %v2126_v40  ;;  %vm850_vm10 = vweird.f32 %v2126_v40 }
 0x1db   : > { %v2131_v51 = vpop.eup %1741  ;;  %v741_v53 = vmul.f32 1.442695, %v689_v8  ;;  %v743_v56 = vmul.f32 1.442695, %v690_v9  ;;  %v827_v28 = vmul.f32 %v1997_v13, %v826_v10  ;;  %v828_v41 = vmul.f32 %v1999_v16, %v826_v10 }
 0x1dc   : > { %v2137_v60 = vpop.eup %1743  ;;  %v832_v63 = vmul.f32 %v1740_v61, %v831_v49 }
 0x1dd   : > { %1747 = vpow2.f32 %v741_v53  ;;  %v792_v20 = vadd.f32 %v2137_v60, %v2131_v51 }
 0x1de   : > { %1749 = vpow2.f32 %v743_v56  ;;  %v833_v6 = vadd.f32 %v1740_v61, %v832_v63  ;;  %v854_v63 = vand.u32 2147483647, %v2126_v40 }
 0x1df   : > { %v2143_v7 = vpop.eup %1745  ;;  %793 = vadd.xlane.f32.xlu1 %v792_v20 }
 0x1e0   : > { %v846_v12 = vmul.f32 %v2143_v7, %v2126_v40  ;;  %v2147_v14 = vpop.xlane.xlu1 %775  ;;  %v656_v17 = vpop.xlane.xlu0 %655  ;;  %v837_v19 = vsel %vm836_vm7, %v1740_v61, %v833_v6  ;;  %vm851_vm9 = vweird.f32 %v2143_v7  ;;  %v857_v40 = vor.u32 1.1754944e-38, %v856_v50 }
 0x1e1   : > { %1751 = vrcp.f32 %v2147_v14  ;;  %v691_v59 = vsub.f32 %v2017_v32, %v656_v17  ;;  %v692_v27 = vsub.f32 %v2019_v33, %v656_v17  ;;  %v842_v29 = vsel %vm839_vm8, %v841_v22, %v837_v19  ;;  %vm2177_vm11 = vmor %vm850_vm10, %vm851_vm9 }
 0x1e2   : > { %v847_v24 = vsub.f32 1.0, %v846_v12  ;;  %v843_v62 = vmul.f32 %v2007_v23, %v842_v29  ;;  %v844_v61 = vmul.f32 %v2009_v26, %v842_v29  ;;  %v872_v18 = vand.u32 2147483648, %v2147_v14 }
 0x1e3   : > { %v2153_v31 = vpop.eup %1747  ;;  %v745_v35 = vmul.f32 1.442695, %v691_v59  ;;  %v747_v0 = vmul.f32 1.442695, %v692_v27  ;;  %v870_v12 = vand.u32 2147483647, %v2147_v14  ;;  %vm866_vm13 = vweird.f32 %v2147_v14 }
 0x1e4   : > { %v2158_v44 = vpop.eup %1749  ;;  %v848_v32 = vmul.f32 %v2143_v7, %v847_v24  ;;  %v1069_v8 = vpack.c.bf16 %v843_v62, %v827_v28  ;;  %v1070_v33 = vpack.c.bf16 %v844_v61, %v828_v41  ;;  %vm855_vm14 = vcmp.eq.f32.partialorder %v854_v63, 8.507059e+37 }
 0x1e5   : > { %1753 = vpow2.f32 %v745_v35  ;;  %v795_v13 = vadd.f32 %v2158_v44, %v2153_v31  ;;  %v873_v28 = vor.u32 1.1754944e-38, %v872_v18  ;;  %vm871_vm0 = vcmp.eq.f32.partialorder %v870_v12, 8.507059e+37 }
 0x1e6   : > { %1755 = vpow2.f32 %v747_v0  ;;  %1189 = vmatmul.bf16.vlgmr.msra.gmra.mxu2 %v1069_v8  ;;  %1238 = vmatmul.bf16.vlgmr.msra.gmra.mxu3 %v1070_v33  ;;  %v849_v9 = vadd.f32 %v2143_v7, %v848_v32 }
 0x1e7   : > { %v1752_v49 = vpop.eup %1751  ;;  %796 = vadd.xlane.f32.xlu2 %v795_v13 }
 0x1e8   : > { %v862_v23 = vmul.f32 %v1752_v49, %v2147_v14  ;;  %v2164_v16 = vpop.xlane.xlu1 %778  ;;  %v659_v26 = vpop.xlane.xlu0 %658  ;;  %v853_v10 = vsel %vm2177_vm11, %v2143_v7, %v849_v9  ;;  %vm867_vm12 = vweird.f32 %v1752_v49 }
 0x1e9   : > { %1757 = vrcp.f32 %v2164_v16  ;;  %v693_v52 = vsub.f32 %v2033_v46, %v659_v26  ;;  %v694_v57 = vsub.f32 %v2037_v48, %v659_v26  ;;  %v858_v22 = vsel %vm855_vm14, %v857_v40, %v853_v10  ;;  %vm868_vm15 = vmor %vm866_vm13, %vm867_vm12 }
 0x1ea   : > { %v863_v53 = vsub.f32 1.0, %v862_v23  ;;  %v859_v62 = vmul.f32 %v2021_v34, %v858_v22  ;;  %v860_v8 = vmul.f32 %v2025_v38, %v858_v22  ;;  %v888_v50 = vand.u32 2147483648, %v2164_v16 }
 0x1eb   : > { %v2174_v56 = vpop.eup %1753  ;;  %v749_v20 = vmul.f32 1.442695, %v693_v52  ;;  %v751_v46 = vmul.f32 1.442695, %v694_v57  ;;  %vm882_vm2 = vweird.f32 %v2164_v16  ;;  %v886_v63 = vand.u32 2147483647, %v2164_v16 }
 0x1ec   : > { %v2181_v5 = vpop.eup %1755  ;;  %v864_v6 = vmul.f32 %v1752_v49, %v863_v53 }
 0x1ed   : > { %1759 = vpow2.f32 %v749_v20  ;;  %v798_v48 = vadd.f32 %v2181_v5, %v2174_v56  ;;  %vm887_vm6 = vcmp.eq.f32.partialorder %v886_v63, 8.507059e+37 }
 0x1ee   : > { %1761 = vpow2.f32 %v751_v46  ;;  %v865_v17 = vadd.f32 %v1752_v49, %v864_v6 }
 0x1ef   : > { %v2190_v19 = vpop.eup %1757  ;;  %799 = vadd.xlane.f32.xlu0 %v798_v48 }
 0x1f0   : > { %v878_v7 = vmul.f32 %v2190_v19, %v2164_v16  ;;  %v2194_v59 = vpop.xlane.xlu2 %781  ;;  %v662_v24 = vpop.xlane.xlu1 %661  ;;  %v869_v27 = vsel %vm868_vm15, %v1752_v49, %v865_v17  ;;  %vm883_vm1 = vweird.f32 %v2190_v19  ;;  %v889_v16 = vor.u32 1.1754944e-38, %v888_v50 }
 0x1f1   : > { %1763 = vrcp.f32 %v2194_v59  ;;  %v695_v14 = vsub.f32 %v2058_v55, %v662_v24  ;;  %v696_v35 = vsub.f32 %v2062_v3, %v662_v24  ;;  %v874_v41 = vsel %vm871_vm0, %v873_v28, %v869_v27  ;;  %vm2224_vm3 = vmor %vm882_vm2, %vm883_vm1 }
 0x1f2   : > { %v879_v29 = vsub.f32 1.0, %v878_v7  ;;  %v875_v0 = vmul.f32 %v2031_v43, %v874_v41  ;;  %v876_v33 = vmul.f32 %v2035_v47, %v874_v41  ;;  %v904_v20 = vand.u32 2147483648, %v2194_v59 }
 0x1f3   : > { %v2200_v61 = vpop.eup %1759  ;;  %v753_v32 = vmul.f32 1.442695, %v695_v14  ;;  %v755_v49 = vmul.f32 1.442695, %v696_v35  ;;  %v902_v40 = vand.u32 2147483647, %v2194_v59  ;;  %vm898_vm5 = vweird.f32 %v2194_v59 }
 0x1f4   : > { %v2205_v13 = vpop.eup %1761  ;;  %v880_v55 = vmul.f32 %v2190_v19, %v879_v29  ;;  %v1071_v23 = vpack.c.bf16 %v875_v0, %v859_v62  ;;  %v1072_v3 = vpack.c.bf16 %v876_v33, %v860_v8  ;;  %v905_v28 = vor.u32 1.1754944e-38, %v904_v20 }
 0x1f5   : > { %1765 = vpow2.f32 %v753_v32  ;;  %v801_v34 = vadd.f32 %v2205_v13, %v2200_v61  ;;  %vm903_vm8 = vcmp.eq.f32.partialorder %v902_v40, 8.507059e+37 }
 0x1f6   : > { %1767 = vpow2.f32 %v755_v49  ;;  %1194 = vmatmul.bf16.gmra.mxu2 %v1071_v23  ;;  %1243 = vmatmul.bf16.gmra.mxu3 %v1072_v3  ;;  %v881_v9 = vadd.f32 %v2190_v19, %v880_v55 }
 0x1f7   : > { %v1764_v26 = vpop.eup %1763  ;;  %802 = vadd.xlane.f32.xlu1 %v801_v34 }
 0x1f8   : > { %v894_v43 = vmul.f32 %v1764_v26, %v2194_v59  ;;  %v2211_v38 = vpop.xlane.xlu2 %784  ;;  %v665_v47 = vpop.xlane.xlu1 %664  ;;  %v885_v48 = vsel %vm2224_vm3, %v2190_v19, %v881_v9  ;;  %vm899_vm4 = vweird.f32 %v1764_v26 }
 0x1f9   : > { %1769 = vrcp.f32 %v2211_v38  ;;  %v697_v52 = vsub.f32 %v2076_v21, %v665_v47  ;;  %v698_v57 = vsub.f32 %v2078_v58, %v665_v47  ;;  %v890_v22 = vsel %vm887_vm6, %v889_v16, %v885_v48  ;;  %vm900_vm7 = vmor %vm898_vm5, %vm899_vm4 }
 0x1fa   : > { %v895_v53 = vsub.f32 1.0, %v894_v43  ;;  %v891_v35 = vmul.f32 %v2045_v54, %v890_v22  ;;  %v892_v8 = vmul.f32 %v2049_v2, %v890_v22  ;;  %v920_v2 = vand.u32 2147483648, %v2211_v38 }
 0x1fb   : > { %v2221_v18 = vpop.eup %1765  ;;  %v757_v4 = vmul.f32 1.442695, %v697_v52  ;;  %v759_v21 = vmul.f32 1.442695, %v698_v57  ;;  %vm914_vm10 = vweird.f32 %v2211_v38 }
 0x1fc   : > { %v2228_v46 = vpop.eup %1767  ;;  %v896_v10 = vmul.f32 %v1764_v26, %v895_v53  ;;  %v921_v63 = vor.u32 1.1754944e-38, %v920_v2 }
 0x1fd   : > { %1771 = vpow2.f32 %v757_v4  ;;  %v804_v58 = vadd.f32 %v2228_v46, %v2221_v18 }
 0x1fe   : > { %1773 = vpow2.f32 %v759_v21  ;;  %v897_v12 = vadd.f32 %v1764_v26, %v896_v10 }
 0x1ff   : > { %v1770_v17 = vpop.eup %1769  ;;  %805 = vadd.xlane.f32.xlu2 %v804_v58 }
 0x200   : > { %v910_v7 = vmul.f32 %v1770_v17, %v2211_v38  ;;  %v788_v19 = vpop.xlane.xlu0 %787  ;;  %v668_v24 = vpop.xlane.xlu2 %667  ;;  %v901_v27 = vsel %vm900_vm7, %v1764_v26, %v897_v12  ;;  %vm915_vm9 = vweird.f32 %v1770_v17  ;;  %v918_v26 = vand.u32 2147483647, %v2211_v38 }
 0x201   : > { %1775 = vrcp.f32 %v788_v19  ;;  %v699_v14 = vsub.f32 %v2092_v36, %v668_v24  ;;  %v700_v59 = vsub.f32 %v2094_v37, %v668_v24  ;;  %v906_v62 = vsel %vm903_vm8, %v905_v28, %v901_v27  ;;  %vm916_vm11 = vmor %vm914_vm10, %vm915_vm9 }
 0x202   : > { %v911_v29 = vsub.f32 1.0, %v910_v7  ;;  %v907_v0 = vmul.f32 %v2068_v11, %v906_v62  ;;  %v908_v33 = vmul.f32 %v2070_v15, %v906_v62  ;;  %v936_v47 = vand.u32 2147483648, %v788_v19 }
 0x203   : > { %v2241_v41 = vpop.eup %1771  ;;  %v761_v32 = vmul.f32 1.442695, %v699_v14  ;;  %v763_v36 = vmul.f32 1.442695, %v700_v59  ;;  %v934_v53 = vand.u32 2147483647, %v788_v19  ;;  %vm930_vm13 = vweird.f32 %v788_v19 }
 0x204   : > { %v2246_v55 = vpop.eup %1773  ;;  %v912_v49 = vmul.f32 %v1770_v17, %v911_v29  ;;  %v1073_v23 = vpack.c.bf16 %v907_v0, %v891_v35  ;;  %v1074_v3 = vpack.c.bf16 %v908_v33, %v892_v8  ;;  %vm919_vm14 = vcmp.eq.f32.partialorder %v918_v26, 8.507059e+37 }
 0x205   : > { %1777 = vpow2.f32 %v761_v32  ;;  %v807_v54 = vadd.f32 %v2246_v55, %v2241_v41  ;;  %v937_v38 = vor.u32 1.1754944e-38, %v936_v47  ;;  %vm935_vm0 = vcmp.eq.f32.partialorder %v934_v53, 8.507059e+37 }
 0x206   : > { %1779 = vpow2.f32 %v763_v36  ;;  %1199 = vmatmul.bf16.gmra.mxu2 %v1073_v23  ;;  %1248 = vmatmul.bf16.gmra.mxu3 %v1074_v3  ;;  %v913_v11 = vadd.f32 %v1770_v17, %v912_v49  ;;  %vm1295_vm10 = vcmask 519168  }
 0x207   : > { %v1776_v37 = vpop.eup %1775  ;;  %808 = vadd.xlane.f32.xlu0 %v807_v54 }
 0x208   : > { %v926_v34 = vmul.f32 %v1776_v37, %v788_v19  ;;  %v917_v52 = vsel %vm916_vm11, %v1770_v17, %v913_v11  ;;  %vm931_vm12 = vweird.f32 %v1776_v37  ;;  %v791_v17 = vpop.xlane.xlu0 %790 }
 0x209   : > { %v922_v4 = vsel %vm919_vm14, %v921_v63, %v917_v52  ;;  %vm932_vm15 = vmor %vm930_vm13, %vm931_vm12  ;;  %1781 = vrcp.f32 %v791_v17  ;;  %vm946_vm2 = vweird.f32 %v791_v17  ;;  %v950_v29 = vand.u32 2147483647, %v791_v17 }
 0x20a   : > { %v927_v15 = vsub.f32 1.0, %v926_v34  ;;  %v923_v21 = vmul.f32 %v2082_v25, %v922_v4  ;;  %v924_v58 = vmul.f32 %v2086_v30, %v922_v4 }
 0x20b   : > { %v2253_v43 = vpop.eup %1777  ;;  %vm951_vm6 = vcmp.eq.f32.partialorder %v950_v29, 8.507059e+37 }
 0x20c   : > { %v2255_v9 = vpop.eup %1779  ;;  %v928_v50 = vmul.f32 %v1776_v37, %v927_v15 }
 0x20d   : > { %v810_v57 = vadd.f32 %v2255_v9, %v2253_v43 }
 0x20e   : > { %v929_v20 = vadd.f32 %v1776_v37, %v928_v50 }
 0x20f   : > { %811 = vadd.xlane.f32.xlu1 %v810_v57  ;;  %v1782_v22 = vpop.eup %1781 }
 0x210   : > { %v933_v6 = vsel %vm932_vm15, %v1776_v37, %v929_v20  ;;  %v942_v7 = vmul.f32 %v1782_v22, %v791_v17  ;;  %vm947_vm1 = vweird.f32 %v1782_v22 }
 0x211   : > { %v938_v10 = vsel %vm935_vm0, %v937_v38, %v933_v6  ;;  %vm948_vm3 = vmor %vm946_vm2, %vm947_vm1 }
 0x212   : > { %v939_v48 = vmul.f32 %v2096_v39, %v938_v10  ;;  %v940_v16 = vmul.f32 %v2098_v42, %v938_v10  ;;  %v943_v19 = vsub.f32 1.0, %v942_v7  ;;  %v952_v39 = vand.u32 2147483648, %v791_v17 }
 0x214   : > { %v1075_v40 = vpack.c.bf16 %v939_v48, %v923_v21  ;;  %v1076_v12 = vpack.c.bf16 %v940_v16, %v924_v58  ;;  %v944_v27 = vmul.f32 %v1782_v22, %v943_v19  ;;  %v953_v32 = vor.u32 1.1754944e-38, %v952_v39 }
 0x216   : > { %1204 = vmatmul.bf16.gmra.mxu2 %v1075_v40  ;;  %1253 = vmatmul.bf16.gmra.mxu3 %v1076_v12  ;;  %v945_v14 = vadd.f32 %v1782_v22, %v944_v27 }
 0x218   : > { %v949_v62 = vsel %vm948_vm3, %v1782_v22, %v945_v14 }
 0x219   : > { %v954_v33 = vsel %vm951_vm6, %v953_v32, %v949_v62 }
 0x21a   : > { %v955_v37 = vmul.f32 %v2104_v1, %v954_v33  ;;  %v956_v15 = vmul.f32 %v2106_v45, %v954_v33 }
 0x252   : > { %v794_v24 = vpop.xlane.xlu1 %793 }
 0x253   : > { %1783 = vrcp.f32 %v794_v24  ;;  %v968_v35 = vand.u32 2147483648, %v794_v24  ;;  %v966_v0 = vand.u32 2147483647, %v794_v24  ;;  %vm962_vm5 = vweird.f32 %v794_v24 }
 0x255   : > { %v969_v3 = vor.u32 1.1754944e-38, %v968_v35  ;;  %vm967_vm8 = vcmp.eq.f32.partialorder %v966_v0, 8.507059e+37 }
 0x259   : > { %v1784_v28 = vpop.eup %1783 }
 0x25a   : > { %v958_v25 = vmul.f32 %v1784_v28, %v794_v24  ;;  %v797_v30 = vpop.xlane.xlu2 %796  ;;  %vm963_vm4 = vweird.f32 %v1784_v28 }
 0x25b   : > { %1785 = vrcp.f32 %v797_v30  ;;  %vm964_vm7 = vmor %vm962_vm5, %vm963_vm4  ;;  %v984_v1 = vand.u32 2147483648, %v797_v30  ;;  %vm978_vm11 = vweird.f32 %v797_v30 }
 0x25c   : > { %v959_v42 = vsub.f32 1.0, %v958_v25 }
 0x25d   : > { %v985_v16 = vor.u32 1.1754944e-38, %v984_v1 }
 0x25e   : > { %v960_v59 = vmul.f32 %v1784_v28, %v959_v42 }
 0x260   : > { %v961_v8 = vadd.f32 %v1784_v28, %v960_v59 }
 0x261   : > { %v1786_v49 = vpop.eup %1785 }
 0x262   : > { %v800_v36 = vpop.xlane.xlu0 %799  ;;  %v965_v23 = vsel %vm964_vm7, %v1784_v28, %v961_v8  ;;  %v974_v54 = vmul.f32 %v1786_v49, %v797_v30  ;;  %vm979_vm9 = vweird.f32 %v1786_v49 }
 0x263   : > { %1787 = vrcp.f32 %v800_v36  ;;  %v970_v34 = vsel %vm967_vm8, %v969_v3, %v965_v23  ;;  %v1000_v6 = vand.u32 2147483648, %v800_v36  ;;  %vm980_vm12 = vmor %vm978_vm11, %vm979_vm9  ;;  %v998_v58 = vand.u32 2147483647, %v800_v36 }
 0x264   : > { %v975_v11 = vsub.f32 1.0, %v974_v54  ;;  %v971_v2 = vmul.f32 %v2131_v51, %v970_v34  ;;  %v972_v26 = vmul.f32 %v2137_v60, %v970_v34  ;;  %v982_v60 = vand.u32 2147483647, %v797_v30 }
 0x265   : > { %vm994_vm14 = vweird.f32 %v800_v36  ;;  %v1001_v17 = vor.u32 1.1754944e-38, %v1000_v6  ;;  %vm999_vm1 = vcmp.eq.f32.partialorder %v998_v58, 8.507059e+37 }
 0x266   : > { %v976_v47 = vmul.f32 %v1786_v49, %v975_v11  ;;  %v1077_v50 = vpack.c.bf16 %v971_v2, %v955_v37  ;;  %v1078_v52 = vpack.c.bf16 %v972_v26, %v956_v15  ;;  %vm983_vm15 = vcmp.eq.f32.partialorder %v982_v60, 8.507059e+37 }
 0x268   : > { %1209 = vmatmul.bf16.gmra.mxu2 %v1077_v50  ;;  %1258 = vmatmul.bf16.gmra.mxu3 %v1078_v52  ;;  %v977_v4 = vadd.f32 %v1786_v49, %v976_v47 }
 0x269   : > { %v1788_v53 = vpop.eup %1787  ;;  %v1190_v63 = vpop.f32.mrf.mxu2 }
 0x26a   : > { %v990_v57 = vmul.f32 %v1788_v53, %v800_v36  ;;  %v1239_v20 = vpop.f32.mrf.mxu3  ;;  %v2267_v51 = vpop.xlane.xlu1 %802  ;;  %v981_v48 = vsel %vm980_vm12, %v1786_v49, %v977_v4  ;;  %vm995_vm13 = vweird.f32 %v1788_v53 }
 0x26b   : > { %v1240_v38 = vadd.f32 %v1239_v20, %v1190_v63  ;;  %1789 = vrcp.f32 %v2267_v51  ;;  %v986_v12 = vsel %vm983_vm15, %v985_v16, %v981_v48  ;;  %vm996_vm0 = vmor %vm994_vm14, %vm995_vm13  ;;  %vm1010_vm3 = vweird.f32 %v2267_v51 }
 0x26c   : > { %v991_v45 = vsub.f32 1.0, %v990_v57  ;;  %v987_v39 = vmul.f32 %v2153_v31, %v986_v12  ;;  %v988_v30 = vmul.f32 %v2158_v44, %v986_v12  ;;  %v1014_v37 = vand.u32 2147483647, %v2267_v51 }
 0x26d   : > { %v1279_v10 = vpack.c.bf16 %v1240_v38, %v1240_v38 }
 0x26e   : > { %v992_v21 = vmul.f32 %v1788_v53, %v991_v45  ;;  %vm1015_vm8 = vcmp.eq.f32.partialorder %v1014_v37, 8.507059e+37 }
 0x26f   : > { %1296 = vst.msk [vmem:[%s2274_s8] sm:$0xf] %vm1295_vm10, %v1279_v10 }
 0x270   : > { %v993_v40 = vadd.f32 %v1788_v53, %v992_v21 }
 0x271   : > { %v1790_v22 = vpop.eup %1789  ;;  %v1192_v7 = vpop.f32.mrf.mxu2 }
 0x272   : > { %v1241_v19 = vpop.f32.mrf.mxu3  ;;  %v997_v24 = vsel %vm996_vm0, %v1788_v53, %v993_v40  ;;  %v1006_v27 = vmul.f32 %v1790_v22, %v2267_v51  ;;  %v806_v25 = vpop.xlane.xlu2 %805  ;;  %vm1011_vm2 = vweird.f32 %v1790_v22 }
 0x273   : > { %v1242_v28 = vadd.f32 %v1241_v19, %v1192_v7  ;;  %v1002_v14 = vsel %vm999_vm1, %v1001_v17, %v997_v24  ;;  %1791 = vrcp.f32 %v806_v25  ;;  %v1032_v54 = vand.u32 2147483648, %v806_v25  ;;  %vm2294_vm5 = vmor %vm1010_vm3, %vm1011_vm2 }
 0x274   : > { %v1007_v42 = vsub.f32 1.0, %v1006_v27  ;;  %v1003_v59 = vmul.f32 %v2174_v56, %v1002_v14  ;;  %v1004_v35 = vmul.f32 %v2181_v5, %v1002_v14  ;;  %v1016_v5 = vand.u32 2147483648, %v2267_v51 }
 0x275   : > { %v1280_v29 = vpack.c.bf16 %v1242_v28, %v1242_v28  ;;  %v1030_v2 = vand.u32 2147483647, %v806_v25  ;;  %vm1026_vm6 = vweird.f32 %v806_v25  ;;  %v1033_v52 = vor.u32 1.1754944e-38, %v1032_v54 }
 0x276   : > { %v1079_v62 = vpack.c.bf16 %v1003_v59, %v987_v39  ;;  %v1080_v32 = vpack.c.bf16 %v1004_v35, %v988_v30  ;;  %v1008_v0 = vmul.f32 %v1790_v22, %v1007_v42  ;;  %v1017_v47 = vor.u32 1.1754944e-38, %v1016_v5 }
 0x277   : > { %1297 = vst.msk [vmem:[%s2274_s8 + $0x4] sm:$0xf] %vm1295_vm10, %v1280_v29  ;;  %vm1031_vm9 = vcmp.eq.f32.partialorder %v1030_v2, 8.507059e+37 }
 0x278   : > { %1214 = vmatmul.bf16.gmra.mxu2 %v1079_v62  ;;  %1263 = vmatmul.bf16.gmra.mxu3 %v1080_v32  ;;  %v1009_v56 = vadd.f32 %v1790_v22, %v1008_v0 }
 0x279   : > { %v1792_v8 = vpop.eup %1791  ;;  %v1195_v33 = vpop.f32.mrf.mxu2 }
 0x27a   : > { %v1244_v49 = vpop.f32.mrf.mxu3  ;;  %v1022_v31 = vmul.f32 %v1792_v8, %v806_v25  ;;  %v2286_v44 = vpop.xlane.xlu0 %808  ;;  %vm1027_vm4 = vweird.f32 %v1792_v8  ;;  %v1013_v15 = vsel %vm2294_vm5, %v1790_v22, %v1009_v56 }
 0x27b   : > { %v1245_v36 = vadd.f32 %v1244_v49, %v1195_v33  ;;  %1793 = vrcp.f32 %v2286_v44  ;;  %vm1028_vm7 = vmor %vm1026_vm6, %vm1027_vm4  ;;  %v1018_v1 = vsel %vm1015_vm8, %v1017_v47, %v1013_v15  ;;  %vm1042_vm12 = vweird.f32 %v2286_v44 }
 0x27c   : > { %v1023_v23 = vsub.f32 1.0, %v1022_v31  ;;  %v1019_v6 = vmul.f32 %v2200_v61, %v1018_v1  ;;  %v1020_v21 = vmul.f32 %v2205_v13, %v1018_v1  ;;  %v1048_v61 = vand.u32 2147483648, %v2286_v44 }
 0x27d   : > { %v1281_v3 = vpack.c.bf16 %v1245_v36, %v1245_v36  ;;  %v1046_v13 = vand.u32 2147483647, %v2286_v44 }
 0x27e   : > { %v1024_v34 = vmul.f32 %v1792_v8, %v1023_v23  ;;  %v1049_v25 = vor.u32 1.1754944e-38, %v1048_v61 }
 0x27f   : > { %1298 = vst.msk [vmem:[%s2274_s8 + $0x8] sm:$0xf] %vm1295_vm10, %v1281_v3  ;;  %vm1047_vm15 = vcmp.eq.f32.partialorder %v1046_v13, 8.507059e+37 }
 0x280   : > { %v1025_v26 = vadd.f32 %v1792_v8, %v1024_v34 }
 0x281   : > { %v1794_v50 = vpop.eup %1793  ;;  %v1197_v53 = vpop.f32.mrf.mxu2 }
 0x282   : > { %v1246_v57 = vpop.f32.mrf.mxu3  ;;  %v1038_v63 = vmul.f32 %v1794_v50, %v2286_v44  ;;  %v812_v4 = vpop.xlane.xlu1 %811  ;;  %v1029_v38 = vsel %vm1028_vm7, %v1792_v8, %v1025_v26  ;;  %vm1043_vm11 = vweird.f32 %v1794_v50 }
 0x283   : > { %v1247_v20 = vadd.f32 %v1246_v57, %v1197_v53  ;;  %1795 = vrcp.f32 %v812_v4  ;;  %v1034_v60 = vsel %vm1031_vm9, %v1033_v52, %v1029_v38  ;;  %vm1044_vm13 = vmor %vm1042_vm12, %vm1043_vm11  ;;  %v1064_v27 = vand.u32 2147483648, %v812_v4 }
 0x284   : > { %v1039_v51 = vsub.f32 1.0, %v1038_v63  ;;  %v1035_v10 = vmul.f32 %v2221_v18, %v1034_v60  ;;  %v1036_v48 = vmul.f32 %v2228_v46, %v1034_v60  ;;  %v1062_v39 = vand.u32 2147483647, %v812_v4 }
 0x285   : > { %v1282_v45 = vpack.c.bf16 %v1247_v20, %v1247_v20  ;;  %vm1058_vm0 = vweird.f32 %v812_v4  ;;  %v1065_v29 = vor.u32 1.1754944e-38, %v1064_v27 }
 0x286   : > { %v1040_v58 = vmul.f32 %v1794_v50, %v1039_v51  ;;  %v1081_v16 = vpack.c.bf16 %v1035_v10, %v1019_v6  ;;  %v1082_v40 = vpack.c.bf16 %v1036_v48, %v1020_v21  ;;  %vm1063_vm2 = vcmp.eq.f32.partialorder %v1062_v39, 8.507059e+37 }
 0x287   : > { %1299 = vst.msk [vmem:[%s2274_s8 + $0xc] sm:$0xf] %vm1295_vm10, %v1282_v45 }
 0x288   : > { %v1041_v17 = vadd.f32 %v1794_v50, %v1040_v58  ;;  %1219 = vmatmul.bf16.gmra.mxu2 %v1081_v16  ;;  %1268 = vmatmul.bf16.gmra.mxu3 %v1082_v40 }
 0x289   : > { %v1796_v12 = vpop.eup %1795  ;;  %v1200_v22 = vpop.f32.mrf.mxu2 }
 0x28a   : > { %v1249_v7 = vpop.f32.mrf.mxu3  ;;  %v1054_v18 = vmul.f32 %v1796_v12, %v812_v4  ;;  %v1045_v28 = vsel %vm1044_vm13, %v1794_v50, %v1041_v17  ;;  %vm1059_vm14 = vweird.f32 %v1796_v12 }
 0x28b   : > { %v1250_v19 = vadd.f32 %v1249_v7, %v1200_v22  ;;  %v1050_v42 = vsel %vm1047_vm15, %v1049_v25, %v1045_v28  ;;  %vm1060_vm1 = vmor %vm1058_vm0, %vm1059_vm14 }
 0x28c   : > { %v1055_v46 = vsub.f32 1.0, %v1054_v18  ;;  %v1051_v0 = vmul.f32 %v2241_v41, %v1050_v42  ;;  %v1052_v31 = vmul.f32 %v2246_v55, %v1050_v42 }
 0x28d   : > { %v1283_v24 = vpack.c.bf16 %v1250_v19, %v1250_v19 }
 0x28e   : > { %v1056_v14 = vmul.f32 %v1796_v12, %v1055_v46 }
 0x28f   : > { %1300 = vst.msk [vmem:[%s2274_s8 + $0x10] sm:$0xf] %vm1295_vm10, %v1283_v24 }
 0x290   : > { %v1057_v30 = vadd.f32 %v1796_v12, %v1056_v14 }
 0x291   : > { %v1202_v59 = vpop.f32.mrf.mxu2 }
 0x292   : > { %v1251_v35 = vpop.f32.mrf.mxu3  ;;  %v1061_v32 = vsel %vm1060_vm1, %v1796_v12, %v1057_v30 }
 0x293   : > { %v1252_v62 = vadd.f32 %v1251_v35, %v1202_v59  ;;  %v1066_v8 = vsel %vm1063_vm2, %v1065_v29, %v1061_v32 }
 0x294   : > { %v1067_v49 = vmul.f32 %v2253_v43, %v1066_v8  ;;  %v1068_v36 = vmul.f32 %v2255_v9, %v1066_v8 }
 0x295   : > { %v1284_v33 = vpack.c.bf16 %v1252_v62, %v1252_v62 }
 0x296   : > { %v1083_v44 = vpack.c.bf16 %v1067_v49, %v1051_v0  ;;  %v1084_v56 = vpack.c.bf16 %v1068_v36, %v1052_v31 }
 0x297   : > { %1301 = vst.msk [vmem:[%s2274_s8 + $0x14] sm:$0xf] %vm1295_vm10, %v1284_v33 }
 0x298   : > { %1224 = vmatmul.bf16.gmra.mxu2 %v1083_v44  ;;  %1273 = vmatmul.bf16.gmra.mxu3 %v1084_v56 }
 0x299   : > { %v1205_v5 = vpop.f32.mrf.mxu2 }
 0x29a   : > { %v1254_v23 = vpop.f32.mrf.mxu3 }
 0x29b   : > { %v1255_v3 = vadd.f32 %v1254_v23, %v1205_v5 }
 0x29d   : > { %v1285_v41 = vpack.c.bf16 %v1255_v3, %v1255_v3 }
 0x29f   : > { %1302 = vst.msk [vmem:[%s2274_s8 + $0x18] sm:$0xf] %vm1295_vm10, %v1285_v41 }
 0x2a1   : > { %v1207_v43 = vpop.f32.mrf.mxu2 }
 0x2a2   : > { %v1256_v54 = vpop.f32.mrf.mxu3 }
 0x2a3   : > { %v1257_v55 = vadd.f32 %v1256_v54, %v1207_v43 }
 0x2a5   : > { %v1286_v37 = vpack.c.bf16 %v1257_v55, %v1257_v55 }
 0x2a7   : > { %1303 = vst.msk [vmem:[%s2274_s8 + $0x1c] sm:$0xf] %vm1295_vm10, %v1286_v37 }
 0x2eb   : > { %v1210_v9 = vpop.f32.mrf.mxu2  ;;  %v1259_v34 = vpop.f32.mrf.mxu3 }
 0x2ec   : > { %v1260_v11 = vadd.f32 %v1259_v34, %v1210_v9 }
 0x2ee   : > { %v1287_v2 = vpack.c.bf16 %v1260_v11, %v1260_v11 }
 0x2f0   : > { %1304 = vst.msk [vmem:[%s2274_s8 + $0x20] sm:$0xf] %vm1295_vm10, %v1287_v2 }
 0x2f3   : > { %v1212_v15 = vpop.f32.mrf.mxu2  ;;  %v1261_v26 = vpop.f32.mrf.mxu3 }
 0x2f4   : > { %v1262_v47 = vadd.f32 %v1261_v26, %v1212_v15 }
 0x2f6   : > { %v1288_v50 = vpack.c.bf16 %v1262_v47, %v1262_v47 }
 0x2f8   : > { %1305 = vst.msk [vmem:[%s2274_s8 + $0x24] sm:$0xf] %vm1295_vm10, %v1288_v50 }
 0x2fb   : > { %v1215_v52 = vpop.f32.mrf.mxu2  ;;  %v1264_v53 = vpop.f32.mrf.mxu3 }
 0x2fc   : > { %v1265_v57 = vadd.f32 %v1264_v53, %v1215_v52 }
 0x2fe   : > { %v1289_v63 = vpack.c.bf16 %v1265_v57, %v1265_v57 }
 0x300   : > { %1306 = vst.msk [vmem:[%s2274_s8 + $0x28] sm:$0xf] %vm1295_vm10, %v1289_v63 }
 0x303   : > { %v1217_v20 = vpop.f32.mrf.mxu2  ;;  %v1266_v4 = vpop.f32.mrf.mxu3 }
 0x304   : > { %v1267_v1 = vadd.f32 %v1266_v4, %v1217_v20 }
 0x306   : > { %v1290_v38 = vpack.c.bf16 %v1267_v1, %v1267_v1 }
 0x308   : > { %1307 = vst.msk [vmem:[%s2274_s8 + $0x2c] sm:$0xf] %vm1295_vm10, %v1290_v38 }
 0x30b   : > { %v1220_v51 = vpop.f32.mrf.mxu2  ;;  %v1269_v45 = vpop.f32.mrf.mxu3 }
 0x30c   : > { %v1270_v60 = vadd.f32 %v1269_v45, %v1220_v51 }
 0x30e   : > { %v1291_v6 = vpack.c.bf16 %v1270_v60, %v1270_v60 }
 0x310   : > { %1308 = vst.msk [vmem:[%s2274_s8 + $0x30] sm:$0xf] %vm1295_vm10, %v1291_v6 }
 0x313   : > { %v1222_v10 = vpop.f32.mrf.mxu2  ;;  %v1271_v21 = vpop.f32.mrf.mxu3 }
 0x314   : > { %v1272_v48 = vadd.f32 %v1271_v21, %v1222_v10 }
 0x316   : > { %v1292_v58 = vpack.c.bf16 %v1272_v48, %v1272_v48 }
 0x318   : > { %1309 = vst.msk [vmem:[%s2274_s8 + $0x34] sm:$0xf] %vm1295_vm10, %v1292_v58 }
 0x31b   : > { %v1225_v16 = vpop.f32.mrf.mxu2  ;;  %v1274_v40 = vpop.f32.mrf.mxu3 }
 0x31c   : > { %v1275_v12 = vadd.f32 %v1274_v40, %v1225_v16 }
 0x31e   : > { %v1293_v17 = vpack.c.bf16 %v1275_v12, %v1275_v12 }
 0x320   : > { %1310 = vst.msk [vmem:[%s2274_s8 + $0x38] sm:$0xf] %vm1295_vm10, %v1293_v17 }
 0x323   : > { %v1227_v22 = vpop.f32.mrf.mxu2  ;;  %v1276_v7 = vpop.f32.mrf.mxu3 }
 0x324   : > { %v1277_v61 = vadd.f32 %v1276_v7, %v1227_v22 }
 0x326   : > { %v1294_v18 = vpack.c.bf16 %v1277_v61, %v1277_v61 }
 0x328   : > { %1311 = vst.msk [vmem:[%s2274_s8 + $0x3c] sm:$0xf] %vm1295_vm10, %v1294_v18 }
 0x329 PF: > { %s13_s16 = sadd.s32 1, %s1835_s16   ;;  %s2365_s12 = smov %s1827_s14 }
 0x32a   : > { %p10_p7 = scmp.ge.s32.totalorder %s13_s16, 6   ;;  %s2366_s13 = smov %s1831_s15 }
 0x32b   : > { %s2367_s14 = smov %s2370_s17  ;;  %s2368_s15 = smov %s2374_s18 }
 0x32c   :  { %12 = sbr.rel (!%p10_p7) target bundleno = 3 (0x3), region = 68 }

// kernel: separate_non_local_forward.7
= control target key start
LH: loop header
LB: loop body
LE: loop exit
PB: predicated region body
PF: predicated region fallthrough
CT: control target
= control target key end

     0   :  { %13 = vsyncpa [#allocation3], 0  ;;  %s2301_s0 = inlined_call_operand.vmem [shape: bf16[2048,16], index: 0, kind: input, shape index: {}]   ;;  %s2302_s1 = inlined_call_operand.vmem [shape: bf16[2048,16], index: 1, kind: input, shape index: {}]   ;;  %s2303_s2 = inlined_call_operand.vmem [shape: bf16[2048,16], index: 2, kind: input, shape index: {}]   ;;  %s2304_s3 = inlined_call_operand.vmem [shape: f32[2048,32], index: 3, kind: input, shape index: {}]   ;;  %s2305_s4 = inlined_call_operand.vmem [shape: bf16[16,32], index: 4, kind: input, shape index: {}]   ;;  %s2306_s5 = inlined_call_operand.vmem [shape: bf16[16,32], index: 5, kind: input, shape index: {}]   ;;  %s2307_s6 = inlined_call_operand.vmem [shape: bf16[16,32], index: 6, kind: input, shape index: {}]   ;;  %s2308_s7 = inlined_call_operand.vmem [shape: f32[1,32], index: 7, kind: input, shape index: {}]   ;;  %s2309_s8 = inlined_call_operand.hbm [shape: f32[2048,32], index: 8, kind: output, shape index: {}]  }
   0x1   :  { %15 = vsyncpa [#allocation3 + $0x1], 0  ;;  %s1903_s27 = smov 0   ;;  %s1905_s28 = smov 0  }
   0x2   :  { %s1907_s29 = smov 0   ;;  %s1909_s30 = smov 0  }
   0x3 LB: > { %s1924_s9 = sadd.s32 4294967295, %s1854_s30   ;;  %s1425_s10 = sadd.s32 4294967294, %s1854_s30   ;;  %s1854_s30 = sphi %s1909_s30, %s2315_s30   ;;  %s1850_s29 = sphi %s1907_s29, %s2314_s29   ;;  %s1846_s28 = sphi %s1905_s28, %s2313_s28   ;;  %s1842_s27 = sphi %s1903_s27, %s2312_s27  }
   0x4   : > { %s1928_s11 = sadd.s32 1, %s1854_s30   ;;  %s216_s12 = sadd.s32 1, %s1850_s29 }
   0x5   : > { %s213_s13 = ssub.s32 %s1854_s30, %s1928_s11  ;;  %p226_p0 = scmp.ne.s32.totalorder %s1850_s29, %s1846_s28 }
   0x6   : > { %p214_p1 = scmp.eq.s32.totalorder %s213_s13, 0  ;;  %p227_p2 = scmp.eq.s32.totalorder %s1924_s9, 7 }
   0x7   : > { %p232_p3 = scmp.ne.s32.totalorder %s1846_s28, %s1842_s27  ;;  %p233_p4 = scmp.eq.s32.totalorder %s1425_s10, 7 }
   0x8   : > { %s1939_s14 = scalar_select %p214_p1, %s1850_s29, %s216_s12  }
   0x9   : > { %p1941_p5 = por %p227_p2, %p226_p0  ;;  %p1945_p6 = por %p233_p4, %p232_p3 }
   0xa   : > { %p1428_p7 = scmp.ge.s32.totalorder %s1854_s30, 1  ;;  %p299_p8 = scmp.lt.s32.totalorder %s1854_s30, 9 }
   0xc   : > { %p300_p9 = pnand %p1428_p7, %p299_p8 }
   0xd   : > { %s1430_s23 = sshll.u32 (!%p300_p9), %s1924_s9, 5  ;;  %s345_s22 = sand.u32 (!%p300_p9), 1, %s1846_s28  }
   0xe   : > { %303 = sbr.rel (%p300_p9) target bundleno = 352 (0x160), region = 52  ;;  %p349_p10 = scmp.lt.s32.totalorder (!%p300_p9), %s1430_s23, 255 }
  0x13   : > { %v1728_v0 = vld [vmem:[%s2306_s5] sm:$0xff]  ;;  %s2317_s23 = smov (!%p349_p10, %s1430_s23), 255  ;;  %vm528_vm0 = vcmask 130048   ;;  %vm1278_vm1 = vcmask 261120  }
  0x14   : > { %v1711_v1 = vld [vmem:[%s2305_s4] sm:$0xff]  ;;  %584 = vmatpush.bf16.msra.mxu0 %v1728_v0  ;;  %1747 = vmatpush.bf16.msra.mxu3 %v1728_v0  ;;  %s1431_s24 = sshll.u32 %s2317_s23, 2  ;;  %s1437_s21 = sshll.u32 %s2317_s23, 3 }
  0x15   : > { %v1745_v2 = vld [vmem:[%s2307_s6] sm:$0xff]  ;;  %807 = vmatpush.bf16.msra.mxu1 %v1711_v1  ;;  %s1967_s10 = scalar_lea.vmem %s2302_s1, %s1431_s24  ;;  %s1972_s17 = scalar_lea.vmem %s2301_s0, %s1431_s24 }
  0x16   : > { %1064 = vmatpush.bf16.msra.mxu2 %v1745_v2  ;;  %v1712_v3 = vld [vmem:[%s1967_s10] sm:$0xff]  ;;  %s1980_s20 = scalar_lea.vmem %s2303_s2, %s1431_s24  ;;  %v1713_v7 = vld [vmem:[%s1967_s10 + $0x8] sm:$0xff]  ;;  %v1714_v11 = vld [vmem:[%s1967_s10 + $0x10] sm:$0xff]  ;;  %s2058_s26 = scalar_lea.vmem %s2304_s3, %s1437_s21 }
  0x17   : > { %v1724_v4 = vld [vmem:[%s1967_s10 + $0x60] sm:$0xff]  ;;  %1506 = vmatmul.msk.bf16.vlgmr.msra.gmra.mxu0 %vm528_vm0, %v1712_v3  ;;  %v1725_v8 = vld [vmem:[%s1967_s10 + $0x68] sm:$0xff]  ;;  %v1726_v12 = vld [vmem:[%s1967_s10 + $0x70] sm:$0xff]  ;;  %s1429_s23 = sshll.u32 %s345_s22, 8  ;;  %s1312_s24 = scalar_lea.sflag [#allocation3], %s345_s22 }
  0x18   : > { %1748 = vmatpush.bf16.msrb.mxu3 %v1711_v1  ;;  %v1695_v5 = vld [vmem:[%s1972_s17] sm:$0xff]  ;;  %v1696_v9 = vld [vmem:[%s1972_s17 + $0x8] sm:$0xff]  ;;  %v1697_v13 = vld [vmem:[%s1972_s17 + $0x10] sm:$0xff]  ;;  %s2069_s18 = scalar_lea.vmem [#allocation2], %s1429_s23  ;;  %s1812_s23 = scalar_lea.hbm %s2309_s8, 2048 }
  0x19   : > { %v1729_v6 = vld [vmem:[%s1980_s20] sm:$0xff]  ;;  %1518 = vmatmul.msk.bf16.vlgmr.msra.gmra.mxu3 %vm528_vm0, %v1724_v4  ;;  %1590 = vmatmul.msk.bf16.vlgmr.msra.gmra.mxu1 %vm528_vm0, %v1695_v5  ;;  %v1730_v10 = vld [vmem:[%s1980_s20 + $0x8] sm:$0xff]  ;;  %v1731_v14 = vld [vmem:[%s1980_s20 + $0x10] sm:$0xff] }
  0x1a   : > { %1674 = vmatmul.msk.bf16.vlgmr.msra.gmra.mxu2 %vm528_vm0, %v1729_v6  ;;  %v1715_v15 = vld [vmem:[%s1967_s10 + $0x18] sm:$0xff]  ;;  %v1716_v19 = vld [vmem:[%s1967_s10 + $0x20] sm:$0xff]  ;;  %v1717_v23 = vld [vmem:[%s1967_s10 + $0x28] sm:$0xff] }
  0x1b   : > { %v1727_v16 = vld [vmem:[%s1967_s10 + $0x78] sm:$0xff]  ;;  %v1707_v20 = vld [vmem:[%s1972_s17 + $0x60] sm:$0xff]  ;;  %v1708_v24 = vld [vmem:[%s1972_s17 + $0x68] sm:$0xff] }
  0x1c   : > { %1749 = vmatpush.bf16.msra.mxu3 %v1745_v2  ;;  %v1698_v17 = vld [vmem:[%s1972_s17 + $0x18] sm:$0xff]  ;;  %v1699_v21 = vld [vmem:[%s1972_s17 + $0x20] sm:$0xff]  ;;  %v1700_v25 = vld [vmem:[%s1972_s17 + $0x28] sm:$0xff] }
  0x1d   : > { %v1732_v18 = vld [vmem:[%s1980_s20 + $0x18] sm:$0xff]  ;;  %v1733_v22 = vld [vmem:[%s1980_s20 + $0x20] sm:$0xff]  ;;  %v1734_v26 = vld [vmem:[%s1980_s20 + $0x28] sm:$0xff] }
  0x1e   : > { %v1718_v27 = vld [vmem:[%s1967_s10 + $0x30] sm:$0xff]  ;;  %v1719_v31 = vld [vmem:[%s1967_s10 + $0x38] sm:$0xff]  ;;  %v1720_v35 = vld [vmem:[%s1967_s10 + $0x40] sm:$0xff] }
  0x1f   : > { %v1709_v28 = vld [vmem:[%s1972_s17 + $0x70] sm:$0xff]  ;;  %v1710_v32 = vld [vmem:[%s1972_s17 + $0x78] sm:$0xff]  ;;  %v1741_v36 = vld [vmem:[%s1980_s20 + $0x60] sm:$0xff] }
  0x20   : > { %v1701_v29 = vld [vmem:[%s1972_s17 + $0x30] sm:$0xff]  ;;  %v1702_v33 = vld [vmem:[%s1972_s17 + $0x38] sm:$0xff]  ;;  %v1703_v38 = vld [vmem:[%s1972_s17 + $0x40] sm:$0xff] }
  0x21   : > { %v1735_v30 = vld [vmem:[%s1980_s20 + $0x30] sm:$0xff]  ;;  %v1736_v34 = vld [vmem:[%s1980_s20 + $0x38] sm:$0xff]  ;;  %v1737_v39 = vld [vmem:[%s1980_s20 + $0x40] sm:$0xff] }
  0x22   : > { %v2063_v43 = vld [vmem:[%s2308_s7] ss:$0 sm:$0xff]  ;;  %v1721_v54 = vld [vmem:[%s1967_s10 + $0x48] sm:$0xff]  ;;  %v1216_v5 = vld [vmem:[%s2058_s26 + $0x10] sm:$0xff] }
  0x23   : > { %v1214_v47 = vld [vmem:[%s2058_s26] sm:$0xff]  ;;  %v1742_v55 = vld [vmem:[%s1980_s20 + $0x68] sm:$0xff] }
  0x24   : > { %v1704_v58 = vld [vmem:[%s1972_s17 + $0x48] sm:$0xff] }
  0x25   : > { %v1738_v59 = vld [vmem:[%s1980_s20 + $0x48] sm:$0xff] }
  0x26   : > { %v1215_v60 = vld [vmem:[%s2058_s26 + $0x8] sm:$0xff] }
  0x27   : > { %1507 = vmatmul.msk.bf16.gmra.mxu0 %vm528_vm0, %v1713_v7 }
  0x29   : > { %1519 = vmatmul.msk.bf16.gmra.mxu3 %vm528_vm0, %v1725_v8  ;;  %1591 = vmatmul.msk.bf16.gmra.mxu1 %vm528_vm0, %v1696_v9 }
  0x2a   : > { %1675 = vmatmul.msk.bf16.gmra.mxu2 %vm528_vm0, %v1730_v10 }
  0x37   : > { %1508 = vmatmul.msk.bf16.gmra.mxu0 %vm528_vm0, %v1714_v11 }
  0x39   : > { %1520 = vmatmul.msk.bf16.gmra.mxu3 %vm528_vm0, %v1726_v12  ;;  %1592 = vmatmul.msk.bf16.gmra.mxu1 %vm528_vm0, %v1697_v13  ;;  %v1722_v12 = vld [vmem:[%s1967_s10 + $0x50] sm:$0xff] }
  0x3a   : > { %1676 = vmatmul.msk.bf16.gmra.mxu2 %vm528_vm0, %v1731_v14  ;;  %v1743_v13 = vld [vmem:[%s1980_s20 + $0x70] sm:$0xff] }
  0x47   : > { %1509 = vmatmul.msk.bf16.gmra.mxu0 %vm528_vm0, %v1715_v15 }
  0x49   : > { %1521 = vmatmul.msk.bf16.gmra.mxu3 %vm528_vm0, %v1727_v16  ;;  %1593 = vmatmul.msk.bf16.gmra.mxu1 %vm528_vm0, %v1698_v17  ;;  %v1705_v16 = vld [vmem:[%s1972_s17 + $0x50] sm:$0xff] }
  0x4a   : > { %1677 = vmatmul.msk.bf16.gmra.mxu2 %vm528_vm0, %v1732_v18  ;;  %v1739_v17 = vld [vmem:[%s1980_s20 + $0x50] sm:$0xff]  ;;  %v1217_v18 = vld [vmem:[%s2058_s26 + $0x18] sm:$0xff] }
  0x57   : > { %1510 = vmatmul.msk.bf16.gmra.mxu0 %vm528_vm0, %v1716_v19 }
  0x59   : > { %1602 = vmatmul.msk.bf16.vlgmr.msrb.gmra.mxu3 %vm528_vm0, %v1707_v20  ;;  %1594 = vmatmul.msk.bf16.gmra.mxu1 %vm528_vm0, %v1699_v21 }
  0x5a   : > { %1678 = vmatmul.msk.bf16.gmra.mxu2 %vm528_vm0, %v1733_v22 }
  0x67   : > { %1511 = vmatmul.msk.bf16.gmra.mxu0 %vm528_vm0, %v1717_v23 }
  0x69   : > { %1603 = vmatmul.msk.bf16.gmra.mxu3 %vm528_vm0, %v1708_v24  ;;  %1595 = vmatmul.msk.bf16.gmra.mxu1 %vm528_vm0, %v1700_v25 }
  0x6a   : > { %1679 = vmatmul.msk.bf16.gmra.mxu2 %vm528_vm0, %v1734_v26 }
  0x77   : > { %1512 = vmatmul.msk.bf16.gmra.mxu0 %vm528_vm0, %v1718_v27  ;;  %v1218_v27 = vld [vmem:[%s2058_s26 + $0x20] sm:$0xff] }
  0x79   : > { %1604 = vmatmul.msk.bf16.gmra.mxu3 %vm528_vm0, %v1709_v28  ;;  %1596 = vmatmul.msk.bf16.gmra.mxu1 %vm528_vm0, %v1701_v29 }
  0x7a   : > { %1680 = vmatmul.msk.bf16.gmra.mxu2 %vm528_vm0, %v1735_v30 }
  0x87   : > { %1513 = vmatmul.msk.bf16.gmra.mxu0 %vm528_vm0, %v1719_v31 }
  0x89   : > { %1605 = vmatmul.msk.bf16.gmra.mxu3 %vm528_vm0, %v1710_v32  ;;  %1597 = vmatmul.msk.bf16.gmra.mxu1 %vm528_vm0, %v1702_v33 }
  0x8a   : > { %1681 = vmatmul.msk.bf16.gmra.mxu2 %vm528_vm0, %v1736_v34  ;;  %v1723_v34 = vld [vmem:[%s1967_s10 + $0x58] sm:$0xff]  ;;  %s1746_s10 = sshll.u32 %s1924_s9, 8  ;;  %s1324_s9 = sshll.u32 %s2069_s18, 4  ;;  %s1325_s9 = int_to_ptr.vmem [resolvable:$true] %s1324_s9 }
  0x94   : > { %v586_v37 = vpop.f32.mrf.mxu0 }
  0x96   : > { %v809_v40 = vpop.f32.mrf.mxu1 }
  0x97   : > { %1514 = vmatmul.msk.bf16.gmra.mxu0 %vm528_vm0, %v1720_v35  ;;  %v810_v41 = vadd.f32 %v809_v40, %v586_v37  ;;  %v1744_v35 = vld [vmem:[%s1980_s20 + $0x78] sm:$0xff]  ;;  %v1219_v40 = vld [vmem:[%s2058_s26 + $0x28] sm:$0xff] }
  0x99   : > { %1686 = vmatmul.msk.bf16.vlgmr.msra.gmra.mxu3 %vm528_vm0, %v1741_v36  ;;  %1598 = vmatmul.msk.bf16.gmra.mxu1 %vm528_vm0, %v1703_v38  ;;  %v1706_v38 = vld [vmem:[%s1972_s17 + $0x58] sm:$0xff] }
  0x9a   : > { %1682 = vmatmul.msk.bf16.gmra.mxu2 %vm528_vm0, %v1737_v39  ;;  %v1740_v39 = vld [vmem:[%s1980_s20 + $0x58] sm:$0xff]  ;;  %s1323_s20 = scalar_lea.hbm %s2309_s8, %s1746_s10 }
  0x9b   : > { %s1326_s21 = sshll.u32 %s1323_s20, 4  ;;  %s1327_s21 = int_to_ptr.hbm [resolvable:$true] %s1326_s21 }
  0x9c   : > { %v2053_v42 = vpop.f32.mrf.mxu3  ;;  %v588_v46 = vpop.f32.mrf.mxu0  ;;  %s1806_s25 = sshra.s32 %s1327_s21, 4  ;;  %s1807_s25 = int_to_ptr.hbm [resolvable:$true] %s1806_s25 }
  0x9d   : > { %v1066_v44 = vpop.f32.mrf.mxu2  ;;  %s1808_s12 = scalar_lea.hbm %s1807_s25, 256  ;;  %p1813_p0 = scmp.lt.s32.totalorder %s1807_s25, %s2309_s8 }
  0x9e   : > { %v1146_v45 = vadd.f32 %v1066_v44, %v810_v41  ;;  %v811_v48 = vpop.f32.mrf.mxu1  ;;  %p1809_p11 = scmp.ne.s32.totalorder %s1807_s25, %s1808_s12  ;;  %p1814_p1 = scmp.lt.s32.totalorder %s1812_s23, %s1808_s12 }
  0x9f   : > { %v812_v51 = vadd.f32 %v811_v48, %v588_v46 }
  0xa0   : > { %v1182_v49 = vadd.f32 %v2063_v43, %v1146_v45  ;;  %p1810_p12 = pnand %p1809_p11, %p1941_p5  ;;  %p1815_p2 = por %p1814_p1, %p1813_p0 }
  0xa2   : > { %v1246_v50 = vadd.f32 %v1214_v47, %v1182_v49  ;;  %p1811_p13 = pneg %p1810_p12 }
  0xa4   : > { %1279 = vst.msk [vmem:[%s2069_s18] sm:$0xff] %vm1278_vm1, %v1246_v50  ;;  %v2073_v52 = vpop.f32.mrf.mxu3  ;;  %v591_v57 = vpop.f32.mrf.mxu0  ;;  %p1816_p3 = pnand %p1815_p2, %p1811_p13 }
  0xa5   : > { %v1068_v53 = vpop.f32.mrf.mxu2 }
  0xa6   : > { %v1147_v56 = vadd.f32 %v1068_v53, %v812_v51  ;;  %v814_v61 = vpop.f32.mrf.mxu1  ;;  %v1220_v51 = vld [vmem:[%s2058_s26 + $0x30] sm:$0xff] }
  0xa7   : > { %1515 = vmatmul.msk.bf16.gmra.mxu0 %vm528_vm0, %v1721_v54  ;;  %v815_v0 = vadd.f32 %v814_v61, %v591_v57  ;;  %v1221_v61 = vld [vmem:[%s2058_s26 + $0x38] sm:$0xff] }
  0xa8   : > { %v1183_v62 = vadd.f32 %v2063_v43, %v1147_v56 }
  0xa9   : > { %1687 = vmatmul.msk.bf16.gmra.mxu3 %vm528_vm0, %v1742_v55  ;;  %1599 = vmatmul.msk.bf16.gmra.mxu1 %vm528_vm0, %v1704_v58 }
  0xaa   : > { %v1247_v63 = vadd.f32 %v1215_v60, %v1183_v62  ;;  %1683 = vmatmul.msk.bf16.gmra.mxu2 %vm528_vm0, %v1738_v59 }
  0xac   : > { %1280 = vst.msk [vmem:[%s2069_s18 + $0x8] sm:$0xff] %vm1278_vm1, %v1247_v63  ;;  %v2087_v1 = vpop.f32.mrf.mxu3  ;;  %v593_v4 = vpop.f32.mrf.mxu0 }
  0xad   : > { %v1071_v2 = vpop.f32.mrf.mxu2 }
  0xae   : > { %v1148_v3 = vadd.f32 %v1071_v2, %v815_v0  ;;  %v816_v6 = vpop.f32.mrf.mxu1 }
  0xaf   : > { %v817_v9 = vadd.f32 %v816_v6, %v593_v4 }
  0xb0   : > { %v1184_v7 = vadd.f32 %v2063_v43, %v1148_v3 }
  0xb2   : > { %v1248_v8 = vadd.f32 %v1216_v5, %v1184_v7  ;;  %v1222_v7 = vld [vmem:[%s2058_s26 + $0x40] sm:$0xff] }
  0xb4   : > { %1281 = vst.msk [vmem:[%s2069_s18 + $0x10] sm:$0xff] %vm1278_vm1, %v1248_v8  ;;  %v2093_v10 = vpop.f32.mrf.mxu3  ;;  %v596_v15 = vpop.f32.mrf.mxu0 }
  0xb5   : > { %v1073_v11 = vpop.f32.mrf.mxu2 }
  0xb6   : > { %v1149_v14 = vadd.f32 %v1073_v11, %v817_v9  ;;  %v819_v19 = vpop.f32.mrf.mxu1 }
  0xb7   : > { %1516 = vmatmul.msk.bf16.gmra.mxu0 %vm528_vm0, %v1722_v12  ;;  %v820_v22 = vadd.f32 %v819_v19, %v596_v15 }
  0xb8   : > { %v1185_v20 = vadd.f32 %v2063_v43, %v1149_v14 }
  0xb9   : > { %1688 = vmatmul.msk.bf16.gmra.mxu3 %vm528_vm0, %v1743_v13  ;;  %1600 = vmatmul.msk.bf16.gmra.mxu1 %vm528_vm0, %v1705_v16 }
  0xba   : > { %v1249_v21 = vadd.f32 %v1217_v18, %v1185_v20  ;;  %1684 = vmatmul.msk.bf16.gmra.mxu2 %vm528_vm0, %v1739_v17  ;;  %v1223_v17 = vld [vmem:[%s2058_s26 + $0x48] sm:$0xff] }
  0xbc   : > { %1282 = vst.msk [vmem:[%s2069_s18 + $0x18] sm:$0xff] %vm1278_vm1, %v1249_v21  ;;  %v2107_v23 = vpop.f32.mrf.mxu3  ;;  %v598_v26 = vpop.f32.mrf.mxu0 }
  0xbd   : > { %v1076_v24 = vpop.f32.mrf.mxu2 }
  0xbe   : > { %v1150_v25 = vadd.f32 %v1076_v24, %v820_v22  ;;  %v821_v28 = vpop.f32.mrf.mxu1 }
  0xbf   : > { %v822_v31 = vadd.f32 %v821_v28, %v598_v26 }
  0xc0   : > { %v1186_v29 = vadd.f32 %v2063_v43, %v1150_v25 }
  0xc2   : > { %v1250_v30 = vadd.f32 %v1218_v27, %v1186_v29  ;;  %v1224_v27 = vld [vmem:[%s2058_s26 + $0x50] sm:$0xff] }
  0xc4   : > { %1283 = vst.msk [vmem:[%s2069_s18 + $0x20] sm:$0xff] %vm1278_vm1, %v1250_v30  ;;  %v2113_v32 = vpop.f32.mrf.mxu3  ;;  %v601_v37 = vpop.f32.mrf.mxu0 }
  0xc5   : > { %v1078_v33 = vpop.f32.mrf.mxu2 }
  0xc6   : > { %v1151_v36 = vadd.f32 %v1078_v33, %v822_v31  ;;  %v824_v41 = vpop.f32.mrf.mxu1 }
  0xc7   : > { %1517 = vmatmul.msk.bf16.gmra.mxu0 %vm528_vm0, %v1723_v34  ;;  %v825_v46 = vadd.f32 %v824_v41, %v601_v37  ;;  %v1225_v37 = vld [vmem:[%s2058_s26 + $0x58] sm:$0xff] }
  0xc8   : > { %v1187_v44 = vadd.f32 %v2063_v43, %v1151_v36 }
  0xc9   : > { %1689 = vmatmul.msk.bf16.gmra.mxu3 %vm528_vm0, %v1744_v35  ;;  %1601 = vmatmul.msk.bf16.gmra.mxu1 %vm528_vm0, %v1706_v38 }
  0xca   : > { %v1251_v45 = vadd.f32 %v1219_v40, %v1187_v44  ;;  %1685 = vmatmul.msk.bf16.gmra.mxu2 %vm528_vm0, %v1740_v39 }
  0xcc   : > { %1284 = vst.msk [vmem:[%s2069_s18 + $0x28] sm:$0xff] %vm1278_vm1, %v1251_v45  ;;  %v2127_v47 = vpop.f32.mrf.mxu3  ;;  %v603_v50 = vpop.f32.mrf.mxu0 }
  0xcd   : > { %v1081_v48 = vpop.f32.mrf.mxu2 }
  0xce   : > { %v1152_v49 = vadd.f32 %v1081_v48, %v825_v46  ;;  %v826_v53 = vpop.f32.mrf.mxu1 }
  0xcf   : > { %v827_v56 = vadd.f32 %v826_v53, %v603_v50 }
  0xd0   : > { %v1188_v54 = vadd.f32 %v2063_v43, %v1152_v49  ;;  %v1226_v49 = vld [vmem:[%s2058_s26 + $0x60] sm:$0xff] }
  0xd2   : > { %v1252_v55 = vadd.f32 %v1220_v51, %v1188_v54 }
  0xd4   : > { %1285 = vst.msk [vmem:[%s2069_s18 + $0x30] sm:$0xff] %vm1278_vm1, %v1252_v55  ;;  %v2133_v57 = vpop.f32.mrf.mxu3  ;;  %v606_v60 = vpop.f32.mrf.mxu0 }
  0xd5   : > { %v1083_v58 = vpop.f32.mrf.mxu2 }
  0xd6   : > { %v1153_v59 = vadd.f32 %v1083_v58, %v827_v56  ;;  %v829_v62 = vpop.f32.mrf.mxu1 }
  0xd7   : > { %v830_v2 = vadd.f32 %v829_v62, %v606_v60  ;;  %v1227_v60 = vld [vmem:[%s2058_s26 + $0x68] sm:$0xff] }
  0xd8   : > { %v1189_v63 = vadd.f32 %v2063_v43, %v1153_v59 }
  0xda   : > { %v1253_v0 = vadd.f32 %v1221_v61, %v1189_v63 }
  0xdc   : > { %1286 = vst.msk [vmem:[%s2069_s18 + $0x38] sm:$0xff] %vm1278_vm1, %v1253_v0  ;;  %v2139_v3 = vpop.f32.mrf.mxu3  ;;  %v608_v6 = vpop.f32.mrf.mxu0 }
  0xdd   : > { %v1086_v4 = vpop.f32.mrf.mxu2 }
  0xde   : > { %v1154_v5 = vadd.f32 %v1086_v4, %v830_v2  ;;  %v831_v8 = vpop.f32.mrf.mxu1 }
  0xdf   : > { %v832_v12 = vadd.f32 %v831_v8, %v608_v6 }
  0xe0   : > { %v1190_v9 = vadd.f32 %v2063_v43, %v1154_v5 }
  0xe2   : > { %v1254_v11 = vadd.f32 %v1222_v7, %v1190_v9  ;;  %v1228_v7 = vld [vmem:[%s2058_s26 + $0x70] sm:$0xff] }
  0xe4   : > { %1287 = vst.msk [vmem:[%s2069_s18 + $0x40] sm:$0xff] %vm1278_vm1, %v1254_v11  ;;  %v2145_v13 = vpop.f32.mrf.mxu3  ;;  %v611_v16 = vpop.f32.mrf.mxu0 }
  0xe5   : > { %v1088_v14 = vpop.f32.mrf.mxu2 }
  0xe6   : > { %v1155_v15 = vadd.f32 %v1088_v14, %v832_v12  ;;  %v834_v18 = vpop.f32.mrf.mxu1 }
  0xe7   : > { %v835_v21 = vadd.f32 %v834_v18, %v611_v16  ;;  %v1229_v18 = vld [vmem:[%s2058_s26 + $0x78] sm:$0xff] }
  0xe8   : > { %v1191_v19 = vadd.f32 %v2063_v43, %v1155_v15 }
  0xea   : > { %v1255_v20 = vadd.f32 %v1223_v17, %v1191_v19 }
  0xec   : > { %1288 = vst.msk [vmem:[%s2069_s18 + $0x48] sm:$0xff] %vm1278_vm1, %v1255_v20  ;;  %v2151_v22 = vpop.f32.mrf.mxu3  ;;  %v613_v26 = vpop.f32.mrf.mxu0 }
  0xed   : > { %v1091_v24 = vpop.f32.mrf.mxu2 }
  0xee   : > { %v1156_v25 = vadd.f32 %v1091_v24, %v835_v21  ;;  %v836_v28 = vpop.f32.mrf.mxu1 }
  0xef   : > { %v837_v31 = vadd.f32 %v836_v28, %v613_v26 }
  0xf0   : > { %v1192_v29 = vadd.f32 %v2063_v43, %v1156_v25  ;;  %v870_v25 = vadd.f32 %v2139_v3, %v2053_v42  ;;  %v872_v42 = vadd.f32 %v2145_v13, %v2073_v52 }
  0xf2   : > { %v1256_v30 = vadd.f32 %v1224_v27, %v1192_v29 }
  0xf4   : > { %1289 = vst.msk [vmem:[%s2069_s18 + $0x50] sm:$0xff] %vm1278_vm1, %v1256_v30  ;;  %v2157_v33 = vpop.f32.mrf.mxu3  ;;  %v616_v36 = vpop.f32.mrf.mxu0  ;;  %v1238_v30 = vld [vmem:[%s2058_s26 + $0xc0] sm:$0xff] }
  0xf5   : > { %v1093_v34 = vpop.f32.mrf.mxu2 }
  0xf6   : > { %v1157_v35 = vadd.f32 %v1093_v34, %v837_v31  ;;  %v839_v38 = vpop.f32.mrf.mxu1  ;;  %v1230_v34 = vld [vmem:[%s2058_s26 + $0x80] sm:$0xff] }
  0xf7   : > { %v840_v41 = vadd.f32 %v839_v38, %v616_v36 }
  0xf8   : > { %v1193_v39 = vadd.f32 %v2063_v43, %v1157_v35 }
  0xfa   : > { %v1257_v40 = vadd.f32 %v1225_v37, %v1193_v39 }
  0xfc   : > { %1290 = vst.msk [vmem:[%s2069_s18 + $0x58] sm:$0xff] %vm1278_vm1, %v1257_v40  ;;  %v2163_v44 = vpop.f32.mrf.mxu3  ;;  %v618_v48 = vpop.f32.mrf.mxu0 }
  0xfd   : > { %v1096_v45 = vpop.f32.mrf.mxu2 }
  0xfe   : > { %v1158_v46 = vadd.f32 %v1096_v45, %v840_v41  ;;  %v841_v50 = vpop.f32.mrf.mxu1 }
  0xff   : > { %v842_v54 = vadd.f32 %v841_v50, %v618_v48  ;;  %v1239_v48 = vld [vmem:[%s2058_s26 + $0xc8] sm:$0xff] }
 0x100   : > { %v1194_v51 = vadd.f32 %v2063_v43, %v1158_v46  ;;  %v1231_v50 = vld [vmem:[%s2058_s26 + $0x88] sm:$0xff] }
 0x102   : > { %v1258_v53 = vadd.f32 %v1226_v49, %v1194_v51 }
 0x104   : > { %1291 = vst.msk [vmem:[%s2069_s18 + $0x60] sm:$0xff] %vm1278_vm1, %v1258_v53  ;;  %v2169_v55 = vpop.f32.mrf.mxu3  ;;  %v621_v59 = vpop.f32.mrf.mxu0 }
 0x105   : > { %v1098_v56 = vpop.f32.mrf.mxu2 }
 0x106   : > { %v1159_v58 = vadd.f32 %v1098_v56, %v842_v54  ;;  %v844_v61 = vpop.f32.mrf.mxu1 }
 0x107   : > { %v845_v0 = vadd.f32 %v844_v61, %v621_v59 }
 0x108   : > { %v1195_v62 = vadd.f32 %v2063_v43, %v1159_v58  ;;  %v875_v58 = vadd.f32 %v2151_v22, %v2087_v1 }
 0x10a   : > { %v1259_v63 = vadd.f32 %v1227_v60, %v1195_v62 }
 0x10c   : > { %1292 = vst.msk [vmem:[%s2069_s18 + $0x68] sm:$0xff] %vm1278_vm1, %v1259_v63  ;;  %v2175_v2 = vpop.f32.mrf.mxu3  ;;  %v623_v6 = vpop.f32.mrf.mxu0  ;;  %v1240_v63 = vld [vmem:[%s2058_s26 + $0xd0] sm:$0xff] }
 0x10d   : > { %v1101_v4 = vpop.f32.mrf.mxu2 }
 0x10e   : > { %v1160_v5 = vadd.f32 %v1101_v4, %v845_v0  ;;  %v846_v8 = vpop.f32.mrf.mxu1  ;;  %v1232_v4 = vld [vmem:[%s2058_s26 + $0x90] sm:$0xff] }
 0x10f   : > { %v847_v12 = vadd.f32 %v846_v8, %v623_v6  ;;  %v877_v8 = vadd.f32 %v2157_v33, %v2093_v10 }
 0x110   : > { %v1196_v9 = vadd.f32 %v2063_v43, %v1160_v5 }
 0x112   : > { %v1260_v11 = vadd.f32 %v1228_v7, %v1196_v9 }
 0x114   : > { %1293 = vst.msk [vmem:[%s2069_s18 + $0x70] sm:$0xff] %vm1278_vm1, %v1260_v11  ;;  %v2181_v14 = vpop.f32.mrf.mxu3  ;;  %v626_v17 = vpop.f32.mrf.mxu0 }
 0x115   : > { %v1103_v15 = vpop.f32.mrf.mxu2 }
 0x116   : > { %v1161_v16 = vadd.f32 %v1103_v15, %v847_v12  ;;  %v849_v19 = vpop.f32.mrf.mxu1 }
 0x117   : > { %v850_v24 = vadd.f32 %v849_v19, %v626_v17  ;;  %v1241_v17 = vld [vmem:[%s2058_s26 + $0xd8] sm:$0xff] }
 0x118   : > { %v1197_v20 = vadd.f32 %v2063_v43, %v1161_v16  ;;  %v1233_v19 = vld [vmem:[%s2058_s26 + $0x98] sm:$0xff] }
 0x11a   : > { %v1261_v21 = vadd.f32 %v1229_v18, %v1197_v20 }
 0x11c   : > { %1294 = vst.msk [vmem:[%s2069_s18 + $0x78] sm:$0xff] %vm1278_vm1, %v1261_v21  ;;  %v1126_v26 = vpop.f32.mrf.mxu3  ;;  %v628_v31 = vpop.f32.mrf.mxu0 }
 0x11d   : > { %v1106_v27 = vpop.f32.mrf.mxu2  ;;  %v1170_v28 = vadd.f32 %v1126_v26, %v870_v25  ;;  %v880_v26 = vadd.f32 %v2163_v44, %v2107_v23 }
 0x11e   : > { %v1162_v29 = vadd.f32 %v1106_v27, %v850_v24  ;;  %v851_v36 = vpop.f32.mrf.mxu1 }
 0x11f   : > { %v1206_v35 = vadd.f32 %v2063_v43, %v1170_v28  ;;  %v852_v3 = vadd.f32 %v851_v36, %v628_v31  ;;  %v1242_v31 = vld [vmem:[%s2058_s26 + $0xe0] sm:$0xff] }
 0x120   : > { %v1198_v37 = vadd.f32 %v2063_v43, %v1162_v29 }
 0x121   : > { %v1270_v38 = vadd.f32 %v1238_v30, %v1206_v35  ;;  %v1234_v35 = vld [vmem:[%s2058_s26 + $0xa0] sm:$0xff] }
 0x122   : > { %v1262_v39 = vadd.f32 %v1230_v34, %v1198_v37 }
 0x123   : > { %1303 = vst.msk [vmem:[%s2069_s18 + $0xc0] sm:$0xff] %vm1278_vm1, %v1270_v38 }
 0x124   : > { %1295 = vst.msk [vmem:[%s2069_s18 + $0x80] sm:$0xff] %vm1278_vm1, %v1262_v39  ;;  %v1128_v40 = vpop.f32.mrf.mxu3  ;;  %v631_v49 = vpop.f32.mrf.mxu0  ;;  %v882_v39 = vadd.f32 %v2169_v55, %v2113_v32 }
 0x125   : > { %v1108_v41 = vpop.f32.mrf.mxu2  ;;  %v1171_v45 = vadd.f32 %v1128_v40, %v872_v42 }
 0x126   : > { %v1163_v46 = vadd.f32 %v1108_v41, %v852_v3  ;;  %v854_v53 = vpop.f32.mrf.mxu1 }
 0x127   : > { %v1207_v51 = vadd.f32 %v2063_v43, %v1171_v45  ;;  %v855_v56 = vadd.f32 %v854_v53, %v631_v49 }
 0x128   : > { %v1199_v52 = vadd.f32 %v2063_v43, %v1163_v46  ;;  %v1243_v46 = vld [vmem:[%s2058_s26 + $0xe8] sm:$0xff] }
 0x129   : > { %v1271_v13 = vadd.f32 %v1239_v48, %v1207_v51  ;;  %v1235_v48 = vld [vmem:[%s2058_s26 + $0xa8] sm:$0xff] }
 0x12a   : > { %v1263_v54 = vadd.f32 %v1231_v50, %v1199_v52 }
 0x12b   : > { %1304 = vst.msk [vmem:[%s2069_s18 + $0xc8] sm:$0xff] %vm1278_vm1, %v1271_v13  ;;  %v885_v13 = vadd.f32 %v2175_v2, %v2127_v47 }
 0x12c   : > { %1296 = vst.msk [vmem:[%s2069_s18 + $0x88] sm:$0xff] %vm1278_vm1, %v1263_v54  ;;  %v1131_v59 = vpop.f32.mrf.mxu3  ;;  %v633_v0 = vpop.f32.mrf.mxu0 }
 0x12d   : > { %v1111_v60 = vpop.f32.mrf.mxu2  ;;  %v1172_v61 = vadd.f32 %v1131_v59, %v875_v58 }
 0x12e   : > { %v1164_v62 = vadd.f32 %v1111_v60, %v855_v56  ;;  %v856_v6 = vpop.f32.mrf.mxu1  ;;  %v1244_v60 = vld [vmem:[%s2058_s26 + $0xf0] sm:$0xff] }
 0x12f   : > { %v1208_v5 = vadd.f32 %v2063_v43, %v1172_v61  ;;  %v857_v9 = vadd.f32 %v856_v6, %v633_v0  ;;  %v1236_v61 = vld [vmem:[%s2058_s26 + $0xb0] sm:$0xff] }
 0x130   : > { %v1200_v1 = vadd.f32 %v2063_v43, %v1164_v62 }
 0x131   : > { %v1272_v22 = vadd.f32 %v1240_v63, %v1208_v5  ;;  %v887_v5 = vadd.f32 %v2181_v14, %v2133_v57  ;;  %v1237_v57 = vld [vmem:[%s2058_s26 + $0xb8] sm:$0xff] }
 0x132   : > { %v1264_v7 = vadd.f32 %v1232_v4, %v1200_v1 }
 0x133   : > { %1305 = vst.msk [vmem:[%s2069_s18 + $0xd0] sm:$0xff] %vm1278_vm1, %v1272_v22 }
 0x134   : > { %1297 = vst.msk [vmem:[%s2069_s18 + $0x90] sm:$0xff] %vm1278_vm1, %v1264_v7  ;;  %v1133_v11 = vpop.f32.mrf.mxu3  ;;  %v636_v18 = vpop.f32.mrf.mxu0 }
 0x135   : > { %v1113_v12 = vpop.f32.mrf.mxu2  ;;  %v1173_v15 = vadd.f32 %v1133_v11, %v877_v8 }
 0x136   : > { %v1165_v16 = vadd.f32 %v1113_v12, %v857_v9  ;;  %v859_v21 = vpop.f32.mrf.mxu1  ;;  %v1245_v9 = vld [vmem:[%s2058_s26 + $0xf8] sm:$0xff] }
 0x137   : > { %v1209_v20 = vadd.f32 %v2063_v43, %v1173_v15  ;;  %v860_v25 = vadd.f32 %v859_v21, %v636_v18 }
 0x138   : > { %v1201_v10 = vadd.f32 %v2063_v43, %v1165_v16 }
 0x139   : > { %v1273_v33 = vadd.f32 %v1241_v17, %v1209_v20 }
 0x13a   : > { %v1265_v24 = vadd.f32 %v1233_v19, %v1201_v10 }
 0x13b   : > { %1306 = vst.msk [vmem:[%s2069_s18 + $0xd8] sm:$0xff] %vm1278_vm1, %v1273_v33 }
 0x13c   : > { %1298 = vst.msk [vmem:[%s2069_s18 + $0x98] sm:$0xff] %vm1278_vm1, %v1265_v24  ;;  %v1136_v27 = vpop.f32.mrf.mxu3  ;;  %v638_v34 = vpop.f32.mrf.mxu0 }
 0x13d   : > { %v1116_v28 = vpop.f32.mrf.mxu2  ;;  %v1174_v29 = vadd.f32 %v1136_v27, %v880_v26 }
 0x13e   : > { %v1166_v30 = vadd.f32 %v1116_v28, %v860_v25  ;;  %v861_v37 = vpop.f32.mrf.mxu1 }
 0x13f   : > { %v1210_v36 = vadd.f32 %v2063_v43, %v1174_v29  ;;  %v862_v42 = vadd.f32 %v861_v37, %v638_v34 }
 0x140   : > { %v1202_v23 = vadd.f32 %v2063_v43, %v1166_v30 }
 0x141   : > { %v1274_v44 = vadd.f32 %v1242_v31, %v1210_v36 }
 0x142   : > { %v1266_v38 = vadd.f32 %v1234_v35, %v1202_v23 }
 0x143   : > { %1307 = vst.msk [vmem:[%s2069_s18 + $0xe0] sm:$0xff] %vm1278_vm1, %v1274_v44 }
 0x144   : > { %1299 = vst.msk [vmem:[%s2069_s18 + $0xa0] sm:$0xff] %vm1278_vm1, %v1266_v38  ;;  %v1138_v3 = vpop.f32.mrf.mxu3  ;;  %v641_v50 = vpop.f32.mrf.mxu0 }
 0x145   : > { %v1118_v40 = vpop.f32.mrf.mxu2  ;;  %v1175_v41 = vadd.f32 %v1138_v3, %v882_v39 }
 0x146   : > { %v1167_v45 = vadd.f32 %v1118_v40, %v862_v42  ;;  %v864_v51 = vpop.f32.mrf.mxu1 }
 0x147   : > { %v1211_v49 = vadd.f32 %v2063_v43, %v1175_v41  ;;  %v865_v52 = vadd.f32 %v864_v51, %v641_v50 }
 0x148   : > { %v1203_v32 = vadd.f32 %v2063_v43, %v1167_v45 }
 0x149   : > { %v1275_v55 = vadd.f32 %v1243_v46, %v1211_v49 }
 0x14a   : > { %v1267_v53 = vadd.f32 %v1235_v48, %v1203_v32 }
 0x14b   : > { %1308 = vst.msk [vmem:[%s2069_s18 + $0xe8] sm:$0xff] %vm1278_vm1, %v1275_v55 }
 0x14c   : > { %1300 = vst.msk [vmem:[%s2069_s18 + $0xa8] sm:$0xff] %vm1278_vm1, %v1267_v53  ;;  %v1141_v54 = vpop.f32.mrf.mxu3  ;;  %v643_v2 = vpop.f32.mrf.mxu0 }
 0x14d   : > { %v1121_v56 = vpop.f32.mrf.mxu2  ;;  %v1176_v58 = vadd.f32 %v1141_v54, %v885_v13 }
 0x14e   : > { %v1168_v59 = vadd.f32 %v1121_v56, %v865_v52  ;;  %v866_v0 = vpop.f32.mrf.mxu1 }
 0x14f   : > { %v1212_v62 = vadd.f32 %v2063_v43, %v1176_v58  ;;  %v867_v6 = vadd.f32 %v866_v0, %v643_v2 }
 0x150   : > { %v1204_v63 = vadd.f32 %v2063_v43, %v1168_v59 }
 0x151   : > { %v1276_v47 = vadd.f32 %v1244_v60, %v1212_v62 }
 0x152   : > { %v1268_v4 = vadd.f32 %v1236_v61, %v1204_v63 }
 0x153   : > { %1309 = vst.msk [vmem:[%s2069_s18 + $0xf0] sm:$0xff] %vm1278_vm1, %v1276_v47 }
 0x154   : > { %1301 = vst.msk [vmem:[%s2069_s18 + $0xb0] sm:$0xff] %vm1278_vm1, %v1268_v4  ;;  %v1143_v1 = vpop.f32.mrf.mxu3 }
 0x155   : > { %v1123_v22 = vpop.f32.mrf.mxu2  ;;  %v1177_v7 = vadd.f32 %v1143_v1, %v887_v5 }
 0x156   : > { %v1169_v8 = vadd.f32 %v1123_v22, %v867_v6 }
 0x157   : > { %v1213_v14 = vadd.f32 %v2063_v43, %v1177_v7 }
 0x158   : > { %v1205_v11 = vadd.f32 %v2063_v43, %v1169_v8 }
 0x159   : > { %v1277_v12 = vadd.f32 %v1245_v9, %v1213_v14 }
 0x15a   : > { %v1269_v15 = vadd.f32 %v1237_v57, %v1205_v11 }
 0x15b   : > { %1310 = vst.msk [vmem:[%s2069_s18 + $0xf8] sm:$0xff] %vm1278_vm1, %v1277_v12 }
 0x15c   : > { %1302 = vst.msk [vmem:[%s2069_s18 + $0xb8] sm:$0xff] %vm1278_vm1, %v1269_v15 }
 0x15d   : > { %1819 = shalt.err (!%p1816_p3)
}
 0x15e   : > { %s1856_s22 = smov 128   ;;  %s1857_s18 = smov 8  }
 0x15f   : > { %1750 = dma.vmem_to_hbm [thread:$0]  (%p1941_p5), %s1325_s9, 4096, %s1327_s21, %s1312_s24, %s1856_s22, %s1856_s22, %s1857_s18  }
 0x160 PF: > { %p1756_p4 = scmp.ge.s32.totalorder %s1854_s30, 2  ;;  %s1341_s19 = sand.u32 1, %s1842_s27  }
 0x161   : > { %s1342_s20 = scalar_lea.sflag [#allocation3], %s1341_s19 }
 0x162   : > { %p1753_p7 = pnand %p1756_p4, %p1945_p6 }
 0x164   : > { %p1754_p8 = pneg %p1753_p7 }
 0x166   : > { %1837 = dma.done.wait (%p1754_p8), %s1342_s20, 4096  }
 0x167   : > { %1839 = vsyncadd (%p1754_p8), %s1342_s20, 4294963200  ;;  %p18_p9 = scmp.ge.s32.totalorder %s1928_s11, 10   ;;  %s2312_s27 = smov %s1846_s28 }
 0x168   : > { %s2313_s28 = smov %s1850_s29  ;;  %s2314_s29 = smov %s1939_s14 }
 0x169   : > { %s2315_s30 = smov %s1928_s11  ;;  %20 = sbr.rel (!%p18_p9) target bundleno = 3 (0x3), region = 96 }
 0x16e   :  { %1348 = vsyncpa [#allocation3], 1 }
 0x16f   :  { %1350 = vsyncpa [#allocation3 + $0x1], 1 }

</bundles_post_ra>
